<compile_context>
chip_gen: v7x
topology: tpu7x:2x2x1
jax: 0.10.0
libtpu: 0.0.40
codegen_flags: <defaults>
</compile_context>

<pallas_src>
import math
from functools import partial

import numpy as np
import jax
import jax.numpy as jnp
from jax import lax
from jax.experimental import pallas as pl
from jax.experimental.pallas import tpu as pltpu


# ----------------------------------------------------------------------------
# helpers
# ----------------------------------------------------------------------------

def _round_up(x, m):
    return ((x + m - 1) // m) * m


def _row_tile(M):
    """Row tile: full block when small, 256/512 tiles (padded) otherwise."""
    if M <= 512:
        return M, M
    TM = 512 if M % 512 == 0 else 256
    return TM, _round_up(M, TM)


# ----------------------------------------------------------------------------
# Pallas kernels
# ----------------------------------------------------------------------------

def _linear_kernel(x_ref, w_ref, b_ref, o_ref, *, activation):
    """y = act(x @ w + b); bf16 MXU inputs, f32 accumulate/epilogue."""
    y = jnp.dot(x_ref[...].astype(jnp.bfloat16), w_ref[...],
                preferred_element_type=jnp.float32) + b_ref[...]
    if activation == "relu":
        y = jnp.maximum(y, 0.0)
    o_ref[...] = y.astype(o_ref.dtype)


def _linear_res_ln_kernel(x_ref, w_ref, b_ref, r_ref, g_ref, be_ref, o_ref,
                          *, eps):
    """y = LayerNorm((x @ w + b) + residual) — out-proj + residual + LN fused."""
    y = jnp.dot(x_ref[...].astype(jnp.bfloat16), w_ref[...],
                preferred_element_type=jnp.float32) + b_ref[...]
    y = y + r_ref[...]
    mu = jnp.mean(y, axis=-1, keepdims=True)
    var = jnp.mean((y - mu) ** 2, axis=-1, keepdims=True)
    yn = (y - mu) * lax.rsqrt(var + eps)
    o_ref[...] = (yn * g_ref[...] + be_ref[...]).astype(o_ref.dtype)


def _ffn_ln_kernel(x_ref, w1_ref, b1_ref, w2_ref, b2_ref, g_ref, be_ref, o_ref,
                   *, eps):
    """y = LayerNorm(x + relu(x@w1+b1)@w2+b2); hidden stays in VMEM."""
    x = x_ref[...]
    h = jnp.dot(x.astype(jnp.bfloat16), w1_ref[...],
                preferred_element_type=jnp.float32) + b1_ref[...]
    h = jnp.maximum(h, 0.0)
    y = jnp.dot(h.astype(jnp.bfloat16), w2_ref[...],
                preferred_element_type=jnp.float32) + b2_ref[...]
    y = y + x
    mu = jnp.mean(y, axis=-1, keepdims=True)
    var = jnp.mean((y - mu) ** 2, axis=-1, keepdims=True)
    yn = (y - mu) * lax.rsqrt(var + eps)
    o_ref[...] = (yn * g_ref[...] + be_ref[...]).astype(o_ref.dtype)


def _attn_kernel(*refs, scale, masked):
    """All heads of one batch element per grid step; in-kernel causal+pad mask."""
    if masked:
        q_ref, k_ref, v_ref, valid_ref, o_ref = refs
    else:
        q_ref, k_ref, v_ref, o_ref = refs
    q = q_ref[0].astype(jnp.bfloat16)          # (H, Lq, Dk)
    k = k_ref[0].astype(jnp.bfloat16)          # (H, Lk, Dk)
    v = v_ref[0].astype(jnp.bfloat16)          # (H, Lk, Dv)
    s = jnp.einsum("hqd,hkd->hqk", q, k,
                   preferred_element_type=jnp.float32) * scale
    if masked:
        Lq, Lk = s.shape[1], s.shape[2]
        rows = lax.broadcasted_iota(jnp.int32, (Lq, Lk), 0)
        cols = lax.broadcasted_iota(jnp.int32, (Lq, Lk), 1)
        valid = valid_ref[0]                   # (1, Lk) float
        allow = (cols <= rows) & (valid > 0.0)
        s = jnp.where(allow[None, :, :], s, -1e9)
    s = s - jnp.max(s, axis=-1, keepdims=True)
    p = jnp.exp(s)
    p = p * pl.reciprocal(jnp.sum(p, axis=-1, keepdims=True), approx=True)
    o = jnp.einsum("hqk,hkd->hqd", p.astype(jnp.bfloat16), v,
                   preferred_element_type=jnp.float32)
    o_ref[0] = o.astype(o_ref.dtype)


def _conv_kernel(*refs, kh, kw, Ho, Wo, activation, has_res):
    """Implicit-GEMM stride-1 conv: loop over taps, bf16 dots into f32 acc;
    bias + (optional residual) + ReLU fused in the epilogue."""
    if has_res:
        x_ref, w_ref, b_ref, r_ref, o_ref = refs
    else:
        x_ref, w_ref, b_ref, o_ref = refs
    cout = o_ref.shape[-1]
    acc = jnp.zeros((Ho * Wo, cout), jnp.float32)
    for i in range(kh):
        for j in range(kw):
            tap = x_ref[0, pl.ds(i, Ho), pl.ds(j, Wo), :]        # (Ho, Wo, Cin)
            tap = tap.reshape(Ho * Wo, tap.shape[-1]).astype(jnp.bfloat16)
            acc = acc + jnp.dot(tap, w_ref[i, j],
                                preferred_element_type=jnp.float32)
    y = acc + b_ref[...]
    if has_res:
        y = y + r_ref[0].reshape(Ho * Wo, cout)
    if activation == "relu":
        y = jnp.maximum(y, 0.0)
    o_ref[0] = y.reshape(Ho, Wo, cout).astype(o_ref.dtype)


# ----------------------------------------------------------------------------
# Pallas wrappers (jit-cached by shape)
# ----------------------------------------------------------------------------

@partial(jax.jit, static_argnames=("activation",))
def _pallas_linear(x, w, b, activation):
    M, K = x.shape
    N = w.shape[1]
    TM, Mp = _row_tile(M)
    if Mp != M:
        x = jnp.pad(x, ((0, Mp - M), (0, 0)))
    out = pl.pallas_call(
        partial(_linear_kernel, activation=activation),
        out_shape=jax.ShapeDtypeStruct((Mp, N), jnp.float32),
        grid=(Mp // TM,),
        in_specs=[
            pl.BlockSpec((TM, K), lambda i: (i, 0)),
            pl.BlockSpec((K, N), lambda i: (0, 0)),
            pl.BlockSpec((1, N), lambda i: (0, 0)),
        ],
        out_specs=pl.BlockSpec((TM, N), lambda i: (i, 0)),
        compiler_params=pltpu.CompilerParams(
            dimension_semantics=("parallel",)),
    )(x, w, b.reshape(1, N))
    return out[:M] if Mp != M else out


def pallas_linear(x, w, b, activation=None):
    return _pallas_linear(x, w, b, activation)


@jax.jit
def pallas_linear_res_ln(x, w, b, res, gamma, beta):
    M, K = x.shape
    N = w.shape[1]
    TM, Mp = _row_tile(M)
    if Mp != M:
        x = jnp.pad(x, ((0, Mp - M), (0, 0)))
        res = jnp.pad(res, ((0, Mp - M), (0, 0)))
    out = pl.pallas_call(
        partial(_linear_res_ln_kernel, eps=1e-5),
        out_shape=jax.ShapeDtypeStruct((Mp, N), jnp.float32),
        grid=(Mp // TM,),
        in_specs=[
            pl.BlockSpec((TM, K), lambda i: (i, 0)),
            pl.BlockSpec((K, N), lambda i: (0, 0)),
            pl.BlockSpec((1, N), lambda i: (0, 0)),
            pl.BlockSpec((TM, N), lambda i: (i, 0)),
            pl.BlockSpec((1, N), lambda i: (0, 0)),
            pl.BlockSpec((1, N), lambda i: (0, 0)),
        ],
        out_specs=pl.BlockSpec((TM, N), lambda i: (i, 0)),
        compiler_params=pltpu.CompilerParams(
            dimension_semantics=("parallel",)),
    )(x, w, b.reshape(1, N), res, gamma.reshape(1, N), beta.reshape(1, N))
    return out[:M] if Mp != M else out


@jax.jit
def pallas_ffn_ln(x, w1, b1, w2, b2, gamma, beta):
    M, D = x.shape
    F = w1.shape[1]
    TM, Mp = _row_tile(M)
    if Mp != M:
        x = jnp.pad(x, ((0, Mp - M), (0, 0)))
    out = pl.pallas_call(
        partial(_ffn_ln_kernel, eps=1e-5),
        out_shape=jax.ShapeDtypeStruct((Mp, D), jnp.float32),
        grid=(Mp // TM,),
        in_specs=[
            pl.BlockSpec((TM, D), lambda i: (i, 0)),
            pl.BlockSpec((D, F), lambda i: (0, 0)),
            pl.BlockSpec((1, F), lambda i: (0, 0)),
            pl.BlockSpec((F, D), lambda i: (0, 0)),
            pl.BlockSpec((1, D), lambda i: (0, 0)),
            pl.BlockSpec((1, D), lambda i: (0, 0)),
            pl.BlockSpec((1, D), lambda i: (0, 0)),
        ],
        out_specs=pl.BlockSpec((TM, D), lambda i: (i, 0)),
        compiler_params=pltpu.CompilerParams(
            dimension_semantics=("parallel",)),
    )(x, w1, b1.reshape(1, F), w2, b2.reshape(1, D),
      gamma.reshape(1, D), beta.reshape(1, D))
    return out[:M] if Mp != M else out


@partial(jax.jit, static_argnames=("masked",))
def pallas_attention(q, k, v, key_valid=None, *, masked=False):
    # q: (B, H, Lq, Dk)  k: (B, H, Lk, Dk)  v: (B, H, Lk, Dv)
    # key_valid (masked=True only): (B, 1, Lk) float, >0 where key is not pad.
    B, H, Lq, Dk = q.shape
    Lk = k.shape[2]
    Dv = v.shape[3]
    scale = 1.0 / math.sqrt(Dk)
    in_specs = [
        pl.BlockSpec((1, H, Lq, Dk), lambda b: (b, 0, 0, 0)),
        pl.BlockSpec((1, H, Lk, Dk), lambda b: (b, 0, 0, 0)),
        pl.BlockSpec((1, H, Lk, Dv), lambda b: (b, 0, 0, 0)),
    ]
    args = [q, k, v]
    if masked:
        in_specs.append(pl.BlockSpec((1, 1, Lk), lambda b: (b, 0, 0)))
        args.append(key_valid)
    return pl.pallas_call(
        partial(_attn_kernel, scale=scale, masked=masked),
        out_shape=jax.ShapeDtypeStruct((B, H, Lq, Dv), jnp.float32),
        grid=(B,),
        in_specs=in_specs,
        out_specs=pl.BlockSpec((1, H, Lq, Dv), lambda b: (b, 0, 0, 0)),
        compiler_params=pltpu.CompilerParams(
            dimension_semantics=("parallel",)),
    )(*args)


# ----------------------------------------------------------------------------
# Conv: implicit GEMM (stride-2 handled by space-to-depth in the wrapper)
# ----------------------------------------------------------------------------

def _space_to_depth(xp, w):
    """Rewrite a stride-2 conv as a stride-1 conv (phases -> channels)."""
    B, Hp, Wp, C = xp.shape
    kh, kw, _, Cout = w.shape
    Hp2, Wp2 = _round_up(Hp, 2), _round_up(Wp, 2)
    xp = jnp.pad(xp, ((0, 0), (0, Hp2 - Hp), (0, Wp2 - Wp), (0, 0)))
    xp = xp.reshape(B, Hp2 // 2, 2, Wp2 // 2, 2, C)
    xp = xp.transpose(0, 1, 3, 2, 4, 5).reshape(B, Hp2 // 2, Wp2 // 2, 4 * C)
    kh2, kw2 = _round_up(kh, 2), _round_up(kw, 2)
    w = jnp.pad(w, ((0, kh2 - kh), (0, kw2 - kw), (0, 0), (0, 0)))
    w = w.reshape(kh2 // 2, 2, kw2 // 2, 2, C, Cout)
    w = w.transpose(0, 2, 1, 3, 4, 5).reshape(kh2 // 2, kw2 // 2, 4 * C, Cout)
    return xp, w


@partial(jax.jit, static_argnames=("stride", "padding", "activation"))
def _conv2d(x, w, b, residual, stride, padding, activation):
    """x: (B,H,W,Cin) f32; w: (kh,kw,Cin,Cout) bf16 (BN folded); b: (Cout,) f32."""
    B, H, W, _ = x.shape
    kh, kw, _, Cout = w.shape
    Ho = (H + 2 * padding - kh) // stride + 1
    Wo = (W + 2 * padding - kw) // stride + 1
    xp = jnp.pad(x, ((0, 0), (padding, padding), (padding, padding), (0, 0)))
    if stride == 2:
        xp, w = _space_to_depth(xp, w)
        kh, kw = w.shape[0], w.shape[1]
    elif stride != 1:
        raise NotImplementedError("only stride 1 / 2 supported")
    Hp, Wp, Ci = xp.shape[1], xp.shape[2], xp.shape[3]
    has_res = residual is not None
    in_specs = [
        pl.BlockSpec((1, Hp, Wp, Ci), lambda bi: (bi, 0, 0, 0)),
        pl.BlockSpec((kh, kw, Ci, Cout), lambda bi: (0, 0, 0, 0)),
        pl.BlockSpec((1, Cout), lambda bi: (0, 0)),
    ]
    args = [xp, w, b.reshape(1, Cout)]
    if has_res:
        in_specs.append(pl.BlockSpec((1, Ho, Wo, Cout),
                                     lambda bi: (bi, 0, 0, 0)))
        args.append(residual)
    return pl.pallas_call(
        partial(_conv_kernel, kh=kh, kw=kw, Ho=Ho, Wo=Wo,
                activation=activation, has_res=has_res),
        out_shape=jax.ShapeDtypeStruct((B, Ho, Wo, Cout), jnp.float32),
        grid=(B,),
        in_specs=in_specs,
        out_specs=pl.BlockSpec((1, Ho, Wo, Cout), lambda bi: (bi, 0, 0, 0)),
        compiler_params=pltpu.CompilerParams(
            dimension_semantics=("parallel",)),
    )(*args)


def conv2d(x, w, b, stride, padding, activation=None, residual=None):
    return _conv2d(x, w, b, residual, stride, padding, activation)


def maxpool2d(x, k=3, s=2, p=1):
    # TODO(synk): pooling done with lax.reduce_window glue, not a Pallas kernel.
    return lax.reduce_window(x, -jnp.inf, lax.max,
                             (1, k, k, 1), (1, s, s, 1),
                             ((0, 0), (p, p), (p, p), (0, 0)))


# ----------------------------------------------------------------------------
# Parameter initialization (deterministic, synthetic)
# ----------------------------------------------------------------------------

class ParamGen:
    def __init__(self, key):
        self._key = key

    def _next(self):
        self._key, k = jax.random.split(self._key)
        return k

    def normal(self, shape, scale=1.0):
        return scale * jax.random.normal(self._next(), shape, jnp.float32)


def fold_conv_bn(gen, shape):
    """Conv weight + eval-mode BatchNorm folded into (w_bf16, b_f32)."""
    kh, kw, cin, cout = shape
    w = gen.normal(shape, 1.0 / math.sqrt(kh * kw * cin))
    gamma = 1.0 + 0.1 * gen.normal((cout,))
    beta = 0.1 * gen.normal((cout,))
    mean = 0.05 * gen.normal((cout,))
    var = jnp.ones((cout,), jnp.float32)
    s = gamma / jnp.sqrt(var + 1e-5)
    return (w * s).astype(jnp.bfloat16), (beta - mean * s)


def sinusoid_table(n_pos, d_model):
    pos = np.arange(n_pos)[:, None].astype(np.float64)
    i = np.arange(d_model)[None, :].astype(np.float64)
    angle = pos / np.power(10000.0, 2.0 * (i // 2) / d_model)
    tab = np.zeros((n_pos, d_model), np.float64)
    tab[:, 0::2] = np.sin(angle[:, 0::2])
    tab[:, 1::2] = np.cos(angle[:, 1::2])
    return jnp.asarray(tab, jnp.float32)[None]          # (1, n_pos, d_model)


def _self_attn_params(gen, d_model, n_head, d_k):
    dh = n_head * d_k
    return dict(
        wqkv=gen.normal((d_model, 3 * dh),
                        1.0 / math.sqrt(d_model)).astype(jnp.bfloat16),
        bqkv=jnp.zeros((3 * dh,), jnp.float32),
        wo=gen.normal((dh, d_model), 1.0 / math.sqrt(dh)).astype(jnp.bfloat16),
        bo=jnp.zeros((d_model,), jnp.float32),
    )


def _cross_attn_params(gen, d_model, n_head, d_k):
    dh = n_head * d_k
    return dict(
        wq=gen.normal((d_model, dh),
                      1.0 / math.sqrt(d_model)).astype(jnp.bfloat16),
        bq=jnp.zeros((dh,), jnp.float32),
        wkv=gen.normal((d_model, 2 * dh),
                       1.0 / math.sqrt(d_model)).astype(jnp.bfloat16),
        bkv=jnp.zeros((2 * dh,), jnp.float32),
        wo=gen.normal((dh, d_model), 1.0 / math.sqrt(dh)).astype(jnp.bfloat16),
        bo=jnp.zeros((d_model,), jnp.float32),
    )


def init_params(key, d_input, d_model, n_vocab, dec_len, n_head, d_k, d_ffn,
                enc_n_pos, dec_n_pos, dec_layers, pad_idx=0):
    assert d_model % 8 == 0, "ResEncoder final width (8*c0) must equal d_model"
    gen = ParamGen(key)
    c0 = d_model // 8

    # --- ResEncoder(d_input, layers=(1, 2, 5, 3)) ---
    enc = {"stem": fold_conv_bn(gen, (7, 7, d_input, c0)), "stages": []}
    in_ch = c0
    for si, (n_blocks, ch) in enumerate(zip((1, 2, 5, 3),
                                            (c0, 2 * c0, 4 * c0, 8 * c0))):
        blocks = []
        for bi in range(n_blocks):
            stride = 2 if (si > 0 and bi == 0) else 1
            blk = {"s": stride}
            blk["w1"], blk["b1"] = fold_conv_bn(gen, (3, 3, in_ch, ch))
            blk["w2"], blk["b2"] = fold_conv_bn(gen, (3, 3, ch, ch))
            if stride != 1 or in_ch != ch:
                blk["wd"], blk["bd"] = fold_conv_bn(gen, (1, 1, in_ch, ch))
            blocks.append(blk)
            in_ch = ch
        enc["stages"].append(blocks)

    # --- Decoder ---
    embed = gen.normal((n_vocab, d_model), 1.0 / math.sqrt(d_model))
    embed = embed.at[pad_idx].set(0.0)
    layers = []
    for _ in range(dec_layers):
        layers.append(dict(
            self=_self_attn_params(gen, d_model, n_head, d_k),
            cross=_cross_attn_params(gen, d_model, n_head, d_k),
            ln1_g=jnp.ones((d_model,)), ln1_b=jnp.zeros((d_model,)),
            ln2_g=jnp.ones((d_model,)), ln2_b=jnp.zeros((d_model,)),
            ln3_g=jnp.ones((d_model,)), ln3_b=jnp.zeros((d_model,)),
            w1=gen.normal((d_model, d_ffn),
                          1.0 / math.sqrt(d_model)).astype(jnp.bfloat16),
            b1=jnp.zeros((d_ffn,), jnp.float32),
            w2=gen.normal((d_ffn, d_model),
                          1.0 / math.sqrt(d_ffn)).astype(jnp.bfloat16),
            b2=jnp.zeros((d_model,), jnp.float32),
        ))
    dec = dict(
        embed=embed,
        pos=sinusoid_table(dec_n_pos, d_model),
        layers=layers,
        w_vocab=gen.normal((d_model, n_vocab),
                           1.0 / math.sqrt(d_model)).astype(jnp.bfloat16),
        b_vocab=jnp.zeros((n_vocab,), jnp.float32),
        pad_idx=pad_idx, n_head=n_head, d_k=d_k,
    )

    return dict(enc=enc, enc_pos=sinusoid_table(enc_n_pos, d_model), dec=dec)


# ----------------------------------------------------------------------------
# Model forward
# ----------------------------------------------------------------------------

def basic_block(x, blk):
    out = conv2d(x, blk["w1"], blk["b1"], stride=blk["s"], padding=1,
                 activation="relu")
    if "wd" in blk:
        sc = conv2d(x, blk["wd"], blk["bd"], stride=blk["s"], padding=0,
                    activation=None)
    else:
        sc = x
    # conv2 + BN + residual add + ReLU in one fused Pallas kernel.
    return conv2d(out, blk["w2"], blk["b2"], stride=1, padding=1,
                  activation="relu", residual=sc)


def res_encoder_forward(p, x):
    x = conv2d(x, p["stem"][0], p["stem"][1], stride=2, padding=3,
               activation="relu")
    x = maxpool2d(x)
    for stage in p["stages"]:
        for blk in stage:
            x = basic_block(x, blk)
    B, H, W, C = x.shape
    return x.reshape(B, H * W, C)          # (B, seq, d_model)


def decoder_layer(x, enc_out, p, key_valid, n_head, d_k):
    B, L, Dm = x.shape
    S = enc_out.shape[1]
    dh = n_head * d_k

    # --- masked self attention (fused Q|K|V projection) ---
    qkv = pallas_linear(x.reshape(B * L, Dm), p["self"]["wqkv"],
                        p["self"]["bqkv"])
    qkv = qkv.reshape(B, L, 3, n_head, d_k).transpose(2, 0, 3, 1, 4)
    o = pallas_attention(qkv[0], qkv[1], qkv[2], key_valid, masked=True)
    o = o.transpose(0, 2, 1, 3).reshape(B * L, dh)
    x2 = pallas_linear_res_ln(o, p["self"]["wo"], p["self"]["bo"],
                              x.reshape(B * L, Dm), p["ln1_g"], p["ln1_b"])

    # --- cross attention (fused K|V projection, no mask) ---
    q = pallas_linear(x2, p["cross"]["wq"], p["cross"]["bq"])
    kv = pallas_linear(enc_out.reshape(B * S, Dm), p["cross"]["wkv"],
                       p["cross"]["bkv"])
    q = q.reshape(B, L, n_head, d_k).transpose(0, 2, 1, 3)
    kv = kv.reshape(B, S, 2, n_head, d_k).transpose(2, 0, 3, 1, 4)
    o = pallas_attention(q, kv[0], kv[1], masked=False)
    o = o.transpose(0, 2, 1, 3).reshape(B * L, dh)
    x3 = pallas_linear_res_ln(o, p["cross"]["wo"], p["cross"]["bo"],
                              x2, p["ln2_g"], p["ln2_b"])

    # --- FFN + residual + LayerNorm fused ---
    x4 = pallas_ffn_ln(x3, p["w1"], p["b1"], p["w2"], p["b2"],
                       p["ln3_g"], p["ln3_b"])
    return x4.reshape(B, L, Dm)


def decoder_forward(p, dec_input, enc_out):
    B, L = dec_input.shape
    Dm = p["embed"].shape[1]
    n_head, d_k, pad_idx = p["n_head"], p["d_k"], p["pad_idx"]

    x = p["embed"][dec_input]                        # embedding gather (glue)
    x = x + p["pos"][:, :L, :]                       # dropout -> identity (eval)

    # Tiny (B,1,L) key-validity vector; the causal structure is generated
    # inside the attention kernel (no (B*H,L,L) additive mask in HBM).
    key_valid = (dec_input != pad_idx).astype(jnp.float32).reshape(B, 1, L)

    for layer_p in p["layers"]:
        x = decoder_layer(x, enc_out, layer_p, key_valid, n_head, d_k)

    logits = pallas_linear(x.reshape(B * L, Dm), p["w_vocab"], p["b_vocab"])
    return logits.reshape(B, L, -1)


def res_structure_forward(params, enc_input_nchw, dec_input, is_greedy=False):
    if is_greedy:
        # TODO(synk): autoregressive greedy decode loop not implemented.
        raise NotImplementedError("is_greedy=True path not implemented")
    # layout: NCHW (PyTorch) -> NHWC for the implicit-GEMM conv path.
    x = jnp.transpose(enc_input_nchw, (0, 2, 3, 1)).astype(jnp.float32)
    enc_out = res_encoder_forward(params["enc"], x)
    enc_out = enc_out + params["enc_pos"][:, :enc_out.shape[1], :]
    return decoder_forward(params["dec"], dec_input, enc_out)


# ----------------------------------------------------------------------------
# Demo
# ----------------------------------------------------------------------------

if __name__ == "__main__":
    key = jax.random.PRNGKey(0)

    # Small, consistent hyper-parameters.
    d_input, d_model = 3, 32          # d_model = 8 * base_channels of ResEncoder
    n_vocab, dec_len = 11, 8
    n_head, d_k, d_ffn = 2, 16, 64
    enc_n_pos, dec_n_pos = 16, 16
    dec_layers = 2
    B, H, W = 2, 64, 64               # 64x64 image -> 2x2 feature map -> enc seq 4

    pkey, xkey, tkey = jax.random.split(key, 3)
    params = init_params(pkey, d_input, d_model, n_vocab, dec_len, n_head, d_k,
                         d_ffn, enc_n_pos, dec_n_pos, dec_layers, pad_idx=0)

    enc_input = jax.random.normal(xkey, (B, d_input, H, W), jnp.float32)  # NCHW
    dec_input = jax.random.randint(tkey, (B, dec_len), 1, n_vocab)
    dec_input = dec_input.at[:, -2:].set(0)   # some padding tokens (pad_idx=0)

    out = res_structure_forward(params, enc_input, dec_input, is_greedy=False)
    jax.block_until_ready(out)
    assert out.shape == (B, dec_len, n_vocab)
    print("KERNEL_OK")
</pallas_src>

<mosaic_0001>
module attributes {stable_mosaic.version = 11 : i64} {
  func.func @_conv_kernel(%arg0: i32, %arg1: memref<1x35x35x12xf32, #tpu.memory_space<vmem>>, %arg2: memref<4x4x12x4xbf16, #tpu.memory_space<vmem>>, %arg3: memref<1x4xf32, #tpu.memory_space<vmem>>, %arg4: memref<1x32x32x4xf32, #tpu.memory_space<vmem>>) attributes {dimension_semantics = [#tpu.dimension_semantics<parallel>], iteration_bounds = array<i64: 2>, scalar_prefetch = 0 : i64, scratch_operands = 0 : i64, tpu.core_type = #tpu.core_type<tc>, window_params = [{transform_indices = @transform_0, window_bounds = array<i64: 1, 35, 35, 12>}, {pipeline_mode = #tpu.pipeline_mode<synchronous>, transform_indices = @transform_1, window_bounds = array<i64: 4, 4, 12, 4>}, {pipeline_mode = #tpu.pipeline_mode<synchronous>, transform_indices = @transform_2, window_bounds = array<i64: 1, 4>}, {transform_indices = @transform_3, window_bounds = array<i64: 1, 32, 32, 4>}]} {
    %cst = arith.constant 0.000000e+00 : f32
    %0 = vector.broadcast %cst : f32 to vector<1024x4xf32>
    %c0 = arith.constant 0 : index
    %c0_0 = arith.constant 0 : index
    %c0_1 = arith.constant 0 : index
    %c0_2 = arith.constant 0 : index
    %1 = vector.load %arg1[%c0, %c0_0, %c0_1, %c0_2] : memref<1x35x35x12xf32, #tpu.memory_space<vmem>>, vector<1x32x32x12xf32>
    %2 = vector.shape_cast %1 : vector<1x32x32x12xf32> to vector<32x32x12xf32>
    %3 = vector.shape_cast %2 : vector<32x32x12xf32> to vector<1024x12xf32>
    %4 = arith.truncf %3 : vector<1024x12xf32> to vector<1024x12xbf16>
    %c0_3 = arith.constant 0 : index
    %c0_4 = arith.constant 0 : index
    %c0_5 = arith.constant 0 : index
    %c0_6 = arith.constant 0 : index
    %5 = vector.load %arg2[%c0_3, %c0_4, %c0_5, %c0_6] : memref<4x4x12x4xbf16, #tpu.memory_space<vmem>>, vector<1x1x12x4xbf16>
    %6 = vector.shape_cast %5 : vector<1x1x12x4xbf16> to vector<12x4xbf16>
    %cst_7 = arith.constant dense<0.000000e+00> : vector<1024x4xf32>
    %7 = tpu.matmul %4, %6, %cst_7 {dimension_numbers = #tpu.dot_dimension_numbers<[1], [0], [0], [1], [0, 0, 1, 1], [], []>} : vector<1024x12xbf16>, vector<12x4xbf16>, vector<1024x4xf32> -> vector<1024x4xf32>
    %8 = arith.addf %0, %7 : vector<1024x4xf32>
    %c0_8 = arith.constant 0 : index
    %c0_9 = arith.constant 0 : index
    %c1 = arith.constant 1 : index
    %c0_10 = arith.constant 0 : index
    %9 = vector.load %arg1[%c0_8, %c0_9, %c1, %c0_10] : memref<1x35x35x12xf32, #tpu.memory_space<vmem>>, vector<1x32x32x12xf32>
    %10 = vector.shape_cast %9 : vector<1x32x32x12xf32> to vector<32x32x12xf32>
    %11 = vector.shape_cast %10 : vector<32x32x12xf32> to vector<1024x12xf32>
    %12 = arith.truncf %11 : vector<1024x12xf32> to vector<1024x12xbf16>
    %c0_11 = arith.constant 0 : index
    %c1_12 = arith.constant 1 : index
    %c0_13 = arith.constant 0 : index
    %c0_14 = arith.constant 0 : index
    %13 = vector.load %arg2[%c0_11, %c1_12, %c0_13, %c0_14] : memref<4x4x12x4xbf16, #tpu.memory_space<vmem>>, vector<1x1x12x4xbf16>
    %14 = vector.shape_cast %13 : vector<1x1x12x4xbf16> to vector<12x4xbf16>
    %cst_15 = arith.constant dense<0.000000e+00> : vector<1024x4xf32>
    %15 = tpu.matmul %12, %14, %cst_15 {dimension_numbers = #tpu.dot_dimension_numbers<[1], [0], [0], [1], [0, 0, 1, 1], [], []>} : vector<1024x12xbf16>, vector<12x4xbf16>, vector<1024x4xf32> -> vector<1024x4xf32>
    %16 = arith.addf %8, %15 : vector<1024x4xf32>
    %c0_16 = arith.constant 0 : index
    %c0_17 = arith.constant 0 : index
    %c2 = arith.constant 2 : index
    %c0_18 = arith.constant 0 : index
    %17 = vector.load %arg1[%c0_16, %c0_17, %c2, %c0_18] : memref<1x35x35x12xf32, #tpu.memory_space<vmem>>, vector<1x32x32x12xf32>
    %18 = vector.shape_cast %17 : vector<1x32x32x12xf32> to vector<32x32x12xf32>
    %19 = vector.shape_cast %18 : vector<32x32x12xf32> to vector<1024x12xf32>
    %20 = arith.truncf %19 : vector<1024x12xf32> to vector<1024x12xbf16>
    %c0_19 = arith.constant 0 : index
    %c2_20 = arith.constant 2 : index
    %c0_21 = arith.constant 0 : index
    %c0_22 = arith.constant 0 : index
    %21 = vector.load %arg2[%c0_19, %c2_20, %c0_21, %c0_22] : memref<4x4x12x4xbf16, #tpu.memory_space<vmem>>, vector<1x1x12x4xbf16>
    %22 = vector.shape_cast %21 : vector<1x1x12x4xbf16> to vector<12x4xbf16>
    %cst_23 = arith.constant dense<0.000000e+00> : vector<1024x4xf32>
    %23 = tpu.matmul %20, %22, %cst_23 {dimension_numbers = #tpu.dot_dimension_numbers<[1], [0], [0], [1], [0, 0, 1, 1], [], []>} : vector<1024x12xbf16>, vector<12x4xbf16>, vector<1024x4xf32> -> vector<1024x4xf32>
    %24 = arith.addf %16, %23 : vector<1024x4xf32>
    %c0_24 = arith.constant 0 : index
    %c0_25 = arith.constant 0 : index
    %c3 = arith.constant 3 : index
    %c0_26 = arith.constant 0 : index
    %25 = vector.load %arg1[%c0_24, %c0_25, %c3, %c0_26] : memref<1x35x35x12xf32, #tpu.memory_space<vmem>>, vector<1x32x32x12xf32>
    %26 = vector.shape_cast %25 : vector<1x32x32x12xf32> to vector<32x32x12xf32>
    %27 = vector.shape_cast %26 : vector<32x32x12xf32> to vector<1024x12xf32>
    %28 = arith.truncf %27 : vector<1024x12xf32> to vector<1024x12xbf16>
    %c0_27 = arith.constant 0 : index
    %c3_28 = arith.constant 3 : index
    %c0_29 = arith.constant 0 : index
    %c0_30 = arith.constant 0 : index
    %29 = vector.load %arg2[%c0_27, %c3_28, %c0_29, %c0_30] : memref<4x4x12x4xbf16, #tpu.memory_space<vmem>>, vector<1x1x12x4xbf16>
    %30 = vector.shape_cast %29 : vector<1x1x12x4xbf16> to vector<12x4xbf16>
    %cst_31 = arith.constant dense<0.000000e+00> : vector<1024x4xf32>
    %31 = tpu.matmul %28, %30, %cst_31 {dimension_numbers = #tpu.dot_dimension_numbers<[1], [0], [0], [1], [0, 0, 1, 1], [], []>} : vector<1024x12xbf16>, vector<12x4xbf16>, vector<1024x4xf32> -> vector<1024x4xf32>
    %32 = arith.addf %24, %31 : vector<1024x4xf32>
    %c0_32 = arith.constant 0 : index
    %c1_33 = arith.constant 1 : index
    %c0_34 = arith.constant 0 : index
    %c0_35 = arith.constant 0 : index
    %33 = vector.load %arg1[%c0_32, %c1_33, %c0_34, %c0_35] : memref<1x35x35x12xf32, #tpu.memory_space<vmem>>, vector<1x32x32x12xf32>
    %34 = vector.shape_cast %33 : vector<1x32x32x12xf32> to vector<32x32x12xf32>
    %35 = vector.shape_cast %34 : vector<32x32x12xf32> to vector<1024x12xf32>
    %36 = arith.truncf %35 : vector<1024x12xf32> to vector<1024x12xbf16>
    %c1_36 = arith.constant 1 : index
    %c0_37 = arith.constant 0 : index
    %c0_38 = arith.constant 0 : index
    %c0_39 = arith.constant 0 : index
    %37 = vector.load %arg2[%c1_36, %c0_37, %c0_38, %c0_39] : memref<4x4x12x4xbf16, #tpu.memory_space<vmem>>, vector<1x1x12x4xbf16>
    %38 = vector.shape_cast %37 : vector<1x1x12x4xbf16> to vector<12x4xbf16>
    %cst_40 = arith.constant dense<0.000000e+00> : vector<1024x4xf32>
    %39 = tpu.matmul %36, %38, %cst_40 {dimension_numbers = #tpu.dot_dimension_numbers<[1], [0], [0], [1], [0, 0, 1, 1], [], []>} : vector<1024x12xbf16>, vector<12x4xbf16>, vector<1024x4xf32> -> vector<1024x4xf32>
    %40 = arith.addf %32, %39 : vector<1024x4xf32>
    %c0_41 = arith.constant 0 : index
    %c1_42 = arith.constant 1 : index
    %c1_43 = arith.constant 1 : index
    %c0_44 = arith.constant 0 : index
    %41 = vector.load %arg1[%c0_41, %c1_42, %c1_43, %c0_44] : memref<1x35x35x12xf32, #tpu.memory_space<vmem>>, vector<1x32x32x12xf32>
    %42 = vector.shape_cast %41 : vector<1x32x32x12xf32> to vector<32x32x12xf32>
    %43 = vector.shape_cast %42 : vector<32x32x12xf32> to vector<1024x12xf32>
    %44 = arith.truncf %43 : vector<1024x12xf32> to vector<1024x12xbf16>
    %c1_45 = arith.constant 1 : index
    %c1_46 = arith.constant 1 : index
    %c0_47 = arith.constant 0 : index
    %c0_48 = arith.constant 0 : index
    %45 = vector.load %arg2[%c1_45, %c1_46, %c0_47, %c0_48] : memref<4x4x12x4xbf16, #tpu.memory_space<vmem>>, vector<1x1x12x4xbf16>
    %46 = vector.shape_cast %45 : vector<1x1x12x4xbf16> to vector<12x4xbf16>
    %cst_49 = arith.constant dense<0.000000e+00> : vector<1024x4xf32>
    %47 = tpu.matmul %44, %46, %cst_49 {dimension_numbers = #tpu.dot_dimension_numbers<[1], [0], [0], [1], [0, 0, 1, 1], [], []>} : vector<1024x12xbf16>, vector<12x4xbf16>, vector<1024x4xf32> -> vector<1024x4xf32>
    %48 = arith.addf %40, %47 : vector<1024x4xf32>
    %c0_50 = arith.constant 0 : index
    %c1_51 = arith.constant 1 : index
    %c2_52 = arith.constant 2 : index
    %c0_53 = arith.constant 0 : index
    %49 = vector.load %arg1[%c0_50, %c1_51, %c2_52, %c0_53] : memref<1x35x35x12xf32, #tpu.memory_space<vmem>>, vector<1x32x32x12xf32>
    %50 = vector.shape_cast %49 : vector<1x32x32x12xf32> to vector<32x32x12xf32>
    %51 = vector.shape_cast %50 : vector<32x32x12xf32> to vector<1024x12xf32>
    %52 = arith.truncf %51 : vector<1024x12xf32> to vector<1024x12xbf16>
    %c1_54 = arith.constant 1 : index
    %c2_55 = arith.constant 2 : index
    %c0_56 = arith.constant 0 : index
    %c0_57 = arith.constant 0 : index
    %53 = vector.load %arg2[%c1_54, %c2_55, %c0_56, %c0_57] : memref<4x4x12x4xbf16, #tpu.memory_space<vmem>>, vector<1x1x12x4xbf16>
    %54 = vector.shape_cast %53 : vector<1x1x12x4xbf16> to vector<12x4xbf16>
    %cst_58 = arith.constant dense<0.000000e+00> : vector<1024x4xf32>
    %55 = tpu.matmul %52, %54, %cst_58 {dimension_numbers = #tpu.dot_dimension_numbers<[1], [0], [0], [1], [0, 0, 1, 1], [], []>} : vector<1024x12xbf16>, vector<12x4xbf16>, vector<1024x4xf32> -> vector<1024x4xf32>
    %56 = arith.addf %48, %55 : vector<1024x4xf32>
    %c0_59 = arith.constant 0 : index
    %c1_60 = arith.constant 1 : index
    %c3_61 = arith.constant 3 : index
    %c0_62 = arith.constant 0 : index
    %57 = vector.load %arg1[%c0_59, %c1_60, %c3_61, %c0_62] : memref<1x35x35x12xf32, #tpu.memory_space<vmem>>, vector<1x32x32x12xf32>
    %58 = vector.shape_cast %57 : vector<1x32x32x12xf32> to vector<32x32x12xf32>
    %59 = vector.shape_cast %58 : vector<32x32x12xf32> to vector<1024x12xf32>
    %60 = arith.truncf %59 : vector<1024x12xf32> to vector<1024x12xbf16>
    %c1_63 = arith.constant 1 : index
    %c3_64 = arith.constant 3 : index
    %c0_65 = arith.constant 0 : index
    %c0_66 = arith.constant 0 : index
    %61 = vector.load %arg2[%c1_63, %c3_64, %c0_65, %c0_66] : memref<4x4x12x4xbf16, #tpu.memory_space<vmem>>, vector<1x1x12x4xbf16>
    %62 = vector.shape_cast %61 : vector<1x1x12x4xbf16> to vector<12x4xbf16>
    %cst_67 = arith.constant dense<0.000000e+00> : vector<1024x4xf32>
    %63 = tpu.matmul %60, %62, %cst_67 {dimension_numbers = #tpu.dot_dimension_numbers<[1], [0], [0], [1], [0, 0, 1, 1], [], []>} : vector<1024x12xbf16>, vector<12x4xbf16>, vector<1024x4xf32> -> vector<1024x4xf32>
    %64 = arith.addf %56, %63 : vector<1024x4xf32>
    %c0_68 = arith.constant 0 : index
    %c2_69 = arith.constant 2 : index
    %c0_70 = arith.constant 0 : index
    %c0_71 = arith.constant 0 : index
    %65 = vector.load %arg1[%c0_68, %c2_69, %c0_70, %c0_71] : memref<1x35x35x12xf32, #tpu.memory_space<vmem>>, vector<1x32x32x12xf32>
    %66 = vector.shape_cast %65 : vector<1x32x32x12xf32> to vector<32x32x12xf32>
    %67 = vector.shape_cast %66 : vector<32x32x12xf32> to vector<1024x12xf32>
    %68 = arith.truncf %67 : vector<1024x12xf32> to vector<1024x12xbf16>
    %c2_72 = arith.constant 2 : index
    %c0_73 = arith.constant 0 : index
    %c0_74 = arith.constant 0 : index
    %c0_75 = arith.constant 0 : index
    %69 = vector.load %arg2[%c2_72, %c0_73, %c0_74, %c0_75] : memref<4x4x12x4xbf16, #tpu.memory_space<vmem>>, vector<1x1x12x4xbf16>
    %70 = vector.shape_cast %69 : vector<1x1x12x4xbf16> to vector<12x4xbf16>
    %cst_76 = arith.constant dense<0.000000e+00> : vector<1024x4xf32>
    %71 = tpu.matmul %68, %70, %cst_76 {dimension_numbers = #tpu.dot_dimension_numbers<[1], [0], [0], [1], [0, 0, 1, 1], [], []>} : vector<1024x12xbf16>, vector<12x4xbf16>, vector<1024x4xf32> -> vector<1024x4xf32>
    %72 = arith.addf %64, %71 : vector<1024x4xf32>
    %c0_77 = arith.constant 0 : index
    %c2_78 = arith.constant 2 : index
    %c1_79 = arith.constant 1 : index
    %c0_80 = arith.constant 0 : index
    %73 = vector.load %arg1[%c0_77, %c2_78, %c1_79, %c0_80] : memref<1x35x35x12xf32, #tpu.memory_space<vmem>>, vector<1x32x32x12xf32>
    %74 = vector.shape_cast %73 : vector<1x32x32x12xf32> to vector<32x32x12xf32>
    %75 = vector.shape_cast %74 : vector<32x32x12xf32> to vector<1024x12xf32>
    %76 = arith.truncf %75 : vector<1024x12xf32> to vector<1024x12xbf16>
    %c2_81 = arith.constant 2 : index
    %c1_82 = arith.constant 1 : index
    %c0_83 = arith.constant 0 : index
    %c0_84 = arith.constant 0 : index
    %77 = vector.load %arg2[%c2_81, %c1_82, %c0_83, %c0_84] : memref<4x4x12x4xbf16, #tpu.memory_space<vmem>>, vector<1x1x12x4xbf16>
    %78 = vector.shape_cast %77 : vector<1x1x12x4xbf16> to vector<12x4xbf16>
    %cst_85 = arith.constant dense<0.000000e+00> : vector<1024x4xf32>
    %79 = tpu.matmul %76, %78, %cst_85 {dimension_numbers = #tpu.dot_dimension_numbers<[1], [0], [0], [1], [0, 0, 1, 1], [], []>} : vector<1024x12xbf16>, vector<12x4xbf16>, vector<1024x4xf32> -> vector<1024x4xf32>
    %80 = arith.addf %72, %79 : vector<1024x4xf32>
    %c0_86 = arith.constant 0 : index
    %c2_87 = arith.constant 2 : index
    %c2_88 = arith.constant 2 : index
    %c0_89 = arith.constant 0 : index
    %81 = vector.load %arg1[%c0_86, %c2_87, %c2_88, %c0_89] : memref<1x35x35x12xf32, #tpu.memory_space<vmem>>, vector<1x32x32x12xf32>
    %82 = vector.shape_cast %81 : vector<1x32x32x12xf32> to vector<32x32x12xf32>
    %83 = vector.shape_cast %82 : vector<32x32x12xf32> to vector<1024x12xf32>
    %84 = arith.truncf %83 : vector<1024x12xf32> to vector<1024x12xbf16>
    %c2_90 = arith.constant 2 : index
    %c2_91 = arith.constant 2 : index
    %c0_92 = arith.constant 0 : index
    %c0_93 = arith.constant 0 : index
    %85 = vector.load %arg2[%c2_90, %c2_91, %c0_92, %c0_93] : memref<4x4x12x4xbf16, #tpu.memory_space<vmem>>, vector<1x1x12x4xbf16>
    %86 = vector.shape_cast %85 : vector<1x1x12x4xbf16> to vector<12x4xbf16>
    %cst_94 = arith.constant dense<0.000000e+00> : vector<1024x4xf32>
    %87 = tpu.matmul %84, %86, %cst_94 {dimension_numbers = #tpu.dot_dimension_numbers<[1], [0], [0], [1], [0, 0, 1, 1], [], []>} : vector<1024x12xbf16>, vector<12x4xbf16>, vector<1024x4xf32> -> vector<1024x4xf32>
    %88 = arith.addf %80, %87 : vector<1024x4xf32>
    %c0_95 = arith.constant 0 : index
    %c2_96 = arith.constant 2 : index
    %c3_97 = arith.constant 3 : index
    %c0_98 = arith.constant 0 : index
    %89 = vector.load %arg1[%c0_95, %c2_96, %c3_97, %c0_98] : memref<1x35x35x12xf32, #tpu.memory_space<vmem>>, vector<1x32x32x12xf32>
    %90 = vector.shape_cast %89 : vector<1x32x32x12xf32> to vector<32x32x12xf32>
    %91 = vector.shape_cast %90 : vector<32x32x12xf32> to vector<1024x12xf32>
    %92 = arith.truncf %91 : vector<1024x12xf32> to vector<1024x12xbf16>
    %c2_99 = arith.constant 2 : index
    %c3_100 = arith.constant 3 : index
    %c0_101 = arith.constant 0 : index
    %c0_102 = arith.constant 0 : index
    %93 = vector.load %arg2[%c2_99, %c3_100, %c0_101, %c0_102] : memref<4x4x12x4xbf16, #tpu.memory_space<vmem>>, vector<1x1x12x4xbf16>
    %94 = vector.shape_cast %93 : vector<1x1x12x4xbf16> to vector<12x4xbf16>
    %cst_103 = arith.constant dense<0.000000e+00> : vector<1024x4xf32>
    %95 = tpu.matmul %92, %94, %cst_103 {dimension_numbers = #tpu.dot_dimension_numbers<[1], [0], [0], [1], [0, 0, 1, 1], [], []>} : vector<1024x12xbf16>, vector<12x4xbf16>, vector<1024x4xf32> -> vector<1024x4xf32>
    %96 = arith.addf %88, %95 : vector<1024x4xf32>
    %c0_104 = arith.constant 0 : index
    %c3_105 = arith.constant 3 : index
    %c0_106 = arith.constant 0 : index
    %c0_107 = arith.constant 0 : index
    %97 = vector.load %arg1[%c0_104, %c3_105, %c0_106, %c0_107] : memref<1x35x35x12xf32, #tpu.memory_space<vmem>>, vector<1x32x32x12xf32>
    %98 = vector.shape_cast %97 : vector<1x32x32x12xf32> to vector<32x32x12xf32>
    %99 = vector.shape_cast %98 : vector<32x32x12xf32> to vector<1024x12xf32>
    %100 = arith.truncf %99 : vector<1024x12xf32> to vector<1024x12xbf16>
    %c3_108 = arith.constant 3 : index
    %c0_109 = arith.constant 0 : index
    %c0_110 = arith.constant 0 : index
    %c0_111 = arith.constant 0 : index
    %101 = vector.load %arg2[%c3_108, %c0_109, %c0_110, %c0_111] : memref<4x4x12x4xbf16, #tpu.memory_space<vmem>>, vector<1x1x12x4xbf16>
    %102 = vector.shape_cast %101 : vector<1x1x12x4xbf16> to vector<12x4xbf16>
    %cst_112 = arith.constant dense<0.000000e+00> : vector<1024x4xf32>
    %103 = tpu.matmul %100, %102, %cst_112 {dimension_numbers = #tpu.dot_dimension_numbers<[1], [0], [0], [1], [0, 0, 1, 1], [], []>} : vector<1024x12xbf16>, vector<12x4xbf16>, vector<1024x4xf32> -> vector<1024x4xf32>
    %104 = arith.addf %96, %103 : vector<1024x4xf32>
    %c0_113 = arith.constant 0 : index
    %c3_114 = arith.constant 3 : index
    %c1_115 = arith.constant 1 : index
    %c0_116 = arith.constant 0 : index
    %105 = vector.load %arg1[%c0_113, %c3_114, %c1_115, %c0_116] : memref<1x35x35x12xf32, #tpu.memory_space<vmem>>, vector<1x32x32x12xf32>
    %106 = vector.shape_cast %105 : vector<1x32x32x12xf32> to vector<32x32x12xf32>
    %107 = vector.shape_cast %106 : vector<32x32x12xf32> to vector<1024x12xf32>
    %108 = arith.truncf %107 : vector<1024x12xf32> to vector<1024x12xbf16>
    %c3_117 = arith.constant 3 : index
    %c1_118 = arith.constant 1 : index
    %c0_119 = arith.constant 0 : index
    %c0_120 = arith.constant 0 : index
    %109 = vector.load %arg2[%c3_117, %c1_118, %c0_119, %c0_120] : memref<4x4x12x4xbf16, #tpu.memory_space<vmem>>, vector<1x1x12x4xbf16>
    %110 = vector.shape_cast %109 : vector<1x1x12x4xbf16> to vector<12x4xbf16>
    %cst_121 = arith.constant dense<0.000000e+00> : vector<1024x4xf32>
    %111 = tpu.matmul %108, %110, %cst_121 {dimension_numbers = #tpu.dot_dimension_numbers<[1], [0], [0], [1], [0, 0, 1, 1], [], []>} : vector<1024x12xbf16>, vector<12x4xbf16>, vector<1024x4xf32> -> vector<1024x4xf32>
    %112 = arith.addf %104, %111 : vector<1024x4xf32>
    %c0_122 = arith.constant 0 : index
    %c3_123 = arith.constant 3 : index
    %c2_124 = arith.constant 2 : index
    %c0_125 = arith.constant 0 : index
    %113 = vector.load %arg1[%c0_122, %c3_123, %c2_124, %c0_125] : memref<1x35x35x12xf32, #tpu.memory_space<vmem>>, vector<1x32x32x12xf32>
    %114 = vector.shape_cast %113 : vector<1x32x32x12xf32> to vector<32x32x12xf32>
    %115 = vector.shape_cast %114 : vector<32x32x12xf32> to vector<1024x12xf32>
    %116 = arith.truncf %115 : vector<1024x12xf32> to vector<1024x12xbf16>
    %c3_126 = arith.constant 3 : index
    %c2_127 = arith.constant 2 : index
    %c0_128 = arith.constant 0 : index
    %c0_129 = arith.constant 0 : index
    %117 = vector.load %arg2[%c3_126, %c2_127, %c0_128, %c0_129] : memref<4x4x12x4xbf16, #tpu.memory_space<vmem>>, vector<1x1x12x4xbf16>
    %118 = vector.shape_cast %117 : vector<1x1x12x4xbf16> to vector<12x4xbf16>
    %cst_130 = arith.constant dense<0.000000e+00> : vector<1024x4xf32>
    %119 = tpu.matmul %116, %118, %cst_130 {dimension_numbers = #tpu.dot_dimension_numbers<[1], [0], [0], [1], [0, 0, 1, 1], [], []>} : vector<1024x12xbf16>, vector<12x4xbf16>, vector<1024x4xf32> -> vector<1024x4xf32>
    %120 = arith.addf %112, %119 : vector<1024x4xf32>
    %c0_131 = arith.constant 0 : index
    %c3_132 = arith.constant 3 : index
    %c3_133 = arith.constant 3 : index
    %c0_134 = arith.constant 0 : index
    %121 = vector.load %arg1[%c0_131, %c3_132, %c3_133, %c0_134] : memref<1x35x35x12xf32, #tpu.memory_space<vmem>>, vector<1x32x32x12xf32>
    %122 = vector.shape_cast %121 : vector<1x32x32x12xf32> to vector<32x32x12xf32>
    %123 = vector.shape_cast %122 : vector<32x32x12xf32> to vector<1024x12xf32>
    %124 = arith.truncf %123 : vector<1024x12xf32> to vector<1024x12xbf16>
    %c3_135 = arith.constant 3 : index
    %c3_136 = arith.constant 3 : index
    %c0_137 = arith.constant 0 : index
    %c0_138 = arith.constant 0 : index
    %125 = vector.load %arg2[%c3_135, %c3_136, %c0_137, %c0_138] : memref<4x4x12x4xbf16, #tpu.memory_space<vmem>>, vector<1x1x12x4xbf16>
    %126 = vector.shape_cast %125 : vector<1x1x12x4xbf16> to vector<12x4xbf16>
    %cst_139 = arith.constant dense<0.000000e+00> : vector<1024x4xf32>
    %127 = tpu.matmul %124, %126, %cst_139 {dimension_numbers = #tpu.dot_dimension_numbers<[1], [0], [0], [1], [0, 0, 1, 1], [], []>} : vector<1024x12xbf16>, vector<12x4xbf16>, vector<1024x4xf32> -> vector<1024x4xf32>
    %128 = arith.addf %120, %127 : vector<1024x4xf32>
    %c0_140 = arith.constant 0 : index
    %c0_141 = arith.constant 0 : index
    %129 = vector.load %arg3[%c0_140, %c0_141] : memref<1x4xf32, #tpu.memory_space<vmem>>, vector<1x4xf32>
    %130 = vector.broadcast %129 : vector<1x4xf32> to vector<1024x4xf32>
    %131 = arith.addf %128, %130 : vector<1024x4xf32>
    %cst_142 = arith.constant 0.000000e+00 : f32
    %132 = vector.broadcast %cst_142 : f32 to vector<1024x4xf32>
    %133 = arith.maximumf %131, %132 : vector<1024x4xf32>
    %134 = vector.shape_cast %133 : vector<1024x4xf32> to vector<32x32x4xf32>
    %c0_143 = arith.constant 0 : index
    %c0_144 = arith.constant 0 : index
    %c0_145 = arith.constant 0 : index
    %c0_146 = arith.constant 0 : index
    %135 = vector.load %arg4[%c0_143, %c0_144, %c0_145, %c0_146] : memref<1x32x32x4xf32, #tpu.memory_space<vmem>>, vector<1x32x32x4xf32>
    %136 = vector.shape_cast %135 : vector<1x32x32x4xf32> to vector<32x32x4xf32>
    %137 = vector.shape_cast %134 : vector<32x32x4xf32> to vector<1x32x32x4xf32>
    tpu.vector_store %arg4[%c0_143, %c0_144, %c0_145, %c0_146], %137 {strides = array<i32>} : memref<1x32x32x4xf32, #tpu.memory_space<vmem>>, vector<1x32x32x4xf32>,
    return
  }
  func.func @transform_0(%arg0: i32) -> (i32, i32, i32, i32) {
    %c0_i32 = arith.constant 0 : i32
    %c0_i32_0 = arith.constant 0 : i32
    %c0_i32_1 = arith.constant 0 : i32
    %c0_i32_2 = arith.constant 0 : i32
    return %arg0, %c0_i32, %c0_i32_0, %c0_i32_1 : i32, i32, i32, i32
  }
  func.func @transform_1(%arg0: i32) -> (i32, i32, i32, i32) {
    %c0_i32 = arith.constant 0 : i32
    %c0_i32_0 = arith.constant 0 : i32
    %c0_i32_1 = arith.constant 0 : i32
    %c0_i32_2 = arith.constant 0 : i32
    %c0_i32_3 = arith.constant 0 : i32
    return %c0_i32, %c0_i32_0, %c0_i32_1, %c0_i32_2 : i32, i32, i32, i32
  }
  func.func @transform_2(%arg0: i32) -> (i32, i32) {
    %c0_i32 = arith.constant 0 : i32
    %c0_i32_0 = arith.constant 0 : i32
    %c0_i32_1 = arith.constant 0 : i32
    return %c0_i32, %c0_i32_0 : i32, i32
  }
  func.func @transform_3(%arg0: i32) -> (i32, i32, i32, i32) {
    %c0_i32 = arith.constant 0 : i32
    %c0_i32_0 = arith.constant 0 : i32
    %c0_i32_1 = arith.constant 0 : i32
    %c0_i32_2 = arith.constant 0 : i32
    return %arg0, %c0_i32, %c0_i32_0, %c0_i32_1 : i32, i32, i32, i32
  }
}

</mosaic_0001>

<bundles_post_ra>
// kernel: _conv2d.1
= control target key start
LH: loop header
LB: loop body
LE: loop exit
PB: predicated region body
PF: predicated region fallthrough
CT: control target
= control target key end

     0   :  { %s25183_s12 = smov 0   ;;  %s28230_s0 = inlined_call_operand.vmem [shape: f32[2,35,35,12], index: 0, kind: input, shape index: {}]   ;;  %s28231_s1 = inlined_call_operand.vmem [shape: bf16[4,4,12,4], index: 1, kind: input, shape index: {}]   ;;  %s28232_s2 = inlined_call_operand.vmem [shape: f32[1,4], index: 2, kind: input, shape index: {}]   ;;  %s28233_s3 = inlined_call_operand.vmem [shape: f32[2,32,32,4], index: 3, kind: output, shape index: {}]  }
   0x1 LB: > { %s17455_s13 = sadd.s32 4294967295, %s25161_s12   ;;  %p17459_p0 = scmp.ge.s32.totalorder %s25161_s12, 1  ;;  %s25161_s12 = sphi %s25183_s12, %s13_s12  }
   0x2   : > { %p137_p1 = scmp.lt.s32.totalorder %s25161_s12, 3 }
   0x4   : > { %p138_p2 = pnand %p17459_p0, %p137_p1 }
   0x6   : > { %141 = sbr.rel (%p138_p2) target bundleno = 2286 (0x8ee), region = 32 }
   0xd   : > { %v25138_v0 = vld [vmem:[%s28231_s1 + $0x8] sm:$0x3f]   ;;  %vm759_vm0 = vcmask 1045504   ;;  %p161_p3 = scmp.lt.s32.totalorder %s17455_s13, 1  ;;  %v25139_v1 = vld [vmem:[%s28231_s1 + $0x40] sm:$0x3f]  }
   0xe   : > { %25113 = vmatprep.subr.msk.bf16.mxu1 %vm759_vm0, %v25138_v0  ;;  %v761_v2 = vsel %vm759_vm0, %v25138_v0, 0  ;;  %v25140_v3 = vld [vmem:[%s28231_s1] sm:$0x3f]   ;;  %25121 = vmatprep.subr.msk.bf16.mxu0 %vm759_vm0, %v25139_v1  ;;  %v8856_v4 = vsel %vm759_vm0, %v25139_v1, 0  ;;  %v25141_v5 = vld [vmem:[%s28231_s1 + $0x48] sm:$0x3f]  }
   0xf   : > { %21114 = vmatpush3.bf16.msra.mxu1 %v761_v2  ;;  %s28262_s13 = smov (!%p161_p3, %s17455_s13), 1  ;;  %22154 = vmatpush3.bf16.msra.mxu0 %v8856_v4  ;;  %vm566_vm1 = vcmask 97280   ;;  %v1506_v15 = vsel %vm759_vm0, %v25140_v3, 0  ;;  %v9924_v20 = vsel %vm759_vm0, %v25141_v5, 0  ;;  %vm17271_vm2 = vcmask 31744  }
  0x10   : > { %s25129_s20 = smul.u32 1400, %s28262_s13  ;;  %25114 = vmatprep.subr.msk.bf16.mxu1 %vm759_vm0, %v25140_v3  ;;  %25122 = vmatprep.subr.msk.bf16.mxu0 %vm759_vm0, %v25141_v5  ;;  %s20072_s28 = sshll.u32 %s28262_s13, 10 }
  0x11   : > { %s27787_s13 = scalar_lea.vmem %s28233_s3, %s20072_s28 }
  0x12   : > { %s25214_s25 = scalar_lea.vmem %s28230_s0, %s25129_s20 }
  0x13   : > { %v366_v6 = vld [vmem:[%s25214_s25 + $0x1] sm:$0xff]  ;;  %v367_v7 = vld [vmem:[%s25214_s25 + $0x9] sm:$0xff]  ;;  %v18510_v10 = vld [vmem:[%s25214_s25 + $0x58] sm:$0xff] }
  0x14   : > { %v18509_v8 = vld [vmem:[%s25214_s25 + $0x50] sm:$0xff]  ;;  %v494_v9 = vpack.c.bf16 %v367_v7, %v366_v6  ;;  %v369_v12 = vld [vmem:[%s25214_s25 + $0x19] sm:$0xff]  ;;  %v18512_v17 = vld [vmem:[%s25214_s25 + $0x68] sm:$0xff] }
  0x15   : > { %v368_v11 = vld [vmem:[%s25214_s25 + $0x11] sm:$0xff]  ;;  %v8591_v13 = vpack.c.bf16 %v18510_v10, %v18509_v8  ;;  %v18511_v16 = vld [vmem:[%s25214_s25 + $0x60] sm:$0xff]  ;;  %v370_v18 = vld [vmem:[%s25214_s25 + $0x29] sm:$0xff] }
  0x16   : > { %v495_v14 = vpack.c.bf16 %v369_v12, %v368_v11  ;;  %21115 = vmatprep.mubr.msk.bf16.mxu1 %vm566_vm1, %v494_v9  ;;  %v8592_v19 = vpack.c.bf16 %v18512_v17, %v18511_v16  ;;  %v371_v21 = vld [vmem:[%s25214_s25 + $0x31] sm:$0xff]  ;;  %v18514_v23 = vld [vmem:[%s25214_s25 + $0x80] sm:$0xff]  ;;  %v18515_v28 = vld [vmem:[%s25214_s25 + $0x88] sm:$0xff] }
  0x17   : > { %v18513_v22 = vld [vmem:[%s25214_s25 + $0x78] sm:$0xff]  ;;  %22155 = vmatprep.mubr.msk.bf16.mxu0 %vm566_vm1, %v8591_v13  ;;  %v496_v24 = vpack.c.bf16 %v371_v21, %v370_v18  ;;  %v373_v27 = vld [vmem:[%s25214_s25 + $0x41] sm:$0xff]  ;;  %v18516_v29 = vld [vmem:[%s25214_s25 + $0x90] sm:$0xff] }
  0x18   : > { %21116 = vmatmul.mubr.msk.bf16.vlgmr.msra.gmra.mrb[0].mxu1 %vm566_vm1, %v495_v14  ;;  %v8593_v25 = vpack.c.bf16 %v18514_v23, %v18513_v22  ;;  %22156 = vmatmul.mubr.msk.bf16.vlgmr.msra.gmra.mrb[0].mxu0 %vm566_vm1, %v8592_v19  ;;  %v372_v26 = vld [vmem:[%s25214_s25 + $0x39] sm:$0xff]  ;;  %v374_v30 = vld [vmem:[%s25214_s25 + $0x51] sm:$0xff]  ;;  %v18518_v33 = vld [vmem:[%s25214_s25 + $0xa8] sm:$0xff]  ;;  %v8594_v35 = vpack.c.bf16 %v18516_v29, %v18515_v28 }
  0x19   : > { %21244 = vmatpush3.bf16.msra.mxu1 %v1506_v15  ;;  %22284 = vmatpush3.bf16.msra.mxu0 %v9924_v20  ;;  %v375_v31 = vld [vmem:[%s25214_s25 + $0x59] sm:$0xff]  ;;  %v497_v34 = vpack.c.bf16 %v373_v27, %v372_v26  ;;  %v376_v38 = vld [vmem:[%s25214_s25 + $0x61] sm:$0xff]  ;;  %v377_v39 = vld [vmem:[%s25214_s25 + $0x69] sm:$0xff] }
  0x1a   : > { %21119 = vmatprep.mubr.msk.bf16.mxu1 %vm566_vm1, %v496_v24  ;;  %22159 = vmatprep.mubr.msk.bf16.mxu0 %vm566_vm1, %v8593_v25  ;;  %v18517_v32 = vld [vmem:[%s25214_s25 + $0xa0] sm:$0xff]  ;;  %v25245_v36 = vpack.c.bf16 %v375_v31, %v374_v30  ;;  %v18519_v40 = vld [vmem:[%s25214_s25 + $0xb0] sm:$0xff]  ;;  %v18520_v41 = vld [vmem:[%s25214_s25 + $0xb8] sm:$0xff]  ;;  %v25260_v46 = vpack.c.bf16 %v377_v39, %v376_v38 }
  0x1b   : > { %v8595_v37 = vpack.c.bf16 %v18518_v33, %v18517_v32  ;;  %v378_v42 = vld [vmem:[%s25214_s25 + $0x79] sm:$0xff]  ;;  %v379_v43 = vld [vmem:[%s25214_s25 + $0x81] sm:$0xff]  ;;  %v18522_v45 = vld [vmem:[%s25214_s25 + $0xd0] sm:$0xff]  ;;  %v8596_v47 = vpack.c.bf16 %v18520_v41, %v18519_v40 }
  0x1c   : > { %v18521_v44 = vld [vmem:[%s25214_s25 + $0xc8] sm:$0xff]  ;;  %v25262_v48 = vpack.c.bf16 %v379_v43, %v378_v42  ;;  %v381_v51 = vld [vmem:[%s25214_s25 + $0x91] sm:$0xff]  ;;  %v18524_v53 = vld [vmem:[%s25214_s25 + $0xe0] sm:$0xff] }
  0x1d   : > { %v8597_v49 = vpack.c.bf16 %v18522_v45, %v18521_v44  ;;  %v380_v50 = vld [vmem:[%s25214_s25 + $0x89] sm:$0xff]  ;;  %v18523_v52 = vld [vmem:[%s25214_s25 + $0xd8] sm:$0xff]  ;;  %v382_v54 = vld [vmem:[%s25214_s25 + $0xa1] sm:$0xff] }
  0x1e   : > { %v383_v55 = vld [vmem:[%s25214_s25 + $0xa9] sm:$0xff]  ;;  %v18526_v57 = vld [vmem:[%s25214_s25 + $0xf8] sm:$0xff]  ;;  %v25278_v58 = vpack.c.bf16 %v381_v51, %v380_v50  ;;  %v8598_v59 = vpack.c.bf16 %v18524_v53, %v18523_v52  ;;  %v18527_v0 = vld [vmem:[%s25214_s25 + $0x100] sm:$0xff] }
  0x1f   : > { %v18525_v56 = vld [vmem:[%s25214_s25 + $0xf0] sm:$0xff]  ;;  %v25280_v60 = vpack.c.bf16 %v383_v55, %v382_v54  ;;  %v385_v63 = vld [vmem:[%s25214_s25 + $0xb9] sm:$0xff]  ;;  %v18528_v1 = vld [vmem:[%s25214_s25 + $0x108] sm:$0xff] }
  0x20   : > { %21120 = vmatmul.mubr.msk.bf16.gmra.mrb[4].mxu1 %vm566_vm1, %v497_v34  ;;  %22160 = vmatmul.mubr.msk.bf16.gmra.mrb[4].mxu0 %vm566_vm1, %v8594_v35  ;;  %v8599_v61 = vpack.c.bf16 %v18526_v57, %v18525_v56  ;;  %v384_v62 = vld [vmem:[%s25214_s25 + $0xb1] sm:$0xff]  ;;  %v386_v2 = vld [vmem:[%s25214_s25 + $0xc9] sm:$0xff]  ;;  %v18530_v5 = vld [vmem:[%s25214_s25 + $0x120] sm:$0xff]  ;;  %v8600_v7 = vpack.c.bf16 %v18528_v1, %v18527_v0 }
  0x21   : > { %21123 = vmatprep.mubr.msk.bf16.mxu1 %vm566_vm1, %v25245_v36  ;;  %22163 = vmatprep.mubr.msk.bf16.mxu0 %vm566_vm1, %v8595_v37  ;;  %v387_v3 = vld [vmem:[%s25214_s25 + $0xd1] sm:$0xff]  ;;  %v25296_v6 = vpack.c.bf16 %v385_v63, %v384_v62  ;;  %v388_v10 = vld [vmem:[%s25214_s25 + $0xd9] sm:$0xff]  ;;  %v389_v11 = vld [vmem:[%s25214_s25 + $0xe1] sm:$0xff] }
  0x22   : > { %v18529_v4 = vld [vmem:[%s25214_s25 + $0x118] sm:$0xff]  ;;  %v25298_v8 = vpack.c.bf16 %v387_v3, %v386_v2  ;;  %v18531_v12 = vld [vmem:[%s25214_s25 + $0x128] sm:$0xff]  ;;  %v18532_v13 = vld [vmem:[%s25214_s25 + $0x130] sm:$0xff]  ;;  %v25314_v18 = vpack.c.bf16 %v389_v11, %v388_v10 }
  0x23   : > { %v8601_v9 = vpack.c.bf16 %v18530_v5, %v18529_v4  ;;  %v390_v14 = vld [vmem:[%s25214_s25 + $0xf1] sm:$0xff]  ;;  %v391_v15 = vld [vmem:[%s25214_s25 + $0xf9] sm:$0xff]  ;;  %v18534_v17 = vld [vmem:[%s25214_s25 + $0x148] sm:$0xff]  ;;  %v8602_v19 = vpack.c.bf16 %v18532_v13, %v18531_v12 }
  0x24   : > { %v18533_v16 = vld [vmem:[%s25214_s25 + $0x140] sm:$0xff]  ;;  %v25316_v20 = vpack.c.bf16 %v391_v15, %v390_v14  ;;  %v393_v23 = vld [vmem:[%s25214_s25 + $0x109] sm:$0xff]  ;;  %v18536_v25 = vld [vmem:[%s25214_s25 + $0x158] sm:$0xff] }
  0x25   : > { %v8603_v21 = vpack.c.bf16 %v18534_v17, %v18533_v16  ;;  %v392_v22 = vld [vmem:[%s25214_s25 + $0x101] sm:$0xff]  ;;  %v18535_v24 = vld [vmem:[%s25214_s25 + $0x150] sm:$0xff]  ;;  %v394_v26 = vld [vmem:[%s25214_s25 + $0x119] sm:$0xff] }
  0x26   : > { %v395_v27 = vld [vmem:[%s25214_s25 + $0x121] sm:$0xff]  ;;  %v18538_v29 = vld [vmem:[%s25214_s25 + $0x170] sm:$0xff]  ;;  %v25332_v30 = vpack.c.bf16 %v393_v23, %v392_v22  ;;  %v8604_v31 = vpack.c.bf16 %v18536_v25, %v18535_v24  ;;  %v18539_v37 = vld [vmem:[%s25214_s25 + $0x178] sm:$0xff] }
  0x27   : > { %v18537_v28 = vld [vmem:[%s25214_s25 + $0x168] sm:$0xff]  ;;  %v25334_v32 = vpack.c.bf16 %v395_v27, %v394_v26  ;;  %v397_v35 = vld [vmem:[%s25214_s25 + $0x131] sm:$0xff]  ;;  %v18540_v38 = vld [vmem:[%s25214_s25 + $0x180] sm:$0xff] }
  0x28   : > { %21124 = vmatmul.mubr.msk.bf16.gmra.mrb[8].mxu1 %vm566_vm1, %v25260_v46  ;;  %22164 = vmatmul.mubr.msk.bf16.gmra.mrb[8].mxu0 %vm566_vm1, %v8596_v47  ;;  %v8605_v33 = vpack.c.bf16 %v18538_v29, %v18537_v28  ;;  %v396_v34 = vld [vmem:[%s25214_s25 + $0x129] sm:$0xff]  ;;  %v398_v39 = vld [vmem:[%s25214_s25 + $0x141] sm:$0xff]  ;;  %v18542_v42 = vld [vmem:[%s25214_s25 + $0x198] sm:$0xff]  ;;  %v8606_v44 = vpack.c.bf16 %v18540_v38, %v18539_v37 }
  0x29   : > { %21127 = vmatprep.mubr.msk.bf16.mxu1 %vm566_vm1, %v25262_v48  ;;  %22167 = vmatprep.mubr.msk.bf16.mxu0 %vm566_vm1, %v8597_v49  ;;  %v399_v40 = vld [vmem:[%s25214_s25 + $0x149] sm:$0xff]  ;;  %v25350_v43 = vpack.c.bf16 %v397_v35, %v396_v34  ;;  %v400_v49 = vld [vmem:[%s25214_s25 + $0x151] sm:$0xff]  ;;  %v401_v50 = vld [vmem:[%s25214_s25 + $0x159] sm:$0xff] }
  0x2a   : > { %v18541_v41 = vld [vmem:[%s25214_s25 + $0x190] sm:$0xff]  ;;  %v25352_v45 = vpack.c.bf16 %v399_v40, %v398_v39  ;;  %v18543_v51 = vld [vmem:[%s25214_s25 + $0x1a0] sm:$0xff]  ;;  %v18544_v52 = vld [vmem:[%s25214_s25 + $0x1a8] sm:$0xff]  ;;  %v25368_v57 = vpack.c.bf16 %v401_v50, %v400_v49 }
  0x2b   : > { %v8607_v47 = vpack.c.bf16 %v18542_v42, %v18541_v41  ;;  %v402_v53 = vld [vmem:[%s25214_s25 + $0x169] sm:$0xff]  ;;  %v403_v54 = vld [vmem:[%s25214_s25 + $0x171] sm:$0xff]  ;;  %v18546_v56 = vld [vmem:[%s25214_s25 + $0x1c0] sm:$0xff] }
  0x2c   : > { %v18545_v55 = vld [vmem:[%s25214_s25 + $0x1b8] sm:$0xff]  ;;  %v405_v0 = vld [vmem:[%s25214_s25 + $0x181] sm:$0xff]  ;;  %v18548_v2 = vld [vmem:[%s25214_s25 + $0x1d0] sm:$0xff] }
  0x2d   : > { %v8609_v62 = vpack.c.bf16 %v18546_v56, %v18545_v55  ;;  %v404_v63 = vld [vmem:[%s25214_s25 + $0x179] sm:$0xff]  ;;  %v18547_v1 = vld [vmem:[%s25214_s25 + $0x1c8] sm:$0xff]  ;;  %v406_v3 = vld [vmem:[%s25214_s25 + $0x191] sm:$0xff] }
  0x2e   : > { %v407_v4 = vld [vmem:[%s25214_s25 + $0x199] sm:$0xff]  ;;  %v8610_v10 = vpack.c.bf16 %v18548_v2, %v18547_v1  ;;  %v408_v13 = vld [vmem:[%s25214_s25 + $0x1a1] sm:$0xff]  ;;  %v409_v14 = vld [vmem:[%s25214_s25 + $0x1a9] sm:$0xff] }
  0x2f   : > { %v18549_v5 = vld [vmem:[%s25214_s25 + $0x1e0] sm:$0xff]  ;;  %v25388_v11 = vpack.c.bf16 %v407_v4, %v406_v3  ;;  %v18551_v15 = vld [vmem:[%s25214_s25 + $0x1f0] sm:$0xff]  ;;  %v18552_v16 = vld [vmem:[%s25214_s25 + $0x1f8] sm:$0xff]  ;;  %v25404_v23 = vpack.c.bf16 %v409_v14, %v408_v13 }
  0x30   : > { %21128 = vmatmul.mubr.msk.bf16.gmra.mrb[12].mxu1 %vm566_vm1, %v25278_v58  ;;  %22168 = vmatmul.mubr.msk.bf16.gmra.mrb[12].mxu0 %vm566_vm1, %v8598_v59  ;;  %v8608_v59 = vpack.c.bf16 %v18544_v52, %v18543_v51  ;;  %v410_v17 = vld [vmem:[%s25214_s25 + $0x1b9] sm:$0xff]  ;;  %v18554_v22 = vld [vmem:[%s25214_s25 + $0x210] sm:$0xff]  ;;  %v8612_v24 = vpack.c.bf16 %v18552_v16, %v18551_v15  ;;  %v18560_v49 = vld [vmem:[%s25214_s25 + $0x248] sm:$0xff] }
  0x31   : > { %21131 = vmatprep.mubr.msk.bf16.mxu1 %vm566_vm1, %v25280_v60  ;;  %22171 = vmatprep.mubr.msk.bf16.mxu0 %vm566_vm1, %v8599_v61  ;;  %v25370_v61 = vpack.c.bf16 %v403_v54, %v402_v53  ;;  %v412_v27 = vld [vmem:[%s25214_s25 + $0x1c9] sm:$0xff]  ;;  %v413_v28 = vld [vmem:[%s25214_s25 + $0x1d1] sm:$0xff]  ;;  %v18562_v53 = vld [vmem:[%s25214_s25 + $0x260] sm:$0xff] }
  0x32   : > { %v18555_v29 = vld [vmem:[%s25214_s25 + $0x218] sm:$0xff]  ;;  %v415_v34 = vld [vmem:[%s25214_s25 + $0x1e9] sm:$0xff]  ;;  %v25422_v38 = vpack.c.bf16 %v413_v28, %v412_v27  ;;  %v18565_v4 = vld [vmem:[%s25214_s25 + $0x280] sm:$0xff] }
  0x33   : > { %v18557_v35 = vld [vmem:[%s25214_s25 + $0x230] sm:$0xff]  ;;  %v18558_v37 = vld [vmem:[%s25214_s25 + $0x238] sm:$0xff]  ;;  %v424_v14 = vld [vmem:[%s25214_s25 + $0x241] sm:$0xff] }
  0x34   : > { %v8615_v41 = vpack.c.bf16 %v18558_v37, %v18557_v35  ;;  %v416_v42 = vld [vmem:[%s25214_s25 + $0x1f1] sm:$0xff]  ;;  %v418_v50 = vld [vmem:[%s25214_s25 + $0x209] sm:$0xff]  ;;  %v423_v3 = vld [vmem:[%s25214_s25 + $0x239] sm:$0xff] }
  0x35   : > { %v419_v51 = vld [vmem:[%s25214_s25 + $0x211] sm:$0xff]  ;;  %v425_v15 = vld [vmem:[%s25214_s25 + $0x249] sm:$0xff]  ;;  %v18572_v35 = vld [vmem:[%s25214_s25 + $0x2c0] sm:$0xff] }
  0x36   : > { %v18561_v52 = vld [vmem:[%s25214_s25 + $0x258] sm:$0xff]  ;;  %v25442_v56 = vpack.c.bf16 %v419_v51, %v418_v50  ;;  %v18564_v1 = vld [vmem:[%s25214_s25 + $0x270] sm:$0xff]  ;;  %v430_v37 = vld [vmem:[%s25214_s25 + $0x281] sm:$0xff] }
  0x37   : > { %v422_v2 = vld [vmem:[%s25214_s25 + $0x231] sm:$0xff] }
  0x38   : > { %21132 = vmatmul.mubr.msk.bf16.gmra.mrb[16].mxu1 %vm566_vm1, %v25296_v6  ;;  %22172 = vmatmul.mubr.msk.bf16.gmra.mrb[16].mxu0 %vm566_vm1, %v8600_v7  ;;  %v18550_v7 = vld [vmem:[%s25214_s25 + $0x1e8] sm:$0xff]  ;;  %v18567_v16 = vld [vmem:[%s25214_s25 + $0x290] sm:$0xff] }
  0x39   : > { %21135 = vmatprep.mubr.msk.bf16.mxu1 %vm566_vm1, %v25298_v8  ;;  %22175 = vmatprep.mubr.msk.bf16.mxu0 %vm566_vm1, %v8601_v9  ;;  %v25386_v9 = vpack.c.bf16 %v405_v0, %v404_v63  ;;  %v8611_v12 = vpack.c.bf16 %v18550_v7, %v18549_v5  ;;  %v421_v63 = vld [vmem:[%s25214_s25 + $0x221] sm:$0xff]  ;;  %v432_v51 = vld [vmem:[%s25214_s25 + $0x291] sm:$0xff] }
  0x3a   : > { %v18563_v0 = vld [vmem:[%s25214_s25 + $0x268] sm:$0xff] }
  0x3b   : > { %v18566_v5 = vld [vmem:[%s25214_s25 + $0x288] sm:$0xff] }
  0x3c   : > { %v8619_v13 = vpack.c.bf16 %v18566_v5, %v18565_v4 }
  0x40   : > { %21136 = vmatmul.mubr.msk.bf16.gmra.mrb[20].mxu1 %vm566_vm1, %v25314_v18  ;;  %22176 = vmatmul.mubr.msk.bf16.gmra.mrb[20].mxu0 %vm566_vm1, %v8602_v19  ;;  %v411_v19 = vld [vmem:[%s25214_s25 + $0x1c1] sm:$0xff] }
  0x41   : > { %21139 = vmatprep.mubr.msk.bf16.mxu1 %vm566_vm1, %v25316_v20  ;;  %22179 = vmatprep.mubr.msk.bf16.mxu0 %vm566_vm1, %v8603_v21  ;;  %v18553_v21 = vld [vmem:[%s25214_s25 + $0x208] sm:$0xff]  ;;  %v25406_v25 = vpack.c.bf16 %v411_v19, %v410_v17  ;;  %v18568_v17 = vld [vmem:[%s25214_s25 + $0x298] sm:$0xff] }
  0x42   : > { %v8613_v26 = vpack.c.bf16 %v18554_v22, %v18553_v21  ;;  %v426_v19 = vld [vmem:[%s25214_s25 + $0x259] sm:$0xff]  ;;  %v427_v21 = vld [vmem:[%s25214_s25 + $0x261] sm:$0xff]  ;;  %v8620_v27 = vpack.c.bf16 %v18568_v17, %v18567_v16  ;;  %v18580_v16 = vld [vmem:[%s25214_s25 + $0x310] sm:$0xff] }
  0x43   : > { %v18569_v22 = vld [vmem:[%s25214_s25 + $0x2a8] sm:$0xff]  ;;  %v25478_v28 = vpack.c.bf16 %v427_v21, %v426_v19  ;;  %v438_v17 = vld [vmem:[%s25214_s25 + $0x2d1] sm:$0xff]  ;;  %v439_v19 = vld [vmem:[%s25214_s25 + $0x2d9] sm:$0xff] }
  0x44   : > { %v18581_v21 = vld [vmem:[%s25214_s25 + $0x320] sm:$0xff] }
  0x48   : > { %21140 = vmatmul.mubr.msk.bf16.gmra.mrb[24].mxu1 %vm566_vm1, %v25332_v30  ;;  %22180 = vmatmul.mubr.msk.bf16.gmra.mrb[24].mxu0 %vm566_vm1, %v8604_v31  ;;  %v18556_v31 = vld [vmem:[%s25214_s25 + $0x220] sm:$0xff] }
  0x49   : > { %21143 = vmatprep.mubr.msk.bf16.mxu1 %vm566_vm1, %v25334_v32  ;;  %22183 = vmatprep.mubr.msk.bf16.mxu0 %vm566_vm1, %v8605_v33  ;;  %v414_v33 = vld [vmem:[%s25214_s25 + $0x1e1] sm:$0xff]  ;;  %v8614_v39 = vpack.c.bf16 %v18556_v31, %v18555_v29  ;;  %v428_v31 = vld [vmem:[%s25214_s25 + $0x269] sm:$0xff] }
  0x4a   : > { %v25424_v40 = vpack.c.bf16 %v415_v34, %v414_v33  ;;  %v429_v33 = vld [vmem:[%s25214_s25 + $0x271] sm:$0xff] }
  0x4b   : > { %v18571_v34 = vld [vmem:[%s25214_s25 + $0x2b8] sm:$0xff] }
  0x50   : > { %21144 = vmatmul.mubr.msk.bf16.gmra.mrb[28].mxu1 %vm566_vm1, %v25350_v43  ;;  %22184 = vmatmul.mubr.msk.bf16.gmra.mrb[28].mxu0 %vm566_vm1, %v8606_v44  ;;  %v417_v44 = vld [vmem:[%s25214_s25 + $0x1f9] sm:$0xff] }
  0x51   : > { %21147 = vmatprep.mubr.msk.bf16.mxu1 %vm566_vm1, %v25352_v45  ;;  %22187 = vmatprep.mubr.msk.bf16.mxu0 %vm566_vm1, %v8607_v47  ;;  %v18559_v47 = vld [vmem:[%s25214_s25 + $0x240] sm:$0xff]  ;;  %v25440_v54 = vpack.c.bf16 %v417_v44, %v416_v42  ;;  %v18574_v42 = vld [vmem:[%s25214_s25 + $0x2d8] sm:$0xff]  ;;  %v25494_v44 = vpack.c.bf16 %v429_v33, %v428_v31 }
  0x52   : > { %v8616_v55 = vpack.c.bf16 %v18560_v49, %v18559_v47  ;;  %v8622_v47 = vpack.c.bf16 %v18572_v35, %v18571_v34  ;;  %v440_v33 = vld [vmem:[%s25214_s25 + $0x2e1] sm:$0xff]  ;;  %v441_v34 = vld [vmem:[%s25214_s25 + $0x2e9] sm:$0xff] }
  0x53   : > { %v18583_v35 = vld [vmem:[%s25214_s25 + $0x330] sm:$0xff] }
  0x58   : > { %21148 = vmatmul.mubr.msk.bf16.gmra.mrb[32].mxu1 %vm566_vm1, %v25368_v57  ;;  %22188 = vmatmul.mubr.msk.bf16.gmra.mrb[32].mxu0 %vm566_vm1, %v8608_v59  ;;  %v8617_v59 = vpack.c.bf16 %v18562_v53, %v18561_v52  ;;  %v433_v52 = vld [vmem:[%s25214_s25 + $0x299] sm:$0xff] }
  0x59   : > { %21151 = vmatprep.mubr.msk.bf16.mxu1 %vm566_vm1, %v25370_v61  ;;  %22191 = vmatprep.mubr.msk.bf16.mxu0 %vm566_vm1, %v8609_v62  ;;  %v420_v62 = vld [vmem:[%s25214_s25 + $0x219] sm:$0xff] }
  0x5a   : > { %v25458_v7 = vpack.c.bf16 %v421_v63, %v420_v62  ;;  %v18575_v53 = vld [vmem:[%s25214_s25 + $0x2e0] sm:$0xff]  ;;  %v434_v62 = vld [vmem:[%s25214_s25 + $0x2a9] sm:$0xff]  ;;  %v435_v63 = vld [vmem:[%s25214_s25 + $0x2b1] sm:$0xff] }
  0x5b   : > { %v25528_v5 = vpack.c.bf16 %v435_v63, %v434_v62  ;;  %v445_v62 = vld [vmem:[%s25214_s25 + $0x311] sm:$0xff] }
  0x5c   : > { %v18587_v63 = vld [vmem:[%s25214_s25 + $0x358] sm:$0xff] }
  0x60   : > { %21152 = vmatmul.mubr.msk.bf16.gmra.mrb[36].mxu1 %vm566_vm1, %v25386_v9  ;;  %22192 = vmatmul.mubr.msk.bf16.gmra.mrb[36].mxu0 %vm566_vm1, %v8610_v10  ;;  %v8618_v10 = vpack.c.bf16 %v18564_v1, %v18563_v0  ;;  %v25518_v0 = vld [vmem:[%s28231_s1 + $0x50] sm:$0x3f]   ;;  %v18577_v1 = vld [vmem:[%s25214_s25 + $0x2f8] sm:$0xff] }
  0x61   : > { %21155 = vmatprep.mubr.msk.bf16.mxu1 %vm566_vm1, %v25388_v11  ;;  %22195 = vmatprep.mubr.msk.bf16.mxu0 %vm566_vm1, %v8611_v12  ;;  %v25460_v12 = vpack.c.bf16 %v423_v3, %v422_v2  ;;  %v18578_v2 = vld [vmem:[%s25214_s25 + $0x300] sm:$0xff]  ;;  %v25524_v3 = vpack.c.bf16 %v433_v52, %v432_v51 }
  0x62   : > { %25123 = vmatprep.subr.msk.bf16.mxu0 %vm759_vm0, %v25518_v0 }
  0x68   : > { %21156 = vmatmul.mubr.msk.bf16.gmra.mrb[40].mxu1 %vm566_vm1, %v25404_v23  ;;  %22196 = vmatmul.mubr.msk.bf16.gmra.mrb[40].mxu0 %vm566_vm1, %v8612_v24  ;;  %v18570_v24 = vld [vmem:[%s25214_s25 + $0x2b0] sm:$0xff] }
  0x69   : > { %21159 = vmatprep.mubr.msk.bf16.mxu1 %vm566_vm1, %v25406_v25  ;;  %22199 = vmatprep.mubr.msk.bf16.mxu0 %vm566_vm1, %v8613_v26  ;;  %v25476_v26 = vpack.c.bf16 %v425_v15, %v424_v14  ;;  %v8621_v29 = vpack.c.bf16 %v18570_v24, %v18569_v22  ;;  %v437_v14 = vld [vmem:[%s25214_s25 + $0x2c1] sm:$0xff] }
  0x6a   : > { %v18579_v15 = vld [vmem:[%s25214_s25 + $0x308] sm:$0xff] }
  0x6b   : > { %v18582_v22 = vld [vmem:[%s25214_s25 + $0x328] sm:$0xff] }
  0x6c   : > { %v8627_v31 = vpack.c.bf16 %v18582_v22, %v18581_v21  ;;  %v449_v21 = vld [vmem:[%s25214_s25 + $0x339] sm:$0xff] }
  0x6d   : > { %v18591_v22 = vld [vmem:[%s25214_s25 + $0x380] sm:$0xff] }
  0x70   : > { %21160 = vmatmul.mubr.msk.bf16.gmra.mrb[44].mxu1 %vm566_vm1, %v25422_v38  ;;  %22200 = vmatmul.mubr.msk.bf16.gmra.mrb[44].mxu0 %vm566_vm1, %v8614_v39  ;;  %v431_v39 = vld [vmem:[%s25214_s25 + $0x289] sm:$0xff] }
  0x71   : > { %21163 = vmatprep.mubr.msk.bf16.mxu1 %vm566_vm1, %v25424_v40  ;;  %22203 = vmatprep.mubr.msk.bf16.mxu0 %vm566_vm1, %v8615_v41  ;;  %v18573_v41 = vld [vmem:[%s25214_s25 + $0x2d0] sm:$0xff]  ;;  %v25496_v49 = vpack.c.bf16 %v431_v39, %v430_v37  ;;  %v18584_v37 = vld [vmem:[%s25214_s25 + $0x338] sm:$0xff] }
  0x72   : > { %v8623_v50 = vpack.c.bf16 %v18574_v42, %v18573_v41  ;;  %v442_v39 = vld [vmem:[%s25214_s25 + $0x2f9] sm:$0xff]  ;;  %v443_v41 = vld [vmem:[%s25214_s25 + $0x301] sm:$0xff]  ;;  %v8628_v51 = vpack.c.bf16 %v18584_v37, %v18583_v35 }
  0x73   : > { %v18585_v42 = vld [vmem:[%s25214_s25 + $0x348] sm:$0xff]  ;;  %v25564_v52 = vpack.c.bf16 %v443_v41, %v442_v39  ;;  %v18594_v35 = vld [vmem:[%s25214_s25 + $0x3a0] sm:$0xff] }
  0x78   : > { %21164 = vmatmul.mubr.msk.bf16.gmra.mrb[48].mxu1 %vm566_vm1, %v25440_v54  ;;  %22204 = vmatmul.mubr.msk.bf16.gmra.mrb[48].mxu0 %vm566_vm1, %v8616_v55  ;;  %v18576_v55 = vld [vmem:[%s25214_s25 + $0x2e8] sm:$0xff] }
  0x79   : > { %21167 = vmatprep.mubr.msk.bf16.mxu1 %vm566_vm1, %v25442_v56  ;;  %22207 = vmatprep.mubr.msk.bf16.mxu0 %vm566_vm1, %v8617_v59  ;;  %v25510_v59 = vld [vmem:[%s28231_s1 + $0x10] sm:$0x3f]   ;;  %v8624_v4 = vpack.c.bf16 %v18576_v55, %v18575_v53 }
  0x7a   : > { %25115 = vmatprep.subr.msk.bf16.mxu1 %vm759_vm0, %v25510_v59  ;;  %v444_v55 = vld [vmem:[%s25214_s25 + $0x309] sm:$0xff] }
  0x80   : > { %21168 = vmatmul.mubr.msk.bf16.gmra.mrb[52].mxu1 %vm566_vm1, %v25458_v7  ;;  %22208 = vmatmul.mubr.msk.bf16.gmra.mrb[52].mxu0 %vm566_vm1, %v8618_v10  ;;  %v8625_v10 = vpack.c.bf16 %v18578_v2, %v18577_v1  ;;  %v18588_v1 = vld [vmem:[%s25214_s25 + $0x360] sm:$0xff] }
  0x81   : > { %21171 = vmatprep.mubr.msk.bf16.mxu1 %vm566_vm1, %v25460_v12  ;;  %22211 = vmatprep.mubr.msk.bf16.mxu0 %vm566_vm1, %v8619_v13  ;;  %v436_v13 = vld [vmem:[%s25214_s25 + $0x2b9] sm:$0xff]  ;;  %v446_v2 = vld [vmem:[%s25214_s25 + $0x321] sm:$0xff] }
  0x82   : > { %v25544_v24 = vpack.c.bf16 %v437_v14, %v436_v13  ;;  %v18590_v13 = vld [vmem:[%s25214_s25 + $0x378] sm:$0xff]  ;;  %v25580_v14 = vpack.c.bf16 %v445_v62, %v444_v55  ;;  %v18596_v55 = vld [vmem:[%s25214_s25 + $0x3b0] sm:$0xff] }
  0x83   : > { %v454_v62 = vld [vmem:[%s25214_s25 + $0x371] sm:$0xff] }
  0x88   : > { %21172 = vmatmul.mubr.msk.bf16.gmra.mrb[56].mxu1 %vm566_vm1, %v25476_v26  ;;  %22212 = vmatmul.mubr.msk.bf16.gmra.mrb[56].mxu0 %vm566_vm1, %v8620_v27  ;;  %v8626_v27 = vpack.c.bf16 %v18580_v16, %v18579_v15  ;;  %v8630_v15 = vpack.c.bf16 %v18588_v1, %v18587_v63  ;;  %v455_v63 = vld [vmem:[%s25214_s25 + $0x379] sm:$0xff] }
  0x89   : > { %21175 = vmatprep.mubr.msk.bf16.mxu1 %vm566_vm1, %v25478_v28  ;;  %22215 = vmatprep.mubr.msk.bf16.mxu0 %vm566_vm1, %v8621_v29  ;;  %v25546_v29 = vpack.c.bf16 %v439_v19, %v438_v17  ;;  %v448_v19 = vld [vmem:[%s25214_s25 + $0x331] sm:$0xff]  ;;  %v18597_v1 = vld [vmem:[%s25214_s25 + $0x3c0] sm:$0xff] }
  0x8a   : > { %v25598_v37 = vpack.c.bf16 %v449_v21, %v448_v19  ;;  %v457_v19 = vld [vmem:[%s25214_s25 + $0x389] sm:$0xff] }
  0x8b   : > { %v18599_v21 = vld [vmem:[%s25214_s25 + $0x3d0] sm:$0xff] }
  0x90   : > { %21176 = vmatmul.mubr.msk.bf16.gmra.mrb[60].mxu1 %vm566_vm1, %v25494_v44  ;;  %22216 = vmatmul.mubr.msk.bf16.gmra.mrb[60].mxu0 %vm566_vm1, %v8622_v47  ;;  %v18586_v47 = vld [vmem:[%s25214_s25 + $0x350] sm:$0xff] }
  0x91   : > { %21179 = vmatprep.mubr.msk.bf16.mxu1 %vm566_vm1, %v25496_v49  ;;  %22219 = vmatprep.mubr.msk.bf16.mxu0 %vm566_vm1, %v8623_v50  ;;  %v25562_v50 = vpack.c.bf16 %v441_v34, %v440_v33  ;;  %v8629_v53 = vpack.c.bf16 %v18586_v47, %v18585_v42  ;;  %v451_v33 = vld [vmem:[%s25214_s25 + $0x351] sm:$0xff]  ;;  %v452_v47 = vld [vmem:[%s25214_s25 + $0x359] sm:$0xff] }
  0x92   : > { %v18593_v34 = vld [vmem:[%s25214_s25 + $0x398] sm:$0xff] }
  0x93   : > { %v8633_v42 = vpack.c.bf16 %v18594_v35, %v18593_v34  ;;  %v18602_v34 = vld [vmem:[%s25214_s25 + $0x3f0] sm:$0xff] }
  0x98   : > { %21180 = vmatmul.mubr.msk.bf16.gmra.mrb[64].mxu1 %vm566_vm1, %v25524_v3  ;;  %22220 = vmatmul.mubr.msk.bf16.gmra.mrb[64].mxu0 %vm566_vm1, %v8624_v4  ;;  %v447_v4 = vld [vmem:[%s25214_s25 + $0x329] sm:$0xff] }
  0x99   : > { %21183 = vmatprep.mubr.msk.bf16.mxu1 %vm566_vm1, %v25528_v5  ;;  %22223 = vmatprep.mubr.msk.bf16.mxu0 %vm566_vm1, %v8625_v10  ;;  %v18589_v10 = vld [vmem:[%s25214_s25 + $0x370] sm:$0xff]  ;;  %v25582_v16 = vpack.c.bf16 %v447_v4, %v446_v2  ;;  %v18598_v2 = vld [vmem:[%s25214_s25 + $0x3c8] sm:$0xff] }
  0x9a   : > { %v8631_v17 = vpack.c.bf16 %v18590_v13, %v18589_v10  ;;  %v25618_v13 = vpack.c.bf16 %v455_v63, %v454_v62  ;;  %v18604_v62 = vld [vmem:[%s25214_s25 + $0x400] sm:$0xff] }
  0x9b   : > { %v462_v63 = vld [vmem:[%s25214_s25 + $0x3c1] sm:$0xff] }
  0xa0   : > { %21184 = vmatmul.mubr.msk.bf16.gmra.mrb[68].mxu1 %vm566_vm1, %v25544_v24  ;;  %22224 = vmatmul.mubr.msk.bf16.gmra.mrb[68].mxu0 %vm566_vm1, %v8626_v27  ;;  %v18592_v27 = vld [vmem:[%s25214_s25 + $0x388] sm:$0xff] }
  0xa1   : > { %21187 = vmatprep.mubr.msk.bf16.mxu1 %vm566_vm1, %v25546_v29  ;;  %22227 = vmatprep.mubr.msk.bf16.mxu0 %vm566_vm1, %v8627_v31  ;;  %v450_v31 = vld [vmem:[%s25214_s25 + $0x349] sm:$0xff]  ;;  %v8632_v39 = vpack.c.bf16 %v18592_v27, %v18591_v22  ;;  %v18600_v22 = vld [vmem:[%s25214_s25 + $0x3d8] sm:$0xff] }
  0xa2   : > { %v25600_v41 = vpack.c.bf16 %v451_v33, %v450_v31  ;;  %v458_v27 = vld [vmem:[%s25214_s25 + $0x399] sm:$0xff]  ;;  %v459_v31 = vld [vmem:[%s25214_s25 + $0x3a1] sm:$0xff] }
  0xa3   : > { %v18601_v33 = vld [vmem:[%s25214_s25 + $0x3e8] sm:$0xff] }
  0xa8   : > { %21188 = vmatmul.mubr.msk.bf16.gmra.mrb[72].mxu1 %vm566_vm1, %v25562_v50  ;;  %22228 = vmatmul.mubr.msk.bf16.gmra.mrb[72].mxu0 %vm566_vm1, %v8628_v51  ;;  %v453_v51 = vld [vmem:[%s25214_s25 + $0x361] sm:$0xff] }
  0xa9   : > { %21191 = vmatprep.mubr.msk.bf16.mxu1 %vm566_vm1, %v25564_v52  ;;  %22231 = vmatprep.mubr.msk.bf16.mxu0 %vm566_vm1, %v8629_v53  ;;  %v18595_v53 = vld [vmem:[%s25214_s25 + $0x3a8] sm:$0xff]  ;;  %v25616_v4 = vpack.c.bf16 %v453_v51, %v452_v47  ;;  %v8637_v47 = vpack.c.bf16 %v18602_v34, %v18601_v33 }
  0xaa   : > { %v8634_v10 = vpack.c.bf16 %v18596_v55, %v18595_v53  ;;  %v460_v51 = vld [vmem:[%s25214_s25 + $0x3a9] sm:$0xff]  ;;  %v461_v53 = vld [vmem:[%s25214_s25 + $0x3b1] sm:$0xff] }
  0xab   : > { %v18603_v55 = vld [vmem:[%s25214_s25 + $0x3f8] sm:$0xff]  ;;  %v18608_v33 = vld [vmem:[%s25214_s25 + $0x428] sm:$0xff] }
  0xac   : > { %v466_v34 = vld [vmem:[%s25214_s25 + $0x3e9] sm:$0xff] }
  0xb0   : > { %21192 = vmatmul.mubr.msk.bf16.gmra.mrb[76].mxu1 %vm566_vm1, %v25580_v14  ;;  %22232 = vmatmul.mubr.msk.bf16.gmra.mrb[76].mxu0 %vm566_vm1, %v8630_v15  ;;  %v8635_v15 = vpack.c.bf16 %v18598_v2, %v18597_v1  ;;  %v463_v1 = vld [vmem:[%s25214_s25 + $0x3c9] sm:$0xff] }
  0xb1   : > { %21195 = vmatprep.mubr.msk.bf16.mxu1 %vm566_vm1, %v25582_v16  ;;  %22235 = vmatprep.mubr.msk.bf16.mxu0 %vm566_vm1, %v8631_v17  ;;  %v456_v17 = vld [vmem:[%s25214_s25 + $0x381] sm:$0xff]  ;;  %v18605_v2 = vld [vmem:[%s25214_s25 + $0x410] sm:$0xff] }
  0xb2   : > { %v25634_v35 = vpack.c.bf16 %v457_v19, %v456_v17  ;;  %v8638_v17 = vpack.c.bf16 %v18604_v62, %v18603_v55  ;;  %v25654_v19 = vpack.c.bf16 %v463_v1, %v462_v63  ;;  %v468_v1 = vld [vmem:[%s25214_s25 + $0x3f9] sm:$0xff] }
  0xb8   : > { %21196 = vmatmul.mubr.msk.bf16.gmra.mrb[80].mxu1 %vm566_vm1, %v25598_v37  ;;  %22236 = vmatmul.mubr.msk.bf16.gmra.mrb[80].mxu0 %vm566_vm1, %v8632_v39  ;;  %v8636_v39 = vpack.c.bf16 %v18600_v22, %v18599_v21  ;;  %v464_v22 = vld [vmem:[%s25214_s25 + $0x3d1] sm:$0xff] }
  0xb9   : > { %21199 = vmatprep.mubr.msk.bf16.mxu1 %vm566_vm1, %v25600_v41  ;;  %22239 = vmatprep.mubr.msk.bf16.mxu0 %vm566_vm1, %v8633_v42  ;;  %v25636_v42 = vpack.c.bf16 %v459_v31, %v458_v27  ;;  %v465_v27 = vld [vmem:[%s25214_s25 + $0x3d9] sm:$0xff] }
  0xba   : > { %v18607_v31 = vld [vmem:[%s25214_s25 + $0x420] sm:$0xff] }
  0xbb   : > { %v8640_v55 = vpack.c.bf16 %v18608_v33, %v18607_v31  ;;  %v18614_v31 = vld [vmem:[%s25214_s25 + $0x468] sm:$0xff] }
  0xc0   : > { %21200 = vmatmul.mubr.msk.bf16.gmra.mrb[84].mxu1 %vm566_vm1, %v25616_v4  ;;  %22240 = vmatmul.mubr.msk.bf16.gmra.mrb[84].mxu0 %vm566_vm1, %v8634_v10  ;;  %v18606_v10 = vld [vmem:[%s25214_s25 + $0x418] sm:$0xff] }
  0xc1   : > { %21203 = vmatprep.mubr.msk.bf16.mxu1 %vm566_vm1, %v25618_v13  ;;  %22243 = vmatprep.mubr.msk.bf16.mxu0 %vm566_vm1, %v8635_v15  ;;  %v25652_v15 = vpack.c.bf16 %v461_v53, %v460_v51  ;;  %v8639_v21 = vpack.c.bf16 %v18606_v10, %v18605_v2  ;;  %v18610_v51 = vld [vmem:[%s25214_s25 + $0x440] sm:$0xff]  ;;  %v25670_v53 = vpack.c.bf16 %v465_v27, %v464_v22  ;;  %v18611_v10 = vld [vmem:[%s25214_s25 + $0x448] sm:$0xff] }
  0xc2   : > { %v469_v2 = vld [vmem:[%s25214_s25 + $0x401] sm:$0xff]  ;;  %v471_v22 = vld [vmem:[%s25214_s25 + $0x419] sm:$0xff] }
  0xc3   : > { %v18613_v27 = vld [vmem:[%s25214_s25 + $0x460] sm:$0xff]  ;;  %v25688_v33 = vpack.c.bf16 %v469_v2, %v468_v1  ;;  %v18616_v1 = vld [vmem:[%s25214_s25 + $0x478] sm:$0xff] }
  0xc4   : > { %v474_v2 = vld [vmem:[%s25214_s25 + $0x439] sm:$0xff] }
  0xc5   : > { %28243 = vst [vmem:[#allocation2_spill] sm:$0xff] %v25688_v33 }
  0xc8   : > { %21204 = vmatmul.mubr.msk.bf16.gmra.mrb[88].mxu1 %vm566_vm1, %v25634_v35  ;;  %22244 = vmatmul.mubr.msk.bf16.gmra.mrb[88].mxu0 %vm566_vm1, %v8636_v39  ;;  %v467_v39 = vld [vmem:[%s25214_s25 + $0x3f1] sm:$0xff] }
  0xc9   : > { %21207 = vmatprep.mubr.msk.bf16.mxu1 %vm566_vm1, %v25636_v42  ;;  %22247 = vmatprep.mubr.msk.bf16.mxu0 %vm566_vm1, %v8637_v47  ;;  %v18609_v47 = vld [vmem:[%s25214_s25 + $0x438] sm:$0xff]  ;;  %v25672_v62 = vpack.c.bf16 %v467_v39, %v466_v34 }
  0xca   : > { %v8641_v63 = vpack.c.bf16 %v18610_v51, %v18609_v47  ;;  %v8643_v47 = vpack.c.bf16 %v18614_v31, %v18613_v27  ;;  %v472_v51 = vld [vmem:[%s25214_s25 + $0x421] sm:$0xff] }
  0xd0   : > { %21208 = vmatmul.mubr.msk.bf16.gmra.mrb[92].mxu1 %vm566_vm1, %v25652_v15  ;;  %22248 = vmatmul.mubr.msk.bf16.gmra.mrb[92].mxu0 %vm566_vm1, %v8638_v17  ;;  %v18612_v17 = vld [vmem:[%s25214_s25 + $0x450] sm:$0xff] }
  0xd1   : > { %21211 = vmatprep.mubr.msk.bf16.mxu1 %vm566_vm1, %v25654_v19  ;;  %22251 = vmatprep.mubr.msk.bf16.mxu0 %vm566_vm1, %v8639_v21  ;;  %v470_v21 = vld [vmem:[%s25214_s25 + $0x411] sm:$0xff]  ;;  %v8642_v34 = vpack.c.bf16 %v18612_v17, %v18611_v10  ;;  %v475_v10 = vld [vmem:[%s25214_s25 + $0x441] sm:$0xff] }
  0xd2   : > { %v25690_v39 = vpack.c.bf16 %v471_v22, %v470_v21  ;;  %v18617_v17 = vld [vmem:[%s25214_s25 + $0x488] sm:$0xff]  ;;  %v18618_v21 = vld [vmem:[%s25214_s25 + $0x490] sm:$0xff]  ;;  %v25708_v31 = vpack.c.bf16 %v475_v10, %v474_v2  ;;  %v18622_v2 = vld [vmem:[%s25214_s25 + $0x4b8] sm:$0xff] }
  0xd4   : > { %28244 = vst [vmem:[#allocation3_spill] sm:$0xff] %v25690_v39  ;;  %28246 = vst [vmem:[#allocation5_spill] sm:$0xff] %v25708_v31 }
  0xd8   : > { %21212 = vmatmul.mubr.msk.bf16.gmra.mrb[96].mxu1 %vm566_vm1, %v25670_v53  ;;  %22252 = vmatmul.mubr.msk.bf16.gmra.mrb[96].mxu0 %vm566_vm1, %v8640_v55  ;;  %v473_v55 = vld [vmem:[%s25214_s25 + $0x429] sm:$0xff] }
  0xd9   : > { %21215 = vmatprep.mubr.msk.bf16.mxu1 %vm566_vm1, %v25672_v62  ;;  %22255 = vmatprep.mubr.msk.bf16.mxu0 %vm566_vm1, %v8641_v63  ;;  %v18615_v63 = vld [vmem:[%s25214_s25 + $0x470] sm:$0xff]  ;;  %v25706_v22 = vpack.c.bf16 %v473_v55, %v472_v51  ;;  %v18620_v51 = vld [vmem:[%s25214_s25 + $0x4a0] sm:$0xff] }
  0xda   : > { %v8644_v27 = vpack.c.bf16 %v18616_v1, %v18615_v63  ;;  %v478_v55 = vld [vmem:[%s25214_s25 + $0x461] sm:$0xff]  ;;  %v479_v63 = vld [vmem:[%s25214_s25 + $0x469] sm:$0xff] }
  0xdb   : > { %28245 = vst [vmem:[#allocation4_spill] sm:$0xff] %v25706_v22  ;;  %v18621_v1 = vld [vmem:[%s25214_s25 + $0x4b0] sm:$0xff] }
  0xe0   : > { %21216 = vmatmul.mubr.msk.bf16.gmra.mrb[100].mxu1 %vm566_vm1, %v25688_v33  ;;  %22256 = vmatmul.mubr.msk.bf16.gmra.mrb[100].mxu0 %vm566_vm1, %v8642_v34  ;;  %v8645_v34 = vpack.c.bf16 %v18618_v21, %v18617_v17  ;;  %v18619_v33 = vld [vmem:[%s25214_s25 + $0x498] sm:$0xff]  ;;  %v25726_v21 = vpack.c.bf16 %v479_v63, %v478_v55  ;;  %v18626_v55 = vld [vmem:[%s25214_s25 + $0x4e0] sm:$0xff] }
  0xe1   : > { %21219 = vmatprep.mubr.msk.bf16.mxu1 %vm566_vm1, %v25690_v39  ;;  %22259 = vmatprep.mubr.msk.bf16.mxu0 %vm566_vm1, %v8643_v47  ;;  %v476_v47 = vld [vmem:[%s25214_s25 + $0x449] sm:$0xff]  ;;  %v477_v39 = vld [vmem:[%s25214_s25 + $0x451] sm:$0xff]  ;;  %v8646_v17 = vpack.c.bf16 %v18620_v51, %v18619_v33 }
  0xe2   : > { %v25724_v10 = vpack.c.bf16 %v477_v39, %v476_v47  ;;  %28248 = vst [vmem:[#allocation7_spill] sm:$0xff] %v25726_v21  ;;  %v18624_v33 = vld [vmem:[%s25214_s25 + $0x4c8] sm:$0xff]  ;;  %v483_v47 = vld [vmem:[%s25214_s25 + $0x491] sm:$0xff] }
  0xe3   : > { %v482_v39 = vld [vmem:[%s25214_s25 + $0x489] sm:$0xff]  ;;  %v18625_v51 = vld [vmem:[%s25214_s25 + $0x4d8] sm:$0xff] }
  0xe4   : > { %28247 = vst [vmem:[#allocation6_spill] sm:$0xff] %v25724_v10 }
  0xe8   : > { %21220 = vmatmul.mubr.msk.bf16.gmra.mrb[104].mxu1 %vm566_vm1, %v25706_v22  ;;  %22260 = vmatmul.mubr.msk.bf16.gmra.mrb[104].mxu0 %vm566_vm1, %v8644_v27  ;;  %v8647_v27 = vpack.c.bf16 %v18622_v2, %v18621_v1  ;;  %v18623_v22 = vld [vmem:[%s25214_s25 + $0x4c0] sm:$0xff]  ;;  %v25744_v2 = vpack.c.bf16 %v483_v47, %v482_v39  ;;  %v18630_v39 = vld [vmem:[%s25214_s25 + $0x508] sm:$0xff] }
  0xe9   : > { %21223 = vmatprep.mubr.msk.bf16.mxu1 %vm566_vm1, %v25708_v31  ;;  %22263 = vmatprep.mubr.msk.bf16.mxu0 %vm566_vm1, %v8645_v34  ;;  %v480_v34 = vld [vmem:[%s25214_s25 + $0x471] sm:$0xff]  ;;  %v481_v31 = vld [vmem:[%s25214_s25 + $0x479] sm:$0xff]  ;;  %v8648_v1 = vpack.c.bf16 %v18624_v33, %v18623_v22 }
  0xea   : > { %v25742_v63 = vpack.c.bf16 %v481_v31, %v480_v34  ;;  %28250 = vst [vmem:[#allocation9_spill] sm:$0xff] %v25744_v2  ;;  %v18628_v22 = vld [vmem:[%s25214_s25 + $0x4f0] sm:$0xff]  ;;  %v487_v34 = vld [vmem:[%s25214_s25 + $0x4b9] sm:$0xff] }
  0xeb   : > { %v486_v31 = vld [vmem:[%s25214_s25 + $0x4b1] sm:$0xff]  ;;  %v18629_v33 = vld [vmem:[%s25214_s25 + $0x500] sm:$0xff] }
  0xec   : > { %28249 = vst [vmem:[#allocation8_spill] sm:$0xff] %v25742_v63 }
  0xf0   : > { %21224 = vmatmul.mubr.msk.bf16.gmra.mrb[108].mxu1 %vm566_vm1, %v25724_v10  ;;  %22264 = vmatmul.mubr.msk.bf16.gmra.mrb[108].mxu0 %vm566_vm1, %v8646_v17  ;;  %v8649_v17 = vpack.c.bf16 %v18626_v55, %v18625_v51  ;;  %v18627_v10 = vld [vmem:[%s25214_s25 + $0x4e8] sm:$0xff]  ;;  %v25762_v55 = vpack.c.bf16 %v487_v34, %v486_v31  ;;  %v18634_v31 = vld [vmem:[%s25214_s25 + $0x530] sm:$0xff] }
  0xf1   : > { %21227 = vmatprep.mubr.msk.bf16.mxu1 %vm566_vm1, %v25726_v21  ;;  %22267 = vmatprep.mubr.msk.bf16.mxu0 %vm566_vm1, %v8647_v27  ;;  %v484_v27 = vld [vmem:[%s25214_s25 + $0x499] sm:$0xff]  ;;  %v485_v21 = vld [vmem:[%s25214_s25 + $0x4a1] sm:$0xff]  ;;  %v8650_v51 = vpack.c.bf16 %v18628_v22, %v18627_v10 }
  0xf2   : > { %v25760_v47 = vpack.c.bf16 %v485_v21, %v484_v27  ;;  %28251 = vst [vmem:[#allocation10_spill] sm:$0xff] %v25762_v55  ;;  %v18632_v10 = vld [vmem:[%s25214_s25 + $0x518] sm:$0xff]  ;;  %v491_v27 = vld [vmem:[%s25214_s25 + $0x4e1] sm:$0xff] }
  0xf3   : > { %v490_v21 = vld [vmem:[%s25214_s25 + $0x4d9] sm:$0xff]  ;;  %v18633_v22 = vld [vmem:[%s25214_s25 + $0x528] sm:$0xff] }
  0xf8   : > { %21228 = vmatmul.mubr.msk.bf16.gmra.mrb[112].mxu1 %vm566_vm1, %v25742_v63  ;;  %22268 = vmatmul.mubr.msk.bf16.gmra.mrb[112].mxu0 %vm566_vm1, %v8648_v1  ;;  %v8651_v1 = vpack.c.bf16 %v18630_v39, %v18629_v33  ;;  %v18631_v63 = vld [vmem:[%s25214_s25 + $0x510] sm:$0xff]  ;;  %v25780_v39 = vpack.c.bf16 %v491_v27, %v490_v21 }
  0xf9   : > { %21231 = vmatprep.mubr.msk.bf16.mxu1 %vm566_vm1, %v25744_v2  ;;  %22271 = vmatprep.mubr.msk.bf16.mxu0 %vm566_vm1, %v8649_v17  ;;  %v488_v17 = vld [vmem:[%s25214_s25 + $0x4c1] sm:$0xff]  ;;  %v489_v2 = vld [vmem:[%s25214_s25 + $0x4c9] sm:$0xff]  ;;  %v8652_v33 = vpack.c.bf16 %v18632_v10, %v18631_v63 }
  0xfa   : > { %v25778_v34 = vpack.c.bf16 %v489_v2, %v488_v17  ;;  %v18635_v2 = vld [vmem:[%s25214_s25 + $0x538] sm:$0xff]  ;;  %v18636_v63 = vld [vmem:[%s25214_s25 + $0x540] sm:$0xff]  ;;  %v173_v10 = vld [vmem:[%s25214_s25 + $0x8] sm:$0xff] }
  0xfb   : > { %v172_v17 = vld [vmem:[%s25214_s25] sm:$0xff]  ;;  %v8654_v27 = vpack.c.bf16 %v18636_v63, %v18635_v2  ;;  %v2446_v2 = vsel %vm759_vm0, %v25510_v59, 0  ;;  %v180_v59 = vld [vmem:[%s25214_s25 + $0x50] sm:$0xff] }
 0x100   : > { %21232 = vmatmul.mubr.msk.bf16.gmra.mrb[116].mxu1 %vm566_vm1, %v25760_v47  ;;  %22272 = vmatmul.mubr.msk.bf16.gmra.mrb[116].mxu0 %vm566_vm1, %v8650_v51  ;;  %v8653_v51 = vpack.c.bf16 %v18634_v31, %v18633_v22  ;;  %v300_v22 = vpack.c.bf16 %v173_v10, %v172_v17  ;;  %v174_v31 = vld [vmem:[%s25214_s25 + $0x10] sm:$0xff]  ;;  %v10992_v17 = vsel %vm759_vm0, %v25518_v0, 0  ;;  %v179_v10 = vld [vmem:[%s25214_s25 + $0x40] sm:$0xff] }
 0x101   : > { %21235 = vmatprep.mubr.msk.bf16.mxu1 %vm566_vm1, %v25762_v55  ;;  %22275 = vmatprep.mubr.msk.bf16.mxu0 %vm566_vm1, %v8651_v1  ;;  %v492_v1 = vld [vmem:[%s25214_s25 + $0x4e9] sm:$0xff]  ;;  %v493_v55 = vld [vmem:[%s25214_s25 + $0x4f1] sm:$0xff] }
 0x102   : > { %v25794_v21 = vpack.c.bf16 %v493_v55, %v492_v1  ;;  %v176_v55 = vld [vmem:[%s25214_s25 + $0x28] sm:$0xff] }
 0x108   : > { %21236 = vmatmul.mubr.msk.bf16.gmra.mrb[120].mxu1 %vm566_vm1, %v25778_v34  ;;  %22276 = vmatmul.mubr.msk.bf16.gmra.mrb[120].mxu0 %vm566_vm1, %v8652_v33  ;;  %v175_v33 = vld [vmem:[%s25214_s25 + $0x18] sm:$0xff] }
 0x109   : > { %21239 = vmatprep.mubr.msk.bf16.mxu1 %vm566_vm1, %v25780_v39  ;;  %22279 = vmatprep.mubr.msk.bf16.mxu0 %vm566_vm1, %v8653_v51  ;;  %v177_v51 = vld [vmem:[%s25214_s25 + $0x30] sm:$0xff]  ;;  %v301_v1 = vpack.c.bf16 %v175_v33, %v174_v31  ;;  %v183_v31 = vld [vmem:[%s25214_s25 + $0x68] sm:$0xff]  ;;  %v184_v33 = vld [vmem:[%s25214_s25 + $0x78] sm:$0xff] }
 0x10a   : > { %v302_v63 = vpack.c.bf16 %v177_v51, %v176_v55 }
 0x110   : > { %21240 = vmatmul.mubr.msk.bf16.gmra.mrb[124].mxu1 %vm566_vm1, %v25794_v21  ;;  %22280 = vmatmul.mubr.msk.bf16.gmra.mrb[124].mxu0 %vm566_vm1, %v8654_v27  ;;  %v181_v27 = vld [vmem:[%s25214_s25 + $0x58] sm:$0xff] }
 0x111   : > { %21245 = vmatprep.mubr.msk.bf16.mxu1 %vm566_vm1, %v300_v22  ;;  %22285 = vmatprep.mubr.msk.bf16.mxu0 %vm566_vm1, %v25245_v36  ;;  %v178_v36 = vld [vmem:[%s25214_s25 + $0x38] sm:$0xff]  ;;  %v304_v22 = vpack.c.bf16 %v181_v27, %v180_v59 }
 0x112   : > { %v303_v0 = vpack.c.bf16 %v179_v10, %v178_v36  ;;  %v191_v36 = vld [vmem:[%s25214_s25 + $0xb8] sm:$0xff]  ;;  %v193_v10 = vld [vmem:[%s25214_s25 + $0xd0] sm:$0xff] }
 0x118   : > { %21246 = vmatmul.mubr.msk.bf16.vlgmr.msra.gmra.mrb[0].mxu1 %vm566_vm1, %v301_v1  ;;  %22286 = vmatmul.mubr.msk.bf16.vlgmr.msra.gmra.mrb[0].mxu0 %vm566_vm1, %v25260_v46  ;;  %v182_v46 = vld [vmem:[%s25214_s25 + $0x60] sm:$0xff]  ;;  %v187_v1 = vld [vmem:[%s25214_s25 + $0x90] sm:$0xff] }
 0x119   : > { %21374 = vmatpush3.bf16.msra.mxu1 %v2446_v2  ;;  %22414 = vmatpush3.bf16.msra.mxu0 %v10992_v17  ;;  %v305_v55 = vpack.c.bf16 %v183_v31, %v182_v46  ;;  %v189_v2 = vld [vmem:[%s25214_s25 + $0xa8] sm:$0xff] }
 0x11a   : > { %21249 = vmatprep.mubr.msk.bf16.mxu1 %vm566_vm1, %v302_v63  ;;  %22289 = vmatprep.mubr.msk.bf16.mxu0 %vm566_vm1, %v25262_v48  ;;  %v185_v48 = vld [vmem:[%s25214_s25 + $0x80] sm:$0xff] }
 0x11b   : > { %v306_v51 = vpack.c.bf16 %v185_v48, %v184_v33  ;;  %v199_v33 = vld [vmem:[%s25214_s25 + $0x108] sm:$0xff]  ;;  %v201_v48 = vld [vmem:[%s25214_s25 + $0x120] sm:$0xff] }
 0x120   : > { %21250 = vmatmul.mubr.msk.bf16.gmra.mrb[4].mxu1 %vm566_vm1, %v303_v0  ;;  %22290 = vmatmul.mubr.msk.bf16.gmra.mrb[4].mxu0 %vm566_vm1, %v25278_v58  ;;  %v186_v58 = vld [vmem:[%s25214_s25 + $0x88] sm:$0xff]  ;;  %v195_v0 = vld [vmem:[%s25214_s25 + $0xe0] sm:$0xff] }
 0x121   : > { %21253 = vmatprep.mubr.msk.bf16.mxu1 %vm566_vm1, %v304_v22  ;;  %22293 = vmatprep.mubr.msk.bf16.mxu0 %vm566_vm1, %v25280_v60  ;;  %v188_v60 = vld [vmem:[%s25214_s25 + $0xa0] sm:$0xff]  ;;  %v307_v63 = vpack.c.bf16 %v187_v1, %v186_v58  ;;  %v197_v22 = vld [vmem:[%s25214_s25 + $0xf8] sm:$0xff]  ;;  %v203_v58 = vld [vmem:[%s25214_s25 + $0x130] sm:$0xff] }
 0x122   : > { %v308_v17 = vpack.c.bf16 %v189_v2, %v188_v60  ;;  %v205_v1 = vld [vmem:[%s25214_s25 + $0x148] sm:$0xff] }
 0x128   : > { %21254 = vmatmul.mubr.msk.bf16.gmra.mrb[8].mxu1 %vm566_vm1, %v305_v55  ;;  %22294 = vmatmul.mubr.msk.bf16.gmra.mrb[8].mxu0 %vm566_vm1, %v25296_v6  ;;  %v190_v6 = vld [vmem:[%s25214_s25 + $0xb0] sm:$0xff] }
 0x129   : > { %21257 = vmatprep.mubr.msk.bf16.mxu1 %vm566_vm1, %v306_v51  ;;  %22297 = vmatprep.mubr.msk.bf16.mxu0 %vm566_vm1, %v25298_v8  ;;  %v192_v8 = vld [vmem:[%s25214_s25 + $0xc8] sm:$0xff]  ;;  %v309_v59 = vpack.c.bf16 %v191_v36, %v190_v6 }
 0x12a   : > { %v310_v27 = vpack.c.bf16 %v193_v10, %v192_v8  ;;  %v211_v8 = vld [vmem:[%s25214_s25 + $0x180] sm:$0xff]  ;;  %v213_v10 = vld [vmem:[%s25214_s25 + $0x198] sm:$0xff] }
 0x130   : > { %21258 = vmatmul.mubr.msk.bf16.gmra.mrb[12].mxu1 %vm566_vm1, %v307_v63  ;;  %22298 = vmatmul.mubr.msk.bf16.gmra.mrb[12].mxu0 %vm566_vm1, %v25314_v18  ;;  %v194_v18 = vld [vmem:[%s25214_s25 + $0xd8] sm:$0xff] }
 0x131   : > { %21261 = vmatprep.mubr.msk.bf16.mxu1 %vm566_vm1, %v308_v17  ;;  %22301 = vmatprep.mubr.msk.bf16.mxu0 %vm566_vm1, %v25316_v20  ;;  %v196_v20 = vld [vmem:[%s25214_s25 + $0xf0] sm:$0xff]  ;;  %v311_v46 = vpack.c.bf16 %v195_v0, %v194_v18  ;;  %v207_v63 = vld [vmem:[%s25214_s25 + $0x158] sm:$0xff]  ;;  %v215_v18 = vld [vmem:[%s25214_s25 + $0x1a8] sm:$0xff] }
 0x132   : > { %v312_v31 = vpack.c.bf16 %v197_v22, %v196_v20  ;;  %v209_v17 = vld [vmem:[%s25214_s25 + $0x170] sm:$0xff]  ;;  %v217_v0 = vld [vmem:[%s25214_s25 + $0x1c0] sm:$0xff] }
 0x138   : > { %21262 = vmatmul.mubr.msk.bf16.gmra.mrb[16].mxu1 %vm566_vm1, %v309_v59  ;;  %22302 = vmatmul.mubr.msk.bf16.gmra.mrb[16].mxu0 %vm566_vm1, %v25332_v30  ;;  %v198_v30 = vld [vmem:[%s25214_s25 + $0x100] sm:$0xff] }
 0x139   : > { %21265 = vmatprep.mubr.msk.bf16.mxu1 %vm566_vm1, %v310_v27  ;;  %22305 = vmatprep.mubr.msk.bf16.mxu0 %vm566_vm1, %v25334_v32  ;;  %v200_v32 = vld [vmem:[%s25214_s25 + $0x118] sm:$0xff]  ;;  %v313_v55 = vpack.c.bf16 %v199_v33, %v198_v30 }
 0x13a   : > { %v314_v51 = vpack.c.bf16 %v201_v48, %v200_v32  ;;  %v223_v32 = vld [vmem:[%s25214_s25 + $0x1f8] sm:$0xff]  ;;  %v225_v48 = vld [vmem:[%s25214_s25 + $0x210] sm:$0xff] }
 0x140   : > { %21266 = vmatmul.mubr.msk.bf16.gmra.mrb[20].mxu1 %vm566_vm1, %v311_v46  ;;  %22306 = vmatmul.mubr.msk.bf16.gmra.mrb[20].mxu0 %vm566_vm1, %v25350_v43  ;;  %v202_v43 = vld [vmem:[%s25214_s25 + $0x128] sm:$0xff]  ;;  %v219_v46 = vld [vmem:[%s25214_s25 + $0x1d0] sm:$0xff] }
 0x141   : > { %21269 = vmatprep.mubr.msk.bf16.mxu1 %vm566_vm1, %v312_v31  ;;  %22309 = vmatprep.mubr.msk.bf16.mxu0 %vm566_vm1, %v25352_v45  ;;  %v204_v45 = vld [vmem:[%s25214_s25 + $0x140] sm:$0xff]  ;;  %v315_v60 = vpack.c.bf16 %v203_v58, %v202_v43  ;;  %v221_v31 = vld [vmem:[%s25214_s25 + $0x1e8] sm:$0xff]  ;;  %v229_v58 = vld [vmem:[%s25214_s25 + $0x238] sm:$0xff] }
 0x142   : > { %v316_v2 = vpack.c.bf16 %v205_v1, %v204_v45  ;;  %v227_v43 = vld [vmem:[%s25214_s25 + $0x220] sm:$0xff] }
 0x148   : > { %21270 = vmatmul.mubr.msk.bf16.gmra.mrb[24].mxu1 %vm566_vm1, %v313_v55  ;;  %22310 = vmatmul.mubr.msk.bf16.gmra.mrb[24].mxu0 %vm566_vm1, %v25368_v57  ;;  %v206_v57 = vld [vmem:[%s25214_s25 + $0x150] sm:$0xff] }
 0x149   : > { %21273 = vmatprep.mubr.msk.bf16.mxu1 %vm566_vm1, %v314_v51  ;;  %22313 = vmatprep.mubr.msk.bf16.mxu0 %vm566_vm1, %v25370_v61  ;;  %v208_v61 = vld [vmem:[%s25214_s25 + $0x168] sm:$0xff]  ;;  %v317_v6 = vpack.c.bf16 %v207_v63, %v206_v57 }
 0x14a   : > { %v318_v36 = vpack.c.bf16 %v209_v17, %v208_v61  ;;  %v235_v61 = vld [vmem:[%s25214_s25 + $0x270] sm:$0xff]  ;;  %v237_v17 = vld [vmem:[%s25214_s25 + $0x288] sm:$0xff] }
 0x150   : > { %21274 = vmatmul.mubr.msk.bf16.gmra.mrb[28].mxu1 %vm566_vm1, %v315_v60  ;;  %22314 = vmatmul.mubr.msk.bf16.gmra.mrb[28].mxu0 %vm566_vm1, %v25386_v9  ;;  %v210_v9 = vld [vmem:[%s25214_s25 + $0x178] sm:$0xff]  ;;  %v231_v60 = vld [vmem:[%s25214_s25 + $0x248] sm:$0xff] }
 0x151   : > { %21277 = vmatprep.mubr.msk.bf16.mxu1 %vm566_vm1, %v316_v2  ;;  %22317 = vmatprep.mubr.msk.bf16.mxu0 %vm566_vm1, %v25388_v11  ;;  %v212_v11 = vld [vmem:[%s25214_s25 + $0x190] sm:$0xff]  ;;  %v319_v59 = vpack.c.bf16 %v211_v8, %v210_v9  ;;  %v233_v2 = vld [vmem:[%s25214_s25 + $0x260] sm:$0xff]  ;;  %v239_v9 = vld [vmem:[%s25214_s25 + $0x298] sm:$0xff] }
 0x152   : > { %v320_v27 = vpack.c.bf16 %v213_v10, %v212_v11  ;;  %v240_v8 = vld [vmem:[%s25214_s25 + $0x2a8] sm:$0xff]  ;;  %v241_v11 = vld [vmem:[%s25214_s25 + $0x2b0] sm:$0xff] }
 0x158   : > { %21278 = vmatmul.mubr.msk.bf16.gmra.mrb[32].mxu1 %vm566_vm1, %v317_v6  ;;  %22318 = vmatmul.mubr.msk.bf16.gmra.mrb[32].mxu0 %vm566_vm1, %v25404_v23  ;;  %v214_v23 = vld [vmem:[%s25214_s25 + $0x1a0] sm:$0xff] }
 0x159   : > { %21281 = vmatprep.mubr.msk.bf16.mxu1 %vm566_vm1, %v318_v36  ;;  %22321 = vmatprep.mubr.msk.bf16.mxu0 %vm566_vm1, %v25406_v25  ;;  %v216_v25 = vld [vmem:[%s25214_s25 + $0x1b8] sm:$0xff]  ;;  %v321_v20 = vpack.c.bf16 %v215_v18, %v214_v23  ;;  %v244_v23 = vld [vmem:[%s25214_s25 + $0x2d0] sm:$0xff] }
 0x15a   : > { %v322_v22 = vpack.c.bf16 %v217_v0, %v216_v25  ;;  %v245_v18 = vld [vmem:[%s25214_s25 + $0x2d8] sm:$0xff] }
 0x15b   : > { %v336_v0 = vpack.c.bf16 %v245_v18, %v244_v23  ;;  %v279_v23 = vld [vmem:[%s25214_s25 + $0x428] sm:$0xff] }
 0x15c   : > { %v28257_v18 = vld [vmem:[#allocation7_spill] sm:$0xff] }
 0x160   : > { %21282 = vmatmul.mubr.msk.bf16.gmra.mrb[36].mxu1 %vm566_vm1, %v319_v59  ;;  %22322 = vmatmul.mubr.msk.bf16.gmra.mrb[36].mxu0 %vm566_vm1, %v25422_v38  ;;  %v218_v38 = vld [vmem:[%s25214_s25 + $0x1c8] sm:$0xff]  ;;  %v334_v59 = vpack.c.bf16 %v241_v11, %v240_v8  ;;  %v276_v8 = vld [vmem:[%s25214_s25 + $0x410] sm:$0xff]  ;;  %v277_v11 = vld [vmem:[%s25214_s25 + $0x418] sm:$0xff] }
 0x161   : > { %21285 = vmatprep.mubr.msk.bf16.mxu1 %vm566_vm1, %v320_v27  ;;  %22325 = vmatprep.mubr.msk.bf16.mxu0 %vm566_vm1, %v25424_v40  ;;  %v220_v40 = vld [vmem:[%s25214_s25 + $0x1e0] sm:$0xff]  ;;  %v323_v30 = vpack.c.bf16 %v219_v46, %v218_v38 }
 0x162   : > { %v324_v33 = vpack.c.bf16 %v221_v31, %v220_v40  ;;  %v243_v27 = vld [vmem:[%s25214_s25 + $0x2c0] sm:$0xff]  ;;  %v251_v40 = vld [vmem:[%s25214_s25 + $0x310] sm:$0xff]  ;;  %v253_v31 = vld [vmem:[%s25214_s25 + $0x328] sm:$0xff] }
 0x168   : > { %21286 = vmatmul.mubr.msk.bf16.gmra.mrb[40].mxu1 %vm566_vm1, %v321_v20  ;;  %22326 = vmatmul.mubr.msk.bf16.gmra.mrb[40].mxu0 %vm566_vm1, %v25440_v54  ;;  %v222_v54 = vld [vmem:[%s25214_s25 + $0x1f0] sm:$0xff]  ;;  %v247_v20 = vld [vmem:[%s25214_s25 + $0x2e8] sm:$0xff] }
 0x169   : > { %21289 = vmatprep.mubr.msk.bf16.mxu1 %vm566_vm1, %v322_v22  ;;  %22329 = vmatprep.mubr.msk.bf16.mxu0 %vm566_vm1, %v25442_v56  ;;  %v224_v56 = vld [vmem:[%s25214_s25 + $0x208] sm:$0xff]  ;;  %v325_v55 = vpack.c.bf16 %v223_v32, %v222_v54  ;;  %v249_v22 = vld [vmem:[%s25214_s25 + $0x300] sm:$0xff]  ;;  %v255_v54 = vld [vmem:[%s25214_s25 + $0x338] sm:$0xff] }
 0x16a   : > { %v326_v51 = vpack.c.bf16 %v225_v48, %v224_v56  ;;  %v257_v32 = vld [vmem:[%s25214_s25 + $0x350] sm:$0xff] }
 0x170   : > { %21290 = vmatmul.mubr.msk.bf16.gmra.mrb[44].mxu1 %vm566_vm1, %v323_v30  ;;  %22330 = vmatmul.mubr.msk.bf16.gmra.mrb[44].mxu0 %vm566_vm1, %v25458_v7  ;;  %v226_v7 = vld [vmem:[%s25214_s25 + $0x218] sm:$0xff] }
 0x171   : > { %21293 = vmatprep.mubr.msk.bf16.mxu1 %vm566_vm1, %v324_v33  ;;  %22333 = vmatprep.mubr.msk.bf16.mxu0 %vm566_vm1, %v25460_v12  ;;  %v228_v12 = vld [vmem:[%s25214_s25 + $0x230] sm:$0xff]  ;;  %v327_v45 = vpack.c.bf16 %v227_v43, %v226_v7 }
 0x172   : > { %v328_v1 = vpack.c.bf16 %v229_v58, %v228_v12  ;;  %v263_v12 = vld [vmem:[%s25214_s25 + $0x388] sm:$0xff]  ;;  %v265_v58 = vld [vmem:[%s25214_s25 + $0x3a0] sm:$0xff] }
 0x178   : > { %21294 = vmatmul.mubr.msk.bf16.gmra.mrb[48].mxu1 %vm566_vm1, %v325_v55  ;;  %22334 = vmatmul.mubr.msk.bf16.gmra.mrb[48].mxu0 %vm566_vm1, %v25476_v26  ;;  %v230_v26 = vld [vmem:[%s25214_s25 + $0x240] sm:$0xff] }
 0x179   : > { %21297 = vmatprep.mubr.msk.bf16.mxu1 %vm566_vm1, %v326_v51  ;;  %22337 = vmatprep.mubr.msk.bf16.mxu0 %vm566_vm1, %v25478_v28  ;;  %v232_v28 = vld [vmem:[%s25214_s25 + $0x258] sm:$0xff]  ;;  %v329_v57 = vpack.c.bf16 %v231_v60, %v230_v26  ;;  %v259_v55 = vld [vmem:[%s25214_s25 + $0x360] sm:$0xff]  ;;  %v267_v26 = vld [vmem:[%s25214_s25 + $0x3b0] sm:$0xff] }
 0x17a   : > { %v330_v63 = vpack.c.bf16 %v233_v2, %v232_v28  ;;  %v261_v51 = vld [vmem:[%s25214_s25 + $0x378] sm:$0xff]  ;;  %v269_v60 = vld [vmem:[%s25214_s25 + $0x3c8] sm:$0xff] }
 0x180   : > { %21298 = vmatmul.mubr.msk.bf16.gmra.mrb[52].mxu1 %vm566_vm1, %v327_v45  ;;  %22338 = vmatmul.mubr.msk.bf16.gmra.mrb[52].mxu0 %vm566_vm1, %v25494_v44  ;;  %v234_v44 = vld [vmem:[%s25214_s25 + $0x268] sm:$0xff] }
 0x181   : > { %21301 = vmatprep.mubr.msk.bf16.mxu1 %vm566_vm1, %v328_v1  ;;  %22341 = vmatprep.mubr.msk.bf16.mxu0 %vm566_vm1, %v25496_v49  ;;  %v236_v49 = vld [vmem:[%s25214_s25 + $0x280] sm:$0xff]  ;;  %v331_v6 = vpack.c.bf16 %v235_v61, %v234_v44  ;;  %v28253_v44 = vld [vmem:[#allocation3_spill] sm:$0xff]  ;;  %v273_v61 = vld [vmem:[%s25214_s25 + $0x3f0] sm:$0xff] }
 0x182   : > { %v332_v36 = vpack.c.bf16 %v237_v17, %v236_v49 }
 0x188   : > { %21302 = vmatmul.mubr.msk.bf16.gmra.mrb[56].mxu1 %vm566_vm1, %v329_v57  ;;  %22342 = vmatmul.mubr.msk.bf16.gmra.mrb[56].mxu0 %vm566_vm1, %v25524_v3  ;;  %v238_v3 = vld [vmem:[%s25214_s25 + $0x290] sm:$0xff]  ;;  %v28252_v57 = vld [vmem:[#allocation2_spill] sm:$0xff] }
 0x189   : > { %21305 = vmatprep.mubr.msk.bf16.mxu1 %vm566_vm1, %v330_v63  ;;  %22345 = vmatprep.mubr.msk.bf16.mxu0 %vm566_vm1, %v25528_v5  ;;  %v25969_v5 = vld [vmem:[%s28231_s1 + $0x18] sm:$0x3f]   ;;  %v333_v10 = vpack.c.bf16 %v239_v9, %v238_v3  ;;  %v275_v3 = vld [vmem:[%s25214_s25 + $0x400] sm:$0xff] }
 0x18a   : > { %25116 = vmatprep.subr.msk.bf16.mxu1 %vm759_vm0, %v25969_v5  ;;  %v271_v63 = vld [vmem:[%s25214_s25 + $0x3d8] sm:$0xff] }
 0x18b   : > { %v28255_v9 = vld [vmem:[#allocation5_spill] sm:$0xff] }
 0x190   : > { %21306 = vmatmul.mubr.msk.bf16.gmra.mrb[60].mxu1 %vm566_vm1, %v331_v6  ;;  %22346 = vmatmul.mubr.msk.bf16.gmra.mrb[60].mxu0 %vm566_vm1, %v25544_v24  ;;  %v25978_v24 = vld [vmem:[%s28231_s1 + $0x58] sm:$0x3f]   ;;  %v28254_v6 = vld [vmem:[#allocation4_spill] sm:$0xff] }
 0x191   : > { %21309 = vmatprep.mubr.msk.bf16.mxu1 %vm566_vm1, %v332_v36  ;;  %22349 = vmatprep.mubr.msk.bf16.mxu0 %vm566_vm1, %v25546_v29  ;;  %v242_v29 = vld [vmem:[%s25214_s25 + $0x2b8] sm:$0xff] }
 0x192   : > { %25124 = vmatprep.subr.msk.bf16.mxu0 %vm759_vm0, %v25978_v24  ;;  %v335_v25 = vpack.c.bf16 %v243_v27, %v242_v29  ;;  %v274_v36 = vld [vmem:[%s25214_s25 + $0x3f8] sm:$0xff]  ;;  %v28256_v29 = vld [vmem:[#allocation6_spill] sm:$0xff] }
 0x193   : > { %v278_v27 = vld [vmem:[%s25214_s25 + $0x420] sm:$0xff] }
 0x198   : > { %21310 = vmatmul.mubr.msk.bf16.gmra.mrb[64].mxu1 %vm566_vm1, %v333_v10  ;;  %22350 = vmatmul.mubr.msk.bf16.gmra.mrb[64].mxu0 %vm566_vm1, %v25562_v50  ;;  %v246_v50 = vld [vmem:[%s25214_s25 + $0x2e0] sm:$0xff]  ;;  %v351_v10 = vpack.c.bf16 %v275_v3, %v274_v36  ;;  %v2055_v3 = vld [vmem:[%s25214_s25 + $0x12] sm:$0xff] }
 0x199   : > { %21313 = vmatprep.mubr.msk.bf16.mxu1 %vm566_vm1, %v334_v59  ;;  %22353 = vmatprep.mubr.msk.bf16.mxu0 %vm566_vm1, %v25564_v52  ;;  %v248_v52 = vld [vmem:[%s25214_s25 + $0x2f8] sm:$0xff]  ;;  %v337_v38 = vpack.c.bf16 %v247_v20, %v246_v50  ;;  %v352_v59 = vpack.c.bf16 %v277_v11, %v276_v8  ;;  %v353_v50 = vpack.c.bf16 %v279_v23, %v278_v27  ;;  %v18901_v8 = vld [vmem:[%s25214_s25 + $0x62] sm:$0xff]  ;;  %v18902_v11 = vld [vmem:[%s25214_s25 + $0x6a] sm:$0xff] }
 0x19a   : > { %v338_v46 = vpack.c.bf16 %v249_v22, %v248_v52  ;;  %v28258_v52 = vld [vmem:[#allocation8_spill] sm:$0xff]  ;;  %v282_v22 = vld [vmem:[%s25214_s25 + $0x448] sm:$0xff]  ;;  %v18903_v27 = vld [vmem:[%s25214_s25 + $0x7a] sm:$0xff] }
 0x19b   : > { %v18904_v23 = vld [vmem:[%s25214_s25 + $0x82] sm:$0xff] }
 0x1a0   : > { %21314 = vmatmul.mubr.msk.bf16.gmra.mrb[68].mxu1 %vm566_vm1, %v335_v25  ;;  %22354 = vmatmul.mubr.msk.bf16.gmra.mrb[68].mxu0 %vm566_vm1, %v25580_v14  ;;  %v250_v14 = vld [vmem:[%s25214_s25 + $0x308] sm:$0xff]  ;;  %v280_v25 = vld [vmem:[%s25214_s25 + $0x438] sm:$0xff] }
 0x1a1   : > { %21317 = vmatprep.mubr.msk.bf16.mxu1 %vm566_vm1, %v336_v0  ;;  %22357 = vmatprep.mubr.msk.bf16.mxu0 %vm566_vm1, %v25582_v16  ;;  %v252_v16 = vld [vmem:[%s25214_s25 + $0x320] sm:$0xff]  ;;  %v339_v30 = vpack.c.bf16 %v251_v40, %v250_v14  ;;  %v285_v40 = vld [vmem:[%s25214_s25 + $0x468] sm:$0xff] }
 0x1a2   : > { %v340_v33 = vpack.c.bf16 %v253_v31, %v252_v16  ;;  %v281_v0 = vld [vmem:[%s25214_s25 + $0x440] sm:$0xff] }
 0x1a3   : > { %v354_v20 = vpack.c.bf16 %v281_v0, %v280_v25  ;;  %v284_v14 = vld [vmem:[%s25214_s25 + $0x460] sm:$0xff]  ;;  %v3514_v25 = vsel %vm759_vm0, %v25969_v5, 0  ;;  %v18905_v5 = vld [vmem:[%s25214_s25 + $0x8a] sm:$0xff] }
 0x1a4   : > { %v356_v31 = vpack.c.bf16 %v285_v40, %v284_v14 }
 0x1a8   : > { %21318 = vmatmul.mubr.msk.bf16.gmra.mrb[72].mxu1 %vm566_vm1, %v337_v38  ;;  %22358 = vmatmul.mubr.msk.bf16.gmra.mrb[72].mxu0 %vm566_vm1, %v25598_v37  ;;  %v254_v37 = vld [vmem:[%s25214_s25 + $0x330] sm:$0xff] }
 0x1a9   : > { %21321 = vmatprep.mubr.msk.bf16.mxu1 %vm566_vm1, %v338_v46  ;;  %22361 = vmatprep.mubr.msk.bf16.mxu0 %vm566_vm1, %v25600_v41  ;;  %v256_v41 = vld [vmem:[%s25214_s25 + $0x348] sm:$0xff]  ;;  %v341_v56 = vpack.c.bf16 %v255_v54, %v254_v37  ;;  %v283_v38 = vld [vmem:[%s25214_s25 + $0x450] sm:$0xff]  ;;  %v28259_v46 = vld [vmem:[#allocation9_spill] sm:$0xff] }
 0x1aa   : > { %v342_v48 = vpack.c.bf16 %v257_v32, %v256_v41  ;;  %v355_v16 = vpack.c.bf16 %v283_v38, %v282_v22  ;;  %v28260_v37 = vld [vmem:[#allocation10_spill] sm:$0xff]  ;;  %v288_v54 = vld [vmem:[%s25214_s25 + $0x488] sm:$0xff]  ;;  %v289_v41 = vld [vmem:[%s25214_s25 + $0x490] sm:$0xff] }
 0x1ab   : > { %v2060_v22 = vld [vmem:[%s25214_s25 + $0x42] sm:$0xff]  ;;  %v18906_v38 = vld [vmem:[%s25214_s25 + $0x92] sm:$0xff] }
 0x1ac   : > { %v10730_v40 = vpack.c.bf16 %v18906_v38, %v18905_v5  ;;  %v18948_v5 = vld [vmem:[%s25214_s25 + $0x23a] sm:$0xff] }
 0x1b0   : > { %21322 = vmatmul.mubr.msk.bf16.gmra.mrb[76].mxu1 %vm566_vm1, %v339_v30  ;;  %22362 = vmatmul.mubr.msk.bf16.gmra.mrb[76].mxu0 %vm566_vm1, %v25616_v4  ;;  %v258_v4 = vld [vmem:[%s25214_s25 + $0x358] sm:$0xff]  ;;  %v286_v30 = vld [vmem:[%s25214_s25 + $0x470] sm:$0xff] }
 0x1b1   : > { %21325 = vmatprep.mubr.msk.bf16.mxu1 %vm566_vm1, %v340_v33  ;;  %22365 = vmatprep.mubr.msk.bf16.mxu0 %vm566_vm1, %v25618_v13  ;;  %v260_v13 = vld [vmem:[%s25214_s25 + $0x370] sm:$0xff]  ;;  %v343_v7 = vpack.c.bf16 %v259_v55, %v258_v4  ;;  %v287_v33 = vld [vmem:[%s25214_s25 + $0x478] sm:$0xff] }
 0x1b2   : > { %v344_v43 = vpack.c.bf16 %v261_v51, %v260_v13  ;;  %v357_v32 = vpack.c.bf16 %v287_v33, %v286_v30  ;;  %v292_v4 = vld [vmem:[%s25214_s25 + $0x4b0] sm:$0xff]  ;;  %v293_v55 = vld [vmem:[%s25214_s25 + $0x4b8] sm:$0xff]  ;;  %v18824_v13 = vld [vmem:[%s25214_s25 + $0x501] sm:$0xff] }
 0x1b3   : > { %v18825_v51 = vld [vmem:[%s25214_s25 + $0x509] sm:$0xff]  ;;  %v18910_v30 = vld [vmem:[%s25214_s25 + $0xba] sm:$0xff] }
 0x1b4   : > { %v18911_v33 = vld [vmem:[%s25214_s25 + $0xca] sm:$0xff] }
 0x1b8   : > { %21326 = vmatmul.mubr.msk.bf16.gmra.mrb[80].mxu1 %vm566_vm1, %v341_v56  ;;  %22366 = vmatmul.mubr.msk.bf16.gmra.mrb[80].mxu0 %vm566_vm1, %v25634_v35  ;;  %v262_v35 = vld [vmem:[%s25214_s25 + $0x380] sm:$0xff]  ;;  %v358_v56 = vpack.c.bf16 %v289_v41, %v288_v54 }
 0x1b9   : > { %21329 = vmatprep.mubr.msk.bf16.mxu1 %vm566_vm1, %v342_v48  ;;  %22369 = vmatprep.mubr.msk.bf16.mxu0 %vm566_vm1, %v25636_v42  ;;  %v264_v42 = vld [vmem:[%s25214_s25 + $0x398] sm:$0xff]  ;;  %v345_v45 = vpack.c.bf16 %v263_v12, %v262_v35  ;;  %v291_v48 = vld [vmem:[%s25214_s25 + $0x4a0] sm:$0xff] }
 0x1ba   : > { %v346_v1 = vpack.c.bf16 %v265_v58, %v264_v42  ;;  %v294_v35 = vld [vmem:[%s25214_s25 + $0x4c0] sm:$0xff]  ;;  %v18826_v12 = vld [vmem:[%s25214_s25 + $0x511] sm:$0xff] }
 0x1bb   : > { %v18827_v42 = vld [vmem:[%s25214_s25 + $0x519] sm:$0xff] }
 0x1bc   : > { %v296_v58 = vld [vmem:[%s25214_s25 + $0x4d8] sm:$0xff] }
 0x1c0   : > { %21330 = vmatmul.mubr.msk.bf16.gmra.mrb[84].mxu1 %vm566_vm1, %v343_v7  ;;  %22370 = vmatmul.mubr.msk.bf16.gmra.mrb[84].mxu0 %vm566_vm1, %v25652_v15  ;;  %v266_v15 = vld [vmem:[%s25214_s25 + $0x3a8] sm:$0xff] }
 0x1c1   : > { %21333 = vmatprep.mubr.msk.bf16.mxu1 %vm566_vm1, %v344_v43  ;;  %22373 = vmatprep.mubr.msk.bf16.mxu0 %vm566_vm1, %v25654_v19  ;;  %v268_v19 = vld [vmem:[%s25214_s25 + $0x3c0] sm:$0xff]  ;;  %v347_v28 = vpack.c.bf16 %v267_v26, %v266_v15  ;;  %v9719_v43 = vpack.c.bf16 %v18825_v51, %v18824_v13  ;;  %v18829_v15 = vld [vmem:[%s25214_s25 + $0x531] sm:$0xff]  ;;  %v9720_v26 = vpack.c.bf16 %v18827_v42, %v18826_v12 }
 0x1c2   : > { %v348_v2 = vpack.c.bf16 %v269_v60, %v268_v19  ;;  %v18917_v13 = vld [vmem:[%s25214_s25 + $0x102] sm:$0xff]  ;;  %v18918_v51 = vld [vmem:[%s25214_s25 + $0x10a] sm:$0xff]  ;;  %v18922_v12 = vld [vmem:[%s25214_s25 + $0x132] sm:$0xff] }
 0x1c3   : > { %v18923_v42 = vld [vmem:[%s25214_s25 + $0x142] sm:$0xff] }
 0x1c8   : > { %21334 = vmatmul.mubr.msk.bf16.gmra.mrb[88].mxu1 %vm566_vm1, %v345_v45  ;;  %22374 = vmatmul.mubr.msk.bf16.gmra.mrb[88].mxu0 %vm566_vm1, %v25670_v53  ;;  %v270_v53 = vld [vmem:[%s25214_s25 + $0x3d0] sm:$0xff]  ;;  %v297_v45 = vld [vmem:[%s25214_s25 + $0x4e0] sm:$0xff] }
 0x1c9   : > { %21337 = vmatprep.mubr.msk.bf16.mxu1 %vm566_vm1, %v346_v1  ;;  %22377 = vmatprep.mubr.msk.bf16.mxu0 %vm566_vm1, %v25672_v62  ;;  %v272_v62 = vld [vmem:[%s25214_s25 + $0x3e8] sm:$0xff]  ;;  %v349_v49 = vpack.c.bf16 %v271_v63, %v270_v53  ;;  %v362_v19 = vpack.c.bf16 %v297_v45, %v296_v58 }
 0x1ca   : > { %v350_v17 = vpack.c.bf16 %v273_v61, %v272_v62  ;;  %v18828_v1 = vld [vmem:[%s25214_s25 + $0x529] sm:$0xff]  ;;  %v18831_v53 = vld [vmem:[%s25214_s25 + $0x541] sm:$0xff]  ;;  %v18899_v62 = vld [vmem:[%s25214_s25 + $0x52] sm:$0xff] }
 0x1cb   : > { %v9721_v60 = vpack.c.bf16 %v18829_v15, %v18828_v1  ;;  %v2053_v63 = vld [vmem:[%s25214_s25 + $0x2] sm:$0xff]  ;;  %v18900_v61 = vld [vmem:[%s25214_s25 + $0x5a] sm:$0xff]  ;;  %v18924_v58 = vld [vmem:[%s25214_s25 + $0x14a] sm:$0xff] }
 0x1cc   : > { %v10727_v36 = vpack.c.bf16 %v18900_v61, %v18899_v62  ;;  %v10739_v1 = vpack.c.bf16 %v18924_v58, %v18923_v42  ;;  %v18925_v15 = vld [vmem:[%s25214_s25 + $0x152] sm:$0xff]  ;;  %v18933_v61 = vld [vmem:[%s25214_s25 + $0x1a2] sm:$0xff] }
 0x1cd   : > { %v26285_v42 = vld [vmem:[%s28231_s1 + $0x20] sm:$0x3f]  }
 0x1ce   : > { %v18965_v58 = vld [vmem:[%s25214_s25 + $0x2e2] sm:$0xff] }
 0x1d0   : > { %21338 = vmatmul.mubr.msk.bf16.gmra.mrb[92].mxu1 %vm566_vm1, %v347_v28  ;;  %22378 = vmatmul.mubr.msk.bf16.gmra.mrb[92].mxu0 %vm566_vm1, %v28252_v57  ;;  %v298_v28 = vld [vmem:[%s25214_s25 + $0x4e8] sm:$0xff]  ;;  %v18830_v57 = vld [vmem:[%s25214_s25 + $0x539] sm:$0xff] }
 0x1d1   : > { %21341 = vmatprep.mubr.msk.bf16.mxu1 %vm566_vm1, %v348_v2  ;;  %22381 = vmatprep.mubr.msk.bf16.mxu0 %vm566_vm1, %v28253_v44  ;;  %v299_v2 = vld [vmem:[%s25214_s25 + $0x4f0] sm:$0xff] }
 0x1d2   : > { %v2054_v44 = vld [vmem:[%s25214_s25 + $0xa] sm:$0xff] }
 0x1d8   : > { %21342 = vmatmul.mubr.msk.bf16.gmra.mrb[96].mxu1 %vm566_vm1, %v349_v49  ;;  %22382 = vmatmul.mubr.msk.bf16.gmra.mrb[96].mxu0 %vm566_vm1, %v28254_v6  ;;  %v363_v49 = vpack.c.bf16 %v299_v2, %v298_v28  ;;  %v2181_v6 = vpack.c.bf16 %v2054_v44, %v2053_v63  ;;  %v18929_v2 = vld [vmem:[%s25214_s25 + $0x17a] sm:$0xff] }
 0x1d9   : > { %21345 = vmatprep.mubr.msk.bf16.mxu1 %vm566_vm1, %v350_v17  ;;  %22385 = vmatprep.mubr.msk.bf16.mxu0 %vm566_vm1, %v28255_v9  ;;  %v9722_v17 = vpack.c.bf16 %v18831_v53, %v18830_v57  ;;  %v2056_v9 = vld [vmem:[%s25214_s25 + $0x1a] sm:$0xff]  ;;  %v18930_v57 = vld [vmem:[%s25214_s25 + $0x182] sm:$0xff]  ;;  %v18931_v53 = vld [vmem:[%s25214_s25 + $0x192] sm:$0xff] }
 0x1da   : > { %v18932_v63 = vld [vmem:[%s25214_s25 + $0x19a] sm:$0xff]  ;;  %v10742_v44 = vpack.c.bf16 %v18930_v57, %v18929_v2  ;;  %v18971_v2 = vld [vmem:[%s25214_s25 + $0x322] sm:$0xff]  ;;  %v18972_v57 = vld [vmem:[%s25214_s25 + $0x32a] sm:$0xff] }
 0x1db   : > { %v10743_v62 = vpack.c.bf16 %v18932_v63, %v18931_v53  ;;  %v10763_v63 = vpack.c.bf16 %v18972_v57, %v18971_v2 }
 0x1e0   : > { %21346 = vmatmul.mubr.msk.bf16.gmra.mrb[100].mxu1 %vm566_vm1, %v351_v10  ;;  %22386 = vmatmul.mubr.msk.bf16.gmra.mrb[100].mxu0 %vm566_vm1, %v28256_v29  ;;  %v2057_v10 = vld [vmem:[%s25214_s25 + $0x2a] sm:$0xff]  ;;  %v2182_v29 = vpack.c.bf16 %v2056_v9, %v2055_v3 }
 0x1e1   : > { %21349 = vmatprep.mubr.msk.bf16.mxu1 %vm566_vm1, %v352_v59  ;;  %22389 = vmatprep.mubr.msk.bf16.mxu0 %vm566_vm1, %v28257_v18  ;;  %v2058_v59 = vld [vmem:[%s25214_s25 + $0x32] sm:$0xff]  ;;  %v10728_v18 = vpack.c.bf16 %v18902_v11, %v18901_v8  ;;  %v18937_v9 = vld [vmem:[%s25214_s25 + $0x1ca] sm:$0xff]  ;;  %v18939_v11 = vld [vmem:[%s25214_s25 + $0x1e2] sm:$0xff] }
 0x1e2   : > { %v2183_v0 = vpack.c.bf16 %v2058_v59, %v2057_v10  ;;  %v18938_v8 = vld [vmem:[%s25214_s25 + $0x1d2] sm:$0xff]  ;;  %v18940_v10 = vld [vmem:[%s25214_s25 + $0x1ea] sm:$0xff] }
 0x1e3   : > { %v10746_v59 = vpack.c.bf16 %v18938_v8, %v18937_v9  ;;  %v18979_v9 = vld [vmem:[%s25214_s25 + $0x372] sm:$0xff]  ;;  %v18980_v8 = vld [vmem:[%s25214_s25 + $0x37a] sm:$0xff] }
 0x1e8   : > { %21350 = vmatmul.mubr.msk.bf16.gmra.mrb[104].mxu1 %vm566_vm1, %v353_v50  ;;  %22390 = vmatmul.mubr.msk.bf16.gmra.mrb[104].mxu0 %vm566_vm1, %v28258_v52  ;;  %v12060_v50 = vsel %vm759_vm0, %v25978_v24, 0  ;;  %v2059_v52 = vld [vmem:[%s25214_s25 + $0x3a] sm:$0xff]  ;;  %v18907_v24 = vld [vmem:[%s25214_s25 + $0xa2] sm:$0xff] }
 0x1e9   : > { %21353 = vmatprep.mubr.msk.bf16.mxu1 %vm566_vm1, %v354_v20  ;;  %22393 = vmatprep.mubr.msk.bf16.mxu0 %vm566_vm1, %v28259_v46  ;;  %v10729_v20 = vpack.c.bf16 %v18904_v23, %v18903_v27  ;;  %v18908_v46 = vld [vmem:[%s25214_s25 + $0xaa] sm:$0xff]  ;;  %v2184_v14 = vpack.c.bf16 %v2060_v22, %v2059_v52  ;;  %v18941_v27 = vld [vmem:[%s25214_s25 + $0x1f2] sm:$0xff]  ;;  %v18942_v23 = vld [vmem:[%s25214_s25 + $0x1fa] sm:$0xff] }
 0x1ea   : > { %v18946_v52 = vld [vmem:[%s25214_s25 + $0x222] sm:$0xff]  ;;  %v18947_v22 = vld [vmem:[%s25214_s25 + $0x232] sm:$0xff] }
 0x1f0   : > { %21354 = vmatmul.mubr.msk.bf16.gmra.mrb[108].mxu1 %vm566_vm1, %v355_v16  ;;  %22394 = vmatmul.mubr.msk.bf16.gmra.mrb[108].mxu0 %vm566_vm1, %v25760_v47  ;;  %v290_v47 = vld [vmem:[%s25214_s25 + $0x498] sm:$0xff]  ;;  %v10731_v16 = vpack.c.bf16 %v18908_v46, %v18907_v24  ;;  %v10751_v24 = vpack.c.bf16 %v18948_v5, %v18947_v22  ;;  %v18949_v46 = vld [vmem:[%s25214_s25 + $0x242] sm:$0xff] }
 0x1f1   : > { %21357 = vmatprep.mubr.msk.bf16.mxu1 %vm566_vm1, %v356_v31  ;;  %22397 = vmatprep.mubr.msk.bf16.mxu0 %vm566_vm1, %v28260_v37  ;;  %v359_v7 = vpack.c.bf16 %v291_v48, %v290_v47  ;;  %v18909_v31 = vld [vmem:[%s25214_s25 + $0xb2] sm:$0xff]  ;;  %v18916_v48 = vld [vmem:[%s25214_s25 + $0xfa] sm:$0xff] }
 0x1f2   : > { %v18912_v37 = vld [vmem:[%s25214_s25 + $0xd2] sm:$0xff]  ;;  %v10732_v54 = vpack.c.bf16 %v18910_v30, %v18909_v31 }
 0x1f3   : > { %v10733_v41 = vpack.c.bf16 %v18912_v37, %v18911_v33  ;;  %v18915_v47 = vld [vmem:[%s25214_s25 + $0xf2] sm:$0xff]  ;;  %v18953_v33 = vld [vmem:[%s25214_s25 + $0x26a] sm:$0xff] }
 0x1f4   : > { %v18954_v37 = vld [vmem:[%s25214_s25 + $0x272] sm:$0xff] }
 0x1f8   : > { %21358 = vmatmul.mubr.msk.bf16.gmra.mrb[112].mxu1 %vm566_vm1, %v357_v32  ;;  %22398 = vmatmul.mubr.msk.bf16.gmra.mrb[112].mxu0 %vm566_vm1, %v25778_v34  ;;  %v360_v34 = vpack.c.bf16 %v293_v55, %v292_v4  ;;  %v18913_v32 = vld [vmem:[%s25214_s25 + $0xda] sm:$0xff]  ;;  %v10735_v55 = vpack.c.bf16 %v18916_v48, %v18915_v47  ;;  %v18957_v47 = vld [vmem:[%s25214_s25 + $0x292] sm:$0xff] }
 0x1f9   : > { %21361 = vmatprep.mubr.msk.bf16.mxu1 %vm566_vm1, %v358_v56  ;;  %22401 = vmatprep.mubr.msk.bf16.mxu0 %vm566_vm1, %v25780_v39  ;;  %v295_v39 = vld [vmem:[%s25214_s25 + $0x4c8] sm:$0xff]  ;;  %v18958_v48 = vld [vmem:[%s25214_s25 + $0x29a] sm:$0xff] }
 0x1fa   : > { %v18914_v56 = vld [vmem:[%s25214_s25 + $0xe2] sm:$0xff] }
 0x1fb   : > { %v10734_v4 = vpack.c.bf16 %v18914_v56, %v18913_v32  ;;  %v10754_v32 = vpack.c.bf16 %v18954_v37, %v18953_v33  ;;  %v18995_v33 = vld [vmem:[%s25214_s25 + $0x412] sm:$0xff]  ;;  %v18996_v37 = vld [vmem:[%s25214_s25 + $0x41a] sm:$0xff] }
 0x200   : > { %21362 = vmatmul.mubr.msk.bf16.gmra.mrb[116].mxu1 %vm566_vm1, %v359_v7  ;;  %22402 = vmatmul.mubr.msk.bf16.gmra.mrb[116].mxu0 %vm566_vm1, %v25794_v21  ;;  %v361_v21 = vpack.c.bf16 %v295_v39, %v294_v35  ;;  %v18919_v7 = vld [vmem:[%s25214_s25 + $0x11a] sm:$0xff]  ;;  %v18921_v39 = vld [vmem:[%s25214_s25 + $0x12a] sm:$0xff] }
 0x201   : > { %21365 = vmatprep.mubr.msk.bf16.mxu1 %vm566_vm1, %v360_v34  ;;  %22405 = vmatprep.mubr.msk.bf16.mxu0 %vm566_vm1, %v9719_v43  ;;  %v18920_v34 = vld [vmem:[%s25214_s25 + $0x122] sm:$0xff]  ;;  %v10736_v43 = vpack.c.bf16 %v18918_v51, %v18917_v13  ;;  %v10738_v45 = vpack.c.bf16 %v18922_v12, %v18921_v39  ;;  %v10756_v13 = vpack.c.bf16 %v18958_v48, %v18957_v47  ;;  %v18999_v47 = vld [vmem:[%s25214_s25 + $0x43a] sm:$0xff] }
 0x202   : > { %v10737_v35 = vpack.c.bf16 %v18920_v34, %v18919_v7  ;;  %v18961_v7 = vld [vmem:[%s25214_s25 + $0x2ba] sm:$0xff]  ;;  %v18962_v34 = vld [vmem:[%s25214_s25 + $0x2c2] sm:$0xff] }
 0x203   : > { %v10758_v39 = vpack.c.bf16 %v18962_v34, %v18961_v7  ;;  %v19000_v48 = vld [vmem:[%s25214_s25 + $0x442] sm:$0xff]  ;;  %v19004_v34 = vld [vmem:[%s25214_s25 + $0x46a] sm:$0xff] }
 0x204   : > { %v19003_v7 = vld [vmem:[%s25214_s25 + $0x462] sm:$0xff] }
 0x208   : > { %21366 = vmatmul.mubr.msk.bf16.gmra.mrb[120].mxu1 %vm566_vm1, %v361_v21  ;;  %22406 = vmatmul.mubr.msk.bf16.gmra.mrb[120].mxu0 %vm566_vm1, %v9720_v26  ;;  %v18926_v21 = vld [vmem:[%s25214_s25 + $0x15a] sm:$0xff]  ;;  %v18927_v26 = vld [vmem:[%s25214_s25 + $0x16a] sm:$0xff] }
 0x209   : > { %21369 = vmatprep.mubr.msk.bf16.mxu1 %vm566_vm1, %v362_v19  ;;  %22409 = vmatprep.mubr.msk.bf16.mxu0 %vm566_vm1, %v9721_v60  ;;  %v18928_v19 = vld [vmem:[%s25214_s25 + $0x172] sm:$0xff]  ;;  %v10740_v60 = vpack.c.bf16 %v18926_v21, %v18925_v15  ;;  %v18967_v15 = vld [vmem:[%s25214_s25 + $0x2fa] sm:$0xff]  ;;  %v18968_v21 = vld [vmem:[%s25214_s25 + $0x302] sm:$0xff] }
 0x20a   : > { %v10741_v28 = vpack.c.bf16 %v18928_v19, %v18927_v26  ;;  %v10761_v19 = vpack.c.bf16 %v18968_v21, %v18967_v15 }
 0x210   : > { %21370 = vmatmul.mubr.msk.bf16.gmra.mrb[124].mxu1 %vm566_vm1, %v363_v49  ;;  %22410 = vmatmul.mubr.msk.bf16.gmra.mrb[124].mxu0 %vm566_vm1, %v9722_v17  ;;  %v18934_v49 = vld [vmem:[%s25214_s25 + $0x1aa] sm:$0xff]  ;;  %v18935_v17 = vld [vmem:[%s25214_s25 + $0x1ba] sm:$0xff] }
 0x211   : > { %21375 = vmatprep.mubr.msk.bf16.mxu1 %vm566_vm1, %v2181_v6  ;;  %22415 = vmatprep.mubr.msk.bf16.mxu0 %vm566_vm1, %v10727_v36  ;;  %v18936_v6 = vld [vmem:[%s25214_s25 + $0x1c2] sm:$0xff] }
 0x212   : > { %v10745_v3 = vpack.c.bf16 %v18936_v6, %v18935_v17 }
 0x218   : > { %21376 = vmatmul.mubr.msk.bf16.vlgmr.msra.gmra.mrb[0].mxu1 %vm566_vm1, %v2182_v29  ;;  %22416 = vmatmul.mubr.msk.bf16.vlgmr.msra.gmra.mrb[0].mxu0 %vm566_vm1, %v10728_v18  ;;  %v10747_v29 = vpack.c.bf16 %v18940_v10, %v18939_v11  ;;  %v10767_v10 = vpack.c.bf16 %v18980_v8, %v18979_v9 }
 0x219   : > { %21504 = vmatpush3.bf16.msra.mxu1 %v3514_v25  ;;  %22544 = vmatpush3.bf16.msra.mxu0 %v12060_v50  ;;  %v18944_v25 = vld [vmem:[%s25214_s25 + $0x212] sm:$0xff] }
 0x21a   : > { %21379 = vmatprep.mubr.msk.bf16.mxu1 %vm566_vm1, %v2183_v0  ;;  %22419 = vmatprep.mubr.msk.bf16.mxu0 %vm566_vm1, %v10729_v20  ;;  %v10748_v0 = vpack.c.bf16 %v18942_v23, %v18941_v27  ;;  %v18983_v27 = vld [vmem:[%s25214_s25 + $0x39a] sm:$0xff]  ;;  %v18984_v23 = vld [vmem:[%s25214_s25 + $0x3a2] sm:$0xff] }
 0x21b   : > { %25117 = vmatprep.subr.msk.bf16.mxu1 %vm759_vm0, %v26285_v42 }
 0x220   : > { %21380 = vmatmul.mubr.msk.bf16.gmra.mrb[4].mxu1 %vm566_vm1, %v2184_v14  ;;  %22420 = vmatmul.mubr.msk.bf16.gmra.mrb[4].mxu0 %vm566_vm1, %v10730_v40  ;;  %v18950_v14 = vld [vmem:[%s25214_s25 + $0x24a] sm:$0xff] }
 0x221   : > { %21383 = vmatprep.mubr.msk.bf16.mxu1 %vm566_vm1, %v10727_v36  ;;  %22423 = vmatprep.mubr.msk.bf16.mxu0 %vm566_vm1, %v10731_v16  ;;  %v10744_v36 = vpack.c.bf16 %v18934_v49, %v18933_v61  ;;  %v10752_v31 = vpack.c.bf16 %v18950_v14, %v18949_v46  ;;  %v18975_v61 = vld [vmem:[%s25214_s25 + $0x34a] sm:$0xff]  ;;  %v18976_v49 = vld [vmem:[%s25214_s25 + $0x352] sm:$0xff] }
 0x222   : > { %v10765_v6 = vpack.c.bf16 %v18976_v49, %v18975_v61  ;;  %v18991_v46 = vld [vmem:[%s25214_s25 + $0x3ea] sm:$0xff]  ;;  %v18992_v14 = vld [vmem:[%s25214_s25 + $0x3f2] sm:$0xff] }
 0x228   : > { %21384 = vmatmul.mubr.msk.bf16.gmra.mrb[8].mxu1 %vm566_vm1, %v10728_v18  ;;  %22424 = vmatmul.mubr.msk.bf16.gmra.mrb[8].mxu0 %vm566_vm1, %v10732_v54  ;;  %v18943_v18 = vld [vmem:[%s25214_s25 + $0x20a] sm:$0xff] }
 0x229   : > { %21387 = vmatprep.mubr.msk.bf16.mxu1 %vm566_vm1, %v10729_v20  ;;  %22427 = vmatprep.mubr.msk.bf16.mxu0 %vm566_vm1, %v10733_v41  ;;  %v10749_v50 = vpack.c.bf16 %v18944_v25, %v18943_v18  ;;  %v18945_v20 = vld [vmem:[%s25214_s25 + $0x21a] sm:$0xff]  ;;  %v10769_v25 = vpack.c.bf16 %v18984_v23, %v18983_v27 }
 0x22a   : > { %v10750_v38 = vpack.c.bf16 %v18946_v52, %v18945_v20  ;;  %v18987_v20 = vld [vmem:[%s25214_s25 + $0x3c2] sm:$0xff]  ;;  %v18988_v52 = vld [vmem:[%s25214_s25 + $0x3ca] sm:$0xff] }
 0x22b   : > { %v10771_v5 = vpack.c.bf16 %v18988_v52, %v18987_v20  ;;  %v19094_v20 = vld [vmem:[%s25214_s25 + $0x53] sm:$0xff]  ;;  %v19095_v52 = vld [vmem:[%s25214_s25 + $0x5b] sm:$0xff] }
 0x230   : > { %21388 = vmatmul.mubr.msk.bf16.gmra.mrb[12].mxu1 %vm566_vm1, %v10730_v40  ;;  %22428 = vmatmul.mubr.msk.bf16.gmra.mrb[12].mxu0 %vm566_vm1, %v10734_v4  ;;  %v18951_v40 = vld [vmem:[%s25214_s25 + $0x25a] sm:$0xff] }
 0x231   : > { %21391 = vmatprep.mubr.msk.bf16.mxu1 %vm566_vm1, %v10731_v16  ;;  %22431 = vmatprep.mubr.msk.bf16.mxu0 %vm566_vm1, %v10735_v55  ;;  %v18952_v16 = vld [vmem:[%s25214_s25 + $0x262] sm:$0xff] }
 0x232   : > { %v10753_v30 = vpack.c.bf16 %v18952_v16, %v18951_v40  ;;  %v10773_v16 = vpack.c.bf16 %v18992_v14, %v18991_v46  ;;  %v3124_v46 = vld [vmem:[%s25214_s25 + $0x1b] sm:$0xff]  ;;  %v19096_v14 = vld [vmem:[%s25214_s25 + $0x63] sm:$0xff] }
 0x238   : > { %21392 = vmatmul.mubr.msk.bf16.gmra.mrb[16].mxu1 %vm566_vm1, %v10732_v54  ;;  %22432 = vmatmul.mubr.msk.bf16.gmra.mrb[16].mxu0 %vm566_vm1, %v10736_v43  ;;  %v18955_v54 = vld [vmem:[%s25214_s25 + $0x282] sm:$0xff] }
 0x239   : > { %21395 = vmatprep.mubr.msk.bf16.mxu1 %vm566_vm1, %v10733_v41  ;;  %22435 = vmatprep.mubr.msk.bf16.mxu0 %vm566_vm1, %v10737_v35  ;;  %v18956_v41 = vld [vmem:[%s25214_s25 + $0x28a] sm:$0xff] }
 0x23a   : > { %v10755_v56 = vpack.c.bf16 %v18956_v41, %v18955_v54  ;;  %v10775_v41 = vpack.c.bf16 %v18996_v37, %v18995_v33  ;;  %v19098_v33 = vld [vmem:[%s25214_s25 + $0x7b] sm:$0xff]  ;;  %v19099_v37 = vld [vmem:[%s25214_s25 + $0x83] sm:$0xff] }
 0x240   : > { %21396 = vmatmul.mubr.msk.bf16.gmra.mrb[20].mxu1 %vm566_vm1, %v10734_v4  ;;  %22436 = vmatmul.mubr.msk.bf16.gmra.mrb[20].mxu0 %vm566_vm1, %v10738_v45  ;;  %v18959_v4 = vld [vmem:[%s25214_s25 + $0x2aa] sm:$0xff] }
 0x241   : > { %21399 = vmatprep.mubr.msk.bf16.mxu1 %vm566_vm1, %v10735_v55  ;;  %22439 = vmatprep.mubr.msk.bf16.mxu0 %vm566_vm1, %v10739_v1  ;;  %v18960_v55 = vld [vmem:[%s25214_s25 + $0x2b2] sm:$0xff] }
 0x242   : > { %v10757_v51 = vpack.c.bf16 %v18960_v55, %v18959_v4  ;;  %v10777_v55 = vpack.c.bf16 %v19000_v48, %v18999_v47  ;;  %v11797_v47 = vpack.c.bf16 %v19099_v37, %v19098_v33  ;;  %v3127_v48 = vld [vmem:[%s25214_s25 + $0x3b] sm:$0xff]  ;;  %v19136_v33 = vld [vmem:[%s25214_s25 + $0x1f3] sm:$0xff] }
 0x243   : > { %v19137_v37 = vld [vmem:[%s25214_s25 + $0x1fb] sm:$0xff] }
 0x248   : > { %21400 = vmatmul.mubr.msk.bf16.gmra.mrb[24].mxu1 %vm566_vm1, %v10736_v43  ;;  %22440 = vmatmul.mubr.msk.bf16.gmra.mrb[24].mxu0 %vm566_vm1, %v10740_v60  ;;  %v18963_v43 = vld [vmem:[%s25214_s25 + $0x2d2] sm:$0xff] }
 0x249   : > { %21403 = vmatprep.mubr.msk.bf16.mxu1 %vm566_vm1, %v10737_v35  ;;  %22443 = vmatprep.mubr.msk.bf16.mxu0 %vm566_vm1, %v10741_v28  ;;  %v18964_v35 = vld [vmem:[%s25214_s25 + $0x2da] sm:$0xff] }
 0x24a   : > { %v10759_v12 = vpack.c.bf16 %v18964_v35, %v18963_v43  ;;  %v10779_v35 = vpack.c.bf16 %v19004_v34, %v19003_v7 }
 0x250   : > { %21404 = vmatmul.mubr.msk.bf16.gmra.mrb[28].mxu1 %vm566_vm1, %v10738_v45  ;;  %22444 = vmatmul.mubr.msk.bf16.gmra.mrb[28].mxu0 %vm566_vm1, %v10742_v44  ;;  %v18966_v45 = vld [vmem:[%s25214_s25 + $0x2ea] sm:$0xff] }
 0x251   : > { %21407 = vmatprep.mubr.msk.bf16.mxu1 %vm566_vm1, %v10739_v1  ;;  %22447 = vmatprep.mubr.msk.bf16.mxu0 %vm566_vm1, %v10743_v62  ;;  %v26293_v1 = vld [vmem:[%s28231_s1 + $0x60] sm:$0x3f]   ;;  %v10760_v26 = vpack.c.bf16 %v18966_v45, %v18965_v58  ;;  %v19007_v58 = vld [vmem:[%s25214_s25 + $0x48a] sm:$0xff]  ;;  %v19008_v45 = vld [vmem:[%s25214_s25 + $0x492] sm:$0xff] }
 0x252   : > { %25125 = vmatprep.subr.msk.bf16.mxu0 %vm759_vm0, %v26293_v1  ;;  %v10781_v21 = vpack.c.bf16 %v19008_v45, %v19007_v58 }
 0x258   : > { %21408 = vmatmul.mubr.msk.bf16.gmra.mrb[32].mxu1 %vm566_vm1, %v10740_v60  ;;  %22448 = vmatmul.mubr.msk.bf16.gmra.mrb[32].mxu0 %vm566_vm1, %v10744_v36  ;;  %v18969_v60 = vld [vmem:[%s25214_s25 + $0x30a] sm:$0xff] }
 0x259   : > { %21411 = vmatprep.mubr.msk.bf16.mxu1 %vm566_vm1, %v10741_v28  ;;  %22451 = vmatprep.mubr.msk.bf16.mxu0 %vm566_vm1, %v10745_v3  ;;  %v18970_v28 = vld [vmem:[%s25214_s25 + $0x312] sm:$0xff] }
 0x25a   : > { %v10762_v53 = vpack.c.bf16 %v18970_v28, %v18969_v60  ;;  %v19011_v60 = vld [vmem:[%s25214_s25 + $0x4b2] sm:$0xff]  ;;  %v19012_v28 = vld [vmem:[%s25214_s25 + $0x4ba] sm:$0xff] }
 0x25b   : > { %v10783_v57 = vpack.c.bf16 %v19012_v28, %v19011_v60 }
 0x260   : > { %21412 = vmatmul.mubr.msk.bf16.gmra.mrb[36].mxu1 %vm566_vm1, %v10742_v44  ;;  %22452 = vmatmul.mubr.msk.bf16.gmra.mrb[36].mxu0 %vm566_vm1, %v10746_v59  ;;  %v18973_v44 = vld [vmem:[%s25214_s25 + $0x332] sm:$0xff] }
 0x261   : > { %21415 = vmatprep.mubr.msk.bf16.mxu1 %vm566_vm1, %v10743_v62  ;;  %22455 = vmatprep.mubr.msk.bf16.mxu0 %vm566_vm1, %v10747_v29  ;;  %v18974_v62 = vld [vmem:[%s25214_s25 + $0x33a] sm:$0xff] }
 0x262   : > { %v10764_v17 = vpack.c.bf16 %v18974_v62, %v18973_v44  ;;  %v19015_v44 = vld [vmem:[%s25214_s25 + $0x4da] sm:$0xff]  ;;  %v19016_v62 = vld [vmem:[%s25214_s25 + $0x4e2] sm:$0xff] }
 0x263   : > { %v10785_v49 = vpack.c.bf16 %v19016_v62, %v19015_v44 }
 0x268   : > { %21416 = vmatmul.mubr.msk.bf16.gmra.mrb[40].mxu1 %vm566_vm1, %v10744_v36  ;;  %22456 = vmatmul.mubr.msk.bf16.gmra.mrb[40].mxu0 %vm566_vm1, %v10748_v0  ;;  %v18977_v36 = vld [vmem:[%s25214_s25 + $0x35a] sm:$0xff] }
 0x269   : > { %21419 = vmatprep.mubr.msk.bf16.mxu1 %vm566_vm1, %v10745_v3  ;;  %22459 = vmatprep.mubr.msk.bf16.mxu0 %vm566_vm1, %v10749_v50  ;;  %v18978_v3 = vld [vmem:[%s25214_s25 + $0x362] sm:$0xff] }
 0x26a   : > { %v10766_v11 = vpack.c.bf16 %v18978_v3, %v18977_v36  ;;  %v19019_v36 = vld [vmem:[%s25214_s25 + $0x502] sm:$0xff]  ;;  %v19020_v3 = vld [vmem:[%s25214_s25 + $0x50a] sm:$0xff] }
 0x26b   : > { %v10787_v8 = vpack.c.bf16 %v19020_v3, %v19019_v36 }
 0x270   : > { %21420 = vmatmul.mubr.msk.bf16.gmra.mrb[44].mxu1 %vm566_vm1, %v10746_v59  ;;  %22460 = vmatmul.mubr.msk.bf16.gmra.mrb[44].mxu0 %vm566_vm1, %v10750_v38  ;;  %v18981_v59 = vld [vmem:[%s25214_s25 + $0x382] sm:$0xff] }
 0x271   : > { %21423 = vmatprep.mubr.msk.bf16.mxu1 %vm566_vm1, %v10747_v29  ;;  %22463 = vmatprep.mubr.msk.bf16.mxu0 %vm566_vm1, %v10751_v24  ;;  %v18982_v29 = vld [vmem:[%s25214_s25 + $0x38a] sm:$0xff] }
 0x272   : > { %v10768_v18 = vpack.c.bf16 %v18982_v29, %v18981_v59  ;;  %v19023_v59 = vld [vmem:[%s25214_s25 + $0x52a] sm:$0xff]  ;;  %v19024_v29 = vld [vmem:[%s25214_s25 + $0x532] sm:$0xff] }
 0x273   : > { %v10789_v23 = vpack.c.bf16 %v19024_v29, %v19023_v59 }
 0x278   : > { %21424 = vmatmul.mubr.msk.bf16.gmra.mrb[48].mxu1 %vm566_vm1, %v10748_v0  ;;  %22464 = vmatmul.mubr.msk.bf16.gmra.mrb[48].mxu0 %vm566_vm1, %v10752_v31  ;;  %v18985_v0 = vld [vmem:[%s25214_s25 + $0x3aa] sm:$0xff] }
 0x279   : > { %21427 = vmatprep.mubr.msk.bf16.mxu1 %vm566_vm1, %v10749_v50  ;;  %22467 = vmatprep.mubr.msk.bf16.mxu0 %vm566_vm1, %v10753_v30  ;;  %v18986_v50 = vld [vmem:[%s25214_s25 + $0x3b2] sm:$0xff] }
 0x27a   : > { %v10770_v22 = vpack.c.bf16 %v18986_v50, %v18985_v0  ;;  %v3121_v0 = vld [vmem:[%s25214_s25 + $0x3] sm:$0xff]  ;;  %v3122_v50 = vld [vmem:[%s25214_s25 + $0xb] sm:$0xff] }
 0x280   : > { %21428 = vmatmul.mubr.msk.bf16.gmra.mrb[52].mxu1 %vm566_vm1, %v10750_v38  ;;  %22468 = vmatmul.mubr.msk.bf16.gmra.mrb[52].mxu0 %vm566_vm1, %v10754_v32  ;;  %v18989_v38 = vld [vmem:[%s25214_s25 + $0x3d2] sm:$0xff] }
 0x281   : > { %21431 = vmatprep.mubr.msk.bf16.mxu1 %vm566_vm1, %v10751_v24  ;;  %22471 = vmatprep.mubr.msk.bf16.mxu0 %vm566_vm1, %v10755_v56  ;;  %v18990_v24 = vld [vmem:[%s25214_s25 + $0x3da] sm:$0xff] }
 0x282   : > { %v10772_v40 = vpack.c.bf16 %v18990_v24, %v18989_v38  ;;  %v11795_v38 = vpack.c.bf16 %v19095_v52, %v19094_v20  ;;  %v3123_v24 = vld [vmem:[%s25214_s25 + $0x13] sm:$0xff]  ;;  %v19128_v20 = vld [vmem:[%s25214_s25 + $0x1a3] sm:$0xff]  ;;  %v19129_v52 = vld [vmem:[%s25214_s25 + $0x1ab] sm:$0xff] }
 0x288   : > { %21432 = vmatmul.mubr.msk.bf16.gmra.mrb[56].mxu1 %vm566_vm1, %v10752_v31  ;;  %22472 = vmatmul.mubr.msk.bf16.gmra.mrb[56].mxu0 %vm566_vm1, %v10756_v13  ;;  %v18993_v31 = vld [vmem:[%s25214_s25 + $0x3fa] sm:$0xff] }
 0x289   : > { %21435 = vmatprep.mubr.msk.bf16.mxu1 %vm566_vm1, %v10753_v30  ;;  %22475 = vmatprep.mubr.msk.bf16.mxu0 %vm566_vm1, %v10757_v51  ;;  %v18994_v30 = vld [vmem:[%s25214_s25 + $0x402] sm:$0xff] }
 0x28a   : > { %v10774_v54 = vpack.c.bf16 %v18994_v30, %v18993_v31  ;;  %v3126_v31 = vld [vmem:[%s25214_s25 + $0x33] sm:$0xff]  ;;  %v3250_v30 = vpack.c.bf16 %v3124_v46, %v3123_v24  ;;  %v19132_v46 = vld [vmem:[%s25214_s25 + $0x1cb] sm:$0xff] }
 0x290   : > { %21436 = vmatmul.mubr.msk.bf16.gmra.mrb[60].mxu1 %vm566_vm1, %v10754_v32  ;;  %22476 = vmatmul.mubr.msk.bf16.gmra.mrb[60].mxu0 %vm566_vm1, %v10758_v39  ;;  %v18997_v32 = vld [vmem:[%s25214_s25 + $0x422] sm:$0xff] }
 0x291   : > { %21439 = vmatprep.mubr.msk.bf16.mxu1 %vm566_vm1, %v10755_v56  ;;  %22479 = vmatprep.mubr.msk.bf16.mxu0 %vm566_vm1, %v10759_v12  ;;  %v18998_v56 = vld [vmem:[%s25214_s25 + $0x42a] sm:$0xff] }
 0x292   : > { %v10776_v4 = vpack.c.bf16 %v18998_v56, %v18997_v32  ;;  %v13129_v56 = vsel %vm759_vm0, %v26293_v1, 0  ;;  %v19102_v1 = vld [vmem:[%s25214_s25 + $0xa3] sm:$0xff] }
 0x298   : > { %21440 = vmatmul.mubr.msk.bf16.gmra.mrb[64].mxu1 %vm566_vm1, %v10756_v13  ;;  %22480 = vmatmul.mubr.msk.bf16.gmra.mrb[64].mxu0 %vm566_vm1, %v10760_v26  ;;  %v19001_v13 = vld [vmem:[%s25214_s25 + $0x44a] sm:$0xff] }
 0x299   : > { %21443 = vmatprep.mubr.msk.bf16.mxu1 %vm566_vm1, %v10757_v51  ;;  %22483 = vmatprep.mubr.msk.bf16.mxu0 %vm566_vm1, %v10761_v19  ;;  %v19002_v51 = vld [vmem:[%s25214_s25 + $0x452] sm:$0xff] }
 0x29a   : > { %v10778_v43 = vpack.c.bf16 %v19002_v51, %v19001_v13  ;;  %v19103_v13 = vld [vmem:[%s25214_s25 + $0xab] sm:$0xff] }
 0x29b   : > { %v11799_v34 = vpack.c.bf16 %v19103_v13, %v19102_v1  ;;  %v19144_v13 = vld [vmem:[%s25214_s25 + $0x243] sm:$0xff] }
 0x2a0   : > { %21444 = vmatmul.mubr.msk.bf16.gmra.mrb[68].mxu1 %vm566_vm1, %v10758_v39  ;;  %22484 = vmatmul.mubr.msk.bf16.gmra.mrb[68].mxu0 %vm566_vm1, %v10762_v53  ;;  %v19005_v39 = vld [vmem:[%s25214_s25 + $0x472] sm:$0xff] }
 0x2a1   : > { %21447 = vmatprep.mubr.msk.bf16.mxu1 %vm566_vm1, %v10759_v12  ;;  %22487 = vmatprep.mubr.msk.bf16.mxu0 %vm566_vm1, %v10763_v63  ;;  %v19006_v12 = vld [vmem:[%s25214_s25 + $0x47a] sm:$0xff] }
 0x2a2   : > { %v10780_v15 = vpack.c.bf16 %v19006_v12, %v19005_v39  ;;  %v19106_v39 = vld [vmem:[%s25214_s25 + $0xcb] sm:$0xff]  ;;  %v19107_v12 = vld [vmem:[%s25214_s25 + $0xd3] sm:$0xff] }
 0x2a3   : > { %v11801_v45 = vpack.c.bf16 %v19107_v12, %v19106_v39  ;;  %v19148_v39 = vld [vmem:[%s25214_s25 + $0x26b] sm:$0xff]  ;;  %v19149_v12 = vld [vmem:[%s25214_s25 + $0x273] sm:$0xff] }
 0x2a8   : > { %21448 = vmatmul.mubr.msk.bf16.gmra.mrb[72].mxu1 %vm566_vm1, %v10760_v26  ;;  %22488 = vmatmul.mubr.msk.bf16.gmra.mrb[72].mxu0 %vm566_vm1, %v10764_v17  ;;  %v19009_v26 = vld [vmem:[%s25214_s25 + $0x49a] sm:$0xff] }
 0x2a9   : > { %21451 = vmatprep.mubr.msk.bf16.mxu1 %vm566_vm1, %v10761_v19  ;;  %22491 = vmatprep.mubr.msk.bf16.mxu0 %vm566_vm1, %v10765_v6  ;;  %v19010_v19 = vld [vmem:[%s25214_s25 + $0x4a2] sm:$0xff] }
 0x2aa   : > { %v10782_v2 = vpack.c.bf16 %v19010_v19, %v19009_v26  ;;  %v19110_v26 = vld [vmem:[%s25214_s25 + $0xf3] sm:$0xff]  ;;  %v19111_v19 = vld [vmem:[%s25214_s25 + $0xfb] sm:$0xff] }
 0x2ab   : > { %v11803_v28 = vpack.c.bf16 %v19111_v19, %v19110_v26  ;;  %v19152_v26 = vld [vmem:[%s25214_s25 + $0x293] sm:$0xff]  ;;  %v19153_v19 = vld [vmem:[%s25214_s25 + $0x29b] sm:$0xff] }
 0x2b0   : > { %21452 = vmatmul.mubr.msk.bf16.gmra.mrb[76].mxu1 %vm566_vm1, %v10762_v53  ;;  %22492 = vmatmul.mubr.msk.bf16.gmra.mrb[76].mxu0 %vm566_vm1, %v10766_v11  ;;  %v19013_v53 = vld [vmem:[%s25214_s25 + $0x4c2] sm:$0xff] }
 0x2b1   : > { %21455 = vmatprep.mubr.msk.bf16.mxu1 %vm566_vm1, %v10763_v63  ;;  %22495 = vmatprep.mubr.msk.bf16.mxu0 %vm566_vm1, %v10767_v10  ;;  %v19014_v63 = vld [vmem:[%s25214_s25 + $0x4ca] sm:$0xff] }
 0x2b2   : > { %v10784_v61 = vpack.c.bf16 %v19014_v63, %v19013_v53  ;;  %v19114_v53 = vld [vmem:[%s25214_s25 + $0x11b] sm:$0xff]  ;;  %v19115_v63 = vld [vmem:[%s25214_s25 + $0x123] sm:$0xff] }
 0x2b3   : > { %v11805_v62 = vpack.c.bf16 %v19115_v63, %v19114_v53  ;;  %v19156_v53 = vld [vmem:[%s25214_s25 + $0x2bb] sm:$0xff]  ;;  %v19157_v63 = vld [vmem:[%s25214_s25 + $0x2c3] sm:$0xff] }
 0x2b8   : > { %21456 = vmatmul.mubr.msk.bf16.gmra.mrb[80].mxu1 %vm566_vm1, %v10764_v17  ;;  %22496 = vmatmul.mubr.msk.bf16.gmra.mrb[80].mxu0 %vm566_vm1, %v10768_v18  ;;  %v19017_v17 = vld [vmem:[%s25214_s25 + $0x4ea] sm:$0xff] }
 0x2b9   : > { %21459 = vmatprep.mubr.msk.bf16.mxu1 %vm566_vm1, %v10765_v6  ;;  %22499 = vmatprep.mubr.msk.bf16.mxu0 %vm566_vm1, %v10769_v25  ;;  %v19018_v6 = vld [vmem:[%s25214_s25 + $0x4f2] sm:$0xff] }
 0x2ba   : > { %v10786_v9 = vpack.c.bf16 %v19018_v6, %v19017_v17  ;;  %v19118_v17 = vld [vmem:[%s25214_s25 + $0x143] sm:$0xff]  ;;  %v19119_v6 = vld [vmem:[%s25214_s25 + $0x14b] sm:$0xff] }
 0x2bb   : > { %v11807_v3 = vpack.c.bf16 %v19119_v6, %v19118_v17  ;;  %v26567_v17 = vld [vmem:[%s28231_s1 + $0x28] sm:$0x3f]  }
 0x2bc   : > { %v19160_v6 = vld [vmem:[%s25214_s25 + $0x2e3] sm:$0xff] }
 0x2c0   : > { %21460 = vmatmul.mubr.msk.bf16.gmra.mrb[84].mxu1 %vm566_vm1, %v10766_v11  ;;  %22500 = vmatmul.mubr.msk.bf16.gmra.mrb[84].mxu0 %vm566_vm1, %v10770_v22  ;;  %v19021_v11 = vld [vmem:[%s25214_s25 + $0x512] sm:$0xff] }
 0x2c1   : > { %21463 = vmatprep.mubr.msk.bf16.mxu1 %vm566_vm1, %v10767_v10  ;;  %22503 = vmatprep.mubr.msk.bf16.mxu0 %vm566_vm1, %v10771_v5  ;;  %v19022_v10 = vld [vmem:[%s25214_s25 + $0x51a] sm:$0xff] }
 0x2c2   : > { %v10788_v27 = vpack.c.bf16 %v19022_v10, %v19021_v11  ;;  %v19122_v11 = vld [vmem:[%s25214_s25 + $0x16b] sm:$0xff]  ;;  %v19123_v10 = vld [vmem:[%s25214_s25 + $0x173] sm:$0xff] }
 0x2c3   : > { %v11809_v29 = vpack.c.bf16 %v19123_v10, %v19122_v11 }
 0x2c8   : > { %21464 = vmatmul.mubr.msk.bf16.gmra.mrb[88].mxu1 %vm566_vm1, %v10768_v18  ;;  %22504 = vmatmul.mubr.msk.bf16.gmra.mrb[88].mxu0 %vm566_vm1, %v10772_v40  ;;  %v19025_v18 = vld [vmem:[%s25214_s25 + $0x53a] sm:$0xff] }
 0x2c9   : > { %21467 = vmatprep.mubr.msk.bf16.mxu1 %vm566_vm1, %v10769_v25  ;;  %22507 = vmatprep.mubr.msk.bf16.mxu0 %vm566_vm1, %v10773_v16  ;;  %v19026_v25 = vld [vmem:[%s25214_s25 + $0x542] sm:$0xff] }
 0x2d0   : > { %21468 = vmatmul.mubr.msk.bf16.gmra.mrb[92].mxu1 %vm566_vm1, %v10770_v22  ;;  %22508 = vmatmul.mubr.msk.bf16.gmra.mrb[92].mxu0 %vm566_vm1, %v10774_v54  ;;  %v10790_v22 = vpack.c.bf16 %v19026_v25, %v19025_v18  ;;  %v19126_v18 = vld [vmem:[%s25214_s25 + $0x193] sm:$0xff]  ;;  %v19127_v25 = vld [vmem:[%s25214_s25 + $0x19b] sm:$0xff] }
 0x2d1   : > { %21471 = vmatprep.mubr.msk.bf16.mxu1 %vm566_vm1, %v10771_v5  ;;  %22511 = vmatprep.mubr.msk.bf16.mxu0 %vm566_vm1, %v10775_v41  ;;  %v3249_v5 = vpack.c.bf16 %v3122_v50, %v3121_v0  ;;  %v11811_v50 = vpack.c.bf16 %v19127_v25, %v19126_v18 }
 0x2d8   : > { %21472 = vmatmul.mubr.msk.bf16.gmra.mrb[96].mxu1 %vm566_vm1, %v10772_v40  ;;  %22512 = vmatmul.mubr.msk.bf16.gmra.mrb[96].mxu0 %vm566_vm1, %v10776_v4  ;;  %v19097_v40 = vld [vmem:[%s25214_s25 + $0x6b] sm:$0xff] }
 0x2d9   : > { %21475 = vmatprep.mubr.msk.bf16.mxu1 %vm566_vm1, %v10773_v16  ;;  %22515 = vmatprep.mubr.msk.bf16.mxu0 %vm566_vm1, %v10777_v55  ;;  %v3125_v16 = vld [vmem:[%s25214_s25 + $0x2b] sm:$0xff] }
 0x2da   : > { %v3251_v32 = vpack.c.bf16 %v3126_v31, %v3125_v16  ;;  %v19135_v16 = vld [vmem:[%s25214_s25 + $0x1eb] sm:$0xff] }
 0x2e0   : > { %21476 = vmatmul.mubr.msk.bf16.gmra.mrb[100].mxu1 %vm566_vm1, %v10774_v54  ;;  %22516 = vmatmul.mubr.msk.bf16.gmra.mrb[100].mxu0 %vm566_vm1, %v10778_v43  ;;  %v11796_v54 = vpack.c.bf16 %v19097_v40, %v19096_v14  ;;  %v19133_v14 = vld [vmem:[%s25214_s25 + $0x1d3] sm:$0xff]  ;;  %v19134_v40 = vld [vmem:[%s25214_s25 + $0x1e3] sm:$0xff] }
 0x2e1   : > { %21479 = vmatprep.mubr.msk.bf16.mxu1 %vm566_vm1, %v10775_v41  ;;  %22519 = vmatprep.mubr.msk.bf16.mxu0 %vm566_vm1, %v10779_v35  ;;  %v4583_v41 = vsel %vm759_vm0, %v26285_v42, 0  ;;  %v19100_v42 = vld [vmem:[%s25214_s25 + $0x8b] sm:$0xff]  ;;  %v11814_v31 = vpack.c.bf16 %v19133_v14, %v19132_v46  ;;  %v19174_v46 = vld [vmem:[%s25214_s25 + $0x373] sm:$0xff]  ;;  %v19175_v14 = vld [vmem:[%s25214_s25 + $0x37b] sm:$0xff] }
 0x2e8   : > { %21480 = vmatmul.mubr.msk.bf16.gmra.mrb[104].mxu1 %vm566_vm1, %v10776_v4  ;;  %22520 = vmatmul.mubr.msk.bf16.gmra.mrb[104].mxu0 %vm566_vm1, %v10780_v15  ;;  %v3128_v4 = vld [vmem:[%s25214_s25 + $0x43] sm:$0xff] }
 0x2e9   : > { %21483 = vmatprep.mubr.msk.bf16.mxu1 %vm566_vm1, %v10777_v55  ;;  %22523 = vmatprep.mubr.msk.bf16.mxu0 %vm566_vm1, %v10781_v21  ;;  %v19101_v55 = vld [vmem:[%s25214_s25 + $0x93] sm:$0xff]  ;;  %v3252_v51 = vpack.c.bf16 %v3128_v4, %v3127_v48  ;;  %v19141_v48 = vld [vmem:[%s25214_s25 + $0x223] sm:$0xff] }
 0x2ea   : > { %v11798_v7 = vpack.c.bf16 %v19101_v55, %v19100_v42  ;;  %v19142_v4 = vld [vmem:[%s25214_s25 + $0x233] sm:$0xff]  ;;  %v19143_v42 = vld [vmem:[%s25214_s25 + $0x23b] sm:$0xff] }
 0x2eb   : > { %v11819_v1 = vpack.c.bf16 %v19143_v42, %v19142_v4 }
 0x2f0   : > { %21484 = vmatmul.mubr.msk.bf16.gmra.mrb[108].mxu1 %vm566_vm1, %v10778_v43  ;;  %22524 = vmatmul.mubr.msk.bf16.gmra.mrb[108].mxu0 %vm566_vm1, %v10782_v2  ;;  %v19104_v43 = vld [vmem:[%s25214_s25 + $0xb3] sm:$0xff] }
 0x2f1   : > { %21487 = vmatprep.mubr.msk.bf16.mxu1 %vm566_vm1, %v10779_v35  ;;  %22527 = vmatprep.mubr.msk.bf16.mxu0 %vm566_vm1, %v10783_v57  ;;  %v19105_v35 = vld [vmem:[%s25214_s25 + $0xbb] sm:$0xff] }
 0x2f2   : > { %v11800_v58 = vpack.c.bf16 %v19105_v35, %v19104_v43 }
 0x2f8   : > { %21488 = vmatmul.mubr.msk.bf16.gmra.mrb[112].mxu1 %vm566_vm1, %v10780_v15  ;;  %22528 = vmatmul.mubr.msk.bf16.gmra.mrb[112].mxu0 %vm566_vm1, %v10784_v61  ;;  %v19108_v15 = vld [vmem:[%s25214_s25 + $0xdb] sm:$0xff] }
 0x2f9   : > { %21491 = vmatprep.mubr.msk.bf16.mxu1 %vm566_vm1, %v10781_v21  ;;  %22531 = vmatprep.mubr.msk.bf16.mxu0 %vm566_vm1, %v10785_v49  ;;  %v19109_v21 = vld [vmem:[%s25214_s25 + $0xe3] sm:$0xff] }
 0x2fa   : > { %v11802_v60 = vpack.c.bf16 %v19109_v21, %v19108_v15  ;;  %v11822_v15 = vpack.c.bf16 %v19149_v12, %v19148_v39  ;;  %v19190_v39 = vld [vmem:[%s25214_s25 + $0x413] sm:$0xff]  ;;  %v19191_v12 = vld [vmem:[%s25214_s25 + $0x41b] sm:$0xff] }
 0x300   : > { %21492 = vmatmul.mubr.msk.bf16.gmra.mrb[116].mxu1 %vm566_vm1, %v10782_v2  ;;  %22532 = vmatmul.mubr.msk.bf16.gmra.mrb[116].mxu0 %vm566_vm1, %v10786_v9  ;;  %v19112_v2 = vld [vmem:[%s25214_s25 + $0x103] sm:$0xff] }
 0x301   : > { %21495 = vmatprep.mubr.msk.bf16.mxu1 %vm566_vm1, %v10783_v57  ;;  %22535 = vmatprep.mubr.msk.bf16.mxu0 %vm566_vm1, %v10787_v8  ;;  %v19113_v57 = vld [vmem:[%s25214_s25 + $0x10b] sm:$0xff]  ;;  %v19121_v8 = vld [vmem:[%s25214_s25 + $0x15b] sm:$0xff] }
 0x302   : > { %v11804_v44 = vpack.c.bf16 %v19113_v57, %v19112_v2  ;;  %v11824_v2 = vpack.c.bf16 %v19153_v19, %v19152_v26  ;;  %v19194_v26 = vld [vmem:[%s25214_s25 + $0x43b] sm:$0xff]  ;;  %v19195_v19 = vld [vmem:[%s25214_s25 + $0x443] sm:$0xff] }
 0x308   : > { %21496 = vmatmul.mubr.msk.bf16.gmra.mrb[120].mxu1 %vm566_vm1, %v10784_v61  ;;  %22536 = vmatmul.mubr.msk.bf16.gmra.mrb[120].mxu0 %vm566_vm1, %v10788_v27  ;;  %v19116_v61 = vld [vmem:[%s25214_s25 + $0x12b] sm:$0xff]  ;;  %v19124_v27 = vld [vmem:[%s25214_s25 + $0x17b] sm:$0xff] }
 0x309   : > { %21499 = vmatprep.mubr.msk.bf16.mxu1 %vm566_vm1, %v10785_v49  ;;  %22539 = vmatprep.mubr.msk.bf16.mxu0 %vm566_vm1, %v10789_v23  ;;  %v19117_v49 = vld [vmem:[%s25214_s25 + $0x133] sm:$0xff]  ;;  %v19125_v23 = vld [vmem:[%s25214_s25 + $0x183] sm:$0xff] }
 0x30a   : > { %v11806_v36 = vpack.c.bf16 %v19117_v49, %v19116_v61  ;;  %v11810_v0 = vpack.c.bf16 %v19125_v23, %v19124_v27  ;;  %v11826_v61 = vpack.c.bf16 %v19157_v63, %v19156_v53  ;;  %v19166_v27 = vld [vmem:[%s25214_s25 + $0x323] sm:$0xff]  ;;  %v19167_v23 = vld [vmem:[%s25214_s25 + $0x32b] sm:$0xff] }
 0x30b   : > { %v11831_v25 = vpack.c.bf16 %v19167_v23, %v19166_v27  ;;  %v19198_v53 = vld [vmem:[%s25214_s25 + $0x463] sm:$0xff]  ;;  %v19199_v63 = vld [vmem:[%s25214_s25 + $0x46b] sm:$0xff] }
 0x310   : > { %21500 = vmatmul.mubr.msk.bf16.gmra.mrb[124].mxu1 %vm566_vm1, %v10786_v9  ;;  %22540 = vmatmul.mubr.msk.bf16.gmra.mrb[124].mxu0 %vm566_vm1, %v10790_v22  ;;  %v19120_v9 = vld [vmem:[%s25214_s25 + $0x153] sm:$0xff]  ;;  %v19130_v22 = vld [vmem:[%s25214_s25 + $0x1bb] sm:$0xff] }
 0x311   : > { %21505 = vmatprep.mubr.msk.bf16.mxu1 %vm566_vm1, %v3249_v5  ;;  %22545 = vmatprep.mubr.msk.bf16.mxu0 %vm566_vm1, %v11795_v38  ;;  %v11808_v59 = vpack.c.bf16 %v19121_v8, %v19120_v9  ;;  %v19131_v5 = vld [vmem:[%s25214_s25 + $0x1c3] sm:$0xff]  ;;  %v19162_v9 = vld [vmem:[%s25214_s25 + $0x2fb] sm:$0xff] }
 0x312   : > { %v11813_v24 = vpack.c.bf16 %v19131_v5, %v19130_v22  ;;  %v19163_v8 = vld [vmem:[%s25214_s25 + $0x303] sm:$0xff] }
 0x313   : > { %v11829_v10 = vpack.c.bf16 %v19163_v8, %v19162_v9 }
 0x318   : > { %21506 = vmatmul.mubr.msk.bf16.vlgmr.msra.gmra.mrb[0].mxu1 %vm566_vm1, %v3250_v30  ;;  %22546 = vmatmul.mubr.msk.bf16.vlgmr.msra.gmra.mrb[0].mxu0 %vm566_vm1, %v11796_v54  ;;  %v11815_v30 = vpack.c.bf16 %v19135_v16, %v19134_v40  ;;  %v11835_v16 = vpack.c.bf16 %v19175_v14, %v19174_v46 }
 0x319   : > { %21634 = vmatpush3.bf16.msra.mxu1 %v4583_v41  ;;  %22674 = vmatpush3.bf16.msra.mxu0 %v13129_v56  ;;  %v19139_v41 = vld [vmem:[%s25214_s25 + $0x213] sm:$0xff] }
 0x31a   : > { %21509 = vmatprep.mubr.msk.bf16.mxu1 %vm566_vm1, %v3251_v32  ;;  %22549 = vmatprep.mubr.msk.bf16.mxu0 %vm566_vm1, %v11797_v47  ;;  %v11816_v32 = vpack.c.bf16 %v19137_v37, %v19136_v33  ;;  %v19178_v33 = vld [vmem:[%s25214_s25 + $0x39b] sm:$0xff]  ;;  %v19179_v37 = vld [vmem:[%s25214_s25 + $0x3a3] sm:$0xff] }
 0x31b   : > { %25118 = vmatprep.subr.msk.bf16.mxu1 %vm759_vm0, %v26567_v17 }
 0x320   : > { %21510 = vmatmul.mubr.msk.bf16.gmra.mrb[4].mxu1 %vm566_vm1, %v3252_v51  ;;  %22550 = vmatmul.mubr.msk.bf16.gmra.mrb[4].mxu0 %vm566_vm1, %v11798_v7  ;;  %v19145_v51 = vld [vmem:[%s25214_s25 + $0x24b] sm:$0xff] }
 0x321   : > { %21513 = vmatprep.mubr.msk.bf16.mxu1 %vm566_vm1, %v11795_v38  ;;  %22553 = vmatprep.mubr.msk.bf16.mxu0 %vm566_vm1, %v11799_v34  ;;  %v11812_v38 = vpack.c.bf16 %v19129_v52, %v19128_v20  ;;  %v11820_v43 = vpack.c.bf16 %v19145_v51, %v19144_v13  ;;  %v19170_v20 = vld [vmem:[%s25214_s25 + $0x34b] sm:$0xff]  ;;  %v19171_v52 = vld [vmem:[%s25214_s25 + $0x353] sm:$0xff] }
 0x322   : > { %v11833_v5 = vpack.c.bf16 %v19171_v52, %v19170_v20  ;;  %v19186_v13 = vld [vmem:[%s25214_s25 + $0x3eb] sm:$0xff]  ;;  %v19187_v51 = vld [vmem:[%s25214_s25 + $0x3f3] sm:$0xff] }
 0x328   : > { %21514 = vmatmul.mubr.msk.bf16.gmra.mrb[8].mxu1 %vm566_vm1, %v11796_v54  ;;  %22554 = vmatmul.mubr.msk.bf16.gmra.mrb[8].mxu0 %vm566_vm1, %v11800_v58  ;;  %v19138_v54 = vld [vmem:[%s25214_s25 + $0x20b] sm:$0xff] }
 0x329   : > { %21517 = vmatprep.mubr.msk.bf16.mxu1 %vm566_vm1, %v11797_v47  ;;  %22557 = vmatprep.mubr.msk.bf16.mxu0 %vm566_vm1, %v11801_v45  ;;  %v11817_v56 = vpack.c.bf16 %v19139_v41, %v19138_v54  ;;  %v19140_v47 = vld [vmem:[%s25214_s25 + $0x21b] sm:$0xff]  ;;  %v11837_v41 = vpack.c.bf16 %v19179_v37, %v19178_v33 }
 0x32a   : > { %v11818_v55 = vpack.c.bf16 %v19141_v48, %v19140_v47  ;;  %v19182_v47 = vld [vmem:[%s25214_s25 + $0x3c3] sm:$0xff]  ;;  %v19183_v48 = vld [vmem:[%s25214_s25 + $0x3cb] sm:$0xff] }
 0x32b   : > { %v11839_v42 = vpack.c.bf16 %v19183_v48, %v19182_v47  ;;  %v19289_v47 = vld [vmem:[%s25214_s25 + $0x78] sm:$0xff]  ;;  %v19290_v48 = vld [vmem:[%s25214_s25 + $0x80] sm:$0xff] }
 0x330   : > { %21518 = vmatmul.mubr.msk.bf16.gmra.mrb[12].mxu1 %vm566_vm1, %v11798_v7  ;;  %22558 = vmatmul.mubr.msk.bf16.gmra.mrb[12].mxu0 %vm566_vm1, %v11802_v60  ;;  %v19146_v7 = vld [vmem:[%s25214_s25 + $0x25b] sm:$0xff] }
 0x331   : > { %21521 = vmatprep.mubr.msk.bf16.mxu1 %vm566_vm1, %v11799_v34  ;;  %22561 = vmatprep.mubr.msk.bf16.mxu0 %vm566_vm1, %v11803_v28  ;;  %v19147_v34 = vld [vmem:[%s25214_s25 + $0x263] sm:$0xff] }
 0x332   : > { %v11821_v35 = vpack.c.bf16 %v19147_v34, %v19146_v7  ;;  %v11841_v34 = vpack.c.bf16 %v19187_v51, %v19186_v13  ;;  %v17732_v13 = vld [vmem:[%s25214_s25 + $0x40] sm:$0xff]  ;;  %v19291_v51 = vld [vmem:[%s25214_s25 + $0x88] sm:$0xff] }
 0x338   : > { %21522 = vmatmul.mubr.msk.bf16.gmra.mrb[16].mxu1 %vm566_vm1, %v11800_v58  ;;  %22562 = vmatmul.mubr.msk.bf16.gmra.mrb[16].mxu0 %vm566_vm1, %v11804_v44  ;;  %v19150_v58 = vld [vmem:[%s25214_s25 + $0x283] sm:$0xff] }
 0x339   : > { %21525 = vmatprep.mubr.msk.bf16.mxu1 %vm566_vm1, %v11801_v45  ;;  %22565 = vmatprep.mubr.msk.bf16.mxu0 %vm566_vm1, %v11805_v62  ;;  %v19151_v45 = vld [vmem:[%s25214_s25 + $0x28b] sm:$0xff] }
 0x33a   : > { %v11823_v21 = vpack.c.bf16 %v19151_v45, %v19150_v58  ;;  %v11843_v45 = vpack.c.bf16 %v19191_v12, %v19190_v39  ;;  %v19293_v39 = vld [vmem:[%s25214_s25 + $0xa0] sm:$0xff]  ;;  %v19294_v12 = vld [vmem:[%s25214_s25 + $0xa8] sm:$0xff] }
 0x340   : > { %21526 = vmatmul.mubr.msk.bf16.gmra.mrb[20].mxu1 %vm566_vm1, %v11802_v60  ;;  %22566 = vmatmul.mubr.msk.bf16.gmra.mrb[20].mxu0 %vm566_vm1, %v11806_v36  ;;  %v19154_v60 = vld [vmem:[%s25214_s25 + $0x2ab] sm:$0xff] }
 0x341   : > { %21529 = vmatprep.mubr.msk.bf16.mxu1 %vm566_vm1, %v11803_v28  ;;  %22569 = vmatprep.mubr.msk.bf16.mxu0 %vm566_vm1, %v11807_v3  ;;  %v19155_v28 = vld [vmem:[%s25214_s25 + $0x2b3] sm:$0xff] }
 0x342   : > { %v11825_v57 = vpack.c.bf16 %v19155_v28, %v19154_v60  ;;  %v11845_v28 = vpack.c.bf16 %v19195_v19, %v19194_v26  ;;  %v12866_v26 = vpack.c.bf16 %v19294_v12, %v19293_v39  ;;  %v17735_v19 = vld [vmem:[%s25214_s25 + $0x60] sm:$0xff]  ;;  %v19331_v39 = vld [vmem:[%s25214_s25 + $0x218] sm:$0xff] }
 0x343   : > { %v19332_v12 = vld [vmem:[%s25214_s25 + $0x220] sm:$0xff] }
 0x348   : > { %21530 = vmatmul.mubr.msk.bf16.gmra.mrb[24].mxu1 %vm566_vm1, %v11804_v44  ;;  %22570 = vmatmul.mubr.msk.bf16.gmra.mrb[24].mxu0 %vm566_vm1, %v11808_v59  ;;  %v19158_v44 = vld [vmem:[%s25214_s25 + $0x2d3] sm:$0xff] }
 0x349   : > { %21533 = vmatprep.mubr.msk.bf16.mxu1 %vm566_vm1, %v11805_v62  ;;  %22573 = vmatprep.mubr.msk.bf16.mxu0 %vm566_vm1, %v11809_v29  ;;  %v19159_v62 = vld [vmem:[%s25214_s25 + $0x2db] sm:$0xff] }
 0x34a   : > { %v11827_v49 = vpack.c.bf16 %v19159_v62, %v19158_v44  ;;  %v11847_v62 = vpack.c.bf16 %v19199_v63, %v19198_v53 }
 0x350   : > { %21534 = vmatmul.mubr.msk.bf16.gmra.mrb[28].mxu1 %vm566_vm1, %v11806_v36  ;;  %22574 = vmatmul.mubr.msk.bf16.gmra.mrb[28].mxu0 %vm566_vm1, %v11810_v0  ;;  %v19161_v36 = vld [vmem:[%s25214_s25 + $0x2eb] sm:$0xff] }
 0x351   : > { %21537 = vmatprep.mubr.msk.bf16.mxu1 %vm566_vm1, %v11807_v3  ;;  %22577 = vmatprep.mubr.msk.bf16.mxu0 %vm566_vm1, %v11811_v50  ;;  %v26575_v3 = vld [vmem:[%s28231_s1 + $0x68] sm:$0x3f]   ;;  %v11828_v11 = vpack.c.bf16 %v19161_v36, %v19160_v6  ;;  %v19203_v36 = vld [vmem:[%s25214_s25 + $0x493] sm:$0xff] }
 0x352   : > { %25126 = vmatprep.subr.msk.bf16.mxu0 %vm759_vm0, %v26575_v3  ;;  %v19202_v6 = vld [vmem:[%s25214_s25 + $0x48b] sm:$0xff] }
 0x353   : > { %v11849_v8 = vpack.c.bf16 %v19203_v36, %v19202_v6 }
 0x358   : > { %21538 = vmatmul.mubr.msk.bf16.gmra.mrb[32].mxu1 %vm566_vm1, %v11808_v59  ;;  %22578 = vmatmul.mubr.msk.bf16.gmra.mrb[32].mxu0 %vm566_vm1, %v11812_v38  ;;  %v19164_v59 = vld [vmem:[%s25214_s25 + $0x30b] sm:$0xff] }
 0x359   : > { %21541 = vmatprep.mubr.msk.bf16.mxu1 %vm566_vm1, %v11809_v29  ;;  %22581 = vmatprep.mubr.msk.bf16.mxu0 %vm566_vm1, %v11813_v24  ;;  %v19165_v29 = vld [vmem:[%s25214_s25 + $0x313] sm:$0xff] }
 0x35a   : > { %v11830_v18 = vpack.c.bf16 %v19165_v29, %v19164_v59  ;;  %v19206_v59 = vld [vmem:[%s25214_s25 + $0x4b3] sm:$0xff]  ;;  %v19207_v29 = vld [vmem:[%s25214_s25 + $0x4bb] sm:$0xff] }
 0x35b   : > { %v11851_v23 = vpack.c.bf16 %v19207_v29, %v19206_v59 }
 0x360   : > { %21542 = vmatmul.mubr.msk.bf16.gmra.mrb[36].mxu1 %vm566_vm1, %v11810_v0  ;;  %22582 = vmatmul.mubr.msk.bf16.gmra.mrb[36].mxu0 %vm566_vm1, %v11814_v31  ;;  %v19168_v0 = vld [vmem:[%s25214_s25 + $0x333] sm:$0xff] }
 0x361   : > { %21545 = vmatprep.mubr.msk.bf16.mxu1 %vm566_vm1, %v11811_v50  ;;  %22585 = vmatprep.mubr.msk.bf16.mxu0 %vm566_vm1, %v11815_v30  ;;  %v19169_v50 = vld [vmem:[%s25214_s25 + $0x33b] sm:$0xff] }
 0x362   : > { %v11832_v22 = vpack.c.bf16 %v19169_v50, %v19168_v0  ;;  %v19210_v0 = vld [vmem:[%s25214_s25 + $0x4db] sm:$0xff]  ;;  %v19211_v50 = vld [vmem:[%s25214_s25 + $0x4e3] sm:$0xff] }
 0x363   : > { %v11853_v52 = vpack.c.bf16 %v19211_v50, %v19210_v0 }
 0x368   : > { %21546 = vmatmul.mubr.msk.bf16.gmra.mrb[40].mxu1 %vm566_vm1, %v11812_v38  ;;  %22586 = vmatmul.mubr.msk.bf16.gmra.mrb[40].mxu0 %vm566_vm1, %v11816_v32  ;;  %v19172_v38 = vld [vmem:[%s25214_s25 + $0x35b] sm:$0xff] }
 0x369   : > { %21549 = vmatprep.mubr.msk.bf16.mxu1 %vm566_vm1, %v11813_v24  ;;  %22589 = vmatprep.mubr.msk.bf16.mxu0 %vm566_vm1, %v11817_v56  ;;  %v19173_v24 = vld [vmem:[%s25214_s25 + $0x363] sm:$0xff] }
 0x36a   : > { %v11834_v40 = vpack.c.bf16 %v19173_v24, %v19172_v38  ;;  %v19214_v38 = vld [vmem:[%s25214_s25 + $0x503] sm:$0xff]  ;;  %v19215_v24 = vld [vmem:[%s25214_s25 + $0x50b] sm:$0xff] }
 0x36b   : > { %v11855_v14 = vpack.c.bf16 %v19215_v24, %v19214_v38 }
 0x370   : > { %21550 = vmatmul.mubr.msk.bf16.gmra.mrb[44].mxu1 %vm566_vm1, %v11814_v31  ;;  %22590 = vmatmul.mubr.msk.bf16.gmra.mrb[44].mxu0 %vm566_vm1, %v11818_v55  ;;  %v19176_v31 = vld [vmem:[%s25214_s25 + $0x383] sm:$0xff] }
 0x371   : > { %21553 = vmatprep.mubr.msk.bf16.mxu1 %vm566_vm1, %v11815_v30  ;;  %22593 = vmatprep.mubr.msk.bf16.mxu0 %vm566_vm1, %v11819_v1  ;;  %v19177_v30 = vld [vmem:[%s25214_s25 + $0x38b] sm:$0xff] }
 0x372   : > { %v11836_v54 = vpack.c.bf16 %v19177_v30, %v19176_v31  ;;  %v19218_v31 = vld [vmem:[%s25214_s25 + $0x52b] sm:$0xff]  ;;  %v19219_v30 = vld [vmem:[%s25214_s25 + $0x533] sm:$0xff] }
 0x373   : > { %v11857_v37 = vpack.c.bf16 %v19219_v30, %v19218_v31 }
 0x378   : > { %21554 = vmatmul.mubr.msk.bf16.gmra.mrb[48].mxu1 %vm566_vm1, %v11816_v32  ;;  %22594 = vmatmul.mubr.msk.bf16.gmra.mrb[48].mxu0 %vm566_vm1, %v11820_v43  ;;  %v19180_v32 = vld [vmem:[%s25214_s25 + $0x3ab] sm:$0xff] }
 0x379   : > { %21557 = vmatprep.mubr.msk.bf16.mxu1 %vm566_vm1, %v11817_v56  ;;  %22597 = vmatprep.mubr.msk.bf16.mxu0 %vm566_vm1, %v11821_v35  ;;  %v19181_v56 = vld [vmem:[%s25214_s25 + $0x3b3] sm:$0xff] }
 0x37a   : > { %v11838_v4 = vpack.c.bf16 %v19181_v56, %v19180_v32  ;;  %v17729_v32 = vld [vmem:[%s25214_s25 + $0x28] sm:$0xff]  ;;  %v17730_v56 = vld [vmem:[%s25214_s25 + $0x30] sm:$0xff] }
 0x380   : > { %21558 = vmatmul.mubr.msk.bf16.gmra.mrb[52].mxu1 %vm566_vm1, %v11818_v55  ;;  %22598 = vmatmul.mubr.msk.bf16.gmra.mrb[52].mxu0 %vm566_vm1, %v11822_v15  ;;  %v19184_v55 = vld [vmem:[%s25214_s25 + $0x3d3] sm:$0xff] }
 0x381   : > { %21561 = vmatprep.mubr.msk.bf16.mxu1 %vm566_vm1, %v11819_v1  ;;  %22601 = vmatprep.mubr.msk.bf16.mxu0 %vm566_vm1, %v11823_v21  ;;  %v19185_v1 = vld [vmem:[%s25214_s25 + $0x3db] sm:$0xff] }
 0x382   : > { %v11840_v7 = vpack.c.bf16 %v19185_v1, %v19184_v55  ;;  %v12864_v55 = vpack.c.bf16 %v19290_v48, %v19289_v47  ;;  %v17731_v1 = vld [vmem:[%s25214_s25 + $0x38] sm:$0xff]  ;;  %v19323_v47 = vld [vmem:[%s25214_s25 + $0x1c8] sm:$0xff]  ;;  %v19324_v48 = vld [vmem:[%s25214_s25 + $0x1d0] sm:$0xff] }
 0x388   : > { %21562 = vmatmul.mubr.msk.bf16.gmra.mrb[56].mxu1 %vm566_vm1, %v11820_v43  ;;  %22602 = vmatmul.mubr.msk.bf16.gmra.mrb[56].mxu0 %vm566_vm1, %v11824_v2  ;;  %v19188_v43 = vld [vmem:[%s25214_s25 + $0x3fb] sm:$0xff] }
 0x389   : > { %21565 = vmatprep.mubr.msk.bf16.mxu1 %vm566_vm1, %v11821_v35  ;;  %22605 = vmatprep.mubr.msk.bf16.mxu0 %vm566_vm1, %v11825_v57  ;;  %v19189_v35 = vld [vmem:[%s25214_s25 + $0x403] sm:$0xff] }
 0x38a   : > { %v11842_v58 = vpack.c.bf16 %v19189_v35, %v19188_v43  ;;  %v17734_v43 = vld [vmem:[%s25214_s25 + $0x58] sm:$0xff]  ;;  %v4319_v35 = vpack.c.bf16 %v17732_v13, %v17731_v1  ;;  %v19327_v13 = vld [vmem:[%s25214_s25 + $0x1f0] sm:$0xff] }
 0x390   : > { %21566 = vmatmul.mubr.msk.bf16.gmra.mrb[60].mxu1 %vm566_vm1, %v11822_v15  ;;  %22606 = vmatmul.mubr.msk.bf16.gmra.mrb[60].mxu0 %vm566_vm1, %v11826_v61  ;;  %v19192_v15 = vld [vmem:[%s25214_s25 + $0x423] sm:$0xff] }
 0x391   : > { %21569 = vmatprep.mubr.msk.bf16.mxu1 %vm566_vm1, %v11823_v21  ;;  %22609 = vmatprep.mubr.msk.bf16.mxu0 %vm566_vm1, %v11827_v49  ;;  %v19193_v21 = vld [vmem:[%s25214_s25 + $0x42b] sm:$0xff] }
 0x392   : > { %v11844_v60 = vpack.c.bf16 %v19193_v21, %v19192_v15  ;;  %v14197_v21 = vsel %vm759_vm0, %v26575_v3, 0  ;;  %v19297_v3 = vld [vmem:[%s25214_s25 + $0xc8] sm:$0xff] }
 0x398   : > { %21570 = vmatmul.mubr.msk.bf16.gmra.mrb[64].mxu1 %vm566_vm1, %v11824_v2  ;;  %22610 = vmatmul.mubr.msk.bf16.gmra.mrb[64].mxu0 %vm566_vm1, %v11828_v11  ;;  %v19196_v2 = vld [vmem:[%s25214_s25 + $0x44b] sm:$0xff] }
 0x399   : > { %21573 = vmatprep.mubr.msk.bf16.mxu1 %vm566_vm1, %v11825_v57  ;;  %22613 = vmatprep.mubr.msk.bf16.mxu0 %vm566_vm1, %v11829_v10  ;;  %v19197_v57 = vld [vmem:[%s25214_s25 + $0x453] sm:$0xff] }
 0x39a   : > { %v11846_v44 = vpack.c.bf16 %v19197_v57, %v19196_v2  ;;  %v19298_v2 = vld [vmem:[%s25214_s25 + $0xd0] sm:$0xff] }
 0x39b   : > { %v12868_v63 = vpack.c.bf16 %v19298_v2, %v19297_v3  ;;  %v19339_v2 = vld [vmem:[%s25214_s25 + $0x268] sm:$0xff] }
 0x3a0   : > { %21574 = vmatmul.mubr.msk.bf16.gmra.mrb[68].mxu1 %vm566_vm1, %v11826_v61  ;;  %22614 = vmatmul.mubr.msk.bf16.gmra.mrb[68].mxu0 %vm566_vm1, %v11830_v18  ;;  %v19200_v61 = vld [vmem:[%s25214_s25 + $0x473] sm:$0xff] }
 0x3a1   : > { %21577 = vmatprep.mubr.msk.bf16.mxu1 %vm566_vm1, %v11827_v49  ;;  %22617 = vmatprep.mubr.msk.bf16.mxu0 %vm566_vm1, %v11831_v25  ;;  %v19201_v49 = vld [vmem:[%s25214_s25 + $0x47b] sm:$0xff] }
 0x3a2   : > { %v11848_v9 = vpack.c.bf16 %v19201_v49, %v19200_v61  ;;  %v19301_v61 = vld [vmem:[%s25214_s25 + $0xf0] sm:$0xff]  ;;  %v19302_v49 = vld [vmem:[%s25214_s25 + $0xf8] sm:$0xff] }
 0x3a3   : > { %v12870_v36 = vpack.c.bf16 %v19302_v49, %v19301_v61  ;;  %v19343_v61 = vld [vmem:[%s25214_s25 + $0x290] sm:$0xff]  ;;  %v19344_v49 = vld [vmem:[%s25214_s25 + $0x298] sm:$0xff] }
 0x3a8   : > { %21578 = vmatmul.mubr.msk.bf16.gmra.mrb[72].mxu1 %vm566_vm1, %v11828_v11  ;;  %22618 = vmatmul.mubr.msk.bf16.gmra.mrb[72].mxu0 %vm566_vm1, %v11832_v22  ;;  %v19204_v11 = vld [vmem:[%s25214_s25 + $0x49b] sm:$0xff] }
 0x3a9   : > { %21581 = vmatprep.mubr.msk.bf16.mxu1 %vm566_vm1, %v11829_v10  ;;  %22621 = vmatprep.mubr.msk.bf16.mxu0 %vm566_vm1, %v11833_v5  ;;  %v19205_v10 = vld [vmem:[%s25214_s25 + $0x4a3] sm:$0xff] }
 0x3aa   : > { %v11850_v27 = vpack.c.bf16 %v19205_v10, %v19204_v11  ;;  %v19305_v11 = vld [vmem:[%s25214_s25 + $0x118] sm:$0xff]  ;;  %v19306_v10 = vld [vmem:[%s25214_s25 + $0x120] sm:$0xff] }
 0x3ab   : > { %v12872_v29 = vpack.c.bf16 %v19306_v10, %v19305_v11  ;;  %v19347_v11 = vld [vmem:[%s25214_s25 + $0x2b8] sm:$0xff]  ;;  %v19348_v10 = vld [vmem:[%s25214_s25 + $0x2c0] sm:$0xff] }
 0x3b0   : > { %21582 = vmatmul.mubr.msk.bf16.gmra.mrb[76].mxu1 %vm566_vm1, %v11830_v18  ;;  %22622 = vmatmul.mubr.msk.bf16.gmra.mrb[76].mxu0 %vm566_vm1, %v11834_v40  ;;  %v19208_v18 = vld [vmem:[%s25214_s25 + $0x4c3] sm:$0xff] }
 0x3b1   : > { %21585 = vmatprep.mubr.msk.bf16.mxu1 %vm566_vm1, %v11831_v25  ;;  %22625 = vmatprep.mubr.msk.bf16.mxu0 %vm566_vm1, %v11835_v16  ;;  %v19209_v25 = vld [vmem:[%s25214_s25 + $0x4cb] sm:$0xff] }
 0x3b2   : > { %v11852_v20 = vpack.c.bf16 %v19209_v25, %v19208_v18  ;;  %v19309_v18 = vld [vmem:[%s25214_s25 + $0x140] sm:$0xff]  ;;  %v19310_v25 = vld [vmem:[%s25214_s25 + $0x148] sm:$0xff] }
 0x3b3   : > { %v12874_v50 = vpack.c.bf16 %v19310_v25, %v19309_v18  ;;  %v19351_v18 = vld [vmem:[%s25214_s25 + $0x2e0] sm:$0xff]  ;;  %v19352_v25 = vld [vmem:[%s25214_s25 + $0x2e8] sm:$0xff] }
 0x3b8   : > { %21586 = vmatmul.mubr.msk.bf16.gmra.mrb[80].mxu1 %vm566_vm1, %v11832_v22  ;;  %22626 = vmatmul.mubr.msk.bf16.gmra.mrb[80].mxu0 %vm566_vm1, %v11836_v54  ;;  %v19212_v22 = vld [vmem:[%s25214_s25 + $0x4eb] sm:$0xff] }
 0x3b9   : > { %21589 = vmatprep.mubr.msk.bf16.mxu1 %vm566_vm1, %v11833_v5  ;;  %22629 = vmatprep.mubr.msk.bf16.mxu0 %vm566_vm1, %v11837_v41  ;;  %v19213_v5 = vld [vmem:[%s25214_s25 + $0x4f3] sm:$0xff] }
 0x3ba   : > { %v11854_v46 = vpack.c.bf16 %v19213_v5, %v19212_v22  ;;  %v19313_v22 = vld [vmem:[%s25214_s25 + $0x168] sm:$0xff]  ;;  %v19314_v5 = vld [vmem:[%s25214_s25 + $0x170] sm:$0xff] }
 0x3bb   : > { %v12876_v24 = vpack.c.bf16 %v19314_v5, %v19313_v22  ;;  %v26849_v22 = vld [vmem:[%s28231_s1 + $0x30] sm:$0x3f]   ;;  %v19355_v5 = vld [vmem:[%s25214_s25 + $0x308] sm:$0xff] }
 0x3c0   : > { %21590 = vmatmul.mubr.msk.bf16.gmra.mrb[84].mxu1 %vm566_vm1, %v11834_v40  ;;  %22630 = vmatmul.mubr.msk.bf16.gmra.mrb[84].mxu0 %vm566_vm1, %v11838_v4  ;;  %v19216_v40 = vld [vmem:[%s25214_s25 + $0x513] sm:$0xff] }
 0x3c1   : > { %21593 = vmatprep.mubr.msk.bf16.mxu1 %vm566_vm1, %v11835_v16  ;;  %22633 = vmatprep.mubr.msk.bf16.mxu0 %vm566_vm1, %v11839_v42  ;;  %v19217_v16 = vld [vmem:[%s25214_s25 + $0x51b] sm:$0xff] }
 0x3c2   : > { %v11856_v33 = vpack.c.bf16 %v19217_v16, %v19216_v40  ;;  %v19317_v40 = vld [vmem:[%s25214_s25 + $0x190] sm:$0xff]  ;;  %v19318_v16 = vld [vmem:[%s25214_s25 + $0x198] sm:$0xff] }
 0x3c3   : > { %v12878_v30 = vpack.c.bf16 %v19318_v16, %v19317_v40 }
 0x3c8   : > { %21594 = vmatmul.mubr.msk.bf16.gmra.mrb[88].mxu1 %vm566_vm1, %v11836_v54  ;;  %22634 = vmatmul.mubr.msk.bf16.gmra.mrb[88].mxu0 %vm566_vm1, %v11840_v7  ;;  %v19220_v54 = vld [vmem:[%s25214_s25 + $0x53b] sm:$0xff] }
 0x3c9   : > { %21597 = vmatprep.mubr.msk.bf16.mxu1 %vm566_vm1, %v11837_v41  ;;  %22637 = vmatprep.mubr.msk.bf16.mxu0 %vm566_vm1, %v11841_v34  ;;  %v19221_v41 = vld [vmem:[%s25214_s25 + $0x543] sm:$0xff] }
 0x3d0   : > { %21598 = vmatmul.mubr.msk.bf16.gmra.mrb[92].mxu1 %vm566_vm1, %v11838_v4  ;;  %22638 = vmatmul.mubr.msk.bf16.gmra.mrb[92].mxu0 %vm566_vm1, %v11842_v58  ;;  %v11858_v4 = vpack.c.bf16 %v19221_v41, %v19220_v54  ;;  %v19321_v54 = vld [vmem:[%s25214_s25 + $0x1b8] sm:$0xff]  ;;  %v19322_v41 = vld [vmem:[%s25214_s25 + $0x1c0] sm:$0xff] }
 0x3d1   : > { %21601 = vmatprep.mubr.msk.bf16.mxu1 %vm566_vm1, %v11839_v42  ;;  %22641 = vmatprep.mubr.msk.bf16.mxu0 %vm566_vm1, %v11843_v45  ;;  %v4318_v42 = vpack.c.bf16 %v17730_v56, %v17729_v32  ;;  %v12880_v56 = vpack.c.bf16 %v19322_v41, %v19321_v54 }
 0x3d8   : > { %21602 = vmatmul.mubr.msk.bf16.gmra.mrb[96].mxu1 %vm566_vm1, %v11840_v7  ;;  %22642 = vmatmul.mubr.msk.bf16.gmra.mrb[96].mxu0 %vm566_vm1, %v11844_v60  ;;  %v19292_v7 = vld [vmem:[%s25214_s25 + $0x90] sm:$0xff] }
 0x3d9   : > { %21605 = vmatprep.mubr.msk.bf16.mxu1 %vm566_vm1, %v11841_v34  ;;  %22645 = vmatprep.mubr.msk.bf16.mxu0 %vm566_vm1, %v11845_v28  ;;  %v17733_v34 = vld [vmem:[%s25214_s25 + $0x50] sm:$0xff] }
 0x3da   : > { %v4320_v15 = vpack.c.bf16 %v17734_v43, %v17733_v34  ;;  %v19330_v34 = vld [vmem:[%s25214_s25 + $0x210] sm:$0xff] }
 0x3e0   : > { %21606 = vmatmul.mubr.msk.bf16.gmra.mrb[100].mxu1 %vm566_vm1, %v11842_v58  ;;  %22646 = vmatmul.mubr.msk.bf16.gmra.mrb[100].mxu0 %vm566_vm1, %v11846_v44  ;;  %v12865_v58 = vpack.c.bf16 %v19292_v7, %v19291_v51  ;;  %v19328_v51 = vld [vmem:[%s25214_s25 + $0x1f8] sm:$0xff]  ;;  %v19329_v7 = vld [vmem:[%s25214_s25 + $0x208] sm:$0xff] }
 0x3e1   : > { %21609 = vmatprep.mubr.msk.bf16.mxu1 %vm566_vm1, %v11843_v45  ;;  %22649 = vmatprep.mubr.msk.bf16.mxu0 %vm566_vm1, %v11847_v62  ;;  %v5651_v45 = vsel %vm759_vm0, %v26567_v17, 0  ;;  %v19295_v17 = vld [vmem:[%s25214_s25 + $0xb0] sm:$0xff]  ;;  %v12883_v43 = vpack.c.bf16 %v19328_v51, %v19327_v13  ;;  %v19369_v13 = vld [vmem:[%s25214_s25 + $0x398] sm:$0xff]  ;;  %v19370_v51 = vld [vmem:[%s25214_s25 + $0x3a0] sm:$0xff] }
 0x3e8   : > { %21610 = vmatmul.mubr.msk.bf16.gmra.mrb[104].mxu1 %vm566_vm1, %v11844_v60  ;;  %22650 = vmatmul.mubr.msk.bf16.gmra.mrb[104].mxu0 %vm566_vm1, %v11848_v9  ;;  %v17736_v60 = vld [vmem:[%s25214_s25 + $0x68] sm:$0xff] }
 0x3e9   : > { %21613 = vmatprep.mubr.msk.bf16.mxu1 %vm566_vm1, %v11845_v28  ;;  %22653 = vmatprep.mubr.msk.bf16.mxu0 %vm566_vm1, %v11849_v8  ;;  %v19296_v28 = vld [vmem:[%s25214_s25 + $0xb8] sm:$0xff]  ;;  %v4321_v57 = vpack.c.bf16 %v17736_v60, %v17735_v19  ;;  %v19336_v19 = vld [vmem:[%s25214_s25 + $0x248] sm:$0xff] }
 0x3ea   : > { %v12867_v53 = vpack.c.bf16 %v19296_v28, %v19295_v17  ;;  %v19337_v60 = vld [vmem:[%s25214_s25 + $0x258] sm:$0xff]  ;;  %v19338_v17 = vld [vmem:[%s25214_s25 + $0x260] sm:$0xff] }
 0x3eb   : > { %v12888_v3 = vpack.c.bf16 %v19338_v17, %v19337_v60 }
 0x3f0   : > { %21614 = vmatmul.mubr.msk.bf16.gmra.mrb[108].mxu1 %vm566_vm1, %v11846_v44  ;;  %22654 = vmatmul.mubr.msk.bf16.gmra.mrb[108].mxu0 %vm566_vm1, %v11850_v27  ;;  %v19299_v44 = vld [vmem:[%s25214_s25 + $0xd8] sm:$0xff] }
 0x3f1   : > { %21617 = vmatprep.mubr.msk.bf16.mxu1 %vm566_vm1, %v11847_v62  ;;  %22657 = vmatprep.mubr.msk.bf16.mxu0 %vm566_vm1, %v11851_v23  ;;  %v19300_v62 = vld [vmem:[%s25214_s25 + $0xe0] sm:$0xff] }
 0x3f2   : > { %v12869_v6 = vpack.c.bf16 %v19300_v62, %v19299_v44 }
 0x3f8   : > { %21618 = vmatmul.mubr.msk.bf16.gmra.mrb[112].mxu1 %vm566_vm1, %v11848_v9  ;;  %22658 = vmatmul.mubr.msk.bf16.gmra.mrb[112].mxu0 %vm566_vm1, %v11852_v20  ;;  %v19303_v9 = vld [vmem:[%s25214_s25 + $0x100] sm:$0xff] }
 0x3f9   : > { %21621 = vmatprep.mubr.msk.bf16.mxu1 %vm566_vm1, %v11849_v8  ;;  %22661 = vmatprep.mubr.msk.bf16.mxu0 %vm566_vm1, %v11853_v52  ;;  %v19304_v8 = vld [vmem:[%s25214_s25 + $0x108] sm:$0xff] }
 0x3fa   : > { %v12871_v59 = vpack.c.bf16 %v19304_v8, %v19303_v9  ;;  %v12891_v9 = vpack.c.bf16 %v19344_v49, %v19343_v61  ;;  %v19385_v61 = vld [vmem:[%s25214_s25 + $0x438] sm:$0xff]  ;;  %v19386_v49 = vld [vmem:[%s25214_s25 + $0x440] sm:$0xff] }
 0x400   : > { %21622 = vmatmul.mubr.msk.bf16.gmra.mrb[116].mxu1 %vm566_vm1, %v11850_v27  ;;  %22662 = vmatmul.mubr.msk.bf16.gmra.mrb[116].mxu0 %vm566_vm1, %v11854_v46  ;;  %v19307_v27 = vld [vmem:[%s25214_s25 + $0x128] sm:$0xff] }
 0x401   : > { %21625 = vmatprep.mubr.msk.bf16.mxu1 %vm566_vm1, %v11851_v23  ;;  %22665 = vmatprep.mubr.msk.bf16.mxu0 %vm566_vm1, %v11855_v14  ;;  %v19308_v23 = vld [vmem:[%s25214_s25 + $0x130] sm:$0xff]  ;;  %v19316_v14 = vld [vmem:[%s25214_s25 + $0x180] sm:$0xff] }
 0x402   : > { %v12873_v0 = vpack.c.bf16 %v19308_v23, %v19307_v27  ;;  %v12893_v27 = vpack.c.bf16 %v19348_v10, %v19347_v11  ;;  %v19389_v11 = vld [vmem:[%s25214_s25 + $0x460] sm:$0xff]  ;;  %v19390_v10 = vld [vmem:[%s25214_s25 + $0x468] sm:$0xff] }
 0x408   : > { %21626 = vmatmul.mubr.msk.bf16.gmra.mrb[120].mxu1 %vm566_vm1, %v11852_v20  ;;  %22666 = vmatmul.mubr.msk.bf16.gmra.mrb[120].mxu0 %vm566_vm1, %v11856_v33  ;;  %v19311_v20 = vld [vmem:[%s25214_s25 + $0x150] sm:$0xff]  ;;  %v19319_v33 = vld [vmem:[%s25214_s25 + $0x1a0] sm:$0xff] }
 0x409   : > { %21629 = vmatprep.mubr.msk.bf16.mxu1 %vm566_vm1, %v11853_v52  ;;  %22669 = vmatprep.mubr.msk.bf16.mxu0 %vm566_vm1, %v11857_v37  ;;  %v19312_v52 = vld [vmem:[%s25214_s25 + $0x158] sm:$0xff]  ;;  %v19320_v37 = vld [vmem:[%s25214_s25 + $0x1a8] sm:$0xff] }
 0x40a   : > { %v12875_v38 = vpack.c.bf16 %v19312_v52, %v19311_v20  ;;  %v12879_v32 = vpack.c.bf16 %v19320_v37, %v19319_v33  ;;  %v12895_v20 = vpack.c.bf16 %v19352_v25, %v19351_v18  ;;  %v19361_v33 = vld [vmem:[%s25214_s25 + $0x348] sm:$0xff]  ;;  %v19362_v37 = vld [vmem:[%s25214_s25 + $0x350] sm:$0xff] }
 0x40b   : > { %v12900_v41 = vpack.c.bf16 %v19362_v37, %v19361_v33  ;;  %v19393_v18 = vld [vmem:[%s25214_s25 + $0x488] sm:$0xff]  ;;  %v19394_v25 = vld [vmem:[%s25214_s25 + $0x490] sm:$0xff] }
 0x410   : > { %21630 = vmatmul.mubr.msk.bf16.gmra.mrb[124].mxu1 %vm566_vm1, %v11854_v46  ;;  %22670 = vmatmul.mubr.msk.bf16.gmra.mrb[124].mxu0 %vm566_vm1, %v11858_v4  ;;  %v19315_v46 = vld [vmem:[%s25214_s25 + $0x178] sm:$0xff]  ;;  %v19325_v4 = vld [vmem:[%s25214_s25 + $0x1e0] sm:$0xff] }
 0x411   : > { %21635 = vmatprep.mubr.msk.bf16.mxu1 %vm566_vm1, %v4318_v42  ;;  %22675 = vmatprep.mubr.msk.bf16.mxu0 %vm566_vm1, %v12864_v55  ;;  %v12877_v31 = vpack.c.bf16 %v19316_v14, %v19315_v46  ;;  %v19326_v42 = vld [vmem:[%s25214_s25 + $0x1e8] sm:$0xff]  ;;  %v19357_v46 = vld [vmem:[%s25214_s25 + $0x320] sm:$0xff] }
 0x412   : > { %v12882_v1 = vpack.c.bf16 %v19326_v42, %v19325_v4  ;;  %v19358_v14 = vld [vmem:[%s25214_s25 + $0x328] sm:$0xff] }
 0x413   : > { %v12898_v16 = vpack.c.bf16 %v19358_v14, %v19357_v46 }
 0x418   : > { %21636 = vmatmul.mubr.msk.bf16.vlgmr.msra.gmra.mrb[0].mxu1 %vm566_vm1, %v4319_v35  ;;  %22676 = vmatmul.mubr.msk.bf16.vlgmr.msra.gmra.mrb[0].mxu0 %vm566_vm1, %v12865_v58  ;;  %v12884_v35 = vpack.c.bf16 %v19330_v34, %v19329_v7  ;;  %v12904_v34 = vpack.c.bf16 %v19370_v51, %v19369_v13 }
 0x419   : > { %21764 = vmatpush3.bf16.msra.mxu1 %v5651_v45  ;;  %22804 = vmatpush3.bf16.msra.mxu0 %v14197_v21  ;;  %v19334_v45 = vld [vmem:[%s25214_s25 + $0x238] sm:$0xff] }
 0x41a   : > { %21639 = vmatprep.mubr.msk.bf16.mxu1 %vm566_vm1, %v4320_v15  ;;  %22679 = vmatprep.mubr.msk.bf16.mxu0 %vm566_vm1, %v12866_v26  ;;  %v12885_v15 = vpack.c.bf16 %v19332_v12, %v19331_v39  ;;  %v19373_v39 = vld [vmem:[%s25214_s25 + $0x3c0] sm:$0xff]  ;;  %v19374_v12 = vld [vmem:[%s25214_s25 + $0x3c8] sm:$0xff] }
 0x41b   : > { %25119 = vmatprep.subr.msk.bf16.mxu1 %vm759_vm0, %v26849_v22 }
 0x420   : > { %21640 = vmatmul.mubr.msk.bf16.gmra.mrb[4].mxu1 %vm566_vm1, %v4321_v57  ;;  %22680 = vmatmul.mubr.msk.bf16.gmra.mrb[4].mxu0 %vm566_vm1, %v12867_v53  ;;  %v19340_v57 = vld [vmem:[%s25214_s25 + $0x270] sm:$0xff] }
 0x421   : > { %21643 = vmatprep.mubr.msk.bf16.mxu1 %vm566_vm1, %v12864_v55  ;;  %22683 = vmatprep.mubr.msk.bf16.mxu0 %vm566_vm1, %v12868_v63  ;;  %v12881_v55 = vpack.c.bf16 %v19324_v48, %v19323_v47  ;;  %v12889_v44 = vpack.c.bf16 %v19340_v57, %v19339_v2  ;;  %v19365_v47 = vld [vmem:[%s25214_s25 + $0x370] sm:$0xff]  ;;  %v19366_v48 = vld [vmem:[%s25214_s25 + $0x378] sm:$0xff] }
 0x422   : > { %v12902_v42 = vpack.c.bf16 %v19366_v48, %v19365_v47  ;;  %v19381_v2 = vld [vmem:[%s25214_s25 + $0x410] sm:$0xff]  ;;  %v19382_v57 = vld [vmem:[%s25214_s25 + $0x418] sm:$0xff] }
 0x428   : > { %21644 = vmatmul.mubr.msk.bf16.gmra.mrb[8].mxu1 %vm566_vm1, %v12865_v58  ;;  %22684 = vmatmul.mubr.msk.bf16.gmra.mrb[8].mxu0 %vm566_vm1, %v12869_v6  ;;  %v19333_v58 = vld [vmem:[%s25214_s25 + $0x230] sm:$0xff] }
 0x429   : > { %21647 = vmatprep.mubr.msk.bf16.mxu1 %vm566_vm1, %v12866_v26  ;;  %22687 = vmatprep.mubr.msk.bf16.mxu0 %vm566_vm1, %v12870_v36  ;;  %v12886_v21 = vpack.c.bf16 %v19334_v45, %v19333_v58  ;;  %v19335_v26 = vld [vmem:[%s25214_s25 + $0x240] sm:$0xff]  ;;  %v12906_v45 = vpack.c.bf16 %v19374_v12, %v19373_v39 }
 0x42a   : > { %v12887_v28 = vpack.c.bf16 %v19336_v19, %v19335_v26  ;;  %v19377_v26 = vld [vmem:[%s25214_s25 + $0x3e8] sm:$0xff]  ;;  %v19378_v19 = vld [vmem:[%s25214_s25 + $0x3f0] sm:$0xff] }
 0x42b   : > { %v12908_v17 = vpack.c.bf16 %v19378_v19, %v19377_v26  ;;  %v19484_v26 = vld [vmem:[%s25214_s25 + $0x79] sm:$0xff]  ;;  %v19485_v19 = vld [vmem:[%s25214_s25 + $0x81] sm:$0xff] }
 0x430   : > { %21648 = vmatmul.mubr.msk.bf16.gmra.mrb[12].mxu1 %vm566_vm1, %v12867_v53  ;;  %22688 = vmatmul.mubr.msk.bf16.gmra.mrb[12].mxu0 %vm566_vm1, %v12871_v59  ;;  %v19341_v53 = vld [vmem:[%s25214_s25 + $0x280] sm:$0xff] }
 0x431   : > { %21651 = vmatprep.mubr.msk.bf16.mxu1 %vm566_vm1, %v12868_v63  ;;  %22691 = vmatprep.mubr.msk.bf16.mxu0 %vm566_vm1, %v12872_v29  ;;  %v19342_v63 = vld [vmem:[%s25214_s25 + $0x288] sm:$0xff] }
 0x432   : > { %v12890_v62 = vpack.c.bf16 %v19342_v63, %v19341_v53  ;;  %v12910_v63 = vpack.c.bf16 %v19382_v57, %v19381_v2  ;;  %v17927_v2 = vld [vmem:[%s25214_s25 + $0x41] sm:$0xff]  ;;  %v19486_v57 = vld [vmem:[%s25214_s25 + $0x89] sm:$0xff] }
 0x438   : > { %21652 = vmatmul.mubr.msk.bf16.gmra.mrb[16].mxu1 %vm566_vm1, %v12869_v6  ;;  %22692 = vmatmul.mubr.msk.bf16.gmra.mrb[16].mxu0 %vm566_vm1, %v12873_v0  ;;  %v19345_v6 = vld [vmem:[%s25214_s25 + $0x2a8] sm:$0xff] }
 0x439   : > { %21655 = vmatprep.mubr.msk.bf16.mxu1 %vm566_vm1, %v12870_v36  ;;  %22695 = vmatprep.mubr.msk.bf16.mxu0 %vm566_vm1, %v12874_v50  ;;  %v19346_v36 = vld [vmem:[%s25214_s25 + $0x2b0] sm:$0xff] }
 0x43a   : > { %v12892_v8 = vpack.c.bf16 %v19346_v36, %v19345_v6  ;;  %v12912_v36 = vpack.c.bf16 %v19386_v49, %v19385_v61  ;;  %v19488_v61 = vld [vmem:[%s25214_s25 + $0xa1] sm:$0xff]  ;;  %v19489_v49 = vld [vmem:[%s25214_s25 + $0xa9] sm:$0xff] }
 0x440   : > { %21656 = vmatmul.mubr.msk.bf16.gmra.mrb[20].mxu1 %vm566_vm1, %v12871_v59  ;;  %22696 = vmatmul.mubr.msk.bf16.gmra.mrb[20].mxu0 %vm566_vm1, %v12875_v38  ;;  %v19349_v59 = vld [vmem:[%s25214_s25 + $0x2d0] sm:$0xff] }
 0x441   : > { %21659 = vmatprep.mubr.msk.bf16.mxu1 %vm566_vm1, %v12872_v29  ;;  %22699 = vmatprep.mubr.msk.bf16.mxu0 %vm566_vm1, %v12876_v24  ;;  %v19350_v29 = vld [vmem:[%s25214_s25 + $0x2d8] sm:$0xff] }
 0x442   : > { %v12894_v23 = vpack.c.bf16 %v19350_v29, %v19349_v59  ;;  %v12914_v29 = vpack.c.bf16 %v19390_v10, %v19389_v11  ;;  %v13934_v11 = vpack.c.bf16 %v19489_v49, %v19488_v61  ;;  %v17930_v10 = vld [vmem:[%s25214_s25 + $0x61] sm:$0xff]  ;;  %v19526_v61 = vld [vmem:[%s25214_s25 + $0x219] sm:$0xff] }
 0x443   : > { %v19527_v49 = vld [vmem:[%s25214_s25 + $0x221] sm:$0xff] }
 0x448   : > { %21660 = vmatmul.mubr.msk.bf16.gmra.mrb[24].mxu1 %vm566_vm1, %v12873_v0  ;;  %22700 = vmatmul.mubr.msk.bf16.gmra.mrb[24].mxu0 %vm566_vm1, %v12877_v31  ;;  %v19353_v0 = vld [vmem:[%s25214_s25 + $0x2f8] sm:$0xff] }
 0x449   : > { %21663 = vmatprep.mubr.msk.bf16.mxu1 %vm566_vm1, %v12874_v50  ;;  %22703 = vmatprep.mubr.msk.bf16.mxu0 %vm566_vm1, %v12878_v30  ;;  %v19354_v50 = vld [vmem:[%s25214_s25 + $0x300] sm:$0xff] }
 0x44a   : > { %v12896_v52 = vpack.c.bf16 %v19354_v50, %v19353_v0  ;;  %v12916_v50 = vpack.c.bf16 %v19394_v25, %v19393_v18 }
 0x450   : > { %21664 = vmatmul.mubr.msk.bf16.gmra.mrb[28].mxu1 %vm566_vm1, %v12875_v38  ;;  %22704 = vmatmul.mubr.msk.bf16.gmra.mrb[28].mxu0 %vm566_vm1, %v12879_v32  ;;  %v19356_v38 = vld [vmem:[%s25214_s25 + $0x310] sm:$0xff] }
 0x451   : > { %21667 = vmatprep.mubr.msk.bf16.mxu1 %vm566_vm1, %v12876_v24  ;;  %22707 = vmatprep.mubr.msk.bf16.mxu0 %vm566_vm1, %v12880_v56  ;;  %v26857_v24 = vld [vmem:[%s28231_s1 + $0x70] sm:$0x3f]   ;;  %v12897_v40 = vpack.c.bf16 %v19356_v38, %v19355_v5  ;;  %v19398_v38 = vld [vmem:[%s25214_s25 + $0x4b8] sm:$0xff] }
 0x452   : > { %25127 = vmatprep.subr.msk.bf16.mxu0 %vm759_vm0, %v26857_v24  ;;  %v19397_v5 = vld [vmem:[%s25214_s25 + $0x4b0] sm:$0xff] }
 0x453   : > { %v12918_v14 = vpack.c.bf16 %v19398_v38, %v19397_v5 }
 0x458   : > { %21668 = vmatmul.mubr.msk.bf16.gmra.mrb[32].mxu1 %vm566_vm1, %v12877_v31  ;;  %22708 = vmatmul.mubr.msk.bf16.gmra.mrb[32].mxu0 %vm566_vm1, %v12881_v55  ;;  %v19359_v31 = vld [vmem:[%s25214_s25 + $0x330] sm:$0xff] }
 0x459   : > { %21671 = vmatprep.mubr.msk.bf16.mxu1 %vm566_vm1, %v12878_v30  ;;  %22711 = vmatprep.mubr.msk.bf16.mxu0 %vm566_vm1, %v12882_v1  ;;  %v19360_v30 = vld [vmem:[%s25214_s25 + $0x338] sm:$0xff] }
 0x45a   : > { %v12899_v54 = vpack.c.bf16 %v19360_v30, %v19359_v31  ;;  %v19401_v31 = vld [vmem:[%s25214_s25 + $0x4d8] sm:$0xff]  ;;  %v19402_v30 = vld [vmem:[%s25214_s25 + $0x4e0] sm:$0xff] }
 0x45b   : > { %v12920_v37 = vpack.c.bf16 %v19402_v30, %v19401_v31 }
 0x460   : > { %21672 = vmatmul.mubr.msk.bf16.gmra.mrb[36].mxu1 %vm566_vm1, %v12879_v32  ;;  %22712 = vmatmul.mubr.msk.bf16.gmra.mrb[36].mxu0 %vm566_vm1, %v12883_v43  ;;  %v19363_v32 = vld [vmem:[%s25214_s25 + $0x358] sm:$0xff] }
 0x461   : > { %21675 = vmatprep.mubr.msk.bf16.mxu1 %vm566_vm1, %v12880_v56  ;;  %22715 = vmatprep.mubr.msk.bf16.mxu0 %vm566_vm1, %v12884_v35  ;;  %v19364_v56 = vld [vmem:[%s25214_s25 + $0x360] sm:$0xff] }
 0x462   : > { %v12901_v4 = vpack.c.bf16 %v19364_v56, %v19363_v32  ;;  %v19405_v32 = vld [vmem:[%s25214_s25 + $0x500] sm:$0xff]  ;;  %v19406_v56 = vld [vmem:[%s25214_s25 + $0x508] sm:$0xff] }
 0x463   : > { %v12922_v48 = vpack.c.bf16 %v19406_v56, %v19405_v32 }
 0x468   : > { %21676 = vmatmul.mubr.msk.bf16.gmra.mrb[40].mxu1 %vm566_vm1, %v12881_v55  ;;  %22716 = vmatmul.mubr.msk.bf16.gmra.mrb[40].mxu0 %vm566_vm1, %v12885_v15  ;;  %v19367_v55 = vld [vmem:[%s25214_s25 + $0x380] sm:$0xff] }
 0x469   : > { %21679 = vmatprep.mubr.msk.bf16.mxu1 %vm566_vm1, %v12882_v1  ;;  %22719 = vmatprep.mubr.msk.bf16.mxu0 %vm566_vm1, %v12886_v21  ;;  %v19368_v1 = vld [vmem:[%s25214_s25 + $0x388] sm:$0xff] }
 0x46a   : > { %v12903_v7 = vpack.c.bf16 %v19368_v1, %v19367_v55  ;;  %v19409_v55 = vld [vmem:[%s25214_s25 + $0x528] sm:$0xff]  ;;  %v19410_v1 = vld [vmem:[%s25214_s25 + $0x530] sm:$0xff] }
 0x46b   : > { %v12924_v51 = vpack.c.bf16 %v19410_v1, %v19409_v55 }
 0x470   : > { %21680 = vmatmul.mubr.msk.bf16.gmra.mrb[44].mxu1 %vm566_vm1, %v12883_v43  ;;  %22720 = vmatmul.mubr.msk.bf16.gmra.mrb[44].mxu0 %vm566_vm1, %v12887_v28  ;;  %v19371_v43 = vld [vmem:[%s25214_s25 + $0x3a8] sm:$0xff] }
 0x471   : > { %21683 = vmatprep.mubr.msk.bf16.mxu1 %vm566_vm1, %v12884_v35  ;;  %22723 = vmatprep.mubr.msk.bf16.mxu0 %vm566_vm1, %v12888_v3  ;;  %v19372_v35 = vld [vmem:[%s25214_s25 + $0x3b0] sm:$0xff] }
 0x472   : > { %v12905_v58 = vpack.c.bf16 %v19372_v35, %v19371_v43  ;;  %v19413_v43 = vld [vmem:[%s25214_s25 + $0x550] sm:$0xff]  ;;  %v19414_v35 = vld [vmem:[%s25214_s25 + $0x558] sm:$0xff] }
 0x473   : > { %v12926_v12 = vpack.c.bf16 %v19414_v35, %v19413_v43 }
 0x478   : > { %21684 = vmatmul.mubr.msk.bf16.gmra.mrb[48].mxu1 %vm566_vm1, %v12885_v15  ;;  %22724 = vmatmul.mubr.msk.bf16.gmra.mrb[48].mxu0 %vm566_vm1, %v12889_v44  ;;  %v19375_v15 = vld [vmem:[%s25214_s25 + $0x3d0] sm:$0xff] }
 0x479   : > { %21687 = vmatprep.mubr.msk.bf16.mxu1 %vm566_vm1, %v12886_v21  ;;  %22727 = vmatprep.mubr.msk.bf16.mxu0 %vm566_vm1, %v12890_v62  ;;  %v19376_v21 = vld [vmem:[%s25214_s25 + $0x3d8] sm:$0xff] }
 0x47a   : > { %v12907_v60 = vpack.c.bf16 %v19376_v21, %v19375_v15  ;;  %v17924_v15 = vld [vmem:[%s25214_s25 + $0x29] sm:$0xff]  ;;  %v17925_v21 = vld [vmem:[%s25214_s25 + $0x31] sm:$0xff] }
 0x480   : > { %21688 = vmatmul.mubr.msk.bf16.gmra.mrb[52].mxu1 %vm566_vm1, %v12887_v28  ;;  %22728 = vmatmul.mubr.msk.bf16.gmra.mrb[52].mxu0 %vm566_vm1, %v12891_v9  ;;  %v19379_v28 = vld [vmem:[%s25214_s25 + $0x3f8] sm:$0xff] }
 0x481   : > { %21691 = vmatprep.mubr.msk.bf16.mxu1 %vm566_vm1, %v12888_v3  ;;  %22731 = vmatprep.mubr.msk.bf16.mxu0 %vm566_vm1, %v12892_v8  ;;  %v19380_v3 = vld [vmem:[%s25214_s25 + $0x400] sm:$0xff] }
 0x482   : > { %v12909_v53 = vpack.c.bf16 %v19380_v3, %v19379_v28  ;;  %v13932_v28 = vpack.c.bf16 %v19485_v19, %v19484_v26  ;;  %v17926_v3 = vld [vmem:[%s25214_s25 + $0x39] sm:$0xff]  ;;  %v19518_v26 = vld [vmem:[%s25214_s25 + $0x1c9] sm:$0xff]  ;;  %v19519_v19 = vld [vmem:[%s25214_s25 + $0x1d1] sm:$0xff] }
 0x488   : > { %21692 = vmatmul.mubr.msk.bf16.gmra.mrb[56].mxu1 %vm566_vm1, %v12889_v44  ;;  %22732 = vmatmul.mubr.msk.bf16.gmra.mrb[56].mxu0 %vm566_vm1, %v12893_v27  ;;  %v19383_v44 = vld [vmem:[%s25214_s25 + $0x420] sm:$0xff] }
 0x489   : > { %21695 = vmatprep.mubr.msk.bf16.mxu1 %vm566_vm1, %v12890_v62  ;;  %22735 = vmatprep.mubr.msk.bf16.mxu0 %vm566_vm1, %v12894_v23  ;;  %v19384_v62 = vld [vmem:[%s25214_s25 + $0x428] sm:$0xff] }
 0x48a   : > { %v12911_v6 = vpack.c.bf16 %v19384_v62, %v19383_v44  ;;  %v17929_v44 = vld [vmem:[%s25214_s25 + $0x59] sm:$0xff]  ;;  %v5387_v62 = vpack.c.bf16 %v17927_v2, %v17926_v3  ;;  %v19522_v2 = vld [vmem:[%s25214_s25 + $0x1f1] sm:$0xff] }
 0x490   : > { %21696 = vmatmul.mubr.msk.bf16.gmra.mrb[60].mxu1 %vm566_vm1, %v12891_v9  ;;  %22736 = vmatmul.mubr.msk.bf16.gmra.mrb[60].mxu0 %vm566_vm1, %v12895_v20  ;;  %v19387_v9 = vld [vmem:[%s25214_s25 + $0x448] sm:$0xff] }
 0x491   : > { %21699 = vmatprep.mubr.msk.bf16.mxu1 %vm566_vm1, %v12892_v8  ;;  %22739 = vmatprep.mubr.msk.bf16.mxu0 %vm566_vm1, %v12896_v52  ;;  %v19388_v8 = vld [vmem:[%s25214_s25 + $0x450] sm:$0xff] }
 0x492   : > { %v12913_v59 = vpack.c.bf16 %v19388_v8, %v19387_v9  ;;  %v15265_v8 = vsel %vm759_vm0, %v26857_v24, 0  ;;  %v19492_v24 = vld [vmem:[%s25214_s25 + $0xc9] sm:$0xff] }
 0x498   : > { %21700 = vmatmul.mubr.msk.bf16.gmra.mrb[64].mxu1 %vm566_vm1, %v12893_v27  ;;  %22740 = vmatmul.mubr.msk.bf16.gmra.mrb[64].mxu0 %vm566_vm1, %v12897_v40  ;;  %v19391_v27 = vld [vmem:[%s25214_s25 + $0x470] sm:$0xff] }
 0x499   : > { %21703 = vmatprep.mubr.msk.bf16.mxu1 %vm566_vm1, %v12894_v23  ;;  %22743 = vmatprep.mubr.msk.bf16.mxu0 %vm566_vm1, %v12898_v16  ;;  %v19392_v23 = vld [vmem:[%s25214_s25 + $0x478] sm:$0xff] }
 0x49a   : > { %v12915_v0 = vpack.c.bf16 %v19392_v23, %v19391_v27  ;;  %v19493_v27 = vld [vmem:[%s25214_s25 + $0xd1] sm:$0xff] }
 0x49b   : > { %v13936_v25 = vpack.c.bf16 %v19493_v27, %v19492_v24  ;;  %v19534_v27 = vld [vmem:[%s25214_s25 + $0x269] sm:$0xff] }
 0x4a0   : > { %21704 = vmatmul.mubr.msk.bf16.gmra.mrb[68].mxu1 %vm566_vm1, %v12895_v20  ;;  %22744 = vmatmul.mubr.msk.bf16.gmra.mrb[68].mxu0 %vm566_vm1, %v12899_v54  ;;  %v19395_v20 = vld [vmem:[%s25214_s25 + $0x498] sm:$0xff] }
 0x4a1   : > { %21707 = vmatprep.mubr.msk.bf16.mxu1 %vm566_vm1, %v12896_v52  ;;  %22747 = vmatprep.mubr.msk.bf16.mxu0 %vm566_vm1, %v12900_v41  ;;  %v19396_v52 = vld [vmem:[%s25214_s25 + $0x4a0] sm:$0xff] }
 0x4a2   : > { %v12917_v46 = vpack.c.bf16 %v19396_v52, %v19395_v20  ;;  %v19496_v20 = vld [vmem:[%s25214_s25 + $0xf1] sm:$0xff]  ;;  %v19497_v52 = vld [vmem:[%s25214_s25 + $0xf9] sm:$0xff] }
 0x4a3   : > { %v13938_v38 = vpack.c.bf16 %v19497_v52, %v19496_v20  ;;  %v19538_v20 = vld [vmem:[%s25214_s25 + $0x291] sm:$0xff]  ;;  %v19539_v52 = vld [vmem:[%s25214_s25 + $0x299] sm:$0xff] }
 0x4a8   : > { %21708 = vmatmul.mubr.msk.bf16.gmra.mrb[72].mxu1 %vm566_vm1, %v12897_v40  ;;  %22748 = vmatmul.mubr.msk.bf16.gmra.mrb[72].mxu0 %vm566_vm1, %v12901_v4  ;;  %v19399_v40 = vld [vmem:[%s25214_s25 + $0x4c0] sm:$0xff] }
 0x4a9   : > { %21711 = vmatprep.mubr.msk.bf16.mxu1 %vm566_vm1, %v12898_v16  ;;  %22751 = vmatprep.mubr.msk.bf16.mxu0 %vm566_vm1, %v12902_v42  ;;  %v19400_v16 = vld [vmem:[%s25214_s25 + $0x4c8] sm:$0xff] }
 0x4aa   : > { %v12919_v33 = vpack.c.bf16 %v19400_v16, %v19399_v40  ;;  %v19500_v40 = vld [vmem:[%s25214_s25 + $0x119] sm:$0xff]  ;;  %v19501_v16 = vld [vmem:[%s25214_s25 + $0x121] sm:$0xff] }
 0x4ab   : > { %v13940_v30 = vpack.c.bf16 %v19501_v16, %v19500_v40  ;;  %v19542_v40 = vld [vmem:[%s25214_s25 + $0x2b9] sm:$0xff]  ;;  %v19543_v16 = vld [vmem:[%s25214_s25 + $0x2c1] sm:$0xff] }
 0x4b0   : > { %21712 = vmatmul.mubr.msk.bf16.gmra.mrb[76].mxu1 %vm566_vm1, %v12899_v54  ;;  %22752 = vmatmul.mubr.msk.bf16.gmra.mrb[76].mxu0 %vm566_vm1, %v12903_v7  ;;  %v19403_v54 = vld [vmem:[%s25214_s25 + $0x4e8] sm:$0xff] }
 0x4b1   : > { %21715 = vmatprep.mubr.msk.bf16.mxu1 %vm566_vm1, %v12900_v41  ;;  %22755 = vmatprep.mubr.msk.bf16.mxu0 %vm566_vm1, %v12904_v34  ;;  %v19404_v41 = vld [vmem:[%s25214_s25 + $0x4f0] sm:$0xff] }
 0x4b2   : > { %v12921_v47 = vpack.c.bf16 %v19404_v41, %v19403_v54  ;;  %v19504_v54 = vld [vmem:[%s25214_s25 + $0x141] sm:$0xff]  ;;  %v19505_v41 = vld [vmem:[%s25214_s25 + $0x149] sm:$0xff] }
 0x4b3   : > { %v13942_v56 = vpack.c.bf16 %v19505_v41, %v19504_v54  ;;  %v19546_v54 = vld [vmem:[%s25214_s25 + $0x2e1] sm:$0xff]  ;;  %v19547_v41 = vld [vmem:[%s25214_s25 + $0x2e9] sm:$0xff] }
 0x4b8   : > { %21716 = vmatmul.mubr.msk.bf16.gmra.mrb[80].mxu1 %vm566_vm1, %v12901_v4  ;;  %22756 = vmatmul.mubr.msk.bf16.gmra.mrb[80].mxu0 %vm566_vm1, %v12905_v58  ;;  %v19407_v4 = vld [vmem:[%s25214_s25 + $0x510] sm:$0xff] }
 0x4b9   : > { %21719 = vmatprep.mubr.msk.bf16.mxu1 %vm566_vm1, %v12902_v42  ;;  %22759 = vmatprep.mubr.msk.bf16.mxu0 %vm566_vm1, %v12906_v45  ;;  %v19408_v42 = vld [vmem:[%s25214_s25 + $0x518] sm:$0xff] }
 0x4ba   : > { %v12923_v13 = vpack.c.bf16 %v19408_v42, %v19407_v4  ;;  %v19508_v4 = vld [vmem:[%s25214_s25 + $0x169] sm:$0xff]  ;;  %v19509_v42 = vld [vmem:[%s25214_s25 + $0x171] sm:$0xff] }
 0x4bb   : > { %v13944_v1 = vpack.c.bf16 %v19509_v42, %v19508_v4  ;;  %v27131_v4 = vld [vmem:[%s28231_s1 + $0x38] sm:$0x3f]   ;;  %v19550_v42 = vld [vmem:[%s25214_s25 + $0x309] sm:$0xff] }
 0x4c0   : > { %21720 = vmatmul.mubr.msk.bf16.gmra.mrb[84].mxu1 %vm566_vm1, %v12903_v7  ;;  %22760 = vmatmul.mubr.msk.bf16.gmra.mrb[84].mxu0 %vm566_vm1, %v12907_v60  ;;  %v19411_v7 = vld [vmem:[%s25214_s25 + $0x538] sm:$0xff] }
 0x4c1   : > { %21723 = vmatprep.mubr.msk.bf16.mxu1 %vm566_vm1, %v12904_v34  ;;  %22763 = vmatprep.mubr.msk.bf16.mxu0 %vm566_vm1, %v12908_v17  ;;  %v19412_v34 = vld [vmem:[%s25214_s25 + $0x540] sm:$0xff] }
 0x4c2   : > { %v12925_v39 = vpack.c.bf16 %v19412_v34, %v19411_v7  ;;  %v19512_v7 = vld [vmem:[%s25214_s25 + $0x191] sm:$0xff]  ;;  %v19513_v34 = vld [vmem:[%s25214_s25 + $0x199] sm:$0xff] }
 0x4c3   : > { %v13946_v35 = vpack.c.bf16 %v19513_v34, %v19512_v7 }
 0x4c8   : > { %21724 = vmatmul.mubr.msk.bf16.gmra.mrb[88].mxu1 %vm566_vm1, %v12905_v58  ;;  %22764 = vmatmul.mubr.msk.bf16.gmra.mrb[88].mxu0 %vm566_vm1, %v12909_v53  ;;  %v19415_v58 = vld [vmem:[%s25214_s25 + $0x560] sm:$0xff] }
 0x4c9   : > { %21727 = vmatprep.mubr.msk.bf16.mxu1 %vm566_vm1, %v12906_v45  ;;  %22767 = vmatprep.mubr.msk.bf16.mxu0 %vm566_vm1, %v12910_v63  ;;  %v19416_v45 = vld [vmem:[%s25214_s25 + $0x568] sm:$0xff] }
 0x4d0   : > { %21728 = vmatmul.mubr.msk.bf16.gmra.mrb[92].mxu1 %vm566_vm1, %v12907_v60  ;;  %22768 = vmatmul.mubr.msk.bf16.gmra.mrb[92].mxu0 %vm566_vm1, %v12911_v6  ;;  %v12927_v60 = vpack.c.bf16 %v19416_v45, %v19415_v58  ;;  %v19516_v58 = vld [vmem:[%s25214_s25 + $0x1b9] sm:$0xff]  ;;  %v19517_v45 = vld [vmem:[%s25214_s25 + $0x1c1] sm:$0xff] }
 0x4d1   : > { %21731 = vmatprep.mubr.msk.bf16.mxu1 %vm566_vm1, %v12908_v17  ;;  %22771 = vmatprep.mubr.msk.bf16.mxu0 %vm566_vm1, %v12912_v36  ;;  %v5386_v17 = vpack.c.bf16 %v17925_v21, %v17924_v15  ;;  %v13948_v21 = vpack.c.bf16 %v19517_v45, %v19516_v58 }
 0x4d8   : > { %21732 = vmatmul.mubr.msk.bf16.gmra.mrb[96].mxu1 %vm566_vm1, %v12909_v53  ;;  %22772 = vmatmul.mubr.msk.bf16.gmra.mrb[96].mxu0 %vm566_vm1, %v12913_v59  ;;  %v19487_v53 = vld [vmem:[%s25214_s25 + $0x91] sm:$0xff] }
 0x4d9   : > { %21735 = vmatprep.mubr.msk.bf16.mxu1 %vm566_vm1, %v12910_v63  ;;  %22775 = vmatprep.mubr.msk.bf16.mxu0 %vm566_vm1, %v12914_v29  ;;  %v17928_v63 = vld [vmem:[%s25214_s25 + $0x51] sm:$0xff] }
 0x4da   : > { %v5388_v9 = vpack.c.bf16 %v17929_v44, %v17928_v63  ;;  %v19525_v63 = vld [vmem:[%s25214_s25 + $0x211] sm:$0xff] }
 0x4e0   : > { %21736 = vmatmul.mubr.msk.bf16.gmra.mrb[100].mxu1 %vm566_vm1, %v12911_v6  ;;  %22776 = vmatmul.mubr.msk.bf16.gmra.mrb[100].mxu0 %vm566_vm1, %v12915_v0  ;;  %v13933_v6 = vpack.c.bf16 %v19487_v53, %v19486_v57  ;;  %v19523_v57 = vld [vmem:[%s25214_s25 + $0x1f9] sm:$0xff]  ;;  %v19524_v53 = vld [vmem:[%s25214_s25 + $0x209] sm:$0xff] }
 0x4e1   : > { %21739 = vmatprep.mubr.msk.bf16.mxu1 %vm566_vm1, %v12912_v36  ;;  %22779 = vmatprep.mubr.msk.bf16.mxu0 %vm566_vm1, %v12916_v50  ;;  %v6719_v36 = vsel %vm759_vm0, %v26849_v22, 0  ;;  %v19490_v22 = vld [vmem:[%s25214_s25 + $0xb1] sm:$0xff]  ;;  %v13951_v44 = vpack.c.bf16 %v19523_v57, %v19522_v2  ;;  %v19564_v2 = vld [vmem:[%s25214_s25 + $0x399] sm:$0xff]  ;;  %v19565_v57 = vld [vmem:[%s25214_s25 + $0x3a1] sm:$0xff] }
 0x4e8   : > { %21740 = vmatmul.mubr.msk.bf16.gmra.mrb[104].mxu1 %vm566_vm1, %v12913_v59  ;;  %22780 = vmatmul.mubr.msk.bf16.gmra.mrb[104].mxu0 %vm566_vm1, %v12917_v46  ;;  %v17931_v59 = vld [vmem:[%s25214_s25 + $0x69] sm:$0xff] }
 0x4e9   : > { %21743 = vmatprep.mubr.msk.bf16.mxu1 %vm566_vm1, %v12914_v29  ;;  %22783 = vmatprep.mubr.msk.bf16.mxu0 %vm566_vm1, %v12918_v14  ;;  %v19491_v29 = vld [vmem:[%s25214_s25 + $0xb9] sm:$0xff]  ;;  %v5389_v23 = vpack.c.bf16 %v17931_v59, %v17930_v10  ;;  %v19531_v10 = vld [vmem:[%s25214_s25 + $0x249] sm:$0xff] }
 0x4ea   : > { %v13935_v18 = vpack.c.bf16 %v19491_v29, %v19490_v22  ;;  %v19532_v59 = vld [vmem:[%s25214_s25 + $0x259] sm:$0xff]  ;;  %v19533_v22 = vld [vmem:[%s25214_s25 + $0x261] sm:$0xff] }
 0x4eb   : > { %v13956_v24 = vpack.c.bf16 %v19533_v22, %v19532_v59 }
 0x4f0   : > { %21744 = vmatmul.mubr.msk.bf16.gmra.mrb[108].mxu1 %vm566_vm1, %v12915_v0  ;;  %22784 = vmatmul.mubr.msk.bf16.gmra.mrb[108].mxu0 %vm566_vm1, %v12919_v33  ;;  %v19494_v0 = vld [vmem:[%s25214_s25 + $0xd9] sm:$0xff] }
 0x4f1   : > { %21747 = vmatprep.mubr.msk.bf16.mxu1 %vm566_vm1, %v12916_v50  ;;  %22787 = vmatprep.mubr.msk.bf16.mxu0 %vm566_vm1, %v12920_v37  ;;  %v19495_v50 = vld [vmem:[%s25214_s25 + $0xe1] sm:$0xff] }
 0x4f2   : > { %v13937_v5 = vpack.c.bf16 %v19495_v50, %v19494_v0 }
 0x4f8   : > { %21748 = vmatmul.mubr.msk.bf16.gmra.mrb[112].mxu1 %vm566_vm1, %v12917_v46  ;;  %22788 = vmatmul.mubr.msk.bf16.gmra.mrb[112].mxu0 %vm566_vm1, %v12921_v47  ;;  %v19498_v46 = vld [vmem:[%s25214_s25 + $0x101] sm:$0xff] }
 0x4f9   : > { %21751 = vmatprep.mubr.msk.bf16.mxu1 %vm566_vm1, %v12918_v14  ;;  %22791 = vmatprep.mubr.msk.bf16.mxu0 %vm566_vm1, %v12922_v48  ;;  %v19499_v14 = vld [vmem:[%s25214_s25 + $0x109] sm:$0xff] }
 0x4fa   : > { %v13939_v31 = vpack.c.bf16 %v19499_v14, %v19498_v46  ;;  %v13959_v46 = vpack.c.bf16 %v19539_v52, %v19538_v20  ;;  %v19580_v20 = vld [vmem:[%s25214_s25 + $0x439] sm:$0xff]  ;;  %v19581_v52 = vld [vmem:[%s25214_s25 + $0x441] sm:$0xff] }
 0x500   : > { %21752 = vmatmul.mubr.msk.bf16.gmra.mrb[116].mxu1 %vm566_vm1, %v12919_v33  ;;  %22792 = vmatmul.mubr.msk.bf16.gmra.mrb[116].mxu0 %vm566_vm1, %v12923_v13  ;;  %v19502_v33 = vld [vmem:[%s25214_s25 + $0x129] sm:$0xff] }
 0x501   : > { %21755 = vmatprep.mubr.msk.bf16.mxu1 %vm566_vm1, %v12920_v37  ;;  %22795 = vmatprep.mubr.msk.bf16.mxu0 %vm566_vm1, %v12924_v51  ;;  %v19503_v37 = vld [vmem:[%s25214_s25 + $0x131] sm:$0xff]  ;;  %v19511_v51 = vld [vmem:[%s25214_s25 + $0x181] sm:$0xff] }
 0x502   : > { %v13941_v32 = vpack.c.bf16 %v19503_v37, %v19502_v33  ;;  %v13961_v33 = vpack.c.bf16 %v19543_v16, %v19542_v40  ;;  %v19584_v40 = vld [vmem:[%s25214_s25 + $0x461] sm:$0xff]  ;;  %v19585_v16 = vld [vmem:[%s25214_s25 + $0x469] sm:$0xff] }
 0x508   : > { %21756 = vmatmul.mubr.msk.bf16.gmra.mrb[120].mxu1 %vm566_vm1, %v12921_v47  ;;  %22796 = vmatmul.mubr.msk.bf16.gmra.mrb[120].mxu0 %vm566_vm1, %v12925_v39  ;;  %v19506_v47 = vld [vmem:[%s25214_s25 + $0x151] sm:$0xff]  ;;  %v19514_v39 = vld [vmem:[%s25214_s25 + $0x1a1] sm:$0xff] }
 0x509   : > { %21759 = vmatprep.mubr.msk.bf16.mxu1 %vm566_vm1, %v12922_v48  ;;  %22799 = vmatprep.mubr.msk.bf16.mxu0 %vm566_vm1, %v12926_v12  ;;  %v19507_v48 = vld [vmem:[%s25214_s25 + $0x159] sm:$0xff]  ;;  %v19515_v12 = vld [vmem:[%s25214_s25 + $0x1a9] sm:$0xff] }
 0x50a   : > { %v13943_v55 = vpack.c.bf16 %v19507_v48, %v19506_v47  ;;  %v13947_v15 = vpack.c.bf16 %v19515_v12, %v19514_v39  ;;  %v13963_v47 = vpack.c.bf16 %v19547_v41, %v19546_v54  ;;  %v19556_v39 = vld [vmem:[%s25214_s25 + $0x349] sm:$0xff]  ;;  %v19557_v12 = vld [vmem:[%s25214_s25 + $0x351] sm:$0xff] }
 0x50b   : > { %v13968_v45 = vpack.c.bf16 %v19557_v12, %v19556_v39  ;;  %v19588_v54 = vld [vmem:[%s25214_s25 + $0x489] sm:$0xff]  ;;  %v19589_v41 = vld [vmem:[%s25214_s25 + $0x491] sm:$0xff] }
 0x510   : > { %21760 = vmatmul.mubr.msk.bf16.gmra.mrb[124].mxu1 %vm566_vm1, %v12923_v13  ;;  %22800 = vmatmul.mubr.msk.bf16.gmra.mrb[124].mxu0 %vm566_vm1, %v12927_v60  ;;  %v19510_v13 = vld [vmem:[%s25214_s25 + $0x179] sm:$0xff]  ;;  %v19520_v60 = vld [vmem:[%s25214_s25 + $0x1e1] sm:$0xff] }
 0x511   : > { %21765 = vmatprep.mubr.msk.bf16.mxu1 %vm566_vm1, %v5386_v17  ;;  %22805 = vmatprep.mubr.msk.bf16.mxu0 %vm566_vm1, %v13932_v28  ;;  %v13945_v43 = vpack.c.bf16 %v19511_v51, %v19510_v13  ;;  %v19521_v17 = vld [vmem:[%s25214_s25 + $0x1e9] sm:$0xff]  ;;  %v19552_v13 = vld [vmem:[%s25214_s25 + $0x321] sm:$0xff] }
 0x512   : > { %v13950_v3 = vpack.c.bf16 %v19521_v17, %v19520_v60  ;;  %v19553_v51 = vld [vmem:[%s25214_s25 + $0x329] sm:$0xff] }
 0x513   : > { %v13966_v34 = vpack.c.bf16 %v19553_v51, %v19552_v13 }
 0x518   : > { %21766 = vmatmul.mubr.msk.bf16.vlgmr.msra.gmra.mrb[0].mxu1 %vm566_vm1, %v5387_v62  ;;  %22806 = vmatmul.mubr.msk.bf16.vlgmr.msra.gmra.mrb[0].mxu0 %vm566_vm1, %v13933_v6  ;;  %v13952_v62 = vpack.c.bf16 %v19525_v63, %v19524_v53  ;;  %v13972_v63 = vpack.c.bf16 %v19565_v57, %v19564_v2 }
 0x519   : > { %21894 = vmatpush3.bf16.msra.mxu1 %v6719_v36  ;;  %22934 = vmatpush3.bf16.msra.mxu0 %v15265_v8  ;;  %v19529_v36 = vld [vmem:[%s25214_s25 + $0x239] sm:$0xff] }
 0x51a   : > { %21769 = vmatprep.mubr.msk.bf16.mxu1 %vm566_vm1, %v5388_v9  ;;  %22809 = vmatprep.mubr.msk.bf16.mxu0 %vm566_vm1, %v13934_v11  ;;  %v13953_v9 = vpack.c.bf16 %v19527_v49, %v19526_v61  ;;  %v19568_v61 = vld [vmem:[%s25214_s25 + $0x3c1] sm:$0xff]  ;;  %v19569_v49 = vld [vmem:[%s25214_s25 + $0x3c9] sm:$0xff] }
 0x51b   : > { %25120 = vmatprep.subr.msk.bf16.mxu1 %vm759_vm0, %v27131_v4 }
 0x520   : > { %21770 = vmatmul.mubr.msk.bf16.gmra.mrb[4].mxu1 %vm566_vm1, %v5389_v23  ;;  %22810 = vmatmul.mubr.msk.bf16.gmra.mrb[4].mxu0 %vm566_vm1, %v13935_v18  ;;  %v19535_v23 = vld [vmem:[%s25214_s25 + $0x271] sm:$0xff] }
 0x521   : > { %21773 = vmatprep.mubr.msk.bf16.mxu1 %vm566_vm1, %v13932_v28  ;;  %22813 = vmatprep.mubr.msk.bf16.mxu0 %vm566_vm1, %v13936_v25  ;;  %v13949_v28 = vpack.c.bf16 %v19519_v19, %v19518_v26  ;;  %v13957_v0 = vpack.c.bf16 %v19535_v23, %v19534_v27  ;;  %v19560_v26 = vld [vmem:[%s25214_s25 + $0x371] sm:$0xff]  ;;  %v19561_v19 = vld [vmem:[%s25214_s25 + $0x379] sm:$0xff] }
 0x522   : > { %v13970_v17 = vpack.c.bf16 %v19561_v19, %v19560_v26  ;;  %v19576_v27 = vld [vmem:[%s25214_s25 + $0x411] sm:$0xff]  ;;  %v19577_v23 = vld [vmem:[%s25214_s25 + $0x419] sm:$0xff] }
 0x528   : > { %21774 = vmatmul.mubr.msk.bf16.gmra.mrb[8].mxu1 %vm566_vm1, %v13933_v6  ;;  %22814 = vmatmul.mubr.msk.bf16.gmra.mrb[8].mxu0 %vm566_vm1, %v13937_v5  ;;  %v19528_v6 = vld [vmem:[%s25214_s25 + $0x231] sm:$0xff] }
 0x529   : > { %21777 = vmatprep.mubr.msk.bf16.mxu1 %vm566_vm1, %v13934_v11  ;;  %22817 = vmatprep.mubr.msk.bf16.mxu0 %vm566_vm1, %v13938_v38  ;;  %v13954_v8 = vpack.c.bf16 %v19529_v36, %v19528_v6  ;;  %v19530_v11 = vld [vmem:[%s25214_s25 + $0x241] sm:$0xff]  ;;  %v13974_v36 = vpack.c.bf16 %v19569_v49, %v19568_v61 }
 0x52a   : > { %v13955_v29 = vpack.c.bf16 %v19531_v10, %v19530_v11  ;;  %v19572_v11 = vld [vmem:[%s25214_s25 + $0x3e9] sm:$0xff]  ;;  %v19573_v10 = vld [vmem:[%s25214_s25 + $0x3f1] sm:$0xff] }
 0x52b   : > { %v13976_v22 = vpack.c.bf16 %v19573_v10, %v19572_v11  ;;  %v19679_v11 = vld [vmem:[%s25214_s25 + $0x7a] sm:$0xff]  ;;  %v19680_v10 = vld [vmem:[%s25214_s25 + $0x82] sm:$0xff] }
 0x530   : > { %21778 = vmatmul.mubr.msk.bf16.gmra.mrb[12].mxu1 %vm566_vm1, %v13935_v18  ;;  %22818 = vmatmul.mubr.msk.bf16.gmra.mrb[12].mxu0 %vm566_vm1, %v13939_v31  ;;  %v19536_v18 = vld [vmem:[%s25214_s25 + $0x281] sm:$0xff] }
 0x531   : > { %21781 = vmatprep.mubr.msk.bf16.mxu1 %vm566_vm1, %v13936_v25  ;;  %22821 = vmatprep.mubr.msk.bf16.mxu0 %vm566_vm1, %v13940_v30  ;;  %v19537_v25 = vld [vmem:[%s25214_s25 + $0x289] sm:$0xff] }
 0x532   : > { %v13958_v50 = vpack.c.bf16 %v19537_v25, %v19536_v18  ;;  %v13978_v25 = vpack.c.bf16 %v19577_v23, %v19576_v27  ;;  %v18122_v27 = vld [vmem:[%s25214_s25 + $0x42] sm:$0xff]  ;;  %v19681_v23 = vld [vmem:[%s25214_s25 + $0x8a] sm:$0xff] }
 0x538   : > { %21782 = vmatmul.mubr.msk.bf16.gmra.mrb[16].mxu1 %vm566_vm1, %v13937_v5  ;;  %22822 = vmatmul.mubr.msk.bf16.gmra.mrb[16].mxu0 %vm566_vm1, %v13941_v32  ;;  %v19540_v5 = vld [vmem:[%s25214_s25 + $0x2a9] sm:$0xff] }
 0x539   : > { %21785 = vmatprep.mubr.msk.bf16.mxu1 %vm566_vm1, %v13938_v38  ;;  %22825 = vmatprep.mubr.msk.bf16.mxu0 %vm566_vm1, %v13942_v56  ;;  %v19541_v38 = vld [vmem:[%s25214_s25 + $0x2b1] sm:$0xff] }
 0x53a   : > { %v13960_v14 = vpack.c.bf16 %v19541_v38, %v19540_v5  ;;  %v13980_v38 = vpack.c.bf16 %v19581_v52, %v19580_v20  ;;  %v19683_v20 = vld [vmem:[%s25214_s25 + $0xa2] sm:$0xff]  ;;  %v19684_v52 = vld [vmem:[%s25214_s25 + $0xaa] sm:$0xff] }
 0x540   : > { %21786 = vmatmul.mubr.msk.bf16.gmra.mrb[20].mxu1 %vm566_vm1, %v13939_v31  ;;  %22826 = vmatmul.mubr.msk.bf16.gmra.mrb[20].mxu0 %vm566_vm1, %v13943_v55  ;;  %v19544_v31 = vld [vmem:[%s25214_s25 + $0x2d1] sm:$0xff] }
 0x541   : > { %21789 = vmatprep.mubr.msk.bf16.mxu1 %vm566_vm1, %v13940_v30  ;;  %22829 = vmatprep.mubr.msk.bf16.mxu0 %vm566_vm1, %v13944_v1  ;;  %v19545_v30 = vld [vmem:[%s25214_s25 + $0x2d9] sm:$0xff] }
 0x542   : > { %v13962_v37 = vpack.c.bf16 %v19545_v30, %v19544_v31  ;;  %v13982_v30 = vpack.c.bf16 %v19585_v16, %v19584_v40  ;;  %v15002_v40 = vpack.c.bf16 %v19684_v52, %v19683_v20  ;;  %v18125_v16 = vld [vmem:[%s25214_s25 + $0x62] sm:$0xff]  ;;  %v19721_v20 = vld [vmem:[%s25214_s25 + $0x21a] sm:$0xff] }
 0x543   : > { %v19722_v52 = vld [vmem:[%s25214_s25 + $0x222] sm:$0xff] }
 0x548   : > { %21790 = vmatmul.mubr.msk.bf16.gmra.mrb[24].mxu1 %vm566_vm1, %v13941_v32  ;;  %22830 = vmatmul.mubr.msk.bf16.gmra.mrb[24].mxu0 %vm566_vm1, %v13945_v43  ;;  %v19548_v32 = vld [vmem:[%s25214_s25 + $0x2f9] sm:$0xff] }
 0x549   : > { %21793 = vmatprep.mubr.msk.bf16.mxu1 %vm566_vm1, %v13942_v56  ;;  %22833 = vmatprep.mubr.msk.bf16.mxu0 %vm566_vm1, %v13946_v35  ;;  %v19549_v56 = vld [vmem:[%s25214_s25 + $0x301] sm:$0xff] }
 0x54a   : > { %v13964_v48 = vpack.c.bf16 %v19549_v56, %v19548_v32  ;;  %v13984_v56 = vpack.c.bf16 %v19589_v41, %v19588_v54 }
 0x550   : > { %21794 = vmatmul.mubr.msk.bf16.gmra.mrb[28].mxu1 %vm566_vm1, %v13943_v55  ;;  %22834 = vmatmul.mubr.msk.bf16.gmra.mrb[28].mxu0 %vm566_vm1, %v13947_v15  ;;  %v19551_v55 = vld [vmem:[%s25214_s25 + $0x311] sm:$0xff] }
 0x551   : > { %21797 = vmatprep.mubr.msk.bf16.mxu1 %vm566_vm1, %v13944_v1  ;;  %22837 = vmatprep.mubr.msk.bf16.mxu0 %vm566_vm1, %v13948_v21  ;;  %v27139_v1 = vld [vmem:[%s28231_s1 + $0x78] sm:$0x3f]   ;;  %v13965_v7 = vpack.c.bf16 %v19551_v55, %v19550_v42 }
 0x552   : > { %25128 = vmatprep.subr.msk.bf16.mxu0 %vm759_vm0, %v27139_v1  ;;  %v19592_v42 = vld [vmem:[%s25214_s25 + $0x4b1] sm:$0xff]  ;;  %v19593_v55 = vld [vmem:[%s25214_s25 + $0x4b9] sm:$0xff] }
 0x553   : > { %v13986_v51 = vpack.c.bf16 %v19593_v55, %v19592_v42 }
 0x558   : > { %21798 = vmatmul.mubr.msk.bf16.gmra.mrb[32].mxu1 %vm566_vm1, %v13945_v43  ;;  %22838 = vmatmul.mubr.msk.bf16.gmra.mrb[32].mxu0 %vm566_vm1, %v13949_v28  ;;  %v19554_v43 = vld [vmem:[%s25214_s25 + $0x331] sm:$0xff] }
 0x559   : > { %21801 = vmatprep.mubr.msk.bf16.mxu1 %vm566_vm1, %v13946_v35  ;;  %22841 = vmatprep.mubr.msk.bf16.mxu0 %vm566_vm1, %v13950_v3  ;;  %v19555_v35 = vld [vmem:[%s25214_s25 + $0x339] sm:$0xff] }
 0x55a   : > { %v13967_v58 = vpack.c.bf16 %v19555_v35, %v19554_v43  ;;  %v19596_v43 = vld [vmem:[%s25214_s25 + $0x4d9] sm:$0xff]  ;;  %v19597_v35 = vld [vmem:[%s25214_s25 + $0x4e1] sm:$0xff] }
 0x55b   : > { %v13988_v12 = vpack.c.bf16 %v19597_v35, %v19596_v43 }
 0x560   : > { %21802 = vmatmul.mubr.msk.bf16.gmra.mrb[36].mxu1 %vm566_vm1, %v13947_v15  ;;  %22842 = vmatmul.mubr.msk.bf16.gmra.mrb[36].mxu0 %vm566_vm1, %v13951_v44  ;;  %v19558_v15 = vld [vmem:[%s25214_s25 + $0x359] sm:$0xff] }
 0x561   : > { %21805 = vmatprep.mubr.msk.bf16.mxu1 %vm566_vm1, %v13948_v21  ;;  %22845 = vmatprep.mubr.msk.bf16.mxu0 %vm566_vm1, %v13952_v62  ;;  %v19559_v21 = vld [vmem:[%s25214_s25 + $0x361] sm:$0xff] }
 0x562   : > { %v13969_v60 = vpack.c.bf16 %v19559_v21, %v19558_v15  ;;  %v19600_v15 = vld [vmem:[%s25214_s25 + $0x501] sm:$0xff]  ;;  %v19601_v21 = vld [vmem:[%s25214_s25 + $0x509] sm:$0xff] }
 0x563   : > { %v13990_v19 = vpack.c.bf16 %v19601_v21, %v19600_v15 }
 0x568   : > { %21806 = vmatmul.mubr.msk.bf16.gmra.mrb[40].mxu1 %vm566_vm1, %v13949_v28  ;;  %22846 = vmatmul.mubr.msk.bf16.gmra.mrb[40].mxu0 %vm566_vm1, %v13953_v9  ;;  %v19562_v28 = vld [vmem:[%s25214_s25 + $0x381] sm:$0xff] }
 0x569   : > { %21809 = vmatprep.mubr.msk.bf16.mxu1 %vm566_vm1, %v13950_v3  ;;  %22849 = vmatprep.mubr.msk.bf16.mxu0 %vm566_vm1, %v13954_v8  ;;  %v19563_v3 = vld [vmem:[%s25214_s25 + $0x389] sm:$0xff] }
 0x56a   : > { %v13971_v53 = vpack.c.bf16 %v19563_v3, %v19562_v28  ;;  %v19604_v28 = vld [vmem:[%s25214_s25 + $0x529] sm:$0xff]  ;;  %v19605_v3 = vld [vmem:[%s25214_s25 + $0x531] sm:$0xff] }
 0x56b   : > { %v13992_v57 = vpack.c.bf16 %v19605_v3, %v19604_v28 }
 0x570   : > { %21810 = vmatmul.mubr.msk.bf16.gmra.mrb[44].mxu1 %vm566_vm1, %v13951_v44  ;;  %22850 = vmatmul.mubr.msk.bf16.gmra.mrb[44].mxu0 %vm566_vm1, %v13955_v29  ;;  %v19566_v44 = vld [vmem:[%s25214_s25 + $0x3a9] sm:$0xff] }
 0x571   : > { %21813 = vmatprep.mubr.msk.bf16.mxu1 %vm566_vm1, %v13952_v62  ;;  %22853 = vmatprep.mubr.msk.bf16.mxu0 %vm566_vm1, %v13956_v24  ;;  %v19567_v62 = vld [vmem:[%s25214_s25 + $0x3b1] sm:$0xff] }
 0x572   : > { %v13973_v6 = vpack.c.bf16 %v19567_v62, %v19566_v44  ;;  %v19608_v44 = vld [vmem:[%s25214_s25 + $0x551] sm:$0xff]  ;;  %v19609_v62 = vld [vmem:[%s25214_s25 + $0x559] sm:$0xff] }
 0x573   : > { %v13994_v49 = vpack.c.bf16 %v19609_v62, %v19608_v44 }
 0x578   : > { %21814 = vmatmul.mubr.msk.bf16.gmra.mrb[48].mxu1 %vm566_vm1, %v13953_v9  ;;  %22854 = vmatmul.mubr.msk.bf16.gmra.mrb[48].mxu0 %vm566_vm1, %v13957_v0  ;;  %v19570_v9 = vld [vmem:[%s25214_s25 + $0x3d1] sm:$0xff] }
 0x579   : > { %21817 = vmatprep.mubr.msk.bf16.mxu1 %vm566_vm1, %v13954_v8  ;;  %22857 = vmatprep.mubr.msk.bf16.mxu0 %vm566_vm1, %v13958_v50  ;;  %v19571_v8 = vld [vmem:[%s25214_s25 + $0x3d9] sm:$0xff] }
 0x57a   : > { %v13975_v59 = vpack.c.bf16 %v19571_v8, %v19570_v9  ;;  %v18119_v9 = vld [vmem:[%s25214_s25 + $0x2a] sm:$0xff]  ;;  %v18120_v8 = vld [vmem:[%s25214_s25 + $0x32] sm:$0xff] }
 0x580   : > { %21818 = vmatmul.mubr.msk.bf16.gmra.mrb[52].mxu1 %vm566_vm1, %v13955_v29  ;;  %22858 = vmatmul.mubr.msk.bf16.gmra.mrb[52].mxu0 %vm566_vm1, %v13959_v46  ;;  %v19574_v29 = vld [vmem:[%s25214_s25 + $0x3f9] sm:$0xff] }
 0x581   : > { %21821 = vmatprep.mubr.msk.bf16.mxu1 %vm566_vm1, %v13956_v24  ;;  %22861 = vmatprep.mubr.msk.bf16.mxu0 %vm566_vm1, %v13960_v14  ;;  %v19575_v24 = vld [vmem:[%s25214_s25 + $0x401] sm:$0xff] }
 0x582   : > { %v13977_v18 = vpack.c.bf16 %v19575_v24, %v19574_v29  ;;  %v15000_v29 = vpack.c.bf16 %v19680_v10, %v19679_v11  ;;  %v18121_v24 = vld [vmem:[%s25214_s25 + $0x3a] sm:$0xff]  ;;  %v19713_v11 = vld [vmem:[%s25214_s25 + $0x1ca] sm:$0xff]  ;;  %v19714_v10 = vld [vmem:[%s25214_s25 + $0x1d2] sm:$0xff] }
 0x588   : > { %21822 = vmatmul.mubr.msk.bf16.gmra.mrb[56].mxu1 %vm566_vm1, %v13957_v0  ;;  %22862 = vmatmul.mubr.msk.bf16.gmra.mrb[56].mxu0 %vm566_vm1, %v13961_v33  ;;  %v19578_v0 = vld [vmem:[%s25214_s25 + $0x421] sm:$0xff] }
 0x589   : > { %21825 = vmatprep.mubr.msk.bf16.mxu1 %vm566_vm1, %v13958_v50  ;;  %22865 = vmatprep.mubr.msk.bf16.mxu0 %vm566_vm1, %v13962_v37  ;;  %v19579_v50 = vld [vmem:[%s25214_s25 + $0x429] sm:$0xff] }
 0x58a   : > { %v13979_v5 = vpack.c.bf16 %v19579_v50, %v19578_v0  ;;  %v18124_v0 = vld [vmem:[%s25214_s25 + $0x5a] sm:$0xff]  ;;  %v6455_v50 = vpack.c.bf16 %v18122_v27, %v18121_v24  ;;  %v19717_v27 = vld [vmem:[%s25214_s25 + $0x1f2] sm:$0xff] }
 0x590   : > { %21826 = vmatmul.mubr.msk.bf16.gmra.mrb[60].mxu1 %vm566_vm1, %v13959_v46  ;;  %22866 = vmatmul.mubr.msk.bf16.gmra.mrb[60].mxu0 %vm566_vm1, %v13963_v47  ;;  %v19582_v46 = vld [vmem:[%s25214_s25 + $0x449] sm:$0xff] }
 0x591   : > { %21829 = vmatprep.mubr.msk.bf16.mxu1 %vm566_vm1, %v13960_v14  ;;  %22869 = vmatprep.mubr.msk.bf16.mxu0 %vm566_vm1, %v13964_v48  ;;  %v19583_v14 = vld [vmem:[%s25214_s25 + $0x451] sm:$0xff] }
 0x592   : > { %v13981_v31 = vpack.c.bf16 %v19583_v14, %v19582_v46  ;;  %v16333_v14 = vsel %vm759_vm0, %v27139_v1, 0  ;;  %v19687_v1 = vld [vmem:[%s25214_s25 + $0xca] sm:$0xff] }
 0x598   : > { %21830 = vmatmul.mubr.msk.bf16.gmra.mrb[64].mxu1 %vm566_vm1, %v13961_v33  ;;  %22870 = vmatmul.mubr.msk.bf16.gmra.mrb[64].mxu0 %vm566_vm1, %v13965_v7  ;;  %v19586_v33 = vld [vmem:[%s25214_s25 + $0x471] sm:$0xff] }
 0x599   : > { %21833 = vmatprep.mubr.msk.bf16.mxu1 %vm566_vm1, %v13962_v37  ;;  %22873 = vmatprep.mubr.msk.bf16.mxu0 %vm566_vm1, %v13966_v34  ;;  %v19587_v37 = vld [vmem:[%s25214_s25 + $0x479] sm:$0xff] }
 0x59a   : > { %v13983_v32 = vpack.c.bf16 %v19587_v37, %v19586_v33  ;;  %v19688_v33 = vld [vmem:[%s25214_s25 + $0xd2] sm:$0xff] }
 0x59b   : > { %v15004_v41 = vpack.c.bf16 %v19688_v33, %v19687_v1  ;;  %v19729_v33 = vld [vmem:[%s25214_s25 + $0x26a] sm:$0xff] }
 0x5a0   : > { %21834 = vmatmul.mubr.msk.bf16.gmra.mrb[68].mxu1 %vm566_vm1, %v13963_v47  ;;  %22874 = vmatmul.mubr.msk.bf16.gmra.mrb[68].mxu0 %vm566_vm1, %v13967_v58  ;;  %v19590_v47 = vld [vmem:[%s25214_s25 + $0x499] sm:$0xff] }
 0x5a1   : > { %21837 = vmatprep.mubr.msk.bf16.mxu1 %vm566_vm1, %v13964_v48  ;;  %22877 = vmatprep.mubr.msk.bf16.mxu0 %vm566_vm1, %v13968_v45  ;;  %v19591_v48 = vld [vmem:[%s25214_s25 + $0x4a1] sm:$0xff] }
 0x5a2   : > { %v13985_v13 = vpack.c.bf16 %v19591_v48, %v19590_v47  ;;  %v19691_v47 = vld [vmem:[%s25214_s25 + $0xf2] sm:$0xff]  ;;  %v19692_v48 = vld [vmem:[%s25214_s25 + $0xfa] sm:$0xff] }
 0x5a3   : > { %v15006_v55 = vpack.c.bf16 %v19692_v48, %v19691_v47  ;;  %v19733_v47 = vld [vmem:[%s25214_s25 + $0x292] sm:$0xff]  ;;  %v19734_v48 = vld [vmem:[%s25214_s25 + $0x29a] sm:$0xff] }
 0x5a8   : > { %21838 = vmatmul.mubr.msk.bf16.gmra.mrb[72].mxu1 %vm566_vm1, %v13965_v7  ;;  %22878 = vmatmul.mubr.msk.bf16.gmra.mrb[72].mxu0 %vm566_vm1, %v13969_v60  ;;  %v19594_v7 = vld [vmem:[%s25214_s25 + $0x4c1] sm:$0xff] }
 0x5a9   : > { %21841 = vmatprep.mubr.msk.bf16.mxu1 %vm566_vm1, %v13966_v34  ;;  %22881 = vmatprep.mubr.msk.bf16.mxu0 %vm566_vm1, %v13970_v17  ;;  %v19595_v34 = vld [vmem:[%s25214_s25 + $0x4c9] sm:$0xff] }
 0x5aa   : > { %v13987_v39 = vpack.c.bf16 %v19595_v34, %v19594_v7  ;;  %v19695_v7 = vld [vmem:[%s25214_s25 + $0x11a] sm:$0xff]  ;;  %v19696_v34 = vld [vmem:[%s25214_s25 + $0x122] sm:$0xff] }
 0x5ab   : > { %v15008_v35 = vpack.c.bf16 %v19696_v34, %v19695_v7  ;;  %v19737_v7 = vld [vmem:[%s25214_s25 + $0x2ba] sm:$0xff]  ;;  %v19738_v34 = vld [vmem:[%s25214_s25 + $0x2c2] sm:$0xff] }
 0x5b0   : > { %21842 = vmatmul.mubr.msk.bf16.gmra.mrb[76].mxu1 %vm566_vm1, %v13967_v58  ;;  %22882 = vmatmul.mubr.msk.bf16.gmra.mrb[76].mxu0 %vm566_vm1, %v13971_v53  ;;  %v19598_v58 = vld [vmem:[%s25214_s25 + $0x4e9] sm:$0xff] }
 0x5b1   : > { %21845 = vmatprep.mubr.msk.bf16.mxu1 %vm566_vm1, %v13968_v45  ;;  %22885 = vmatprep.mubr.msk.bf16.mxu0 %vm566_vm1, %v13972_v63  ;;  %v19599_v45 = vld [vmem:[%s25214_s25 + $0x4f1] sm:$0xff] }
 0x5b2   : > { %v13989_v26 = vpack.c.bf16 %v19599_v45, %v19598_v58  ;;  %v19699_v58 = vld [vmem:[%s25214_s25 + $0x142] sm:$0xff]  ;;  %v19700_v45 = vld [vmem:[%s25214_s25 + $0x14a] sm:$0xff] }
 0x5b3   : > { %v15010_v21 = vpack.c.bf16 %v19700_v45, %v19699_v58  ;;  %v19741_v58 = vld [vmem:[%s25214_s25 + $0x2e2] sm:$0xff]  ;;  %v19742_v45 = vld [vmem:[%s25214_s25 + $0x2ea] sm:$0xff] }
 0x5b8   : > { %21846 = vmatmul.mubr.msk.bf16.gmra.mrb[80].mxu1 %vm566_vm1, %v13969_v60  ;;  %22886 = vmatmul.mubr.msk.bf16.gmra.mrb[80].mxu0 %vm566_vm1, %v13973_v6  ;;  %v19602_v60 = vld [vmem:[%s25214_s25 + $0x511] sm:$0xff] }
 0x5b9   : > { %21849 = vmatprep.mubr.msk.bf16.mxu1 %vm566_vm1, %v13970_v17  ;;  %22889 = vmatprep.mubr.msk.bf16.mxu0 %vm566_vm1, %v13974_v36  ;;  %v19603_v17 = vld [vmem:[%s25214_s25 + $0x519] sm:$0xff] }
 0x5ba   : > { %v13991_v2 = vpack.c.bf16 %v19603_v17, %v19602_v60  ;;  %v19703_v60 = vld [vmem:[%s25214_s25 + $0x16a] sm:$0xff]  ;;  %v19704_v17 = vld [vmem:[%s25214_s25 + $0x172] sm:$0xff] }
 0x5bb   : > { %v15012_v3 = vpack.c.bf16 %v19704_v17, %v19703_v60  ;;  %v19745_v60 = vld [vmem:[%s25214_s25 + $0x30a] sm:$0xff]  ;;  %v19746_v17 = vld [vmem:[%s25214_s25 + $0x312] sm:$0xff] }
 0x5c0   : > { %21850 = vmatmul.mubr.msk.bf16.gmra.mrb[84].mxu1 %vm566_vm1, %v13971_v53  ;;  %22890 = vmatmul.mubr.msk.bf16.gmra.mrb[84].mxu0 %vm566_vm1, %v13975_v59  ;;  %v19606_v53 = vld [vmem:[%s25214_s25 + $0x539] sm:$0xff] }
 0x5c1   : > { %21853 = vmatprep.mubr.msk.bf16.mxu1 %vm566_vm1, %v13972_v63  ;;  %22893 = vmatprep.mubr.msk.bf16.mxu0 %vm566_vm1, %v13976_v22  ;;  %v19607_v63 = vld [vmem:[%s25214_s25 + $0x541] sm:$0xff] }
 0x5c2   : > { %v13993_v61 = vpack.c.bf16 %v19607_v63, %v19606_v53  ;;  %v19707_v53 = vld [vmem:[%s25214_s25 + $0x192] sm:$0xff]  ;;  %v19708_v63 = vld [vmem:[%s25214_s25 + $0x19a] sm:$0xff] }
 0x5c3   : > { %v15014_v62 = vpack.c.bf16 %v19708_v63, %v19707_v53  ;;  %v19749_v53 = vld [vmem:[%s25214_s25 + $0x332] sm:$0xff]  ;;  %v19750_v63 = vld [vmem:[%s25214_s25 + $0x33a] sm:$0xff] }
 0x5c8   : > { %21854 = vmatmul.mubr.msk.bf16.gmra.mrb[88].mxu1 %vm566_vm1, %v13973_v6  ;;  %22894 = vmatmul.mubr.msk.bf16.gmra.mrb[88].mxu0 %vm566_vm1, %v13977_v18  ;;  %v19610_v6 = vld [vmem:[%s25214_s25 + $0x561] sm:$0xff] }
 0x5c9   : > { %21857 = vmatprep.mubr.msk.bf16.mxu1 %vm566_vm1, %v13974_v36  ;;  %22897 = vmatprep.mubr.msk.bf16.mxu0 %vm566_vm1, %v13978_v25  ;;  %v19611_v36 = vld [vmem:[%s25214_s25 + $0x569] sm:$0xff] }
 0x5d0   : > { %21858 = vmatmul.mubr.msk.bf16.gmra.mrb[92].mxu1 %vm566_vm1, %v13975_v59  ;;  %22898 = vmatmul.mubr.msk.bf16.gmra.mrb[92].mxu0 %vm566_vm1, %v13979_v5  ;;  %v13995_v59 = vpack.c.bf16 %v19611_v36, %v19610_v6  ;;  %v19711_v6 = vld [vmem:[%s25214_s25 + $0x1ba] sm:$0xff]  ;;  %v19712_v36 = vld [vmem:[%s25214_s25 + $0x1c2] sm:$0xff] }
 0x5d1   : > { %21861 = vmatprep.mubr.msk.bf16.mxu1 %vm566_vm1, %v13976_v22  ;;  %22901 = vmatprep.mubr.msk.bf16.mxu0 %vm566_vm1, %v13980_v38  ;;  %v6454_v22 = vpack.c.bf16 %v18120_v8, %v18119_v9  ;;  %v15016_v8 = vpack.c.bf16 %v19712_v36, %v19711_v6  ;;  %v19753_v6 = vld [vmem:[%s25214_s25 + $0x35a] sm:$0xff]  ;;  %v19754_v36 = vld [vmem:[%s25214_s25 + $0x362] sm:$0xff] }
 0x5d8   : > { %21862 = vmatmul.mubr.msk.bf16.gmra.mrb[96].mxu1 %vm566_vm1, %v13977_v18  ;;  %22902 = vmatmul.mubr.msk.bf16.gmra.mrb[96].mxu0 %vm566_vm1, %v13981_v31  ;;  %v19682_v18 = vld [vmem:[%s25214_s25 + $0x92] sm:$0xff] }
 0x5d9   : > { %21865 = vmatprep.mubr.msk.bf16.mxu1 %vm566_vm1, %v13978_v25  ;;  %22905 = vmatprep.mubr.msk.bf16.mxu0 %vm566_vm1, %v13982_v30  ;;  %v18123_v25 = vld [vmem:[%s25214_s25 + $0x52] sm:$0xff] }
 0x5da   : > { %v6456_v46 = vpack.c.bf16 %v18124_v0, %v18123_v25  ;;  %v19720_v25 = vld [vmem:[%s25214_s25 + $0x212] sm:$0xff] }
 0x5e0   : > { %21866 = vmatmul.mubr.msk.bf16.gmra.mrb[100].mxu1 %vm566_vm1, %v13979_v5  ;;  %22906 = vmatmul.mubr.msk.bf16.gmra.mrb[100].mxu0 %vm566_vm1, %v13983_v32  ;;  %v15001_v5 = vpack.c.bf16 %v19682_v18, %v19681_v23  ;;  %v19718_v23 = vld [vmem:[%s25214_s25 + $0x1fa] sm:$0xff]  ;;  %v19719_v18 = vld [vmem:[%s25214_s25 + $0x20a] sm:$0xff] }
 0x5e1   : > { %21869 = vmatprep.mubr.msk.bf16.mxu1 %vm566_vm1, %v13980_v38  ;;  %22909 = vmatprep.mubr.msk.bf16.mxu0 %vm566_vm1, %v13984_v56  ;;  %v7787_v38 = vsel %vm759_vm0, %v27131_v4, 0  ;;  %v19685_v4 = vld [vmem:[%s25214_s25 + $0xb2] sm:$0xff]  ;;  %v15019_v0 = vpack.c.bf16 %v19718_v23, %v19717_v27 }
 0x5e8   : > { %21870 = vmatmul.mubr.msk.bf16.gmra.mrb[104].mxu1 %vm566_vm1, %v13981_v31  ;;  %22910 = vmatmul.mubr.msk.bf16.gmra.mrb[104].mxu0 %vm566_vm1, %v13985_v13  ;;  %v18126_v31 = vld [vmem:[%s25214_s25 + $0x6a] sm:$0xff] }
 0x5e9   : > { %21873 = vmatprep.mubr.msk.bf16.mxu1 %vm566_vm1, %v13982_v30  ;;  %22913 = vmatprep.mubr.msk.bf16.mxu0 %vm566_vm1, %v13986_v51  ;;  %v19686_v30 = vld [vmem:[%s25214_s25 + $0xba] sm:$0xff]  ;;  %v6457_v37 = vpack.c.bf16 %v18126_v31, %v18125_v16  ;;  %v19726_v16 = vld [vmem:[%s25214_s25 + $0x24a] sm:$0xff] }
 0x5ea   : > { %v15003_v54 = vpack.c.bf16 %v19686_v30, %v19685_v4  ;;  %v19727_v31 = vld [vmem:[%s25214_s25 + $0x25a] sm:$0xff]  ;;  %v19728_v4 = vld [vmem:[%s25214_s25 + $0x262] sm:$0xff] }
 0x5eb   : > { %v15024_v1 = vpack.c.bf16 %v19728_v4, %v19727_v31  ;;  %v19769_v31 = vld [vmem:[%s25214_s25 + $0x3fa] sm:$0xff]  ;;  %v19770_v4 = vld [vmem:[%s25214_s25 + $0x402] sm:$0xff] }
 0x5f0   : > { %21874 = vmatmul.mubr.msk.bf16.gmra.mrb[108].mxu1 %vm566_vm1, %v13983_v32  ;;  %22914 = vmatmul.mubr.msk.bf16.gmra.mrb[108].mxu0 %vm566_vm1, %v13987_v39  ;;  %v19689_v32 = vld [vmem:[%s25214_s25 + $0xda] sm:$0xff] }
 0x5f1   : > { %21877 = vmatprep.mubr.msk.bf16.mxu1 %vm566_vm1, %v13984_v56  ;;  %22917 = vmatprep.mubr.msk.bf16.mxu0 %vm566_vm1, %v13988_v12  ;;  %v19690_v56 = vld [vmem:[%s25214_s25 + $0xe2] sm:$0xff] }
 0x5f2   : > { %v15005_v42 = vpack.c.bf16 %v19690_v56, %v19689_v32 }
 0x5f8   : > { %21878 = vmatmul.mubr.msk.bf16.gmra.mrb[112].mxu1 %vm566_vm1, %v13985_v13  ;;  %22918 = vmatmul.mubr.msk.bf16.gmra.mrb[112].mxu0 %vm566_vm1, %v13989_v26  ;;  %v19693_v13 = vld [vmem:[%s25214_s25 + $0x102] sm:$0xff] }
 0x5f9   : > { %21881 = vmatprep.mubr.msk.bf16.mxu1 %vm566_vm1, %v13986_v51  ;;  %22921 = vmatprep.mubr.msk.bf16.mxu0 %vm566_vm1, %v13990_v19  ;;  %v19694_v51 = vld [vmem:[%s25214_s25 + $0x10a] sm:$0xff] }
 0x5fa   : > { %v15007_v43 = vpack.c.bf16 %v19694_v51, %v19693_v13  ;;  %v15027_v13 = vpack.c.bf16 %v19734_v48, %v19733_v47 }
 0x600   : > { %21882 = vmatmul.mubr.msk.bf16.gmra.mrb[116].mxu1 %vm566_vm1, %v13987_v39  ;;  %22922 = vmatmul.mubr.msk.bf16.gmra.mrb[116].mxu0 %vm566_vm1, %v13991_v2  ;;  %v19697_v39 = vld [vmem:[%s25214_s25 + $0x12a] sm:$0xff] }
 0x601   : > { %21885 = vmatprep.mubr.msk.bf16.mxu1 %vm566_vm1, %v13988_v12  ;;  %22925 = vmatprep.mubr.msk.bf16.mxu0 %vm566_vm1, %v13992_v57  ;;  %v19698_v12 = vld [vmem:[%s25214_s25 + $0x132] sm:$0xff]  ;;  %v19706_v57 = vld [vmem:[%s25214_s25 + $0x182] sm:$0xff] }
 0x602   : > { %v15009_v15 = vpack.c.bf16 %v19698_v12, %v19697_v39  ;;  %v15029_v39 = vpack.c.bf16 %v19738_v34, %v19737_v7 }
 0x608   : > { %21886 = vmatmul.mubr.msk.bf16.gmra.mrb[120].mxu1 %vm566_vm1, %v13989_v26  ;;  %22926 = vmatmul.mubr.msk.bf16.gmra.mrb[120].mxu0 %vm566_vm1, %v13993_v61  ;;  %v19701_v26 = vld [vmem:[%s25214_s25 + $0x152] sm:$0xff]  ;;  %v19709_v61 = vld [vmem:[%s25214_s25 + $0x1a2] sm:$0xff] }
 0x609   : > { %21889 = vmatprep.mubr.msk.bf16.mxu1 %vm566_vm1, %v13990_v19  ;;  %22929 = vmatprep.mubr.msk.bf16.mxu0 %vm566_vm1, %v13994_v49  ;;  %v19702_v19 = vld [vmem:[%s25214_s25 + $0x15a] sm:$0xff]  ;;  %v19710_v49 = vld [vmem:[%s25214_s25 + $0x1aa] sm:$0xff] }
 0x60a   : > { %v15011_v28 = vpack.c.bf16 %v19702_v19, %v19701_v26  ;;  %v15015_v9 = vpack.c.bf16 %v19710_v49, %v19709_v61  ;;  %v15031_v26 = vpack.c.bf16 %v19742_v45, %v19741_v58  ;;  %v15035_v61 = vpack.c.bf16 %v19750_v63, %v19749_v53 }
 0x610   : > { %21890 = vmatmul.mubr.msk.bf16.gmra.mrb[124].mxu1 %vm566_vm1, %v13991_v2  ;;  %22930 = vmatmul.mubr.msk.bf16.gmra.mrb[124].mxu0 %vm566_vm1, %v13995_v59  ;;  %v19705_v2 = vld [vmem:[%s25214_s25 + $0x17a] sm:$0xff]  ;;  %v19715_v59 = vld [vmem:[%s25214_s25 + $0x1e2] sm:$0xff] }
 0x611   : > { %21895 = vmatprep.mubr.msk.bf16.mxu1 %vm566_vm1, %v6454_v22  ;;  %22935 = vmatprep.mubr.msk.bf16.mxu0 %vm566_vm1, %v15000_v29  ;;  %v15013_v44 = vpack.c.bf16 %v19706_v57, %v19705_v2  ;;  %v19716_v22 = vld [vmem:[%s25214_s25 + $0x1ea] sm:$0xff]  ;;  %v15033_v2 = vpack.c.bf16 %v19746_v17, %v19745_v60 }
 0x612   : > { %v15018_v24 = vpack.c.bf16 %v19716_v22, %v19715_v59  ;;  %v19757_v59 = vld [vmem:[%s25214_s25 + $0x382] sm:$0xff]  ;;  %v19758_v22 = vld [vmem:[%s25214_s25 + $0x38a] sm:$0xff] }
 0x613   : > { %v15039_v27 = vpack.c.bf16 %v19758_v22, %v19757_v59 }
 0x618   : > { %21896 = vmatmul.mubr.msk.bf16.vlgmr.msra.gmra.mrb[0].mxu1 %vm566_vm1, %v6455_v50  ;;  %22936 = vmatmul.mubr.msk.bf16.vlgmr.msra.gmra.mrb[0].mxu0 %vm566_vm1, %v15001_v5  ;;  %v15020_v50 = vpack.c.bf16 %v19720_v25, %v19719_v18  ;;  %v19761_v18 = vld [vmem:[%s25214_s25 + $0x3aa] sm:$0xff]  ;;  %v19762_v25 = vld [vmem:[%s25214_s25 + $0x3b2] sm:$0xff] }
 0x619   : > { %22024 = vmatpush3.bf16.msra.mxu1 %v7787_v38  ;;  %23064 = vmatpush3.bf16.msra.mxu0 %v16333_v14  ;;  %v19724_v38 = vld [vmem:[%s25214_s25 + $0x23a] sm:$0xff] }
 0x61a   : > { %21899 = vmatprep.mubr.msk.bf16.mxu1 %vm566_vm1, %v6456_v46  ;;  %22939 = vmatprep.mubr.msk.bf16.mxu0 %vm566_vm1, %v15002_v40  ;;  %v15021_v46 = vpack.c.bf16 %v19722_v52, %v19721_v20  ;;  %v15041_v20 = vpack.c.bf16 %v19762_v25, %v19761_v18 }
 0x620   : > { %21900 = vmatmul.mubr.msk.bf16.gmra.mrb[4].mxu1 %vm566_vm1, %v6457_v37  ;;  %22940 = vmatmul.mubr.msk.bf16.gmra.mrb[4].mxu0 %vm566_vm1, %v15003_v54  ;;  %v19730_v37 = vld [vmem:[%s25214_s25 + $0x272] sm:$0xff] }
 0x621   : > { %21903 = vmatprep.mubr.msk.bf16.mxu1 %vm566_vm1, %v15000_v29  ;;  %22943 = vmatprep.mubr.msk.bf16.mxu0 %vm566_vm1, %v15004_v41  ;;  %v15017_v29 = vpack.c.bf16 %v19714_v10, %v19713_v11  ;;  %v15025_v32 = vpack.c.bf16 %v19730_v37, %v19729_v33  ;;  %v15037_v11 = vpack.c.bf16 %v19754_v36, %v19753_v6 }
 0x622   : > { %v15045_v33 = vpack.c.bf16 %v19770_v4, %v19769_v31  ;;  %v18317_v31 = vld [vmem:[%s25214_s25 + $0x43] sm:$0xff]  ;;  %v19876_v4 = vld [vmem:[%s25214_s25 + $0x8b] sm:$0xff] }
 0x628   : > { %21904 = vmatmul.mubr.msk.bf16.gmra.mrb[8].mxu1 %vm566_vm1, %v15001_v5  ;;  %22944 = vmatmul.mubr.msk.bf16.gmra.mrb[8].mxu0 %vm566_vm1, %v15005_v42  ;;  %v19723_v5 = vld [vmem:[%s25214_s25 + $0x232] sm:$0xff] }
 0x629   : > { %21907 = vmatprep.mubr.msk.bf16.mxu1 %vm566_vm1, %v15002_v40  ;;  %22947 = vmatprep.mubr.msk.bf16.mxu0 %vm566_vm1, %v15006_v55  ;;  %v15022_v14 = vpack.c.bf16 %v19724_v38, %v19723_v5  ;;  %v19725_v40 = vld [vmem:[%s25214_s25 + $0x242] sm:$0xff]  ;;  %v19765_v5 = vld [vmem:[%s25214_s25 + $0x3d2] sm:$0xff]  ;;  %v19766_v38 = vld [vmem:[%s25214_s25 + $0x3da] sm:$0xff] }
 0x62a   : > { %v15023_v30 = vpack.c.bf16 %v19726_v16, %v19725_v40  ;;  %v15043_v40 = vpack.c.bf16 %v19766_v38, %v19765_v5  ;;  %v19874_v5 = vld [vmem:[%s25214_s25 + $0x7b] sm:$0xff]  ;;  %v19875_v38 = vld [vmem:[%s25214_s25 + $0x83] sm:$0xff] }
 0x630   : > { %21908 = vmatmul.mubr.msk.bf16.gmra.mrb[12].mxu1 %vm566_vm1, %v15003_v54  ;;  %22948 = vmatmul.mubr.msk.bf16.gmra.mrb[12].mxu0 %vm566_vm1, %v15007_v43  ;;  %v19731_v54 = vld [vmem:[%s25214_s25 + $0x282] sm:$0xff] }
 0x631   : > { %21911 = vmatprep.mubr.msk.bf16.mxu1 %vm566_vm1, %v15004_v41  ;;  %22951 = vmatprep.mubr.msk.bf16.mxu0 %vm566_vm1, %v15008_v35  ;;  %v19732_v41 = vld [vmem:[%s25214_s25 + $0x28a] sm:$0xff] }
 0x632   : > { %v15026_v56 = vpack.c.bf16 %v19732_v41, %v19731_v54  ;;  %v19773_v54 = vld [vmem:[%s25214_s25 + $0x422] sm:$0xff]  ;;  %v19774_v41 = vld [vmem:[%s25214_s25 + $0x42a] sm:$0xff] }
 0x633   : > { %v15047_v47 = vpack.c.bf16 %v19774_v41, %v19773_v54  ;;  %v19879_v54 = vld [vmem:[%s25214_s25 + $0xab] sm:$0xff] }
 0x638   : > { %21912 = vmatmul.mubr.msk.bf16.gmra.mrb[16].mxu1 %vm566_vm1, %v15005_v42  ;;  %22952 = vmatmul.mubr.msk.bf16.gmra.mrb[16].mxu0 %vm566_vm1, %v15009_v15  ;;  %v19735_v42 = vld [vmem:[%s25214_s25 + $0x2aa] sm:$0xff] }
 0x639   : > { %21915 = vmatprep.mubr.msk.bf16.mxu1 %vm566_vm1, %v15006_v55  ;;  %22955 = vmatprep.mubr.msk.bf16.mxu0 %vm566_vm1, %v15010_v21  ;;  %v19736_v55 = vld [vmem:[%s25214_s25 + $0x2b2] sm:$0xff] }
 0x63a   : > { %v15028_v51 = vpack.c.bf16 %v19736_v55, %v19735_v42  ;;  %v19777_v42 = vld [vmem:[%s25214_s25 + $0x44a] sm:$0xff]  ;;  %v19778_v55 = vld [vmem:[%s25214_s25 + $0x452] sm:$0xff] }
 0x63b   : > { %v15049_v7 = vpack.c.bf16 %v19778_v55, %v19777_v42  ;;  %v18321_v42 = vld [vmem:[%s25214_s25 + $0x6b] sm:$0xff]  ;;  %v19880_v55 = vld [vmem:[%s25214_s25 + $0xb3] sm:$0xff] }
 0x640   : > { %21916 = vmatmul.mubr.msk.bf16.gmra.mrb[20].mxu1 %vm566_vm1, %v15007_v43  ;;  %22956 = vmatmul.mubr.msk.bf16.gmra.mrb[20].mxu0 %vm566_vm1, %v15011_v28  ;;  %v19739_v43 = vld [vmem:[%s25214_s25 + $0x2d2] sm:$0xff] }
 0x641   : > { %21919 = vmatprep.mubr.msk.bf16.mxu1 %vm566_vm1, %v15008_v35  ;;  %22959 = vmatprep.mubr.msk.bf16.mxu0 %vm566_vm1, %v15012_v3  ;;  %v19740_v35 = vld [vmem:[%s25214_s25 + $0x2da] sm:$0xff] }
 0x642   : > { %v15030_v12 = vpack.c.bf16 %v19740_v35, %v19739_v43  ;;  %v19781_v43 = vld [vmem:[%s25214_s25 + $0x472] sm:$0xff]  ;;  %v19782_v35 = vld [vmem:[%s25214_s25 + $0x47a] sm:$0xff] }
 0x643   : > { %v15051_v58 = vpack.c.bf16 %v19782_v35, %v19781_v43 }
 0x648   : > { %21920 = vmatmul.mubr.msk.bf16.gmra.mrb[24].mxu1 %vm566_vm1, %v15009_v15  ;;  %22960 = vmatmul.mubr.msk.bf16.gmra.mrb[24].mxu0 %vm566_vm1, %v15013_v44  ;;  %v19743_v15 = vld [vmem:[%s25214_s25 + $0x2fa] sm:$0xff] }
 0x649   : > { %21923 = vmatprep.mubr.msk.bf16.mxu1 %vm566_vm1, %v15010_v21  ;;  %22963 = vmatprep.mubr.msk.bf16.mxu0 %vm566_vm1, %v15014_v62  ;;  %v19744_v21 = vld [vmem:[%s25214_s25 + $0x302] sm:$0xff] }
 0x64a   : > { %v15032_v19 = vpack.c.bf16 %v19744_v21, %v19743_v15  ;;  %v19785_v15 = vld [vmem:[%s25214_s25 + $0x49a] sm:$0xff]  ;;  %v19786_v21 = vld [vmem:[%s25214_s25 + $0x4a2] sm:$0xff] }
 0x64b   : > { %v15053_v60 = vpack.c.bf16 %v19786_v21, %v19785_v15 }
 0x650   : > { %21924 = vmatmul.mubr.msk.bf16.gmra.mrb[28].mxu1 %vm566_vm1, %v15011_v28  ;;  %22964 = vmatmul.mubr.msk.bf16.gmra.mrb[28].mxu0 %vm566_vm1, %v15015_v9  ;;  %v19747_v28 = vld [vmem:[%s25214_s25 + $0x322] sm:$0xff] }
 0x651   : > { %21927 = vmatprep.mubr.msk.bf16.mxu1 %vm566_vm1, %v15012_v3  ;;  %22967 = vmatprep.mubr.msk.bf16.mxu0 %vm566_vm1, %v15016_v8  ;;  %v19748_v3 = vld [vmem:[%s25214_s25 + $0x32a] sm:$0xff] }
 0x652   : > { %v15034_v57 = vpack.c.bf16 %v19748_v3, %v19747_v28  ;;  %v19789_v28 = vld [vmem:[%s25214_s25 + $0x4c2] sm:$0xff]  ;;  %v19790_v3 = vld [vmem:[%s25214_s25 + $0x4ca] sm:$0xff] }
 0x653   : > { %v15055_v53 = vpack.c.bf16 %v19790_v3, %v19789_v28 }
 0x658   : > { %21928 = vmatmul.mubr.msk.bf16.gmra.mrb[32].mxu1 %vm566_vm1, %v15013_v44  ;;  %22968 = vmatmul.mubr.msk.bf16.gmra.mrb[32].mxu0 %vm566_vm1, %v15017_v29  ;;  %v19751_v44 = vld [vmem:[%s25214_s25 + $0x34a] sm:$0xff] }
 0x659   : > { %21931 = vmatprep.mubr.msk.bf16.mxu1 %vm566_vm1, %v15014_v62  ;;  %22971 = vmatprep.mubr.msk.bf16.mxu0 %vm566_vm1, %v15018_v24  ;;  %v19752_v62 = vld [vmem:[%s25214_s25 + $0x352] sm:$0xff] }
 0x65a   : > { %v15036_v49 = vpack.c.bf16 %v19752_v62, %v19751_v44  ;;  %v19793_v44 = vld [vmem:[%s25214_s25 + $0x4ea] sm:$0xff]  ;;  %v19794_v62 = vld [vmem:[%s25214_s25 + $0x4f2] sm:$0xff] }
 0x65b   : > { %v15057_v6 = vpack.c.bf16 %v19794_v62, %v19793_v44 }
 0x660   : > { %21932 = vmatmul.mubr.msk.bf16.gmra.mrb[36].mxu1 %vm566_vm1, %v15015_v9  ;;  %22972 = vmatmul.mubr.msk.bf16.gmra.mrb[36].mxu0 %vm566_vm1, %v15019_v0  ;;  %v19755_v9 = vld [vmem:[%s25214_s25 + $0x372] sm:$0xff] }
 0x661   : > { %21935 = vmatprep.mubr.msk.bf16.mxu1 %vm566_vm1, %v15016_v8  ;;  %22975 = vmatprep.mubr.msk.bf16.mxu0 %vm566_vm1, %v15020_v50  ;;  %v19756_v8 = vld [vmem:[%s25214_s25 + $0x37a] sm:$0xff] }
 0x662   : > { %v15038_v10 = vpack.c.bf16 %v19756_v8, %v19755_v9  ;;  %v19797_v9 = vld [vmem:[%s25214_s25 + $0x512] sm:$0xff]  ;;  %v19798_v8 = vld [vmem:[%s25214_s25 + $0x51a] sm:$0xff] }
 0x663   : > { %v15059_v59 = vpack.c.bf16 %v19798_v8, %v19797_v9 }
 0x668   : > { %21936 = vmatmul.mubr.msk.bf16.gmra.mrb[40].mxu1 %vm566_vm1, %v15017_v29  ;;  %22976 = vmatmul.mubr.msk.bf16.gmra.mrb[40].mxu0 %vm566_vm1, %v15021_v46  ;;  %v19759_v29 = vld [vmem:[%s25214_s25 + $0x39a] sm:$0xff] }
 0x669   : > { %21939 = vmatprep.mubr.msk.bf16.mxu1 %vm566_vm1, %v15018_v24  ;;  %22979 = vmatprep.mubr.msk.bf16.mxu0 %vm566_vm1, %v15022_v14  ;;  %v19760_v24 = vld [vmem:[%s25214_s25 + $0x3a2] sm:$0xff] }
 0x66a   : > { %v15040_v23 = vpack.c.bf16 %v19760_v24, %v19759_v29  ;;  %v19801_v29 = vld [vmem:[%s25214_s25 + $0x53a] sm:$0xff]  ;;  %v19802_v24 = vld [vmem:[%s25214_s25 + $0x542] sm:$0xff] }
 0x66b   : > { %v15061_v18 = vpack.c.bf16 %v19802_v24, %v19801_v29 }
 0x670   : > { %21940 = vmatmul.mubr.msk.bf16.gmra.mrb[44].mxu1 %vm566_vm1, %v15019_v0  ;;  %22980 = vmatmul.mubr.msk.bf16.gmra.mrb[44].mxu0 %vm566_vm1, %v15023_v30  ;;  %v19763_v0 = vld [vmem:[%s25214_s25 + $0x3c2] sm:$0xff] }
 0x671   : > { %21943 = vmatprep.mubr.msk.bf16.mxu1 %vm566_vm1, %v15020_v50  ;;  %22983 = vmatprep.mubr.msk.bf16.mxu0 %vm566_vm1, %v15024_v1  ;;  %v19764_v50 = vld [vmem:[%s25214_s25 + $0x3ca] sm:$0xff] }
 0x672   : > { %v15042_v52 = vpack.c.bf16 %v19764_v50, %v19763_v0  ;;  %v19805_v0 = vld [vmem:[%s25214_s25 + $0x562] sm:$0xff]  ;;  %v19806_v50 = vld [vmem:[%s25214_s25 + $0x56a] sm:$0xff] }
 0x678   : > { %21944 = vmatmul.mubr.msk.bf16.gmra.mrb[48].mxu1 %vm566_vm1, %v15021_v46  ;;  %22984 = vmatmul.mubr.msk.bf16.gmra.mrb[48].mxu0 %vm566_vm1, %v15025_v32  ;;  %v19767_v46 = vld [vmem:[%s25214_s25 + $0x3ea] sm:$0xff] }
 0x679   : > { %21947 = vmatprep.mubr.msk.bf16.mxu1 %vm566_vm1, %v15022_v14  ;;  %22987 = vmatprep.mubr.msk.bf16.mxu0 %vm566_vm1, %v15026_v56  ;;  %v19768_v14 = vld [vmem:[%s25214_s25 + $0x3f2] sm:$0xff] }
 0x67a   : > { %v15044_v16 = vpack.c.bf16 %v19768_v14, %v19767_v46  ;;  %v15063_v46 = vpack.c.bf16 %v19806_v50, %v19805_v0 }
 0x680   : > { %21948 = vmatmul.mubr.msk.bf16.gmra.mrb[52].mxu1 %vm566_vm1, %v15023_v30  ;;  %22988 = vmatmul.mubr.msk.bf16.gmra.mrb[52].mxu0 %vm566_vm1, %v15027_v13  ;;  %v19771_v30 = vld [vmem:[%s25214_s25 + $0x412] sm:$0xff] }
 0x681   : > { %21951 = vmatprep.mubr.msk.bf16.mxu1 %vm566_vm1, %v15024_v1  ;;  %22991 = vmatprep.mubr.msk.bf16.mxu0 %vm566_vm1, %v15028_v51  ;;  %v19772_v1 = vld [vmem:[%s25214_s25 + $0x41a] sm:$0xff] }
 0x682   : > { %v15046_v37 = vpack.c.bf16 %v19772_v1, %v19771_v30  ;;  %v19877_v30 = vld [vmem:[%s25214_s25 + $0x93] sm:$0xff] }
 0x683   : > { %v18318_v1 = vld [vmem:[%s25214_s25 + $0x53] sm:$0xff] }
 0x688   : > { %21952 = vmatmul.mubr.msk.bf16.gmra.mrb[56].mxu1 %vm566_vm1, %v15025_v32  ;;  %22992 = vmatmul.mubr.msk.bf16.gmra.mrb[56].mxu0 %vm566_vm1, %v15029_v39  ;;  %v19775_v32 = vld [vmem:[%s25214_s25 + $0x43a] sm:$0xff] }
 0x689   : > { %21955 = vmatprep.mubr.msk.bf16.mxu1 %vm566_vm1, %v15026_v56  ;;  %22995 = vmatprep.mubr.msk.bf16.mxu0 %vm566_vm1, %v15030_v12  ;;  %v19776_v56 = vld [vmem:[%s25214_s25 + $0x442] sm:$0xff] }
 0x68a   : > { %v15048_v48 = vpack.c.bf16 %v19776_v56, %v19775_v32  ;;  %v16069_v32 = vpack.c.bf16 %v19877_v30, %v19876_v4  ;;  %v19915_v4 = vld [vmem:[%s25214_s25 + $0x213] sm:$0xff] }
 0x690   : > { %21956 = vmatmul.mubr.msk.bf16.gmra.mrb[60].mxu1 %vm566_vm1, %v15027_v13  ;;  %22996 = vmatmul.mubr.msk.bf16.gmra.mrb[60].mxu0 %vm566_vm1, %v15031_v26  ;;  %v19779_v13 = vld [vmem:[%s25214_s25 + $0x462] sm:$0xff] }
 0x691   : > { %21959 = vmatprep.mubr.msk.bf16.mxu1 %vm566_vm1, %v15028_v51  ;;  %22999 = vmatprep.mubr.msk.bf16.mxu0 %vm566_vm1, %v15032_v19  ;;  %v19780_v51 = vld [vmem:[%s25214_s25 + $0x46a] sm:$0xff] }
 0x692   : > { %v15050_v34 = vpack.c.bf16 %v19780_v51, %v19779_v13  ;;  %v19881_v13 = vld [vmem:[%s25214_s25 + $0xbb] sm:$0xff]  ;;  %v19882_v51 = vld [vmem:[%s25214_s25 + $0xcb] sm:$0xff] }
 0x693   : > { %v16071_v43 = vpack.c.bf16 %v19881_v13, %v19880_v55  ;;  %v19923_v55 = vld [vmem:[%s25214_s25 + $0x263] sm:$0xff] }
 0x698   : > { %21960 = vmatmul.mubr.msk.bf16.gmra.mrb[64].mxu1 %vm566_vm1, %v15029_v39  ;;  %23000 = vmatmul.mubr.msk.bf16.gmra.mrb[64].mxu0 %vm566_vm1, %v15033_v2  ;;  %v19783_v39 = vld [vmem:[%s25214_s25 + $0x48a] sm:$0xff] }
 0x699   : > { %21963 = vmatprep.mubr.msk.bf16.mxu1 %vm566_vm1, %v15030_v12  ;;  %23003 = vmatprep.mubr.msk.bf16.mxu0 %vm566_vm1, %v15034_v57  ;;  %v19784_v12 = vld [vmem:[%s25214_s25 + $0x492] sm:$0xff] }
 0x69a   : > { %v15052_v45 = vpack.c.bf16 %v19784_v12, %v19783_v39  ;;  %v19884_v39 = vld [vmem:[%s25214_s25 + $0xdb] sm:$0xff]  ;;  %v19885_v12 = vld [vmem:[%s25214_s25 + $0xe3] sm:$0xff] }
 0x69b   : > { %v16073_v15 = vpack.c.bf16 %v19885_v12, %v19884_v39 }
 0x6a0   : > { %21964 = vmatmul.mubr.msk.bf16.gmra.mrb[68].mxu1 %vm566_vm1, %v15031_v26  ;;  %23004 = vmatmul.mubr.msk.bf16.gmra.mrb[68].mxu0 %vm566_vm1, %v15035_v61  ;;  %v19787_v26 = vld [vmem:[%s25214_s25 + $0x4b2] sm:$0xff] }
 0x6a1   : > { %21967 = vmatprep.mubr.msk.bf16.mxu1 %vm566_vm1, %v15032_v19  ;;  %23007 = vmatprep.mubr.msk.bf16.mxu0 %vm566_vm1, %v15036_v49  ;;  %v19788_v19 = vld [vmem:[%s25214_s25 + $0x4ba] sm:$0xff] }
 0x6a2   : > { %v15054_v17 = vpack.c.bf16 %v19788_v19, %v19787_v26  ;;  %v19888_v26 = vld [vmem:[%s25214_s25 + $0x103] sm:$0xff]  ;;  %v19889_v19 = vld [vmem:[%s25214_s25 + $0x10b] sm:$0xff] }
 0x6a3   : > { %v16075_v28 = vpack.c.bf16 %v19889_v19, %v19888_v26 }
 0x6a8   : > { %21968 = vmatmul.mubr.msk.bf16.gmra.mrb[72].mxu1 %vm566_vm1, %v15033_v2  ;;  %23008 = vmatmul.mubr.msk.bf16.gmra.mrb[72].mxu0 %vm566_vm1, %v15037_v11  ;;  %v19791_v2 = vld [vmem:[%s25214_s25 + $0x4da] sm:$0xff] }
 0x6a9   : > { %21971 = vmatprep.mubr.msk.bf16.mxu1 %vm566_vm1, %v15034_v57  ;;  %23011 = vmatprep.mubr.msk.bf16.mxu0 %vm566_vm1, %v15038_v10  ;;  %v19792_v57 = vld [vmem:[%s25214_s25 + $0x4e2] sm:$0xff] }
 0x6aa   : > { %v15056_v63 = vpack.c.bf16 %v19792_v57, %v19791_v2  ;;  %v19892_v2 = vld [vmem:[%s25214_s25 + $0x12b] sm:$0xff]  ;;  %v19893_v57 = vld [vmem:[%s25214_s25 + $0x133] sm:$0xff] }
 0x6ab   : > { %v16077_v44 = vpack.c.bf16 %v19893_v57, %v19892_v2 }
 0x6b0   : > { %21972 = vmatmul.mubr.msk.bf16.gmra.mrb[76].mxu1 %vm566_vm1, %v15035_v61  ;;  %23012 = vmatmul.mubr.msk.bf16.gmra.mrb[76].mxu0 %vm566_vm1, %v15039_v27  ;;  %v19795_v61 = vld [vmem:[%s25214_s25 + $0x502] sm:$0xff] }
 0x6b1   : > { %21975 = vmatprep.mubr.msk.bf16.mxu1 %vm566_vm1, %v15036_v49  ;;  %23015 = vmatprep.mubr.msk.bf16.mxu0 %vm566_vm1, %v15040_v23  ;;  %v19796_v49 = vld [vmem:[%s25214_s25 + $0x50a] sm:$0xff] }
 0x6b2   : > { %v15058_v36 = vpack.c.bf16 %v19796_v49, %v19795_v61  ;;  %v19896_v61 = vld [vmem:[%s25214_s25 + $0x153] sm:$0xff]  ;;  %v19897_v49 = vld [vmem:[%s25214_s25 + $0x15b] sm:$0xff] }
 0x6b3   : > { %v16079_v9 = vpack.c.bf16 %v19897_v49, %v19896_v61 }
 0x6b8   : > { %21976 = vmatmul.mubr.msk.bf16.gmra.mrb[80].mxu1 %vm566_vm1, %v15037_v11  ;;  %23016 = vmatmul.mubr.msk.bf16.gmra.mrb[80].mxu0 %vm566_vm1, %v15041_v20  ;;  %v19799_v11 = vld [vmem:[%s25214_s25 + $0x52a] sm:$0xff] }
 0x6b9   : > { %21979 = vmatprep.mubr.msk.bf16.mxu1 %vm566_vm1, %v15038_v10  ;;  %23019 = vmatprep.mubr.msk.bf16.mxu0 %vm566_vm1, %v15042_v52  ;;  %v19800_v10 = vld [vmem:[%s25214_s25 + $0x532] sm:$0xff] }
 0x6ba   : > { %v15060_v22 = vpack.c.bf16 %v19800_v10, %v19799_v11  ;;  %v19900_v11 = vld [vmem:[%s25214_s25 + $0x17b] sm:$0xff]  ;;  %v19901_v10 = vld [vmem:[%s25214_s25 + $0x183] sm:$0xff] }
 0x6bb   : > { %v16081_v29 = vpack.c.bf16 %v19901_v10, %v19900_v11 }
 0x6c0   : > { %21980 = vmatmul.mubr.msk.bf16.gmra.mrb[84].mxu1 %vm566_vm1, %v15039_v27  ;;  %23020 = vmatmul.mubr.msk.bf16.gmra.mrb[84].mxu0 %vm566_vm1, %v15043_v40  ;;  %v19803_v27 = vld [vmem:[%s25214_s25 + $0x552] sm:$0xff] }
 0x6c1   : > { %21983 = vmatprep.mubr.msk.bf16.mxu1 %vm566_vm1, %v15040_v23  ;;  %23023 = vmatprep.mubr.msk.bf16.mxu0 %vm566_vm1, %v15044_v16  ;;  %v19804_v23 = vld [vmem:[%s25214_s25 + $0x55a] sm:$0xff] }
 0x6c2   : > { %v15062_v25 = vpack.c.bf16 %v19804_v23, %v19803_v27  ;;  %v19904_v27 = vld [vmem:[%s25214_s25 + $0x1a3] sm:$0xff]  ;;  %v19905_v23 = vld [vmem:[%s25214_s25 + $0x1ab] sm:$0xff] }
 0x6c3   : > { %v16083_v0 = vpack.c.bf16 %v19905_v23, %v19904_v27 }
 0x6c8   : > { %21984 = vmatmul.mubr.msk.bf16.gmra.mrb[88].mxu1 %vm566_vm1, %v15041_v20  ;;  %23024 = vmatmul.mubr.msk.bf16.gmra.mrb[88].mxu0 %vm566_vm1, %v15045_v33  ;;  %v18314_v20 = vld [vmem:[%s25214_s25 + $0x2b] sm:$0xff] }
 0x6c9   : > { %21987 = vmatprep.mubr.msk.bf16.mxu1 %vm566_vm1, %v15042_v52  ;;  %23027 = vmatprep.mubr.msk.bf16.mxu0 %vm566_vm1, %v15046_v37  ;;  %v18315_v52 = vld [vmem:[%s25214_s25 + $0x33] sm:$0xff] }
 0x6ca   : > { %v7522_v14 = vpack.c.bf16 %v18315_v52, %v18314_v20  ;;  %v19908_v20 = vld [vmem:[%s25214_s25 + $0x1cb] sm:$0xff]  ;;  %v19909_v52 = vld [vmem:[%s25214_s25 + $0x1d3] sm:$0xff] }
 0x6d0   : > { %21988 = vmatmul.mubr.msk.bf16.gmra.mrb[92].mxu1 %vm566_vm1, %v15043_v40  ;;  %23028 = vmatmul.mubr.msk.bf16.gmra.mrb[92].mxu0 %vm566_vm1, %v15047_v47  ;;  %v16068_v40 = vpack.c.bf16 %v19875_v38, %v19874_v5  ;;  %v19910_v5 = vld [vmem:[%s25214_s25 + $0x1e3] sm:$0xff]  ;;  %v19911_v38 = vld [vmem:[%s25214_s25 + $0x1eb] sm:$0xff] }
 0x6d1   : > { %21991 = vmatprep.mubr.msk.bf16.mxu1 %vm566_vm1, %v15044_v16  ;;  %23031 = vmatprep.mubr.msk.bf16.mxu0 %vm566_vm1, %v15048_v48  ;;  %v18316_v16 = vld [vmem:[%s25214_s25 + $0x3b] sm:$0xff] }
 0x6d2   : > { %v7523_v41 = vpack.c.bf16 %v18317_v31, %v18316_v16  ;;  %v19913_v16 = vld [vmem:[%s25214_s25 + $0x1fb] sm:$0xff]  ;;  %v19914_v31 = vld [vmem:[%s25214_s25 + $0x20b] sm:$0xff] }
 0x6d8   : > { %21992 = vmatmul.mubr.msk.bf16.gmra.mrb[96].mxu1 %vm566_vm1, %v15045_v33  ;;  %23032 = vmatmul.mubr.msk.bf16.gmra.mrb[96].mxu0 %vm566_vm1, %v15049_v7  ;;  %v18319_v33 = vld [vmem:[%s25214_s25 + $0x5b] sm:$0xff] }
 0x6d9   : > { %21995 = vmatprep.mubr.msk.bf16.mxu1 %vm566_vm1, %v15046_v37  ;;  %23035 = vmatprep.mubr.msk.bf16.mxu0 %vm566_vm1, %v15050_v34  ;;  %v19878_v37 = vld [vmem:[%s25214_s25 + $0xa3] sm:$0xff]  ;;  %v7524_v56 = vpack.c.bf16 %v18319_v33, %v18318_v1  ;;  %v16088_v1 = vpack.c.bf16 %v19915_v4, %v19914_v31  ;;  %v19916_v33 = vld [vmem:[%s25214_s25 + $0x21b] sm:$0xff]  ;;  %v19956_v31 = vld [vmem:[%s25214_s25 + $0x3ab] sm:$0xff] }
 0x6da   : > { %v19957_v4 = vld [vmem:[%s25214_s25 + $0x3b3] sm:$0xff] }
 0x6e0   : > { %21996 = vmatmul.mubr.msk.bf16.gmra.mrb[100].mxu1 %vm566_vm1, %v15047_v47  ;;  %23036 = vmatmul.mubr.msk.bf16.gmra.mrb[100].mxu0 %vm566_vm1, %v15051_v58  ;;  %v16070_v47 = vpack.c.bf16 %v19879_v54, %v19878_v37  ;;  %v19917_v37 = vld [vmem:[%s25214_s25 + $0x223] sm:$0xff]  ;;  %v19918_v54 = vld [vmem:[%s25214_s25 + $0x233] sm:$0xff] }
 0x6e1   : > { %21999 = vmatprep.mubr.msk.bf16.mxu1 %vm566_vm1, %v15048_v48  ;;  %23039 = vmatprep.mubr.msk.bf16.mxu0 %vm566_vm1, %v15052_v45  ;;  %v18320_v48 = vld [vmem:[%s25214_s25 + $0x63] sm:$0xff] }
 0x6e8   : > { %22000 = vmatmul.mubr.msk.bf16.gmra.mrb[104].mxu1 %vm566_vm1, %v15049_v7  ;;  %23040 = vmatmul.mubr.msk.bf16.gmra.mrb[104].mxu0 %vm566_vm1, %v15053_v60  ;;  %v19883_v7 = vld [vmem:[%s25214_s25 + $0xd3] sm:$0xff] }
 0x6e9   : > { %22003 = vmatprep.mubr.msk.bf16.mxu1 %vm566_vm1, %v15050_v34  ;;  %23043 = vmatprep.mubr.msk.bf16.mxu0 %vm566_vm1, %v15054_v17  ;;  %v7525_v34 = vpack.c.bf16 %v18321_v42, %v18320_v48  ;;  %v16072_v35 = vpack.c.bf16 %v19883_v7, %v19882_v51  ;;  %v19921_v48 = vld [vmem:[%s25214_s25 + $0x24b] sm:$0xff]  ;;  %v19922_v42 = vld [vmem:[%s25214_s25 + $0x25b] sm:$0xff] }
 0x6ea   : > { %v16092_v51 = vpack.c.bf16 %v19923_v55, %v19922_v42  ;;  %v19924_v7 = vld [vmem:[%s25214_s25 + $0x26b] sm:$0xff]  ;;  %v19964_v42 = vld [vmem:[%s25214_s25 + $0x3fb] sm:$0xff]  ;;  %v19965_v55 = vld [vmem:[%s25214_s25 + $0x403] sm:$0xff] }
 0x6f0   : > { %22004 = vmatmul.mubr.msk.bf16.gmra.mrb[108].mxu1 %vm566_vm1, %v15051_v58  ;;  %23044 = vmatmul.mubr.msk.bf16.gmra.mrb[108].mxu0 %vm566_vm1, %v15055_v53  ;;  %v19886_v58 = vld [vmem:[%s25214_s25 + $0xf3] sm:$0xff] }
 0x6f1   : > { %22007 = vmatprep.mubr.msk.bf16.mxu1 %vm566_vm1, %v15052_v45  ;;  %23047 = vmatprep.mubr.msk.bf16.mxu0 %vm566_vm1, %v15056_v63  ;;  %v19887_v45 = vld [vmem:[%s25214_s25 + $0xfb] sm:$0xff] }
 0x6f2   : > { %v16074_v21 = vpack.c.bf16 %v19887_v45, %v19886_v58  ;;  %v19928_v58 = vld [vmem:[%s25214_s25 + $0x293] sm:$0xff]  ;;  %v19929_v45 = vld [vmem:[%s25214_s25 + $0x29b] sm:$0xff] }
 0x6f3   : > { %v16095_v26 = vpack.c.bf16 %v19929_v45, %v19928_v58 }
 0x6f8   : > { %22008 = vmatmul.mubr.msk.bf16.gmra.mrb[112].mxu1 %vm566_vm1, %v15053_v60  ;;  %23048 = vmatmul.mubr.msk.bf16.gmra.mrb[112].mxu0 %vm566_vm1, %v15057_v6  ;;  %v19890_v60 = vld [vmem:[%s25214_s25 + $0x11b] sm:$0xff] }
 0x6f9   : > { %22011 = vmatprep.mubr.msk.bf16.mxu1 %vm566_vm1, %v15054_v17  ;;  %23051 = vmatprep.mubr.msk.bf16.mxu0 %vm566_vm1, %v15058_v36  ;;  %v19891_v17 = vld [vmem:[%s25214_s25 + $0x123] sm:$0xff] }
 0x6fa   : > { %v16076_v3 = vpack.c.bf16 %v19891_v17, %v19890_v60  ;;  %v19932_v60 = vld [vmem:[%s25214_s25 + $0x2bb] sm:$0xff]  ;;  %v19933_v17 = vld [vmem:[%s25214_s25 + $0x2c3] sm:$0xff] }
 0x6fb   : > { %v16097_v2 = vpack.c.bf16 %v19933_v17, %v19932_v60 }
 0x700   : > { %22012 = vmatmul.mubr.msk.bf16.gmra.mrb[116].mxu1 %vm566_vm1, %v15055_v53  ;;  %23052 = vmatmul.mubr.msk.bf16.gmra.mrb[116].mxu0 %vm566_vm1, %v15059_v59  ;;  %v19894_v53 = vld [vmem:[%s25214_s25 + $0x143] sm:$0xff] }
 0x701   : > { %22015 = vmatprep.mubr.msk.bf16.mxu1 %vm566_vm1, %v15056_v63  ;;  %23055 = vmatprep.mubr.msk.bf16.mxu0 %vm566_vm1, %v15060_v22  ;;  %v19895_v63 = vld [vmem:[%s25214_s25 + $0x14b] sm:$0xff]  ;;  %v19903_v22 = vld [vmem:[%s25214_s25 + $0x19b] sm:$0xff] }
 0x702   : > { %v16078_v62 = vpack.c.bf16 %v19895_v63, %v19894_v53  ;;  %v19936_v53 = vld [vmem:[%s25214_s25 + $0x2e3] sm:$0xff]  ;;  %v19937_v63 = vld [vmem:[%s25214_s25 + $0x2eb] sm:$0xff] }
 0x703   : > { %v16099_v61 = vpack.c.bf16 %v19937_v63, %v19936_v53 }
 0x708   : > { %22016 = vmatmul.mubr.msk.bf16.gmra.mrb[120].mxu1 %vm566_vm1, %v15057_v6  ;;  %23056 = vmatmul.mubr.msk.bf16.gmra.mrb[120].mxu0 %vm566_vm1, %v15061_v18  ;;  %v19898_v6 = vld [vmem:[%s25214_s25 + $0x16b] sm:$0xff]  ;;  %v19906_v18 = vld [vmem:[%s25214_s25 + $0x1bb] sm:$0xff] }
 0x709   : > { %22019 = vmatprep.mubr.msk.bf16.mxu1 %vm566_vm1, %v15058_v36  ;;  %23059 = vmatprep.mubr.msk.bf16.mxu0 %vm566_vm1, %v15062_v25  ;;  %v19899_v36 = vld [vmem:[%s25214_s25 + $0x173] sm:$0xff]  ;;  %v19907_v25 = vld [vmem:[%s25214_s25 + $0x1c3] sm:$0xff] }
 0x70a   : > { %v16080_v8 = vpack.c.bf16 %v19899_v36, %v19898_v6  ;;  %v16084_v50 = vpack.c.bf16 %v19907_v25, %v19906_v18  ;;  %v19940_v6 = vld [vmem:[%s25214_s25 + $0x30b] sm:$0xff]  ;;  %v19941_v36 = vld [vmem:[%s25214_s25 + $0x313] sm:$0xff]  ;;  %v19948_v18 = vld [vmem:[%s25214_s25 + $0x35b] sm:$0xff] }
 0x70b   : > { %v16101_v11 = vpack.c.bf16 %v19941_v36, %v19940_v6  ;;  %v19949_v25 = vld [vmem:[%s25214_s25 + $0x363] sm:$0xff] }
 0x710   : > { %22020 = vmatmul.mubr.msk.bf16.gmra.mrb[124].mxu1 %vm566_vm1, %v15059_v59  ;;  %23060 = vmatmul.mubr.msk.bf16.gmra.mrb[124].mxu0 %vm566_vm1, %v15063_v46  ;;  %v19902_v59 = vld [vmem:[%s25214_s25 + $0x193] sm:$0xff]  ;;  %v16085_v46 = vpack.c.bf16 %v19909_v52, %v19908_v20  ;;  %v16105_v20 = vpack.c.bf16 %v19949_v25, %v19948_v18 }
 0x711   : > { %22025 = vmatprep.mubr.msk.bf16.mxu1 %vm566_vm1, %v7522_v14  ;;  %23065 = vmatprep.mubr.msk.bf16.mxu0 %vm566_vm1, %v16068_v40  ;;  %v16082_v24 = vpack.c.bf16 %v19903_v22, %v19902_v59  ;;  %v16086_v14 = vpack.c.bf16 %v19911_v38, %v19910_v5  ;;  %v19944_v59 = vld [vmem:[%s25214_s25 + $0x333] sm:$0xff]  ;;  %v19945_v22 = vld [vmem:[%s25214_s25 + $0x33b] sm:$0xff]  ;;  %v19952_v5 = vld [vmem:[%s25214_s25 + $0x383] sm:$0xff] }
 0x712   : > { %v16103_v27 = vpack.c.bf16 %v19945_v22, %v19944_v59  ;;  %v19953_v38 = vld [vmem:[%s25214_s25 + $0x38b] sm:$0xff]  ;;  %v19987_v59 = vld [vmem:[%s25214_s25 + $0x4e3] sm:$0xff] }
 0x718   : > { %22026 = vmatmul.mubr.msk.bf16.vlgmr.msra.gmra.mrb[0].mxu1 %vm566_vm1, %v7523_v41  ;;  %23066 = vmatmul.mubr.msk.bf16.vlgmr.msra.gmra.mrb[0].mxu0 %vm566_vm1, %v16069_v32  ;;  %v19919_v41 = vld [vmem:[%s25214_s25 + $0x23b] sm:$0xff] }
 0x719   : > { %22029 = vmatprep.mubr.msk.bf16.mxu1 %vm566_vm1, %v7524_v56  ;;  %23069 = vmatprep.mubr.msk.bf16.mxu0 %vm566_vm1, %v16070_v47  ;;  %v16090_v56 = vpack.c.bf16 %v19919_v41, %v19918_v54  ;;  %v19960_v54 = vld [vmem:[%s25214_s25 + $0x3d3] sm:$0xff]  ;;  %v19961_v41 = vld [vmem:[%s25214_s25 + $0x3db] sm:$0xff] }
 0x720   : > { %22030 = vmatmul.mubr.msk.bf16.gmra.mrb[4].mxu1 %vm566_vm1, %v7525_v34  ;;  %23070 = vmatmul.mubr.msk.bf16.gmra.mrb[4].mxu0 %vm566_vm1, %v16071_v43  ;;  %v19925_v34 = vld [vmem:[%s25214_s25 + $0x273] sm:$0xff] }
 0x721   : > { %22033 = vmatprep.mubr.msk.bf16.mxu1 %vm566_vm1, %v16068_v40  ;;  %23073 = vmatprep.mubr.msk.bf16.mxu0 %vm566_vm1, %v16072_v35  ;;  %v19912_v40 = vld [vmem:[%s25214_s25 + $0x1f3] sm:$0xff]  ;;  %v16093_v39 = vpack.c.bf16 %v19925_v34, %v19924_v7  ;;  %v16113_v7 = vpack.c.bf16 %v19965_v55, %v19964_v42 }
 0x722   : > { %v16087_v30 = vpack.c.bf16 %v19913_v16, %v19912_v40  ;;  %v16107_v40 = vpack.c.bf16 %v19953_v38, %v19952_v5 }
 0x728   : > { %22034 = vmatmul.mubr.msk.bf16.gmra.mrb[8].mxu1 %vm566_vm1, %v16069_v32  ;;  %23074 = vmatmul.mubr.msk.bf16.gmra.mrb[8].mxu0 %vm566_vm1, %v16073_v15  ;;  %v16089_v32 = vpack.c.bf16 %v19917_v37, %v19916_v33  ;;  %v16109_v33 = vpack.c.bf16 %v19957_v4, %v19956_v31 }
 0x729   : > { %22037 = vmatprep.mubr.msk.bf16.mxu1 %vm566_vm1, %v16070_v47  ;;  %23077 = vmatprep.mubr.msk.bf16.mxu0 %vm566_vm1, %v16074_v21  ;;  %v19920_v47 = vld [vmem:[%s25214_s25 + $0x243] sm:$0xff] }
 0x72a   : > { %v16091_v13 = vpack.c.bf16 %v19921_v48, %v19920_v47  ;;  %v16111_v47 = vpack.c.bf16 %v19961_v41, %v19960_v54  ;;  %v19990_v41 = vld [vmem:[%s25214_s25 + $0x503] sm:$0xff] }
 0x730   : > { %22038 = vmatmul.mubr.msk.bf16.gmra.mrb[12].mxu1 %vm566_vm1, %v16071_v43  ;;  %23078 = vmatmul.mubr.msk.bf16.gmra.mrb[12].mxu0 %vm566_vm1, %v16075_v28  ;;  %v19926_v43 = vld [vmem:[%s25214_s25 + $0x283] sm:$0xff] }
 0x731   : > { %22041 = vmatprep.mubr.msk.bf16.mxu1 %vm566_vm1, %v16072_v35  ;;  %23081 = vmatprep.mubr.msk.bf16.mxu0 %vm566_vm1, %v16076_v3  ;;  %v19927_v35 = vld [vmem:[%s25214_s25 + $0x28b] sm:$0xff] }
 0x732   : > { %v16094_v12 = vpack.c.bf16 %v19927_v35, %v19926_v43  ;;  %v19968_v43 = vld [vmem:[%s25214_s25 + $0x423] sm:$0xff]  ;;  %v19969_v35 = vld [vmem:[%s25214_s25 + $0x42b] sm:$0xff] }
 0x733   : > { %v16115_v58 = vpack.c.bf16 %v19969_v35, %v19968_v43 }
 0x738   : > { %22042 = vmatmul.mubr.msk.bf16.gmra.mrb[16].mxu1 %vm566_vm1, %v16073_v15  ;;  %23082 = vmatmul.mubr.msk.bf16.gmra.mrb[16].mxu0 %vm566_vm1, %v16077_v44  ;;  %v19930_v15 = vld [vmem:[%s25214_s25 + $0x2ab] sm:$0xff] }
 0x739   : > { %22045 = vmatprep.mubr.msk.bf16.mxu1 %vm566_vm1, %v16074_v21  ;;  %23085 = vmatprep.mubr.msk.bf16.mxu0 %vm566_vm1, %v16078_v62  ;;  %v19931_v21 = vld [vmem:[%s25214_s25 + $0x2b3] sm:$0xff] }
 0x73a   : > { %v16096_v19 = vpack.c.bf16 %v19931_v21, %v19930_v15  ;;  %v19972_v15 = vld [vmem:[%s25214_s25 + $0x44b] sm:$0xff]  ;;  %v19973_v21 = vld [vmem:[%s25214_s25 + $0x453] sm:$0xff] }
 0x73b   : > { %v16117_v60 = vpack.c.bf16 %v19973_v21, %v19972_v15 }
 0x740   : > { %22046 = vmatmul.mubr.msk.bf16.gmra.mrb[20].mxu1 %vm566_vm1, %v16075_v28  ;;  %23086 = vmatmul.mubr.msk.bf16.gmra.mrb[20].mxu0 %vm566_vm1, %v16079_v9  ;;  %v19934_v28 = vld [vmem:[%s25214_s25 + $0x2d3] sm:$0xff] }
 0x741   : > { %22049 = vmatprep.mubr.msk.bf16.mxu1 %vm566_vm1, %v16076_v3  ;;  %23089 = vmatprep.mubr.msk.bf16.mxu0 %vm566_vm1, %v16080_v8  ;;  %v19935_v3 = vld [vmem:[%s25214_s25 + $0x2db] sm:$0xff] }
 0x742   : > { %v16098_v57 = vpack.c.bf16 %v19935_v3, %v19934_v28  ;;  %v19976_v28 = vld [vmem:[%s25214_s25 + $0x473] sm:$0xff]  ;;  %v19977_v3 = vld [vmem:[%s25214_s25 + $0x47b] sm:$0xff] }
 0x743   : > { %v16119_v53 = vpack.c.bf16 %v19977_v3, %v19976_v28  ;;  %v19993_v28 = vld [vmem:[%s25214_s25 + $0x51b] sm:$0xff] }
 0x748   : > { %22050 = vmatmul.mubr.msk.bf16.gmra.mrb[24].mxu1 %vm566_vm1, %v16077_v44  ;;  %23090 = vmatmul.mubr.msk.bf16.gmra.mrb[24].mxu0 %vm566_vm1, %v16081_v29  ;;  %v19938_v44 = vld [vmem:[%s25214_s25 + $0x2fb] sm:$0xff] }
 0x749   : > { %22053 = vmatprep.mubr.msk.bf16.mxu1 %vm566_vm1, %v16078_v62  ;;  %23093 = vmatprep.mubr.msk.bf16.mxu0 %vm566_vm1, %v16082_v24  ;;  %v19939_v62 = vld [vmem:[%s25214_s25 + $0x303] sm:$0xff] }
 0x74a   : > { %v16100_v49 = vpack.c.bf16 %v19939_v62, %v19938_v44  ;;  %v19980_v44 = vld [vmem:[%s25214_s25 + $0x49b] sm:$0xff]  ;;  %v19981_v62 = vld [vmem:[%s25214_s25 + $0x4a3] sm:$0xff] }
 0x74b   : > { %v27759_v6 = vpack.c.bf16 %v19981_v62, %v19980_v44 }
 0x750   : > { %22054 = vmatmul.mubr.msk.bf16.gmra.mrb[28].mxu1 %vm566_vm1, %v16079_v9  ;;  %23094 = vmatmul.mubr.msk.bf16.gmra.mrb[28].mxu0 %vm566_vm1, %v16083_v0  ;;  %v19942_v9 = vld [vmem:[%s25214_s25 + $0x323] sm:$0xff] }
 0x751   : > { %22057 = vmatprep.mubr.msk.bf16.mxu1 %vm566_vm1, %v16080_v8  ;;  %23097 = vmatprep.mubr.msk.bf16.mxu0 %vm566_vm1, %v16084_v50  ;;  %v19943_v8 = vld [vmem:[%s25214_s25 + $0x32b] sm:$0xff] }
 0x752   : > { %v16102_v10 = vpack.c.bf16 %v19943_v8, %v19942_v9  ;;  %v19984_v9 = vld [vmem:[%s25214_s25 + $0x4c3] sm:$0xff]  ;;  %v19985_v8 = vld [vmem:[%s25214_s25 + $0x4cb] sm:$0xff] }
 0x753   : > { %v27779_v25 = vpack.c.bf16 %v19985_v8, %v19984_v9 }
 0x758   : > { %22058 = vmatmul.mubr.msk.bf16.gmra.mrb[32].mxu1 %vm566_vm1, %v16081_v29  ;;  %23098 = vmatmul.mubr.msk.bf16.gmra.mrb[32].mxu0 %vm566_vm1, %v16085_v46  ;;  %v19946_v29 = vld [vmem:[%s25214_s25 + $0x34b] sm:$0xff] }
 0x759   : > { %22061 = vmatprep.mubr.msk.bf16.mxu1 %vm566_vm1, %v16082_v24  ;;  %23101 = vmatprep.mubr.msk.bf16.mxu0 %vm566_vm1, %v16086_v14  ;;  %v19947_v24 = vld [vmem:[%s25214_s25 + $0x353] sm:$0xff] }
 0x75a   : > { %v16104_v23 = vpack.c.bf16 %v19947_v24, %v19946_v29  ;;  %v27776_v29 = vld [vmem:[%s28232_s2] ss:$0 sm:$0xff] }
 0x760   : > { %22062 = vmatmul.mubr.msk.bf16.gmra.mrb[36].mxu1 %vm566_vm1, %v16083_v0  ;;  %23102 = vmatmul.mubr.msk.bf16.gmra.mrb[36].mxu0 %vm566_vm1, %v16087_v30  ;;  %v19950_v0 = vld [vmem:[%s25214_s25 + $0x373] sm:$0xff] }
 0x761   : > { %22065 = vmatprep.mubr.msk.bf16.mxu1 %vm566_vm1, %v16084_v50  ;;  %23105 = vmatprep.mubr.msk.bf16.mxu0 %vm566_vm1, %v16088_v1  ;;  %v19951_v50 = vld [vmem:[%s25214_s25 + $0x37b] sm:$0xff] }
 0x762   : > { %v16106_v52 = vpack.c.bf16 %v19951_v50, %v19950_v0 }
 0x768   : > { %22066 = vmatmul.mubr.msk.bf16.gmra.mrb[40].mxu1 %vm566_vm1, %v16085_v46  ;;  %23106 = vmatmul.mubr.msk.bf16.gmra.mrb[40].mxu0 %vm566_vm1, %v16089_v32  ;;  %v19954_v46 = vld [vmem:[%s25214_s25 + $0x39b] sm:$0xff] }
 0x769   : > { %22069 = vmatprep.mubr.msk.bf16.mxu1 %vm566_vm1, %v16086_v14  ;;  %23109 = vmatprep.mubr.msk.bf16.mxu0 %vm566_vm1, %v16090_v56  ;;  %v19955_v14 = vld [vmem:[%s25214_s25 + $0x3a3] sm:$0xff] }
 0x76a   : > { %v16108_v16 = vpack.c.bf16 %v19955_v14, %v19954_v46 }
 0x770   : > { %22070 = vmatmul.mubr.msk.bf16.gmra.mrb[44].mxu1 %vm566_vm1, %v16087_v30  ;;  %23110 = vmatmul.mubr.msk.bf16.gmra.mrb[44].mxu0 %vm566_vm1, %v16091_v13  ;;  %v19958_v30 = vld [vmem:[%s25214_s25 + $0x3c3] sm:$0xff] }
 0x771   : > { %22073 = vmatprep.mubr.msk.bf16.mxu1 %vm566_vm1, %v16088_v1  ;;  %23113 = vmatprep.mubr.msk.bf16.mxu0 %vm566_vm1, %v16092_v51  ;;  %v19959_v1 = vld [vmem:[%s25214_s25 + $0x3cb] sm:$0xff] }
 0x772   : > { %v16110_v37 = vpack.c.bf16 %v19959_v1, %v19958_v30  ;;  %v19988_v1 = vld [vmem:[%s25214_s25 + $0x4eb] sm:$0xff] }
 0x778   : > { %22074 = vmatmul.mubr.msk.bf16.gmra.mrb[48].mxu1 %vm566_vm1, %v16089_v32  ;;  %23114 = vmatmul.mubr.msk.bf16.gmra.mrb[48].mxu0 %vm566_vm1, %v16093_v39  ;;  %v19962_v32 = vld [vmem:[%s25214_s25 + $0x3eb] sm:$0xff] }
 0x779   : > { %22077 = vmatprep.mubr.msk.bf16.mxu1 %vm566_vm1, %v16090_v56  ;;  %23117 = vmatprep.mubr.msk.bf16.mxu0 %vm566_vm1, %v16094_v12  ;;  %v19963_v56 = vld [vmem:[%s25214_s25 + $0x3f3] sm:$0xff] }
 0x77a   : > { %v16112_v48 = vpack.c.bf16 %v19963_v56, %v19962_v32  ;;  %v19991_v32 = vld [vmem:[%s25214_s25 + $0x50b] sm:$0xff] }
 0x77b   : > { %v27812_v35 = vpack.c.bf16 %v19991_v32, %v19990_v41 }
 0x780   : > { %22078 = vmatmul.mubr.msk.bf16.gmra.mrb[52].mxu1 %vm566_vm1, %v16091_v13  ;;  %23118 = vmatmul.mubr.msk.bf16.gmra.mrb[52].mxu0 %vm566_vm1, %v16095_v26  ;;  %v19966_v13 = vld [vmem:[%s25214_s25 + $0x413] sm:$0xff] }
 0x781   : > { %22081 = vmatprep.mubr.msk.bf16.mxu1 %vm566_vm1, %v16092_v51  ;;  %23121 = vmatprep.mubr.msk.bf16.mxu0 %vm566_vm1, %v16096_v19  ;;  %v19967_v51 = vld [vmem:[%s25214_s25 + $0x41b] sm:$0xff] }
 0x782   : > { %v16114_v34 = vpack.c.bf16 %v19967_v51, %v19966_v13 }
 0x788   : > { %22082 = vmatmul.mubr.msk.bf16.gmra.mrb[56].mxu1 %vm566_vm1, %v16093_v39  ;;  %23122 = vmatmul.mubr.msk.bf16.gmra.mrb[56].mxu0 %vm566_vm1, %v16097_v2  ;;  %v19970_v39 = vld [vmem:[%s25214_s25 + $0x43b] sm:$0xff] }
 0x789   : > { %22085 = vmatprep.mubr.msk.bf16.mxu1 %vm566_vm1, %v16094_v12  ;;  %23125 = vmatprep.mubr.msk.bf16.mxu0 %vm566_vm1, %v16098_v57  ;;  %v19971_v12 = vld [vmem:[%s25214_s25 + $0x443] sm:$0xff] }
 0x78a   : > { %v16116_v45 = vpack.c.bf16 %v19971_v12, %v19970_v39 }
 0x790   : > { %22086 = vmatmul.mubr.msk.bf16.gmra.mrb[60].mxu1 %vm566_vm1, %v16095_v26  ;;  %23126 = vmatmul.mubr.msk.bf16.gmra.mrb[60].mxu0 %vm566_vm1, %v16099_v61  ;;  %v19974_v26 = vld [vmem:[%s25214_s25 + $0x463] sm:$0xff] }
 0x791   : > { %22089 = vmatprep.mubr.msk.bf16.mxu1 %vm566_vm1, %v16096_v19  ;;  %23129 = vmatprep.mubr.msk.bf16.mxu0 %vm566_vm1, %v16100_v49  ;;  %v19975_v19 = vld [vmem:[%s25214_s25 + $0x46b] sm:$0xff] }
 0x792   : > { %v16118_v17 = vpack.c.bf16 %v19975_v19, %v19974_v26 }
 0x798   : > { %22090 = vmatmul.mubr.msk.bf16.gmra.mrb[64].mxu1 %vm566_vm1, %v16097_v2  ;;  %23130 = vmatmul.mubr.msk.bf16.gmra.mrb[64].mxu0 %vm566_vm1, %v16101_v11  ;;  %v19978_v2 = vld [vmem:[%s25214_s25 + $0x48b] sm:$0xff] }
 0x799   : > { %22093 = vmatprep.mubr.msk.bf16.mxu1 %vm566_vm1, %v16098_v57  ;;  %23133 = vmatprep.mubr.msk.bf16.mxu0 %vm566_vm1, %v16102_v10  ;;  %v19979_v57 = vld [vmem:[%s25214_s25 + $0x493] sm:$0xff] }
 0x79a   : > { %v16120_v63 = vpack.c.bf16 %v19979_v57, %v19978_v2  ;;  %v19994_v57 = vld [vmem:[%s25214_s25 + $0x52b] sm:$0xff] }
 0x7a0   : > { %22094 = vmatmul.mubr.msk.bf16.gmra.mrb[68].mxu1 %vm566_vm1, %v16099_v61  ;;  %23134 = vmatmul.mubr.msk.bf16.gmra.mrb[68].mxu0 %vm566_vm1, %v16103_v27  ;;  %v19982_v61 = vld [vmem:[%s25214_s25 + $0x4b3] sm:$0xff] }
 0x7a1   : > { %22097 = vmatprep.mubr.msk.bf16.mxu1 %vm566_vm1, %v16100_v49  ;;  %23137 = vmatprep.mubr.msk.bf16.mxu0 %vm566_vm1, %v16104_v23  ;;  %v19983_v49 = vld [vmem:[%s25214_s25 + $0x4bb] sm:$0xff] }
 0x7a2   : > { %v27761_v36 = vpack.c.bf16 %v19983_v49, %v19982_v61 }
 0x7a8   : > { %22098 = vmatmul.mubr.msk.bf16.gmra.mrb[72].mxu1 %vm566_vm1, %v16101_v11  ;;  %23138 = vmatmul.mubr.msk.bf16.gmra.mrb[72].mxu0 %vm566_vm1, %v16105_v20 }
 0x7a9   : > { %22101 = vmatprep.mubr.msk.bf16.mxu1 %vm566_vm1, %v16102_v10  ;;  %23141 = vmatprep.mubr.msk.bf16.mxu0 %vm566_vm1, %v16106_v52  ;;  %v19986_v10 = vld [vmem:[%s25214_s25 + $0x4db] sm:$0xff] }
 0x7b0   : > { %22102 = vmatmul.mubr.msk.bf16.gmra.mrb[76].mxu1 %vm566_vm1, %v16103_v27  ;;  %23142 = vmatmul.mubr.msk.bf16.gmra.mrb[76].mxu0 %vm566_vm1, %v16107_v40 }
 0x7b1   : > { %22105 = vmatprep.mubr.msk.bf16.mxu1 %vm566_vm1, %v16104_v23  ;;  %23145 = vmatprep.mubr.msk.bf16.mxu0 %vm566_vm1, %v16108_v16 }
 0x7b8   : > { %22106 = vmatmul.mubr.msk.bf16.gmra.mrb[80].mxu1 %vm566_vm1, %v16105_v20  ;;  %23146 = vmatmul.mubr.msk.bf16.gmra.mrb[80].mxu0 %vm566_vm1, %v16109_v33 }
 0x7b9   : > { %22109 = vmatprep.mubr.msk.bf16.mxu1 %vm566_vm1, %v16106_v52  ;;  %23149 = vmatprep.mubr.msk.bf16.mxu0 %vm566_vm1, %v16110_v37  ;;  %v27781_v52 = vpack.c.bf16 %v19987_v59, %v19986_v10 }
 0x7c0   : > { %22110 = vmatmul.mubr.msk.bf16.gmra.mrb[84].mxu1 %vm566_vm1, %v16107_v40  ;;  %23150 = vmatmul.mubr.msk.bf16.gmra.mrb[84].mxu0 %vm566_vm1, %v16111_v47 }
 0x7c1   : > { %22113 = vmatprep.mubr.msk.bf16.mxu1 %vm566_vm1, %v16108_v16  ;;  %23153 = vmatprep.mubr.msk.bf16.mxu0 %vm566_vm1, %v16112_v48 }
 0x7c8   : > { %22114 = vmatmul.mubr.msk.bf16.gmra.mrb[88].mxu1 %vm566_vm1, %v16109_v33  ;;  %23154 = vmatmul.mubr.msk.bf16.gmra.mrb[88].mxu0 %vm566_vm1, %v16113_v7  ;;  %v19989_v33 = vld [vmem:[%s25214_s25 + $0x4f3] sm:$0xff] }
 0x7c9   : > { %22117 = vmatprep.mubr.msk.bf16.mxu1 %vm566_vm1, %v16110_v37  ;;  %23157 = vmatprep.mubr.msk.bf16.mxu0 %vm566_vm1, %v16114_v34  ;;  %v27808_v51 = vpack.c.bf16 %v19989_v33, %v19988_v1 }
 0x7d0   : > { %22118 = vmatmul.mubr.msk.bf16.gmra.mrb[92].mxu1 %vm566_vm1, %v16111_v47  ;;  %23158 = vmatmul.mubr.msk.bf16.gmra.mrb[92].mxu0 %vm566_vm1, %v16115_v58 }
 0x7d1   : > { %22121 = vmatprep.mubr.msk.bf16.mxu1 %vm566_vm1, %v16112_v48  ;;  %23161 = vmatprep.mubr.msk.bf16.mxu0 %vm566_vm1, %v16116_v45 }
 0x7d8   : > { %22122 = vmatmul.mubr.msk.bf16.gmra.mrb[96].mxu1 %vm566_vm1, %v16113_v7  ;;  %23162 = vmatmul.mubr.msk.bf16.gmra.mrb[96].mxu0 %vm566_vm1, %v16117_v60 }
 0x7d9   : > { %22125 = vmatprep.mubr.msk.bf16.mxu1 %vm566_vm1, %v16114_v34  ;;  %23165 = vmatprep.mubr.msk.bf16.mxu0 %vm566_vm1, %v16118_v17 }
 0x7e0   : > { %22126 = vmatmul.mubr.msk.bf16.gmra.mrb[100].mxu1 %vm566_vm1, %v16115_v58  ;;  %23166 = vmatmul.mubr.msk.bf16.gmra.mrb[100].mxu0 %vm566_vm1, %v16119_v53 }
 0x7e1   : > { %22129 = vmatprep.mubr.msk.bf16.mxu1 %vm566_vm1, %v16116_v45  ;;  %23169 = vmatprep.mubr.msk.bf16.mxu0 %vm566_vm1, %v16120_v63 }
 0x7e8   : > { %22130 = vmatmul.mubr.msk.bf16.gmra.mrb[104].mxu1 %vm566_vm1, %v16117_v60  ;;  %23170 = vmatmul.mubr.msk.bf16.gmra.mrb[104].mxu0 %vm566_vm1, %v27759_v6 }
 0x7e9   : > { %22133 = vmatprep.mubr.msk.bf16.mxu1 %vm566_vm1, %v16118_v17  ;;  %23173 = vmatprep.mubr.msk.bf16.mxu0 %vm566_vm1, %v27761_v36  ;;  %v19992_v17 = vld [vmem:[%s25214_s25 + $0x513] sm:$0xff] }
 0x7eb   : > { %v22027_v11 = vpop.f32.mrb[0].mxu1  ;;  %v23067_v22 = vpop.f32.mrb[0].mxu0 }
 0x7ec   : > { %v7823_v24 = vpop.f32.mrb[1].mxu1  ;;  %v23193_v27 = vadd.f32 %v23067_v22, %v22027_v11  ;;  %v16369_v23 = vpop.f32.mrb[1].mxu0 }
 0x7ed   : > { %v22028_v18 = vpop.f32.mrb[2].mxu1  ;;  %v23194_v0 = vadd.f32 %v16369_v23, %v7823_v24  ;;  %v23068_v50 = vpop.f32.mrb[2].mxu0 }
 0x7ee   : > { %v7826_v20 = vpop.f32.mrb[3].mxu1  ;;  %v17017_v5 = vadd.f32 %v23193_v27, %v27776_v29  ;;  %v23195_v38 = vadd.f32 %v23068_v50, %v22028_v18  ;;  %v16372_v46 = vpop.f32.mrb[3].mxu0 }
 0x7ef   : > { %v17015_v14 = vadd.f32 %v23194_v0, %v27776_v29  ;;  %v23196_v40 = vadd.f32 %v16372_v46, %v7826_v20 }
 0x7f0   : > { %22134 = vmatmul.mubr.msk.bf16.gmra.mrb[108].mxu1 %vm566_vm1, %v16119_v53  ;;  %v17145_v16 = vmax.f32 %v17017_v5, 0.0  ;;  %v17018_v31 = vadd.f32 %v23195_v38, %v27776_v29  ;;  %23174 = vmatmul.mubr.msk.bf16.gmra.mrb[108].mxu0 %vm566_vm1, %v27779_v25  ;;  %v19995_v53 = vld [vmem:[%s25214_s25 + $0x533] sm:$0xff]  ;;  %v19996_v5 = vld [vmem:[%s25214_s25 + $0x53b] sm:$0xff]  ;;  %v19997_v38 = vld [vmem:[%s25214_s25 + $0x543] sm:$0xff] }
 0x7f1   : > { %22137 = vmatprep.mubr.msk.bf16.mxu1 %vm566_vm1, %v16120_v63  ;;  %v17143_v4 = vmax.f32 %v17015_v14, 0.0  ;;  %v17016_v30 = vadd.f32 %v23196_v40, %v27776_v29  ;;  %23177 = vmatprep.mubr.msk.bf16.mxu0 %vm566_vm1, %v27781_v52  ;;  %v16128_v10 = vpack.c.bf16 %v19995_v53, %v19994_v57  ;;  %v19998_v14 = vld [vmem:[%s25214_s25 + $0x553] sm:$0xff]  ;;  %v19999_v40 = vld [vmem:[%s25214_s25 + $0x55b] sm:$0xff]  ;;  %v16129_v33 = vpack.c.bf16 %v19997_v38, %v19996_v5 }
 0x7f2   : > { %17274 = vst.msk [vmem:[%s27787_s13 + $0x10] sm:$0xff] %vm17271_vm2, %v17145_v16  ;;  %v17146_v37 = vmax.f32 %v17018_v31, 0.0  ;;  %v16130_v32 = vpack.c.bf16 %v19999_v40, %v19998_v14 }
 0x7f3   : > { %v22031_v54 = vpop.f32.mrb[4].mxu1  ;;  %17272 = vst.msk [vmem:[%s27787_s13] sm:$0xff] %vm17271_vm2, %v17143_v4  ;;  %v17144_v56 = vmax.f32 %v17016_v30, 0.0  ;;  %v23071_v47 = vpop.f32.mrb[4].mxu0 }
 0x7f4   : > { %v7839_v48 = vpop.f32.mrb[5].mxu1  ;;  %17275 = vst.msk [vmem:[%s27787_s13 + $0x18] sm:$0xff] %vm17271_vm2, %v17146_v37  ;;  %v23197_v42 = vadd.f32 %v23071_v47, %v22031_v54  ;;  %v16385_v55 = vpop.f32.mrb[5].mxu0 }
 0x7f5   : > { %v22032_v13 = vpop.f32.mrb[6].mxu1  ;;  %17273 = vst.msk [vmem:[%s27787_s13 + $0x8] sm:$0xff] %vm17271_vm2, %v17144_v56  ;;  %v23198_v7 = vadd.f32 %v16385_v55, %v7839_v48  ;;  %v23072_v34 = vpop.f32.mrb[6].mxu0 }
 0x7f6   : > { %v7842_v43 = vpop.f32.mrb[7].mxu1  ;;  %v17021_v39 = vadd.f32 %v23197_v42, %v27776_v29  ;;  %v23199_v12 = vadd.f32 %v23072_v34, %v22032_v13  ;;  %v16388_v58 = vpop.f32.mrb[7].mxu0 }
 0x7f7   : > { %v17019_v45 = vadd.f32 %v23198_v7, %v27776_v29  ;;  %v23200_v15 = vadd.f32 %v16388_v58, %v7842_v43 }
 0x7f8   : > { %22138 = vmatmul.mubr.msk.bf16.gmra.mrb[112].mxu1 %vm566_vm1, %v27759_v6  ;;  %v17149_v21 = vmax.f32 %v17021_v39, 0.0  ;;  %v17022_v26 = vadd.f32 %v23199_v12, %v27776_v29  ;;  %23178 = vmatmul.mubr.msk.bf16.gmra.mrb[112].mxu0 %vm566_vm1, %v27808_v51  ;;  %v20000_v39 = vld [vmem:[%s25214_s25 + $0x563] sm:$0xff]  ;;  %v20001_v12 = vld [vmem:[%s25214_s25 + $0x56b] sm:$0xff] }
 0x7f9   : > { %22141 = vmatprep.mubr.msk.bf16.mxu1 %vm566_vm1, %v27761_v36  ;;  %v17147_v19 = vmax.f32 %v17019_v45, 0.0  ;;  %v17020_v60 = vadd.f32 %v23200_v15, %v27776_v29  ;;  %23181 = vmatprep.mubr.msk.bf16.mxu0 %vm566_vm1, %v27812_v35  ;;  %v27836_v36 = vpack.c.bf16 %v19993_v28, %v19992_v17 }
 0x7fa   : > { %17278 = vst.msk [vmem:[%s27787_s13 + $0x30] sm:$0xff] %vm17271_vm2, %v17149_v21  ;;  %v17150_v3 = vmax.f32 %v17022_v26, 0.0 }
 0x7fb   : > { %v22035_v2 = vpop.f32.mrb[8].mxu1  ;;  %17276 = vst.msk [vmem:[%s27787_s13 + $0x20] sm:$0xff] %vm17271_vm2, %v17147_v19  ;;  %v17148_v63 = vmax.f32 %v17020_v60, 0.0  ;;  %v23075_v44 = vpop.f32.mrb[8].mxu0  ;;  %v16131_v60 = vpack.c.bf16 %v20001_v12, %v20000_v39 }
 0x7fc   : > { %v7855_v62 = vpop.f32.mrb[9].mxu1  ;;  %17279 = vst.msk [vmem:[%s27787_s13 + $0x38] sm:$0xff] %vm17271_vm2, %v17150_v3  ;;  %v23201_v61 = vadd.f32 %v23075_v44, %v22035_v2  ;;  %v16401_v49 = vpop.f32.mrb[9].mxu0 }
 0x7fd   : > { %v22036_v6 = vpop.f32.mrb[10].mxu1  ;;  %17277 = vst.msk [vmem:[%s27787_s13 + $0x28] sm:$0xff] %vm17271_vm2, %v17148_v63  ;;  %v23202_v9 = vadd.f32 %v16401_v49, %v7855_v62  ;;  %v23076_v8 = vpop.f32.mrb[10].mxu0 }
 0x7fe   : > { %v7858_v11 = vpop.f32.mrb[11].mxu1  ;;  %v17025_v59 = vadd.f32 %v23201_v61, %v27776_v29  ;;  %v23203_v22 = vadd.f32 %v23076_v8, %v22036_v6  ;;  %v16404_v24 = vpop.f32.mrb[11].mxu0 }
 0x7ff   : > { %v17023_v27 = vadd.f32 %v23202_v9, %v27776_v29  ;;  %v23204_v23 = vadd.f32 %v16404_v24, %v7858_v11 }
 0x800   : > { %22142 = vmatmul.mubr.msk.bf16.gmra.mrb[116].mxu1 %vm566_vm1, %v27779_v25  ;;  %v17153_v18 = vmax.f32 %v17025_v59, 0.0  ;;  %v17026_v0 = vadd.f32 %v23203_v22, %v27776_v29  ;;  %23182 = vmatmul.mubr.msk.bf16.gmra.mrb[116].mxu0 %vm566_vm1, %v27836_v36 }
 0x801   : > { %22145 = vmatprep.mubr.msk.bf16.mxu1 %vm566_vm1, %v27781_v52  ;;  %v17151_v50 = vmax.f32 %v17023_v27, 0.0  ;;  %v17024_v20 = vadd.f32 %v23204_v23, %v27776_v29  ;;  %23185 = vmatprep.mubr.msk.bf16.mxu0 %vm566_vm1, %v16128_v10 }
 0x802   : > { %17282 = vst.msk [vmem:[%s27787_s13 + $0x50] sm:$0xff] %vm17271_vm2, %v17153_v18  ;;  %v17154_v25 = vmax.f32 %v17026_v0, 0.0 }
 0x803   : > { %v22039_v46 = vpop.f32.mrb[12].mxu1  ;;  %17280 = vst.msk [vmem:[%s27787_s13 + $0x40] sm:$0xff] %vm17271_vm2, %v17151_v50  ;;  %v17152_v16 = vmax.f32 %v17024_v20, 0.0  ;;  %v23079_v31 = vpop.f32.mrb[12].mxu0 }
 0x804   : > { %v7871_v4 = vpop.f32.mrb[13].mxu1  ;;  %17283 = vst.msk [vmem:[%s27787_s13 + $0x58] sm:$0xff] %vm17271_vm2, %v17154_v25  ;;  %v23205_v52 = vadd.f32 %v23079_v31, %v22039_v46  ;;  %v16417_v30 = vpop.f32.mrb[13].mxu0 }
 0x805   : > { %v22040_v1 = vpop.f32.mrb[14].mxu1  ;;  %17281 = vst.msk [vmem:[%s27787_s13 + $0x48] sm:$0xff] %vm17271_vm2, %v17152_v16  ;;  %v23206_v37 = vadd.f32 %v16417_v30, %v7871_v4  ;;  %v23080_v54 = vpop.f32.mrb[14].mxu0 }
 0x806   : > { %v7874_v41 = vpop.f32.mrb[15].mxu1  ;;  %v17029_v56 = vadd.f32 %v23205_v52, %v27776_v29  ;;  %v23207_v47 = vadd.f32 %v23080_v54, %v22040_v1  ;;  %v16420_v48 = vpop.f32.mrb[15].mxu0 }
 0x807   : > { %v17027_v42 = vadd.f32 %v23206_v37, %v27776_v29  ;;  %v23208_v55 = vadd.f32 %v16420_v48, %v7874_v41 }
 0x808   : > { %22146 = vmatmul.mubr.msk.bf16.gmra.mrb[120].mxu1 %vm566_vm1, %v27808_v51  ;;  %v17157_v13 = vmax.f32 %v17029_v56, 0.0  ;;  %v17030_v7 = vadd.f32 %v23207_v47, %v27776_v29  ;;  %23186 = vmatmul.mubr.msk.bf16.gmra.mrb[120].mxu0 %vm566_vm1, %v16129_v33 }
 0x809   : > { %22149 = vmatprep.mubr.msk.bf16.mxu1 %vm566_vm1, %v27812_v35  ;;  %v17155_v34 = vmax.f32 %v17027_v42, 0.0  ;;  %v17028_v43 = vadd.f32 %v23208_v55, %v27776_v29  ;;  %23189 = vmatprep.mubr.msk.bf16.mxu0 %vm566_vm1, %v16130_v32 }
 0x80a   : > { %17286 = vst.msk [vmem:[%s27787_s13 + $0x70] sm:$0xff] %vm17271_vm2, %v17157_v13  ;;  %v17158_v51 = vmax.f32 %v17030_v7, 0.0 }
 0x80b   : > { %v22043_v58 = vpop.f32.mrb[16].mxu1  ;;  %17284 = vst.msk [vmem:[%s27787_s13 + $0x60] sm:$0xff] %vm17271_vm2, %v17155_v34  ;;  %v17156_v45 = vmax.f32 %v17028_v43, 0.0  ;;  %v23083_v15 = vpop.f32.mrb[16].mxu0 }
 0x80c   : > { %v7887_v21 = vpop.f32.mrb[17].mxu1  ;;  %17287 = vst.msk [vmem:[%s27787_s13 + $0x78] sm:$0xff] %vm17271_vm2, %v17158_v51  ;;  %v23209_v35 = vadd.f32 %v23083_v15, %v22043_v58  ;;  %v16433_v26 = vpop.f32.mrb[17].mxu0 }
 0x80d   : > { %v22044_v19 = vpop.f32.mrb[18].mxu1  ;;  %17285 = vst.msk [vmem:[%s27787_s13 + $0x68] sm:$0xff] %vm17271_vm2, %v17156_v45  ;;  %v23210_v17 = vadd.f32 %v16433_v26, %v7887_v21  ;;  %v23084_v28 = vpop.f32.mrb[18].mxu0 }
 0x80e   : > { %v7890_v3 = vpop.f32.mrb[19].mxu1  ;;  %v17033_v2 = vadd.f32 %v23209_v35, %v27776_v29  ;;  %v23211_v57 = vadd.f32 %v23084_v28, %v22044_v19  ;;  %v16436_v53 = vpop.f32.mrb[19].mxu0 }
 0x80f   : > { %v17031_v63 = vadd.f32 %v23210_v17, %v27776_v29  ;;  %v23212_v44 = vadd.f32 %v16436_v53, %v7890_v3 }
 0x810   : > { %22150 = vmatmul.mubr.msk.bf16.gmra.mrb[124].mxu1 %vm566_vm1, %v27836_v36  ;;  %v17161_v62 = vmax.f32 %v17033_v2, 0.0  ;;  %v17034_v61 = vadd.f32 %v23211_v57, %v27776_v29  ;;  %23190 = vmatmul.mubr.msk.bf16.gmra.mrb[124].mxu0 %vm566_vm1, %v16131_v60 }
 0x811   : > { %v17159_v49 = vmax.f32 %v17031_v63, 0.0  ;;  %v17032_v6 = vadd.f32 %v23212_v44, %v27776_v29 }
 0x812   : > { %17290 = vst.msk [vmem:[%s27787_s13 + $0x90] sm:$0xff] %vm17271_vm2, %v17161_v62  ;;  %v17162_v9 = vmax.f32 %v17034_v61, 0.0 }
 0x813   : > { %v22047_v8 = vpop.f32.mrb[20].mxu1  ;;  %17288 = vst.msk [vmem:[%s27787_s13 + $0x80] sm:$0xff] %vm17271_vm2, %v17159_v49  ;;  %v17160_v11 = vmax.f32 %v17032_v6, 0.0  ;;  %v23087_v10 = vpop.f32.mrb[20].mxu0 }
 0x814   : > { %v7903_v59 = vpop.f32.mrb[21].mxu1  ;;  %17291 = vst.msk [vmem:[%s27787_s13 + $0x98] sm:$0xff] %vm17271_vm2, %v17162_v9  ;;  %v23213_v36 = vadd.f32 %v23087_v10, %v22047_v8  ;;  %v16449_v22 = vpop.f32.mrb[21].mxu0 }
 0x815   : > { %v22048_v24 = vpop.f32.mrb[22].mxu1  ;;  %17289 = vst.msk [vmem:[%s27787_s13 + $0x88] sm:$0xff] %vm17271_vm2, %v17160_v11  ;;  %v23214_v27 = vadd.f32 %v16449_v22, %v7903_v59  ;;  %v23088_v23 = vpop.f32.mrb[22].mxu0 }
 0x816   : > { %v7906_v18 = vpop.f32.mrb[23].mxu1  ;;  %v17037_v0 = vadd.f32 %v23213_v36, %v27776_v29  ;;  %v23215_v50 = vadd.f32 %v23088_v23, %v22048_v24  ;;  %v16452_v20 = vpop.f32.mrb[23].mxu0 }
 0x817   : > { %v17035_v5 = vadd.f32 %v23214_v27, %v27776_v29  ;;  %v23216_v38 = vadd.f32 %v16452_v20, %v7906_v18 }
 0x818   : > { %v17165_v25 = vmax.f32 %v17037_v0, 0.0  ;;  %v17038_v46 = vadd.f32 %v23215_v50, %v27776_v29 }
 0x819   : > { %v17163_v14 = vmax.f32 %v17035_v5, 0.0  ;;  %v17036_v40 = vadd.f32 %v23216_v38, %v27776_v29 }
 0x81a   : > { %17294 = vst.msk [vmem:[%s27787_s13 + $0xb0] sm:$0xff] %vm17271_vm2, %v17165_v25  ;;  %v17166_v16 = vmax.f32 %v17038_v46, 0.0 }
 0x81b   : > { %v22051_v31 = vpop.f32.mrb[24].mxu1  ;;  %17292 = vst.msk [vmem:[%s27787_s13 + $0xa0] sm:$0xff] %vm17271_vm2, %v17163_v14  ;;  %v17164_v4 = vmax.f32 %v17036_v40, 0.0  ;;  %v23091_v52 = vpop.f32.mrb[24].mxu0 }
 0x81c   : > { %v7919_v30 = vpop.f32.mrb[25].mxu1  ;;  %17295 = vst.msk [vmem:[%s27787_s13 + $0xb8] sm:$0xff] %vm17271_vm2, %v17166_v16  ;;  %v23217_v1 = vadd.f32 %v23091_v52, %v22051_v31  ;;  %v16465_v33 = vpop.f32.mrb[25].mxu0 }
 0x81d   : > { %v22052_v37 = vpop.f32.mrb[26].mxu1  ;;  %17293 = vst.msk [vmem:[%s27787_s13 + $0xa8] sm:$0xff] %vm17271_vm2, %v17164_v4  ;;  %v23218_v54 = vadd.f32 %v16465_v33, %v7919_v30  ;;  %v23092_v41 = vpop.f32.mrb[26].mxu0 }
 0x81e   : > { %v7922_v32 = vpop.f32.mrb[27].mxu1  ;;  %v17041_v56 = vadd.f32 %v23217_v1, %v27776_v29  ;;  %v23219_v47 = vadd.f32 %v23092_v41, %v22052_v37  ;;  %v16468_v48 = vpop.f32.mrb[27].mxu0 }
 0x81f   : > { %v17039_v42 = vadd.f32 %v23218_v54, %v27776_v29  ;;  %v23220_v55 = vadd.f32 %v16468_v48, %v7922_v32 }
 0x820   : > { %v17169_v13 = vmax.f32 %v17041_v56, 0.0  ;;  %v17042_v7 = vadd.f32 %v23219_v47, %v27776_v29 }
 0x821   : > { %v17167_v34 = vmax.f32 %v17039_v42, 0.0  ;;  %v17040_v43 = vadd.f32 %v23220_v55, %v27776_v29 }
 0x822   : > { %17298 = vst.msk [vmem:[%s27787_s13 + $0xd0] sm:$0xff] %vm17271_vm2, %v17169_v13  ;;  %v17170_v39 = vmax.f32 %v17042_v7, 0.0 }
 0x823   : > { %v22055_v12 = vpop.f32.mrb[28].mxu1  ;;  %17296 = vst.msk [vmem:[%s27787_s13 + $0xc0] sm:$0xff] %vm17271_vm2, %v17167_v34  ;;  %v17168_v51 = vmax.f32 %v17040_v43, 0.0  ;;  %v23095_v58 = vpop.f32.mrb[28].mxu0 }
 0x824   : > { %v7935_v45 = vpop.f32.mrb[29].mxu1  ;;  %17299 = vst.msk [vmem:[%s27787_s13 + $0xd8] sm:$0xff] %vm17271_vm2, %v17170_v39  ;;  %v23221_v15 = vadd.f32 %v23095_v58, %v22055_v12  ;;  %v16481_v21 = vpop.f32.mrb[29].mxu0 }
 0x825   : > { %v22056_v35 = vpop.f32.mrb[30].mxu1  ;;  %17297 = vst.msk [vmem:[%s27787_s13 + $0xc8] sm:$0xff] %vm17271_vm2, %v17168_v51  ;;  %v23222_v26 = vadd.f32 %v16481_v21, %v7935_v45  ;;  %v23096_v19 = vpop.f32.mrb[30].mxu0 }
 0x826   : > { %v7938_v60 = vpop.f32.mrb[31].mxu1  ;;  %v17045_v17 = vadd.f32 %v23221_v15, %v27776_v29  ;;  %v23223_v28 = vadd.f32 %v23096_v19, %v22056_v35  ;;  %v16484_v3 = vpop.f32.mrb[31].mxu0 }
 0x827   : > { %v17043_v2 = vadd.f32 %v23222_v26, %v27776_v29  ;;  %v23224_v57 = vadd.f32 %v16484_v3, %v7938_v60 }
 0x828   : > { %v17173_v53 = vmax.f32 %v17045_v17, 0.0  ;;  %v17046_v63 = vadd.f32 %v23223_v28, %v27776_v29 }
 0x829   : > { %v17171_v44 = vmax.f32 %v17043_v2, 0.0  ;;  %v17044_v62 = vadd.f32 %v23224_v57, %v27776_v29 }
 0x82a   : > { %17302 = vst.msk [vmem:[%s27787_s13 + $0xf0] sm:$0xff] %vm17271_vm2, %v17173_v53  ;;  %v17174_v61 = vmax.f32 %v17046_v63, 0.0 }
 0x82b   : > { %v22059_v49 = vpop.f32.mrb[32].mxu1  ;;  %17300 = vst.msk [vmem:[%s27787_s13 + $0xe0] sm:$0xff] %vm17271_vm2, %v17171_v44  ;;  %v17172_v6 = vmax.f32 %v17044_v62, 0.0  ;;  %v23099_v9 = vpop.f32.mrb[32].mxu0 }
 0x82c   : > { %v7951_v8 = vpop.f32.mrb[33].mxu1  ;;  %17303 = vst.msk [vmem:[%s27787_s13 + $0xf8] sm:$0xff] %vm17271_vm2, %v17174_v61  ;;  %v23225_v11 = vadd.f32 %v23099_v9, %v22059_v49  ;;  %v16497_v10 = vpop.f32.mrb[33].mxu0 }
 0x82d   : > { %v22060_v59 = vpop.f32.mrb[34].mxu1  ;;  %17301 = vst.msk [vmem:[%s27787_s13 + $0xe8] sm:$0xff] %vm17271_vm2, %v17172_v6  ;;  %v23226_v36 = vadd.f32 %v16497_v10, %v7951_v8  ;;  %v23100_v22 = vpop.f32.mrb[34].mxu0 }
 0x82e   : > { %v7954_v24 = vpop.f32.mrb[35].mxu1  ;;  %v17049_v27 = vadd.f32 %v23225_v11, %v27776_v29  ;;  %v23227_v23 = vadd.f32 %v23100_v22, %v22060_v59  ;;  %v16500_v18 = vpop.f32.mrb[35].mxu0 }
 0x82f   : > { %v17047_v0 = vadd.f32 %v23226_v36, %v27776_v29  ;;  %v23228_v50 = vadd.f32 %v16500_v18, %v7954_v24 }
 0x830   : > { %v17177_v20 = vmax.f32 %v17049_v27, 0.0  ;;  %v17050_v5 = vadd.f32 %v23227_v23, %v27776_v29 }
 0x831   : > { %v17175_v38 = vmax.f32 %v17047_v0, 0.0  ;;  %v17048_v25 = vadd.f32 %v23228_v50, %v27776_v29 }
 0x832   : > { %17306 = vst.msk [vmem:[%s27787_s13 + $0x110] sm:$0xff] %vm17271_vm2, %v17177_v20  ;;  %v17178_v46 = vmax.f32 %v17050_v5, 0.0 }
 0x833   : > { %v22063_v14 = vpop.f32.mrb[36].mxu1  ;;  %17304 = vst.msk [vmem:[%s27787_s13 + $0x100] sm:$0xff] %vm17271_vm2, %v17175_v38  ;;  %v17176_v40 = vmax.f32 %v17048_v25, 0.0  ;;  %v23103_v16 = vpop.f32.mrb[36].mxu0 }
 0x834   : > { %v7967_v31 = vpop.f32.mrb[37].mxu1  ;;  %17307 = vst.msk [vmem:[%s27787_s13 + $0x118] sm:$0xff] %vm17271_vm2, %v17178_v46  ;;  %v23229_v4 = vadd.f32 %v23103_v16, %v22063_v14  ;;  %v16513_v52 = vpop.f32.mrb[37].mxu0 }
 0x835   : > { %v22064_v30 = vpop.f32.mrb[38].mxu1  ;;  %17305 = vst.msk [vmem:[%s27787_s13 + $0x108] sm:$0xff] %vm17271_vm2, %v17176_v40  ;;  %v23230_v1 = vadd.f32 %v16513_v52, %v7967_v31  ;;  %v23104_v33 = vpop.f32.mrb[38].mxu0 }
 0x836   : > { %v7970_v37 = vpop.f32.mrb[39].mxu1  ;;  %v17053_v54 = vadd.f32 %v23229_v4, %v27776_v29  ;;  %v23231_v41 = vadd.f32 %v23104_v33, %v22064_v30  ;;  %v16516_v32 = vpop.f32.mrb[39].mxu0 }
 0x837   : > { %v17051_v56 = vadd.f32 %v23230_v1, %v27776_v29  ;;  %v23232_v47 = vadd.f32 %v16516_v32, %v7970_v37 }
 0x838   : > { %v17181_v48 = vmax.f32 %v17053_v54, 0.0  ;;  %v17054_v42 = vadd.f32 %v23231_v41, %v27776_v29 }
 0x839   : > { %v17179_v55 = vmax.f32 %v17051_v56, 0.0  ;;  %v17052_v13 = vadd.f32 %v23232_v47, %v27776_v29 }
 0x83a   : > { %17310 = vst.msk [vmem:[%s27787_s13 + $0x130] sm:$0xff] %vm17271_vm2, %v17181_v48  ;;  %v17182_v7 = vmax.f32 %v17054_v42, 0.0 }
 0x83b   : > { %v22067_v34 = vpop.f32.mrb[40].mxu1  ;;  %17308 = vst.msk [vmem:[%s27787_s13 + $0x120] sm:$0xff] %vm17271_vm2, %v17179_v55  ;;  %v17180_v43 = vmax.f32 %v17052_v13, 0.0  ;;  %v23107_v39 = vpop.f32.mrb[40].mxu0 }
 0x83c   : > { %v7983_v12 = vpop.f32.mrb[41].mxu1  ;;  %17311 = vst.msk [vmem:[%s27787_s13 + $0x138] sm:$0xff] %vm17271_vm2, %v17182_v7  ;;  %v23233_v51 = vadd.f32 %v23107_v39, %v22067_v34  ;;  %v16529_v58 = vpop.f32.mrb[41].mxu0 }
 0x83d   : > { %v22068_v45 = vpop.f32.mrb[42].mxu1  ;;  %17309 = vst.msk [vmem:[%s27787_s13 + $0x128] sm:$0xff] %vm17271_vm2, %v17180_v43  ;;  %v23234_v15 = vadd.f32 %v16529_v58, %v7983_v12  ;;  %v23108_v21 = vpop.f32.mrb[42].mxu0 }
 0x83e   : > { %v7986_v35 = vpop.f32.mrb[43].mxu1  ;;  %v17057_v26 = vadd.f32 %v23233_v51, %v27776_v29  ;;  %v23235_v19 = vadd.f32 %v23108_v21, %v22068_v45  ;;  %v16532_v60 = vpop.f32.mrb[43].mxu0 }
 0x83f   : > { %v17055_v17 = vadd.f32 %v23234_v15, %v27776_v29  ;;  %v23236_v28 = vadd.f32 %v16532_v60, %v7986_v35 }
 0x840   : > { %v17185_v3 = vmax.f32 %v17057_v26, 0.0  ;;  %v17058_v2 = vadd.f32 %v23235_v19, %v27776_v29 }
 0x841   : > { %v17183_v57 = vmax.f32 %v17055_v17, 0.0  ;;  %v17056_v53 = vadd.f32 %v23236_v28, %v27776_v29 }
 0x842   : > { %17314 = vst.msk [vmem:[%s27787_s13 + $0x150] sm:$0xff] %vm17271_vm2, %v17185_v3  ;;  %v17186_v63 = vmax.f32 %v17058_v2, 0.0 }
 0x843   : > { %v22071_v44 = vpop.f32.mrb[44].mxu1  ;;  %17312 = vst.msk [vmem:[%s27787_s13 + $0x140] sm:$0xff] %vm17271_vm2, %v17183_v57  ;;  %v17184_v62 = vmax.f32 %v17056_v53, 0.0  ;;  %v23111_v61 = vpop.f32.mrb[44].mxu0 }
 0x844   : > { %v7999_v49 = vpop.f32.mrb[45].mxu1  ;;  %17315 = vst.msk [vmem:[%s27787_s13 + $0x158] sm:$0xff] %vm17271_vm2, %v17186_v63  ;;  %v23237_v6 = vadd.f32 %v23111_v61, %v22071_v44  ;;  %v16545_v9 = vpop.f32.mrb[45].mxu0 }
 0x845   : > { %v22072_v8 = vpop.f32.mrb[46].mxu1  ;;  %17313 = vst.msk [vmem:[%s27787_s13 + $0x148] sm:$0xff] %vm17271_vm2, %v17184_v62  ;;  %v23238_v11 = vadd.f32 %v16545_v9, %v7999_v49  ;;  %v23112_v10 = vpop.f32.mrb[46].mxu0 }
 0x846   : > { %v8002_v59 = vpop.f32.mrb[47].mxu1  ;;  %v17061_v36 = vadd.f32 %v23237_v6, %v27776_v29  ;;  %v23239_v22 = vadd.f32 %v23112_v10, %v22072_v8  ;;  %v16548_v24 = vpop.f32.mrb[47].mxu0 }
 0x847   : > { %v17059_v27 = vadd.f32 %v23238_v11, %v27776_v29  ;;  %v23240_v23 = vadd.f32 %v16548_v24, %v8002_v59 }
 0x848   : > { %v17189_v18 = vmax.f32 %v17061_v36, 0.0  ;;  %v17062_v0 = vadd.f32 %v23239_v22, %v27776_v29 }
 0x849   : > { %v17187_v50 = vmax.f32 %v17059_v27, 0.0  ;;  %v17060_v20 = vadd.f32 %v23240_v23, %v27776_v29 }
 0x84a   : > { %17318 = vst.msk [vmem:[%s27787_s13 + $0x170] sm:$0xff] %vm17271_vm2, %v17189_v18  ;;  %v17190_v5 = vmax.f32 %v17062_v0, 0.0 }
 0x84b   : > { %v22075_v38 = vpop.f32.mrb[48].mxu1  ;;  %17316 = vst.msk [vmem:[%s27787_s13 + $0x160] sm:$0xff] %vm17271_vm2, %v17187_v50  ;;  %v17188_v25 = vmax.f32 %v17060_v20, 0.0  ;;  %v23115_v46 = vpop.f32.mrb[48].mxu0 }
 0x84c   : > { %v8015_v14 = vpop.f32.mrb[49].mxu1  ;;  %17319 = vst.msk [vmem:[%s27787_s13 + $0x178] sm:$0xff] %vm17271_vm2, %v17190_v5  ;;  %v23241_v40 = vadd.f32 %v23115_v46, %v22075_v38  ;;  %v16561_v16 = vpop.f32.mrb[49].mxu0 }
 0x84d   : > { %v22076_v31 = vpop.f32.mrb[50].mxu1  ;;  %17317 = vst.msk [vmem:[%s27787_s13 + $0x168] sm:$0xff] %vm17271_vm2, %v17188_v25  ;;  %v23242_v4 = vadd.f32 %v16561_v16, %v8015_v14  ;;  %v23116_v52 = vpop.f32.mrb[50].mxu0 }
 0x84e   : > { %v8018_v30 = vpop.f32.mrb[51].mxu1  ;;  %v17065_v1 = vadd.f32 %v23241_v40, %v27776_v29  ;;  %v23243_v33 = vadd.f32 %v23116_v52, %v22076_v31  ;;  %v16564_v37 = vpop.f32.mrb[51].mxu0 }
 0x84f   : > { %v17063_v54 = vadd.f32 %v23242_v4, %v27776_v29  ;;  %v23244_v41 = vadd.f32 %v16564_v37, %v8018_v30 }
 0x850   : > { %v17193_v32 = vmax.f32 %v17065_v1, 0.0  ;;  %v17066_v56 = vadd.f32 %v23243_v33, %v27776_v29 }
 0x851   : > { %v17191_v47 = vmax.f32 %v17063_v54, 0.0  ;;  %v17064_v48 = vadd.f32 %v23244_v41, %v27776_v29 }
 0x852   : > { %17322 = vst.msk [vmem:[%s27787_s13 + $0x190] sm:$0xff] %vm17271_vm2, %v17193_v32  ;;  %v17194_v42 = vmax.f32 %v17066_v56, 0.0 }
 0x853   : > { %v22079_v55 = vpop.f32.mrb[52].mxu1  ;;  %17320 = vst.msk [vmem:[%s27787_s13 + $0x180] sm:$0xff] %vm17271_vm2, %v17191_v47  ;;  %v17192_v13 = vmax.f32 %v17064_v48, 0.0  ;;  %v23119_v7 = vpop.f32.mrb[52].mxu0 }
 0x854   : > { %v8031_v34 = vpop.f32.mrb[53].mxu1  ;;  %17323 = vst.msk [vmem:[%s27787_s13 + $0x198] sm:$0xff] %vm17271_vm2, %v17194_v42  ;;  %v23245_v43 = vadd.f32 %v23119_v7, %v22079_v55  ;;  %v16577_v39 = vpop.f32.mrb[53].mxu0 }
 0x855   : > { %v22080_v12 = vpop.f32.mrb[54].mxu1  ;;  %17321 = vst.msk [vmem:[%s27787_s13 + $0x188] sm:$0xff] %vm17271_vm2, %v17192_v13  ;;  %v23246_v51 = vadd.f32 %v16577_v39, %v8031_v34  ;;  %v23120_v58 = vpop.f32.mrb[54].mxu0 }
 0x856   : > { %v8034_v45 = vpop.f32.mrb[55].mxu1  ;;  %v17069_v15 = vadd.f32 %v23245_v43, %v27776_v29  ;;  %v23247_v21 = vadd.f32 %v23120_v58, %v22080_v12  ;;  %v16580_v35 = vpop.f32.mrb[55].mxu0 }
 0x857   : > { %v17067_v26 = vadd.f32 %v23246_v51, %v27776_v29  ;;  %v23248_v19 = vadd.f32 %v16580_v35, %v8034_v45 }
 0x858   : > { %v17197_v60 = vmax.f32 %v17069_v15, 0.0  ;;  %v17070_v17 = vadd.f32 %v23247_v21, %v27776_v29 }
 0x859   : > { %v17195_v28 = vmax.f32 %v17067_v26, 0.0  ;;  %v17068_v3 = vadd.f32 %v23248_v19, %v27776_v29 }
 0x85a   : > { %17326 = vst.msk [vmem:[%s27787_s13 + $0x1b0] sm:$0xff] %vm17271_vm2, %v17197_v60  ;;  %v17198_v2 = vmax.f32 %v17070_v17, 0.0 }
 0x85b   : > { %v22083_v57 = vpop.f32.mrb[56].mxu1  ;;  %17324 = vst.msk [vmem:[%s27787_s13 + $0x1a0] sm:$0xff] %vm17271_vm2, %v17195_v28  ;;  %v17196_v53 = vmax.f32 %v17068_v3, 0.0  ;;  %v23123_v63 = vpop.f32.mrb[56].mxu0 }
 0x85c   : > { %v8047_v44 = vpop.f32.mrb[57].mxu1  ;;  %17327 = vst.msk [vmem:[%s27787_s13 + $0x1b8] sm:$0xff] %vm17271_vm2, %v17198_v2  ;;  %v23249_v62 = vadd.f32 %v23123_v63, %v22083_v57  ;;  %v16593_v61 = vpop.f32.mrb[57].mxu0 }
 0x85d   : > { %v22084_v49 = vpop.f32.mrb[58].mxu1  ;;  %17325 = vst.msk [vmem:[%s27787_s13 + $0x1a8] sm:$0xff] %vm17271_vm2, %v17196_v53  ;;  %v23250_v6 = vadd.f32 %v16593_v61, %v8047_v44  ;;  %v23124_v9 = vpop.f32.mrb[58].mxu0 }
 0x85e   : > { %v8050_v8 = vpop.f32.mrb[59].mxu1  ;;  %v17073_v11 = vadd.f32 %v23249_v62, %v27776_v29  ;;  %v23251_v10 = vadd.f32 %v23124_v9, %v22084_v49  ;;  %v16596_v59 = vpop.f32.mrb[59].mxu0 }
 0x85f   : > { %v17071_v36 = vadd.f32 %v23250_v6, %v27776_v29  ;;  %v23252_v22 = vadd.f32 %v16596_v59, %v8050_v8 }
 0x860   : > { %v17201_v24 = vmax.f32 %v17073_v11, 0.0  ;;  %v17074_v27 = vadd.f32 %v23251_v10, %v27776_v29 }
 0x861   : > { %v17199_v23 = vmax.f32 %v17071_v36, 0.0  ;;  %v17072_v18 = vadd.f32 %v23252_v22, %v27776_v29 }
 0x862   : > { %17330 = vst.msk [vmem:[%s27787_s13 + $0x1d0] sm:$0xff] %vm17271_vm2, %v17201_v24  ;;  %v17202_v0 = vmax.f32 %v17074_v27, 0.0 }
 0x863   : > { %v22087_v50 = vpop.f32.mrb[60].mxu1  ;;  %17328 = vst.msk [vmem:[%s27787_s13 + $0x1c0] sm:$0xff] %vm17271_vm2, %v17199_v23  ;;  %v17200_v20 = vmax.f32 %v17072_v18, 0.0  ;;  %v23127_v5 = vpop.f32.mrb[60].mxu0 }
 0x864   : > { %v8063_v38 = vpop.f32.mrb[61].mxu1  ;;  %17331 = vst.msk [vmem:[%s27787_s13 + $0x1d8] sm:$0xff] %vm17271_vm2, %v17202_v0  ;;  %v23253_v25 = vadd.f32 %v23127_v5, %v22087_v50  ;;  %v16609_v46 = vpop.f32.mrb[61].mxu0 }
 0x865   : > { %v22088_v14 = vpop.f32.mrb[62].mxu1  ;;  %17329 = vst.msk [vmem:[%s27787_s13 + $0x1c8] sm:$0xff] %vm17271_vm2, %v17200_v20  ;;  %v23254_v40 = vadd.f32 %v16609_v46, %v8063_v38  ;;  %v23128_v16 = vpop.f32.mrb[62].mxu0 }
 0x866   : > { %v8066_v31 = vpop.f32.mrb[63].mxu1  ;;  %v17077_v4 = vadd.f32 %v23253_v25, %v27776_v29  ;;  %v23255_v52 = vadd.f32 %v23128_v16, %v22088_v14  ;;  %v16612_v30 = vpop.f32.mrb[63].mxu0 }
 0x867   : > { %v17075_v1 = vadd.f32 %v23254_v40, %v27776_v29  ;;  %v23256_v33 = vadd.f32 %v16612_v30, %v8066_v31 }
 0x868   : > { %v17205_v37 = vmax.f32 %v17077_v4, 0.0  ;;  %v17078_v54 = vadd.f32 %v23255_v52, %v27776_v29 }
 0x869   : > { %v17203_v41 = vmax.f32 %v17075_v1, 0.0  ;;  %v17076_v32 = vadd.f32 %v23256_v33, %v27776_v29 }
 0x86a   : > { %17334 = vst.msk [vmem:[%s27787_s13 + $0x1f0] sm:$0xff] %vm17271_vm2, %v17205_v37  ;;  %v17206_v56 = vmax.f32 %v17078_v54, 0.0 }
 0x86b   : > { %v22091_v47 = vpop.f32.mrb[64].mxu1  ;;  %17332 = vst.msk [vmem:[%s27787_s13 + $0x1e0] sm:$0xff] %vm17271_vm2, %v17203_v41  ;;  %v17204_v48 = vmax.f32 %v17076_v32, 0.0  ;;  %v23131_v42 = vpop.f32.mrb[64].mxu0 }
 0x86c   : > { %v8079_v55 = vpop.f32.mrb[65].mxu1  ;;  %17335 = vst.msk [vmem:[%s27787_s13 + $0x1f8] sm:$0xff] %vm17271_vm2, %v17206_v56  ;;  %v23257_v13 = vadd.f32 %v23131_v42, %v22091_v47  ;;  %v16625_v7 = vpop.f32.mrb[65].mxu0 }
 0x86d   : > { %v22092_v34 = vpop.f32.mrb[66].mxu1  ;;  %17333 = vst.msk [vmem:[%s27787_s13 + $0x1e8] sm:$0xff] %vm17271_vm2, %v17204_v48  ;;  %v23258_v43 = vadd.f32 %v16625_v7, %v8079_v55  ;;  %v23132_v39 = vpop.f32.mrb[66].mxu0 }
 0x86e   : > { %v8082_v12 = vpop.f32.mrb[67].mxu1  ;;  %v17081_v51 = vadd.f32 %v23257_v13, %v27776_v29  ;;  %v23259_v58 = vadd.f32 %v23132_v39, %v22092_v34  ;;  %v16628_v45 = vpop.f32.mrb[67].mxu0 }
 0x86f   : > { %v17079_v15 = vadd.f32 %v23258_v43, %v27776_v29  ;;  %v23260_v21 = vadd.f32 %v16628_v45, %v8082_v12 }
 0x870   : > { %v17209_v35 = vmax.f32 %v17081_v51, 0.0  ;;  %v17082_v26 = vadd.f32 %v23259_v58, %v27776_v29 }
 0x871   : > { %v17207_v19 = vmax.f32 %v17079_v15, 0.0  ;;  %v17080_v60 = vadd.f32 %v23260_v21, %v27776_v29  ;;  %v28071_v15 = vld [vmem:[%s28232_s2] ss:$0 sm:$0xff] }
 0x872   : > { %17338 = vst.msk [vmem:[%s27787_s13 + $0x210] sm:$0xff] %vm17271_vm2, %v17209_v35  ;;  %v17210_v17 = vmax.f32 %v17082_v26, 0.0 }
 0x873   : > { %v22095_v28 = vpop.f32.mrb[68].mxu1  ;;  %17336 = vst.msk [vmem:[%s27787_s13 + $0x200] sm:$0xff] %vm17271_vm2, %v17207_v19  ;;  %v17208_v3 = vmax.f32 %v17080_v60, 0.0  ;;  %v23135_v2 = vpop.f32.mrb[68].mxu0 }
 0x874   : > { %v8095_v57 = vpop.f32.mrb[69].mxu1  ;;  %17339 = vst.msk [vmem:[%s27787_s13 + $0x218] sm:$0xff] %vm17271_vm2, %v17210_v17  ;;  %v23261_v53 = vadd.f32 %v23135_v2, %v22095_v28  ;;  %v16641_v63 = vpop.f32.mrb[69].mxu0 }
 0x875   : > { %v22096_v44 = vpop.f32.mrb[70].mxu1  ;;  %17337 = vst.msk [vmem:[%s27787_s13 + $0x208] sm:$0xff] %vm17271_vm2, %v17208_v3  ;;  %v23262_v62 = vadd.f32 %v16641_v63, %v8095_v57  ;;  %v23136_v61 = vpop.f32.mrb[70].mxu0 }
 0x876   : > { %v8098_v49 = vpop.f32.mrb[71].mxu1  ;;  %v17085_v6 = vadd.f32 %v23261_v53, %v27776_v29  ;;  %v23263_v9 = vadd.f32 %v23136_v61, %v22096_v44  ;;  %v16644_v8 = vpop.f32.mrb[71].mxu0 }
 0x877   : > { %v17083_v11 = vadd.f32 %v23262_v62, %v27776_v29  ;;  %v23264_v10 = vadd.f32 %v16644_v8, %v8098_v49 }
 0x878   : > { %v17213_v59 = vmax.f32 %v17085_v6, 0.0  ;;  %v17086_v36 = vadd.f32 %v23263_v9, %v27776_v29 }
 0x879   : > { %v17211_v22 = vmax.f32 %v17083_v11, 0.0  ;;  %v17084_v24 = vadd.f32 %v23264_v10, %v27776_v29 }
 0x87a   : > { %17342 = vst.msk [vmem:[%s27787_s13 + $0x230] sm:$0xff] %vm17271_vm2, %v17213_v59  ;;  %v17214_v27 = vmax.f32 %v17086_v36, 0.0 }
 0x87b   : > { %v22099_v23 = vpop.f32.mrb[72].mxu1  ;;  %17340 = vst.msk [vmem:[%s27787_s13 + $0x220] sm:$0xff] %vm17271_vm2, %v17211_v22  ;;  %v17212_v18 = vmax.f32 %v17084_v24, 0.0  ;;  %v23139_v0 = vpop.f32.mrb[72].mxu0 }
 0x87c   : > { %v8111_v50 = vpop.f32.mrb[73].mxu1  ;;  %17343 = vst.msk [vmem:[%s27787_s13 + $0x238] sm:$0xff] %vm17271_vm2, %v17214_v27  ;;  %v23265_v20 = vadd.f32 %v23139_v0, %v22099_v23  ;;  %v16657_v5 = vpop.f32.mrb[73].mxu0 }
 0x87d   : > { %v22100_v38 = vpop.f32.mrb[74].mxu1  ;;  %17341 = vst.msk [vmem:[%s27787_s13 + $0x228] sm:$0xff] %vm17271_vm2, %v17212_v18  ;;  %v23266_v25 = vadd.f32 %v16657_v5, %v8111_v50  ;;  %v23140_v46 = vpop.f32.mrb[74].mxu0 }
 0x87e   : > { %v8114_v14 = vpop.f32.mrb[75].mxu1  ;;  %v17089_v40 = vadd.f32 %v23265_v20, %v27776_v29  ;;  %v23267_v16 = vadd.f32 %v23140_v46, %v22100_v38  ;;  %v16660_v31 = vpop.f32.mrb[75].mxu0 }
 0x87f   : > { %v17087_v4 = vadd.f32 %v23266_v25, %v27776_v29  ;;  %v23268_v52 = vadd.f32 %v16660_v31, %v8114_v14 }
 0x880   : > { %v17217_v30 = vmax.f32 %v17089_v40, 0.0  ;;  %v17090_v1 = vadd.f32 %v23267_v16, %v27776_v29 }
 0x881   : > { %v17215_v33 = vmax.f32 %v17087_v4, 0.0  ;;  %v17088_v37 = vadd.f32 %v23268_v52, %v27776_v29 }
 0x882   : > { %17346 = vst.msk [vmem:[%s27787_s13 + $0x250] sm:$0xff] %vm17271_vm2, %v17217_v30  ;;  %v17218_v54 = vmax.f32 %v17090_v1, 0.0 }
 0x883   : > { %v22103_v41 = vpop.f32.mrb[76].mxu1  ;;  %17344 = vst.msk [vmem:[%s27787_s13 + $0x240] sm:$0xff] %vm17271_vm2, %v17215_v33  ;;  %v17216_v32 = vmax.f32 %v17088_v37, 0.0  ;;  %v23143_v56 = vpop.f32.mrb[76].mxu0 }
 0x884   : > { %v8127_v47 = vpop.f32.mrb[77].mxu1  ;;  %17347 = vst.msk [vmem:[%s27787_s13 + $0x258] sm:$0xff] %vm17271_vm2, %v17218_v54  ;;  %v23269_v48 = vadd.f32 %v23143_v56, %v22103_v41  ;;  %v16673_v42 = vpop.f32.mrb[77].mxu0 }
 0x885   : > { %v22104_v55 = vpop.f32.mrb[78].mxu1  ;;  %17345 = vst.msk [vmem:[%s27787_s13 + $0x248] sm:$0xff] %vm17271_vm2, %v17216_v32  ;;  %v23270_v13 = vadd.f32 %v16673_v42, %v8127_v47  ;;  %v23144_v7 = vpop.f32.mrb[78].mxu0 }
 0x886   : > { %v8130_v34 = vpop.f32.mrb[79].mxu1  ;;  %v17093_v43 = vadd.f32 %v23269_v48, %v27776_v29  ;;  %v23271_v39 = vadd.f32 %v23144_v7, %v22104_v55  ;;  %v16676_v12 = vpop.f32.mrb[79].mxu0 }
 0x887   : > { %v17091_v51 = vadd.f32 %v23270_v13, %v27776_v29  ;;  %v23272_v58 = vadd.f32 %v16676_v12, %v8130_v34 }
 0x888   : > { %v17221_v45 = vmax.f32 %v17093_v43, 0.0  ;;  %v17094_v21 = vadd.f32 %v28071_v15, %v23271_v39 }
 0x889   : > { %v17219_v35 = vmax.f32 %v17091_v51, 0.0  ;;  %v17092_v26 = vadd.f32 %v28071_v15, %v23272_v58 }
 0x88a   : > { %17350 = vst.msk [vmem:[%s27787_s13 + $0x270] sm:$0xff] %vm17271_vm2, %v17221_v45  ;;  %v17222_v19 = vmax.f32 %v17094_v21, 0.0 }
 0x88b   : > { %v22107_v60 = vpop.f32.mrb[80].mxu1  ;;  %17348 = vst.msk [vmem:[%s27787_s13 + $0x260] sm:$0xff] %vm17271_vm2, %v17219_v35  ;;  %v17220_v29 = vmax.f32 %v17092_v26, 0.0  ;;  %v23147_v17 = vpop.f32.mrb[80].mxu0 }
 0x88c   : > { %v8143_v28 = vpop.f32.mrb[81].mxu1  ;;  %17351 = vst.msk [vmem:[%s27787_s13 + $0x278] sm:$0xff] %vm17271_vm2, %v17222_v19  ;;  %v23273_v3 = vadd.f32 %v23147_v17, %v22107_v60  ;;  %v16689_v2 = vpop.f32.mrb[81].mxu0 }
 0x88d   : > { %v22108_v57 = vpop.f32.mrb[82].mxu1  ;;  %17349 = vst.msk [vmem:[%s27787_s13 + $0x268] sm:$0xff] %vm17271_vm2, %v17220_v29  ;;  %v23274_v53 = vadd.f32 %v16689_v2, %v8143_v28  ;;  %v23148_v63 = vpop.f32.mrb[82].mxu0 }
 0x88e   : > { %v8146_v44 = vpop.f32.mrb[83].mxu1  ;;  %v17097_v62 = vadd.f32 %v28071_v15, %v23273_v3  ;;  %v23275_v61 = vadd.f32 %v23148_v63, %v22108_v57  ;;  %v16692_v49 = vpop.f32.mrb[83].mxu0 }
 0x88f   : > { %v17095_v6 = vadd.f32 %v28071_v15, %v23274_v53  ;;  %v23276_v9 = vadd.f32 %v16692_v49, %v8146_v44 }
 0x890   : > { %v17225_v8 = vmax.f32 %v17097_v62, 0.0  ;;  %v17098_v11 = vadd.f32 %v28071_v15, %v23275_v61 }
 0x891   : > { %v17223_v10 = vmax.f32 %v17095_v6, 0.0  ;;  %v17096_v59 = vadd.f32 %v28071_v15, %v23276_v9 }
 0x892   : > { %17354 = vst.msk [vmem:[%s27787_s13 + $0x290] sm:$0xff] %vm17271_vm2, %v17225_v8  ;;  %v17226_v36 = vmax.f32 %v17098_v11, 0.0 }
 0x893   : > { %v22111_v22 = vpop.f32.mrb[84].mxu1  ;;  %17352 = vst.msk [vmem:[%s27787_s13 + $0x280] sm:$0xff] %vm17271_vm2, %v17223_v10  ;;  %v17224_v24 = vmax.f32 %v17096_v59, 0.0  ;;  %v23151_v27 = vpop.f32.mrb[84].mxu0 }
 0x894   : > { %v8159_v23 = vpop.f32.mrb[85].mxu1  ;;  %17355 = vst.msk [vmem:[%s27787_s13 + $0x298] sm:$0xff] %vm17271_vm2, %v17226_v36  ;;  %v23277_v18 = vadd.f32 %v23151_v27, %v22111_v22  ;;  %v16705_v0 = vpop.f32.mrb[85].mxu0 }
 0x895   : > { %v22112_v50 = vpop.f32.mrb[86].mxu1  ;;  %17353 = vst.msk [vmem:[%s27787_s13 + $0x288] sm:$0xff] %vm17271_vm2, %v17224_v24  ;;  %v23278_v20 = vadd.f32 %v16705_v0, %v8159_v23  ;;  %v23152_v5 = vpop.f32.mrb[86].mxu0 }
 0x896   : > { %v8162_v38 = vpop.f32.mrb[87].mxu1  ;;  %v17101_v25 = vadd.f32 %v28071_v15, %v23277_v18  ;;  %v23279_v46 = vadd.f32 %v23152_v5, %v22112_v50  ;;  %v16708_v14 = vpop.f32.mrb[87].mxu0 }
 0x897   : > { %v17099_v40 = vadd.f32 %v28071_v15, %v23278_v20  ;;  %v23280_v16 = vadd.f32 %v16708_v14, %v8162_v38 }
 0x898   : > { %v17229_v31 = vmax.f32 %v17101_v25, 0.0  ;;  %v17102_v4 = vadd.f32 %v28071_v15, %v23279_v46 }
 0x899   : > { %v17227_v52 = vmax.f32 %v17099_v40, 0.0  ;;  %v17100_v30 = vadd.f32 %v28071_v15, %v23280_v16 }
 0x89a   : > { %17358 = vst.msk [vmem:[%s27787_s13 + $0x2b0] sm:$0xff] %vm17271_vm2, %v17229_v31  ;;  %v17230_v1 = vmax.f32 %v17102_v4, 0.0 }
 0x89b   : > { %v22115_v33 = vpop.f32.mrb[88].mxu1  ;;  %17356 = vst.msk [vmem:[%s27787_s13 + $0x2a0] sm:$0xff] %vm17271_vm2, %v17227_v52  ;;  %v17228_v37 = vmax.f32 %v17100_v30, 0.0  ;;  %v23155_v54 = vpop.f32.mrb[88].mxu0 }
 0x89c   : > { %v8175_v41 = vpop.f32.mrb[89].mxu1  ;;  %17359 = vst.msk [vmem:[%s27787_s13 + $0x2b8] sm:$0xff] %vm17271_vm2, %v17230_v1  ;;  %v23281_v32 = vadd.f32 %v23155_v54, %v22115_v33  ;;  %v16721_v56 = vpop.f32.mrb[89].mxu0 }
 0x89d   : > { %v22116_v47 = vpop.f32.mrb[90].mxu1  ;;  %17357 = vst.msk [vmem:[%s27787_s13 + $0x2a8] sm:$0xff] %vm17271_vm2, %v17228_v37  ;;  %v23282_v48 = vadd.f32 %v16721_v56, %v8175_v41  ;;  %v23156_v42 = vpop.f32.mrb[90].mxu0 }
 0x89e   : > { %v8178_v55 = vpop.f32.mrb[91].mxu1  ;;  %v17105_v13 = vadd.f32 %v28071_v15, %v23281_v32  ;;  %v23283_v7 = vadd.f32 %v23156_v42, %v22116_v47  ;;  %v16724_v34 = vpop.f32.mrb[91].mxu0 }
 0x89f   : > { %v17103_v43 = vadd.f32 %v28071_v15, %v23282_v48  ;;  %v23284_v39 = vadd.f32 %v16724_v34, %v8178_v55 }
 0x8a0   : > { %v17233_v12 = vmax.f32 %v17105_v13, 0.0  ;;  %v17106_v51 = vadd.f32 %v28071_v15, %v23283_v7 }
 0x8a1   : > { %v17231_v58 = vmax.f32 %v17103_v43, 0.0  ;;  %v17104_v45 = vadd.f32 %v28071_v15, %v23284_v39 }
 0x8a2   : > { %17362 = vst.msk [vmem:[%s27787_s13 + $0x2d0] sm:$0xff] %vm17271_vm2, %v17233_v12  ;;  %v17234_v21 = vmax.f32 %v17106_v51, 0.0 }
 0x8a3   : > { %v22119_v35 = vpop.f32.mrb[92].mxu1  ;;  %17360 = vst.msk [vmem:[%s27787_s13 + $0x2c0] sm:$0xff] %vm17271_vm2, %v17231_v58  ;;  %v17232_v26 = vmax.f32 %v17104_v45, 0.0  ;;  %v23159_v19 = vpop.f32.mrb[92].mxu0 }
 0x8a4   : > { %v8191_v60 = vpop.f32.mrb[93].mxu1  ;;  %17363 = vst.msk [vmem:[%s27787_s13 + $0x2d8] sm:$0xff] %vm17271_vm2, %v17234_v21  ;;  %v23285_v29 = vadd.f32 %v23159_v19, %v22119_v35  ;;  %v16737_v17 = vpop.f32.mrb[93].mxu0 }
 0x8a5   : > { %v22120_v28 = vpop.f32.mrb[94].mxu1  ;;  %17361 = vst.msk [vmem:[%s27787_s13 + $0x2c8] sm:$0xff] %vm17271_vm2, %v17232_v26  ;;  %v23286_v3 = vadd.f32 %v16737_v17, %v8191_v60  ;;  %v23160_v2 = vpop.f32.mrb[94].mxu0 }
 0x8a6   : > { %v8194_v57 = vpop.f32.mrb[95].mxu1  ;;  %v17109_v53 = vadd.f32 %v28071_v15, %v23285_v29  ;;  %v23287_v63 = vadd.f32 %v23160_v2, %v22120_v28  ;;  %v16740_v44 = vpop.f32.mrb[95].mxu0 }
 0x8a7   : > { %v17107_v62 = vadd.f32 %v28071_v15, %v23286_v3  ;;  %v23288_v61 = vadd.f32 %v16740_v44, %v8194_v57 }
 0x8a8   : > { %v17237_v49 = vmax.f32 %v17109_v53, 0.0  ;;  %v17110_v6 = vadd.f32 %v28071_v15, %v23287_v63 }
 0x8a9   : > { %v17235_v9 = vmax.f32 %v17107_v62, 0.0  ;;  %v17108_v8 = vadd.f32 %v28071_v15, %v23288_v61 }
 0x8aa   : > { %17366 = vst.msk [vmem:[%s27787_s13 + $0x2f0] sm:$0xff] %vm17271_vm2, %v17237_v49  ;;  %v17238_v11 = vmax.f32 %v17110_v6, 0.0 }
 0x8ab   : > { %v22123_v10 = vpop.f32.mrb[96].mxu1  ;;  %17364 = vst.msk [vmem:[%s27787_s13 + $0x2e0] sm:$0xff] %vm17271_vm2, %v17235_v9  ;;  %v17236_v59 = vmax.f32 %v17108_v8, 0.0  ;;  %v23163_v36 = vpop.f32.mrb[96].mxu0 }
 0x8ac   : > { %v8207_v22 = vpop.f32.mrb[97].mxu1  ;;  %17367 = vst.msk [vmem:[%s27787_s13 + $0x2f8] sm:$0xff] %vm17271_vm2, %v17238_v11  ;;  %v23289_v24 = vadd.f32 %v23163_v36, %v22123_v10  ;;  %v16753_v27 = vpop.f32.mrb[97].mxu0 }
 0x8ad   : > { %v22124_v23 = vpop.f32.mrb[98].mxu1  ;;  %17365 = vst.msk [vmem:[%s27787_s13 + $0x2e8] sm:$0xff] %vm17271_vm2, %v17236_v59  ;;  %v23290_v18 = vadd.f32 %v16753_v27, %v8207_v22  ;;  %v23164_v0 = vpop.f32.mrb[98].mxu0 }
 0x8ae   : > { %v8210_v50 = vpop.f32.mrb[99].mxu1  ;;  %v17113_v20 = vadd.f32 %v28071_v15, %v23289_v24  ;;  %v23291_v5 = vadd.f32 %v23164_v0, %v22124_v23  ;;  %v16756_v38 = vpop.f32.mrb[99].mxu0 }
 0x8af   : > { %v17111_v25 = vadd.f32 %v28071_v15, %v23290_v18  ;;  %v23292_v46 = vadd.f32 %v16756_v38, %v8210_v50 }
 0x8b0   : > { %v17241_v14 = vmax.f32 %v17113_v20, 0.0  ;;  %v17114_v40 = vadd.f32 %v28071_v15, %v23291_v5 }
 0x8b1   : > { %v17239_v16 = vmax.f32 %v17111_v25, 0.0  ;;  %v17112_v31 = vadd.f32 %v28071_v15, %v23292_v46 }
 0x8b2   : > { %17370 = vst.msk [vmem:[%s27787_s13 + $0x310] sm:$0xff] %vm17271_vm2, %v17241_v14  ;;  %v17242_v4 = vmax.f32 %v17114_v40, 0.0 }
 0x8b3   : > { %v22127_v52 = vpop.f32.mrb[100].mxu1  ;;  %17368 = vst.msk [vmem:[%s27787_s13 + $0x300] sm:$0xff] %vm17271_vm2, %v17239_v16  ;;  %v17240_v30 = vmax.f32 %v17112_v31, 0.0  ;;  %v23167_v1 = vpop.f32.mrb[100].mxu0 }
 0x8b4   : > { %v8223_v33 = vpop.f32.mrb[101].mxu1  ;;  %17371 = vst.msk [vmem:[%s27787_s13 + $0x318] sm:$0xff] %vm17271_vm2, %v17242_v4  ;;  %v23293_v37 = vadd.f32 %v23167_v1, %v22127_v52  ;;  %v16769_v54 = vpop.f32.mrb[101].mxu0 }
 0x8b5   : > { %v22128_v41 = vpop.f32.mrb[102].mxu1  ;;  %17369 = vst.msk [vmem:[%s27787_s13 + $0x308] sm:$0xff] %vm17271_vm2, %v17240_v30  ;;  %v23294_v32 = vadd.f32 %v16769_v54, %v8223_v33  ;;  %v23168_v56 = vpop.f32.mrb[102].mxu0 }
 0x8b6   : > { %v8226_v47 = vpop.f32.mrb[103].mxu1  ;;  %v17117_v48 = vadd.f32 %v28071_v15, %v23293_v37  ;;  %v23295_v42 = vadd.f32 %v23168_v56, %v22128_v41  ;;  %v16772_v55 = vpop.f32.mrb[103].mxu0 }
 0x8b7   : > { %v17115_v13 = vadd.f32 %v28071_v15, %v23294_v32  ;;  %v23296_v7 = vadd.f32 %v16772_v55, %v8226_v47 }
 0x8b8   : > { %v17245_v34 = vmax.f32 %v17117_v48, 0.0  ;;  %v17118_v43 = vadd.f32 %v28071_v15, %v23295_v42 }
 0x8b9   : > { %v17243_v39 = vmax.f32 %v17115_v13, 0.0  ;;  %v17116_v12 = vadd.f32 %v28071_v15, %v23296_v7 }
 0x8ba   : > { %17374 = vst.msk [vmem:[%s27787_s13 + $0x330] sm:$0xff] %vm17271_vm2, %v17245_v34  ;;  %v17246_v51 = vmax.f32 %v17118_v43, 0.0 }
 0x8bb   : > { %v22131_v58 = vpop.f32.mrb[104].mxu1  ;;  %17372 = vst.msk [vmem:[%s27787_s13 + $0x320] sm:$0xff] %vm17271_vm2, %v17243_v39  ;;  %v17244_v45 = vmax.f32 %v17116_v12, 0.0  ;;  %v23171_v21 = vpop.f32.mrb[104].mxu0 }
 0x8bc   : > { %v8239_v35 = vpop.f32.mrb[105].mxu1  ;;  %17375 = vst.msk [vmem:[%s27787_s13 + $0x338] sm:$0xff] %vm17271_vm2, %v17246_v51  ;;  %v23297_v26 = vadd.f32 %v23171_v21, %v22131_v58  ;;  %v16785_v19 = vpop.f32.mrb[105].mxu0 }
 0x8bd   : > { %v22132_v60 = vpop.f32.mrb[106].mxu1  ;;  %17373 = vst.msk [vmem:[%s27787_s13 + $0x328] sm:$0xff] %vm17271_vm2, %v17244_v45  ;;  %v23298_v29 = vadd.f32 %v16785_v19, %v8239_v35  ;;  %v23172_v17 = vpop.f32.mrb[106].mxu0 }
 0x8be   : > { %v8242_v28 = vpop.f32.mrb[107].mxu1  ;;  %v17121_v3 = vadd.f32 %v28071_v15, %v23297_v26  ;;  %v23299_v2 = vadd.f32 %v23172_v17, %v22132_v60  ;;  %v16788_v57 = vpop.f32.mrb[107].mxu0 }
 0x8bf   : > { %v17119_v53 = vadd.f32 %v28071_v15, %v23298_v29  ;;  %v23300_v63 = vadd.f32 %v16788_v57, %v8242_v28 }
 0x8c0   : > { %v17249_v44 = vmax.f32 %v17121_v3, 0.0  ;;  %v17122_v62 = vadd.f32 %v28071_v15, %v23299_v2 }
 0x8c1   : > { %v17247_v61 = vmax.f32 %v17119_v53, 0.0  ;;  %v17120_v49 = vadd.f32 %v28071_v15, %v23300_v63 }
 0x8c2   : > { %17378 = vst.msk [vmem:[%s27787_s13 + $0x350] sm:$0xff] %vm17271_vm2, %v17249_v44  ;;  %v17250_v6 = vmax.f32 %v17122_v62, 0.0 }
 0x8c3   : > { %v22135_v9 = vpop.f32.mrb[108].mxu1  ;;  %17376 = vst.msk [vmem:[%s27787_s13 + $0x340] sm:$0xff] %vm17271_vm2, %v17247_v61  ;;  %v17248_v8 = vmax.f32 %v17120_v49, 0.0  ;;  %v23175_v11 = vpop.f32.mrb[108].mxu0 }
 0x8c4   : > { %v8255_v10 = vpop.f32.mrb[109].mxu1  ;;  %17379 = vst.msk [vmem:[%s27787_s13 + $0x358] sm:$0xff] %vm17271_vm2, %v17250_v6  ;;  %v23301_v59 = vadd.f32 %v23175_v11, %v22135_v9  ;;  %v16801_v36 = vpop.f32.mrb[109].mxu0 }
 0x8c5   : > { %v22136_v22 = vpop.f32.mrb[110].mxu1  ;;  %17377 = vst.msk [vmem:[%s27787_s13 + $0x348] sm:$0xff] %vm17271_vm2, %v17248_v8  ;;  %v23302_v24 = vadd.f32 %v16801_v36, %v8255_v10  ;;  %v23176_v27 = vpop.f32.mrb[110].mxu0 }
 0x8c6   : > { %v8258_v23 = vpop.f32.mrb[111].mxu1  ;;  %v17125_v18 = vadd.f32 %v28071_v15, %v23301_v59  ;;  %v23303_v0 = vadd.f32 %v23176_v27, %v22136_v22  ;;  %v16804_v50 = vpop.f32.mrb[111].mxu0 }
 0x8c7   : > { %v17123_v20 = vadd.f32 %v28071_v15, %v23302_v24  ;;  %v23304_v5 = vadd.f32 %v16804_v50, %v8258_v23 }
 0x8c8   : > { %v17253_v38 = vmax.f32 %v17125_v18, 0.0  ;;  %v17126_v25 = vadd.f32 %v28071_v15, %v23303_v0 }
 0x8c9   : > { %v17251_v46 = vmax.f32 %v17123_v20, 0.0  ;;  %v17124_v14 = vadd.f32 %v28071_v15, %v23304_v5 }
 0x8ca   : > { %17382 = vst.msk [vmem:[%s27787_s13 + $0x370] sm:$0xff] %vm17271_vm2, %v17253_v38  ;;  %v17254_v40 = vmax.f32 %v17126_v25, 0.0 }
 0x8cb   : > { %v22139_v16 = vpop.f32.mrb[112].mxu1  ;;  %17380 = vst.msk [vmem:[%s27787_s13 + $0x360] sm:$0xff] %vm17271_vm2, %v17251_v46  ;;  %v17252_v31 = vmax.f32 %v17124_v14, 0.0  ;;  %v23179_v4 = vpop.f32.mrb[112].mxu0 }
 0x8cc   : > { %v8271_v52 = vpop.f32.mrb[113].mxu1  ;;  %17383 = vst.msk [vmem:[%s27787_s13 + $0x378] sm:$0xff] %vm17271_vm2, %v17254_v40  ;;  %v23305_v30 = vadd.f32 %v23179_v4, %v22139_v16  ;;  %v16817_v1 = vpop.f32.mrb[113].mxu0 }
 0x8cd   : > { %v22140_v33 = vpop.f32.mrb[114].mxu1  ;;  %17381 = vst.msk [vmem:[%s27787_s13 + $0x368] sm:$0xff] %vm17271_vm2, %v17252_v31  ;;  %v23306_v37 = vadd.f32 %v16817_v1, %v8271_v52  ;;  %v23180_v54 = vpop.f32.mrb[114].mxu0 }
 0x8ce   : > { %v8274_v41 = vpop.f32.mrb[115].mxu1  ;;  %v17129_v32 = vadd.f32 %v28071_v15, %v23305_v30  ;;  %v23307_v56 = vadd.f32 %v23180_v54, %v22140_v33  ;;  %v16820_v47 = vpop.f32.mrb[115].mxu0 }
 0x8cf   : > { %v17127_v48 = vadd.f32 %v28071_v15, %v23306_v37  ;;  %v23308_v42 = vadd.f32 %v16820_v47, %v8274_v41 }
 0x8d0   : > { %v17257_v55 = vmax.f32 %v17129_v32, 0.0  ;;  %v17130_v13 = vadd.f32 %v28071_v15, %v23307_v56 }
 0x8d1   : > { %v17255_v7 = vmax.f32 %v17127_v48, 0.0  ;;  %v17128_v34 = vadd.f32 %v28071_v15, %v23308_v42 }
 0x8d2   : > { %17386 = vst.msk [vmem:[%s27787_s13 + $0x390] sm:$0xff] %vm17271_vm2, %v17257_v55  ;;  %v17258_v43 = vmax.f32 %v17130_v13, 0.0 }
 0x8d3   : > { %v22143_v39 = vpop.f32.mrb[116].mxu1  ;;  %17384 = vst.msk [vmem:[%s27787_s13 + $0x380] sm:$0xff] %vm17271_vm2, %v17255_v7  ;;  %v17256_v12 = vmax.f32 %v17128_v34, 0.0  ;;  %v23183_v51 = vpop.f32.mrb[116].mxu0 }
 0x8d4   : > { %v8287_v58 = vpop.f32.mrb[117].mxu1  ;;  %17387 = vst.msk [vmem:[%s27787_s13 + $0x398] sm:$0xff] %vm17271_vm2, %v17258_v43  ;;  %v23309_v45 = vadd.f32 %v23183_v51, %v22143_v39  ;;  %v16833_v21 = vpop.f32.mrb[117].mxu0 }
 0x8d5   : > { %v22144_v35 = vpop.f32.mrb[118].mxu1  ;;  %17385 = vst.msk [vmem:[%s27787_s13 + $0x388] sm:$0xff] %vm17271_vm2, %v17256_v12  ;;  %v23310_v26 = vadd.f32 %v16833_v21, %v8287_v58  ;;  %v23184_v19 = vpop.f32.mrb[118].mxu0 }
 0x8d6   : > { %v8290_v60 = vpop.f32.mrb[119].mxu1  ;;  %v17133_v29 = vadd.f32 %v28071_v15, %v23309_v45  ;;  %v23311_v17 = vadd.f32 %v23184_v19, %v22144_v35  ;;  %v16836_v28 = vpop.f32.mrb[119].mxu0 }
 0x8d7   : > { %v17131_v3 = vadd.f32 %v28071_v15, %v23310_v26  ;;  %v23312_v2 = vadd.f32 %v16836_v28, %v8290_v60 }
 0x8d8   : > { %v17261_v57 = vmax.f32 %v17133_v29, 0.0  ;;  %v17134_v53 = vadd.f32 %v28071_v15, %v23311_v17 }
 0x8d9   : > { %v17259_v63 = vmax.f32 %v17131_v3, 0.0  ;;  %v17132_v44 = vadd.f32 %v28071_v15, %v23312_v2 }
 0x8da   : > { %17390 = vst.msk [vmem:[%s27787_s13 + $0x3b0] sm:$0xff] %vm17271_vm2, %v17261_v57  ;;  %v17262_v62 = vmax.f32 %v17134_v53, 0.0 }
 0x8db   : > { %v22147_v61 = vpop.f32.mrb[120].mxu1  ;;  %17388 = vst.msk [vmem:[%s27787_s13 + $0x3a0] sm:$0xff] %vm17271_vm2, %v17259_v63  ;;  %v17260_v49 = vmax.f32 %v17132_v44, 0.0  ;;  %v23187_v6 = vpop.f32.mrb[120].mxu0 }
 0x8dc   : > { %v8303_v9 = vpop.f32.mrb[121].mxu1  ;;  %17391 = vst.msk [vmem:[%s27787_s13 + $0x3b8] sm:$0xff] %vm17271_vm2, %v17262_v62  ;;  %v23313_v8 = vadd.f32 %v23187_v6, %v22147_v61  ;;  %v16849_v11 = vpop.f32.mrb[121].mxu0 }
 0x8dd   : > { %v22148_v10 = vpop.f32.mrb[122].mxu1  ;;  %17389 = vst.msk [vmem:[%s27787_s13 + $0x3a8] sm:$0xff] %vm17271_vm2, %v17260_v49  ;;  %v23314_v59 = vadd.f32 %v16849_v11, %v8303_v9  ;;  %v23188_v36 = vpop.f32.mrb[122].mxu0 }
 0x8de   : > { %v8306_v22 = vpop.f32.mrb[123].mxu1  ;;  %v17137_v24 = vadd.f32 %v28071_v15, %v23313_v8  ;;  %v23315_v27 = vadd.f32 %v23188_v36, %v22148_v10  ;;  %v16852_v23 = vpop.f32.mrb[123].mxu0 }
 0x8df   : > { %v17135_v18 = vadd.f32 %v28071_v15, %v23314_v59  ;;  %v23316_v0 = vadd.f32 %v16852_v23, %v8306_v22 }
 0x8e0   : > { %v17265_v50 = vmax.f32 %v17137_v24, 0.0  ;;  %v17138_v20 = vadd.f32 %v28071_v15, %v23315_v27 }
 0x8e1   : > { %v17263_v5 = vmax.f32 %v17135_v18, 0.0  ;;  %v17136_v38 = vadd.f32 %v28071_v15, %v23316_v0 }
 0x8e2   : > { %17394 = vst.msk [vmem:[%s27787_s13 + $0x3d0] sm:$0xff] %vm17271_vm2, %v17265_v50  ;;  %v17266_v25 = vmax.f32 %v17138_v20, 0.0 }
 0x8e3   : > { %v22151_v46 = vpop.f32.mrb[124].mxu1  ;;  %17392 = vst.msk [vmem:[%s27787_s13 + $0x3c0] sm:$0xff] %vm17271_vm2, %v17263_v5  ;;  %v17264_v14 = vmax.f32 %v17136_v38, 0.0  ;;  %v23191_v40 = vpop.f32.mrb[124].mxu0 }
 0x8e4   : > { %v8319_v16 = vpop.f32.mrb[125].mxu1  ;;  %17395 = vst.msk [vmem:[%s27787_s13 + $0x3d8] sm:$0xff] %vm17271_vm2, %v17266_v25  ;;  %v23317_v31 = vadd.f32 %v23191_v40, %v22151_v46  ;;  %v16865_v4 = vpop.f32.mrb[125].mxu0 }
 0x8e5   : > { %v22152_v52 = vpop.f32.mrb[126].mxu1  ;;  %17393 = vst.msk [vmem:[%s27787_s13 + $0x3c8] sm:$0xff] %vm17271_vm2, %v17264_v14  ;;  %v23318_v30 = vadd.f32 %v16865_v4, %v8319_v16  ;;  %v23192_v1 = vpop.f32.mrb[126].mxu0 }
 0x8e6   : > { %v8322_v33 = vpop.f32.mrb[127].mxu1  ;;  %v17141_v37 = vadd.f32 %v28071_v15, %v23317_v31  ;;  %v23319_v54 = vadd.f32 %v23192_v1, %v22152_v52  ;;  %v16868_v41 = vpop.f32.mrb[127].mxu0 }
 0x8e7   : > { %v17139_v32 = vadd.f32 %v28071_v15, %v23318_v30  ;;  %v23320_v56 = vadd.f32 %v16868_v41, %v8322_v33 }
 0x8e8   : > { %v17269_v47 = vmax.f32 %v17141_v37, 0.0  ;;  %v17142_v48 = vadd.f32 %v28071_v15, %v23319_v54 }
 0x8e9   : > { %v17267_v42 = vmax.f32 %v17139_v32, 0.0  ;;  %v17140_v55 = vadd.f32 %v28071_v15, %v23320_v56 }
 0x8ea   : > { %17398 = vst.msk [vmem:[%s27787_s13 + $0x3f0] sm:$0xff] %vm17271_vm2, %v17269_v47  ;;  %v17270_v13 = vmax.f32 %v17142_v48, 0.0 }
 0x8eb   : > { %17396 = vst.msk [vmem:[%s27787_s13 + $0x3e0] sm:$0xff] %vm17271_vm2, %v17267_v42  ;;  %v17268_v7 = vmax.f32 %v17140_v55, 0.0 }
 0x8ec   : > { %17399 = vst.msk [vmem:[%s27787_s13 + $0x3f8] sm:$0xff] %vm17271_vm2, %v17270_v13 }
 0x8ed   : > { %17397 = vst.msk [vmem:[%s27787_s13 + $0x3e8] sm:$0xff] %vm17271_vm2, %v17268_v7 }
 0x8ee PF: > { %s13_s12 = sadd.s32 1, %s25161_s12  }
 0x8ef   : > { %p10_p4 = scmp.ge.s32.totalorder %s13_s12, 4  }
 0x8f1   :  { %12 = sbr.rel (!%p10_p4) target bundleno = 1 (0x1), region = 80 }

</bundles_post_ra>
